<compile_context>
chip_gen: v7x
topology: tpu7x:2x2x1
jax: 0.10.0
libtpu: 0.0.40
codegen_flags: <defaults>
</compile_context>

<pallas_src>
import math

import jax
import jax.numpy as jnp
from jax.experimental import pallas as pl
from jax.experimental.pallas import tpu as pltpu


def _ceil_div(a, b):
    return -(-a // b)


def _mlp_kernel(x_ref, w1t_ref, b1_ref, w2t_ref, part_ref, acc_ref):
    """Grid = (column-half c [parallel], K block k [reduction])."""
    k = pl.program_id(1)

    @pl.when(k == 0)
    def _():
        acc_ref[...] = jnp.zeros_like(acc_ref)

    # Layer-1 partial matmul for this (H1 half, K block):
    #   x block   : [B, tk]   (cast to the streaming dtype -> small operand)
    #   W1^T block: [tk, Hc]  (MXU-native [K, N] orientation, bf16 by default)
    x_blk = x_ref[...].astype(w1t_ref.dtype)
    acc_ref[...] += jnp.dot(x_blk, w1t_ref[...],
                            preferred_element_type=jnp.float32)

    @pl.when(k == pl.num_programs(1) - 1)
    def _():
        # Layer-1 bias + ReLU on this H1 slice; Dropout(0.6) is identity (eval).
        h1 = jnp.maximum(acc_ref[...] + b1_ref[...], 0.0)
        # Partial layer-2 contribution of this H1 slice (resident W2^T slice, f32).
        part_ref[...] = jnp.dot(h1, w2t_ref[...],
                                preferred_element_type=jnp.float32)


def prepare_params(w1, b1, w2, b2, w3, b3, stream_dtype=jnp.bfloat16):
    """One-time weight prep (amortized at model-load time).

    Stores the big W1 in MXU-native [K, H1] orientation and in the streaming
    dtype (bf16 by default -> halves HBM traffic of the dominant stream), and
    W2 as [H1, H2].  Accumulation and the epilogue stay f32.
    """
    return dict(
        w1t=jnp.asarray(w1.T, dtype=stream_dtype),        # [K, H1]
        b1=jnp.asarray(b1, dtype=jnp.float32).reshape(1, -1),
        w2t=jnp.asarray(w2.T, dtype=jnp.float32),          # [H1, H2]
        b2=jnp.asarray(b2, dtype=jnp.float32),
        w3=jnp.asarray(w3, dtype=jnp.float32),              # [1, H2]
        b3=jnp.asarray(b3, dtype=jnp.float32),
    )


def learner_forward(x, params, *, tk=None, vmem_budget_bytes=12 * 1024 * 1024):
    """Fused Learner forward.  x: [B, K] f32, params from prepare_params()."""
    w1t, b1 = params["w1t"], params["b1"]
    w2t, b2 = params["w2t"], params["b2"]
    w3, b3 = params["w3"], params["b3"]

    B, K = x.shape
    Kw, H1 = w1t.shape
    H2 = w2t.shape[1]
    assert Kw == K, "w1t must be [K, H1]"

    # Split H1 across a leading 'parallel' grid axis (2 TensorCores on v7x;
    # serializes harmlessly on v5e/v6e).  Requires lane-aligned halves.
    nc = 2 if H1 % 256 == 0 else 1
    hc = H1 // nc

    # Pick the K tile so the double-buffered W1 slab stays ~<= vmem_budget_bytes
    # (fits the scoped-VMEM default on every generation): bf16 -> full K, f32 -> K/2.
    itemsize = jnp.dtype(w1t.dtype).itemsize
    if tk is None:
        max_tk = max(128, (vmem_budget_bytes // (2 * hc * itemsize)) // 128 * 128)
        nk = max(1, _ceil_div(K, max_tk))
        tk = _ceil_div(_ceil_div(K, nk), 128) * 128
    nk = _ceil_div(K, tk)
    kp = nk * tk
    if kp != K:
        # Zero padding along K is exact for the matmul (only hit for odd K;
        # the module default K=10752 never pads).
        x = jnp.pad(x, ((0, 0), (0, kp - K)))
        w1t = jnp.pad(w1t, ((0, kp - K), (0, 0)))

    partial = pl.pallas_call(
        _mlp_kernel,
        out_shape=jax.ShapeDtypeStruct((nc, B, H2), jnp.float32),
        grid_spec=pltpu.PrefetchScalarGridSpec(
            num_scalar_prefetch=0,
            grid=(nc, nk),
            in_specs=[
                pl.BlockSpec((B, tk), lambda c, k: (0, k)),    # x K-block (streamed)
                pl.BlockSpec((tk, hc), lambda c, k: (k, c)),   # W1^T block (streamed)
                pl.BlockSpec((1, hc), lambda c, k: (0, c)),    # b1 slice (resident)
                pl.BlockSpec((hc, H2), lambda c, k: (c, 0)),   # W2^T slice (resident)
            ],
            out_specs=pl.BlockSpec((None, B, H2), lambda c, k: (c, 0, 0)),
            scratch_shapes=[pltpu.VMEM((B, hc), jnp.float32)],
        ),
        compiler_params=pltpu.CompilerParams(
            dimension_semantics=("parallel", "arbitrary"),
        ),
    )(x, w1t, b1, w2t)

    # Tiny epilogue (B*H2 values): sum the per-core partials, +b2, layer 3, sigmoid.
    h2 = partial.sum(axis=0) + b2
    logits = h2 @ w3.T + b3
    return jax.nn.sigmoid(logits)


# ----------------------------- reference & test -----------------------------

def _xavier_normal(key, shape):
    fan_out, fan_in = shape
    std = (2.0 / (fan_in + fan_out)) ** 0.5
    return std * jax.random.normal(key, shape, dtype=jnp.float32)


def _linear_bias(key, fan_in, out):
    bound = 1.0 / (fan_in ** 0.5)
    return jax.random.uniform(key, (out,), dtype=jnp.float32,
                              minval=-bound, maxval=bound)


def _reference(x, w1, b1, w2, b2, w3, b3):
    h1 = jnp.maximum(x @ w1.T + b1, 0.0)
    h2 = h1 @ w2.T + b2
    return jax.nn.sigmoid(h2 @ w3.T + b3)


if __name__ == "__main__":
    INPUT_DIM = 10752   # module default
    H1, H2 = 512, 32    # fixed by the module
    B = 8               # small batch

    root = jax.random.PRNGKey(0)
    kx, k1, k2, k3, kb1, kb2, kb3 = jax.random.split(root, 7)

    x = jax.random.normal(kx, (B, INPUT_DIM), dtype=jnp.float32)
    w1 = _xavier_normal(k1, (H1, INPUT_DIM))
    b1 = _linear_bias(kb1, INPUT_DIM, H1)
    w2 = _xavier_normal(k2, (H2, H1))
    b2 = _linear_bias(kb2, H1, H2)
    w3 = _xavier_normal(k3, (1, H2))
    b3 = _linear_bias(kb3, H2, 1)

    # --- production default: bf16 weight streaming, f32 accumulate/epilogue ---
    params_bf16 = prepare_params(w1, b1, w2, b2, w3, b3, stream_dtype=jnp.bfloat16)
    out_bf16 = jax.block_until_ready(learner_forward(x, params_bf16))
    ref_bf16 = _reference(x.astype(jnp.bfloat16).astype(jnp.float32),
                          w1.astype(jnp.bfloat16).astype(jnp.float32),
                          b1, w2, b2, w3, b3)
    assert out_bf16.shape == (B, 1)
    assert jnp.allclose(out_bf16, ref_bf16, atol=1e-4, rtol=1e-4), \
        "bf16 streaming path mismatch vs bf16-cast reference"

    # --- exact f32 path (matches the module's eval-mode math) ---
    params_f32 = prepare_params(w1, b1, w2, b2, w3, b3, stream_dtype=jnp.float32)
    out_f32 = jax.block_until_ready(learner_forward(x, params_f32))
    ref_f32 = _reference(x, w1, b1, w2, b2, w3, b3)
    assert out_f32.shape == (B, 1)
    assert jnp.allclose(out_f32, ref_f32, atol=1e-5, rtol=1e-5), \
        "f32 path mismatch vs reference"

    print("KERNEL_OK")
</pallas_src>

<mosaic_0001>
module attributes {stable_mosaic.version = 11 : i64} {
  func.func @_mlp_kernel(%arg0: i32, %arg1: i32, %arg2: memref<8x10752xf32, #tpu.memory_space<vmem>>, %arg3: memref<10752x256xbf16, #tpu.memory_space<vmem>>, %arg4: memref<1x256xf32, #tpu.memory_space<vmem>>, %arg5: memref<256x32xf32, #tpu.memory_space<vmem>>, %arg6: memref<1x8x32xf32, #tpu.memory_space<vmem>>, %arg7: memref<8x256xf32, #tpu.memory_space<vmem>>) attributes {dimension_semantics = [#tpu.dimension_semantics<parallel>, #tpu.dimension_semantics<arbitrary>], iteration_bounds = array<i64: 2, 1>, scalar_prefetch = 0 : i64, scratch_operands = 1 : i64, tpu.core_type = #tpu.core_type<tc>, window_params = [{transform_indices = @transform_0, window_bounds = array<i64: 8, 10752>}, {transform_indices = @transform_1, window_bounds = array<i64: 10752, 256>}, {transform_indices = @transform_2, window_bounds = array<i64: 1, 256>}, {transform_indices = @transform_3, window_bounds = array<i64: 256, 32>}, {transform_indices = @transform_4, window_bounds = array<i64: 1, 8, 32>}]} {
    %c0_i32 = arith.constant 0 : i32
    %0 = arith.cmpi eq, %arg1, %c0_i32 : i32
    %1 = arith.extui %0 : i1 to i32
    %c0_i32_0 = arith.constant 0 : i32
    %2 = arith.cmpi ne, %1, %c0_i32_0 : i32
    scf.if %2 {
      %cst_10 = arith.constant 0.000000e+00 : f32
      %13 = vector.broadcast %cst_10 : f32 to vector<8x256xf32>
      %c0_11 = arith.constant 0 : index
      %c0_12 = arith.constant 0 : index
      %14 = vector.load %arg7[%c0_11, %c0_12] : memref<8x256xf32, #tpu.memory_space<vmem>>, vector<8x256xf32>
      tpu.vector_store %arg7[%c0_11, %c0_12], %13 {strides = array<i32>} : memref<8x256xf32, #tpu.memory_space<vmem>>, vector<8x256xf32>,
    } else {
    }
    %c0 = arith.constant 0 : index
    %c0_1 = arith.constant 0 : index
    %3 = vector.load %arg2[%c0, %c0_1] : memref<8x10752xf32, #tpu.memory_space<vmem>>, vector<8x10752xf32>
    %4 = arith.truncf %3 : vector<8x10752xf32> to vector<8x10752xbf16>
    %c0_2 = arith.constant 0 : index
    %c0_3 = arith.constant 0 : index
    %5 = vector.load %arg7[%c0_2, %c0_3] : memref<8x256xf32, #tpu.memory_space<vmem>>, vector<8x256xf32>
    %c0_4 = arith.constant 0 : index
    %c0_5 = arith.constant 0 : index
    %6 = vector.load %arg3[%c0_4, %c0_5] : memref<10752x256xbf16, #tpu.memory_space<vmem>>, vector<10752x256xbf16>
    %cst = arith.constant dense<0.000000e+00> : vector<8x256xf32>
    %7 = tpu.matmul %4, %6, %cst {dimension_numbers = #tpu.dot_dimension_numbers<[1], [0], [0], [1], [0, 0, 1, 1], [], []>} : vector<8x10752xbf16>, vector<10752x256xbf16>, vector<8x256xf32> -> vector<8x256xf32>
    %8 = arith.addf %5, %7 : vector<8x256xf32>
    %c0_6 = arith.constant 0 : index
    %c0_7 = arith.constant 0 : index
    %9 = vector.load %arg7[%c0_6, %c0_7] : memref<8x256xf32, #tpu.memory_space<vmem>>, vector<8x256xf32>
    tpu.vector_store %arg7[%c0_6, %c0_7], %8 {strides = array<i32>} : memref<8x256xf32, #tpu.memory_space<vmem>>, vector<8x256xf32>,
    %c0_i32_8 = arith.constant 0 : i32
    %10 = arith.cmpi eq, %arg1, %c0_i32_8 : i32
    %11 = arith.extui %10 : i1 to i32
    %c0_i32_9 = arith.constant 0 : i32
    %12 = arith.cmpi ne, %11, %c0_i32_9 : i32
    scf.if %12 {
      %c0_10 = arith.constant 0 : index
      %c0_11 = arith.constant 0 : index
      %13 = vector.load %arg7[%c0_10, %c0_11] : memref<8x256xf32, #tpu.memory_space<vmem>>, vector<8x256xf32>
      %c0_12 = arith.constant 0 : index
      %c0_13 = arith.constant 0 : index
      %14 = vector.load %arg4[%c0_12, %c0_13] : memref<1x256xf32, #tpu.memory_space<vmem>>, vector<1x256xf32>
      %15 = vector.broadcast %14 : vector<1x256xf32> to vector<8x256xf32>
      %16 = arith.addf %13, %15 : vector<8x256xf32>
      %cst_14 = arith.constant 0.000000e+00 : f32
      %17 = vector.broadcast %cst_14 : f32 to vector<8x256xf32>
      %18 = arith.maximumf %16, %17 : vector<8x256xf32>
      %c0_15 = arith.constant 0 : index
      %c0_16 = arith.constant 0 : index
      %19 = vector.load %arg5[%c0_15, %c0_16] : memref<256x32xf32, #tpu.memory_space<vmem>>, vector<256x32xf32>
      %cst_17 = arith.constant dense<0.000000e+00> : vector<8x32xf32>
      %20 = tpu.matmul %18, %19, %cst_17 {dimension_numbers = #tpu.dot_dimension_numbers<[1], [0], [0], [1], [0, 0, 1, 1], [], []>} : vector<8x256xf32>, vector<256x32xf32>, vector<8x32xf32> -> vector<8x32xf32>
      %c0_18 = arith.constant 0 : index
      %c0_19 = arith.constant 0 : index
      %c0_20 = arith.constant 0 : index
      %21 = vector.load %arg6[%c0_18, %c0_19, %c0_20] : memref<1x8x32xf32, #tpu.memory_space<vmem>>, vector<1x8x32xf32>
      %22 = vector.shape_cast %21 : vector<1x8x32xf32> to vector<8x32xf32>
      %23 = vector.shape_cast %20 : vector<8x32xf32> to vector<1x8x32xf32>
      tpu.vector_store %arg6[%c0_18, %c0_19, %c0_20], %23 {strides = array<i32>} : memref<1x8x32xf32, #tpu.memory_space<vmem>>, vector<1x8x32xf32>,
    } else {
    }
    return
  }
  func.func @transform_0(%arg0: i32, %arg1: i32) -> (i32, i32) {
    %c0_i32 = arith.constant 0 : i32
    %c0_i32_0 = arith.constant 0 : i32
    return %c0_i32, %arg1 : i32, i32
  }
  func.func @transform_1(%arg0: i32, %arg1: i32) -> (i32, i32) {
    %c0_i32 = arith.constant 0 : i32
    return %arg1, %arg0 : i32, i32
  }
  func.func @transform_2(%arg0: i32, %arg1: i32) -> (i32, i32) {
    %c0_i32 = arith.constant 0 : i32
    %c0_i32_0 = arith.constant 0 : i32
    return %c0_i32, %arg0 : i32, i32
  }
  func.func @transform_3(%arg0: i32, %arg1: i32) -> (i32, i32) {
    %c0_i32 = arith.constant 0 : i32
    %c0_i32_0 = arith.constant 0 : i32
    return %arg0, %c0_i32 : i32, i32
  }
  func.func @transform_4(%arg0: i32, %arg1: i32) -> (i32, i32, i32) {
    %c0_i32 = arith.constant 0 : i32
    %c0_i32_0 = arith.constant 0 : i32
    %c0_i32_1 = arith.constant 0 : i32
    return %arg0, %c0_i32, %c0_i32_0 : i32, i32, i32
  }
}

</mosaic_0001>

<bundles_post_ra>
// kernel: tpu_custom_call.1
= control target key start
LH: loop header
LB: loop body
LE: loop exit
PB: predicated region body
PF: predicated region fallthrough
CT: control target
= control target key end

     0   :  { %s16027_s0 = inlined_call_operand.hbm [shape: f32[8,10752], index: 0, kind: input, shape index: {}]   ;;  %s16028_s1 = inlined_call_operand.hbm [shape: bf16[10752,512], index: 1, kind: input, shape index: {}]   ;;  %s16029_s2 = inlined_call_operand.hbm [shape: f32[1,512], index: 2, kind: input, shape index: {}]   ;;  %s16030_s3 = inlined_call_operand.vmem [shape: f32[512,32], index: 3, kind: input, shape index: {}]   ;;  %s16031_s4 = inlined_call_operand.hbm [shape: f32[2,8,32], index: 4, kind: output, shape index: {}]  }
   0x1   :  { %16037 = sst [smem:[#allocation13_spill]] %s16028_s1 }
   0x2   :  { %16038 = sst [smem:[#allocation14_spill]] %s16029_s2 }
   0x3   :  { %9 = vsyncpa [#allocation4], 0 }
   0x4   :  { %10 = vsyncpa [#allocation7], 0 }
   0x5   :  { %12 = vsyncpa [#allocation7 + $0x1], 0 }
   0x6   :  { %13 = vsyncpa [#allocation5], 0 }
   0x7   :  { %15 = vsyncpa [#allocation5 + $0x1], 0  ;;  %s14287_s15 = smov 0   ;;  %s14289_s16 = smov 0  }
   0x8   :  { %s14291_s17 = smov 0   ;;  %s14293_s18 = smov 0  }
   0x9   :  { %s14295_s19 = smov 0   ;;  %s14297_s20 = smov 0  }
   0xa LB: > { %s33_s21 = sadd.s32 1, %s14249_s19  ;;  %s68_s22 = sadd.s32 1, %s14241_s17  ;;  %s14253_s20 = sphi %s14297_s20, %s21_s20   ;;  %s14249_s19 = sphi %s14295_s19, %s16059_s19   ;;  %s14245_s18 = sphi %s14293_s18, %s16058_s18   ;;  %s14241_s17 = sphi %s14291_s17, %s16057_s17   ;;  %s14237_s16 = sphi %s14289_s16, %s16056_s16   ;;  %s14233_s15 = sphi %s14287_s15, %s16055_s15  }
   0xb   : > { %p35_p0 = scmp.ge.s32.totalorder %s33_s21, 2  ;;  %p75_p1 = scmp.ne.s32.totalorder %s14241_s17, %s14237_s16 }
   0xc   : > { %p76_p2 = scmp.eq.s32.totalorder %s14253_s20, 0  ;;  %p12008_p5 = scmp.lt.s32.totalorder %s14253_s20, 2 }
   0xd   : > { %s16061_s21 = smov (%p35_p0, %s33_s21), 0  ;;  %s197_s24 = sand.u32 1, %s14253_s20  }
   0xe   : > { %p77_p4 = por %p76_p2, %p75_p1  ;;  %s64_s23 = ssub.s32 %s14249_s19, %s16061_s21 }
   0xf   : > { %p66_p6 = scmp.eq.s32.totalorder %s64_s23, 0  ;;  %s199_s25 = sand.u32 1, %s14241_s17  }
  0x10   : > { %s11911_s26 = sshll.u32 %s14249_s19, 7  ;;  %s11980_s28 = smul.u32 10752, %s199_s25 }
  0x11   : > { %s14335_s27 = scalar_select %p66_p6, %s14241_s17, %s68_s22  }
  0x12   : > { %s16039_s1 = sld [smem:[#allocation13_spill]]  ;;  %p14344_p7 = pnand %p12008_p5, %p77_p4 }
  0x13   : > { %s201_s7 = scalar_lea.vmem [#allocation6], %s11980_s28  ;;  %s14350_s9 = scalar_lea.sflag [#allocation7], %s197_s24 }
  0x14   : > { %s211_s8 = sshll.u32 %s201_s7, 4  ;;  %p14081_p9 = pneg %p14344_p7  ;;  %s14348_s8 = int_to_ptr.vmem [resolvable:$true] %s211_s8 }
  0x18   : > { %s14342_s5 = scalar_lea.hbm %s16039_s1, %s11911_s26  ;;  %s14084_s13 = scalar_lea.hbm %s16039_s1, 344064 }
  0x19   : > { %s14079_s10 = scalar_lea.hbm %s14342_s5, 172032  ;;  %p14085_p12 = scmp.lt.u32.totalorder %s14342_s5, %s16039_s1 }
  0x1a   : > { %p14080_p8 = scmp.ne.s32.totalorder %s14342_s5, %s14079_s10  ;;  %p14086_p13 = scmp.lt.u32.totalorder %s14084_s13, %s14079_s10 }
  0x1b   : > { %p14088_p2 = scmp.lt.u32.totalorder %s14079_s10, %s14342_s5 }
  0x1c   : > { %p14082_p10 = pnand %p14081_p9, %p14080_p8  ;;  %p14087_p0 = por %p14086_p13, %p14085_p12 }
  0x1e   : > { %p14083_p11 = pneg %p14082_p10  ;;  %p14089_p4 = por %p14088_p2, %p14087_p0 }
  0x20   : > { %p14090_p5 = pnand %p14089_p4, %p14083_p11 }
  0x22   : > { %14093 = shalt.err (!%p14090_p5)
}
  0x23   : > { %s14094_s23 = scalar_lea.vmem %s14348_s8, 172032  ;;  %s14255_s24 = smov [#allocation6]  }
  0x24   : > { %p14095_p6 = scmp.ne.s32.totalorder %s14348_s8, %s14094_s23  ;;  %s14099_s26 = sshll.u32 %s14255_s24, 4  ;;  %s14100_s26 = int_to_ptr.vmem [resolvable:$false] %s14099_s26 }
  0x25   : > { %s14101_s28 = scalar_lea.vmem %s14100_s26, 344064  ;;  %p14102_p3 = scmp.lt.s32.totalorder %s14348_s8, %s14100_s26 }
  0x26   : > { %p14097_p8 = pnand %p14095_p6, %p14081_p9  ;;  %p14103_p12 = scmp.lt.s32.totalorder %s14101_s28, %s14094_s23 }
  0x28   : > { %p14098_p10 = pneg %p14097_p8  ;;  %p14104_p13 = por %p14103_p12, %p14102_p3 }
  0x2a   : > { %p14105_p0 = pnand %p14104_p13, %p14098_p10 }
  0x2c   : > { %14108 = shalt.err (!%p14105_p0)
}
  0x2d   : > { %s14256_s29 = smov 256   ;;  %s14257_s30 = smov 128  }
  0x2e   : > { %s14258_s7 = smov 8   ;;  %s14379_s10 = sadd.s32 4294967295, %s14253_s20  }
  0x2f   : > { %11999 = dma.hbm_to_vmem [thread:$0]  (!%p14344_p7), %s14342_s5, 172032, %s14348_s8, %s14350_s9, %s14256_s29, %s14257_s30, %s14258_s7  }
  0x30   : > { %s10548_s11 = sadd.s32 4294967294, %s14253_s20   ;;  %p81_p3 = scmp.ne.s32.totalorder %s14237_s16, %s14233_s15 }
  0x31   : > { %p16032_p11 = scmp.eq.s32.totalorder %s14379_s10, 0  ;;  %p157_p2 = scmp.eq.s32.totalorder %s14379_s10, 1 }
  0x32   : > { %p163_p4 = scmp.eq.s32.totalorder %s10548_s11, 1  ;;  %p10549_p6 = scmp.ge.s32.totalorder %s14253_s20, 1 }
  0x33   : > { %p14388_p5 = por %p16032_p11, %p81_p3  ;;  %p14396_p8 = por %p157_p2, %p75_p1 }
  0x34   : > { %p14400_p10 = por %p163_p4, %p81_p3  ;;  %p170_p12 = scmp.lt.s32.totalorder %s14253_s20, 3 }
  0x35   : > { %s16041_s12 = scalar_select %p14388_p5, 1, 0 }
  0x36   : > { %s16042_s5 = scalar_select %p14396_p8, 1, 0 }
  0x37   : > { %s16043_s8 = scalar_select %p14400_p10, 1, 0 }
  0x38   : > { %s10554_s13 = sshll.u32 %s199_s25, 1  ;;  %p14407_p13 = pnand %p10549_p6, %p170_p12 }
  0x39   : > { %s14259_s22 = smov [#allocation3]   ;;  %s11912_s24 = sshll.u32 %s14249_s19, 5 }
  0x3a   : > { %s16044_s14 = scalar_select %p14407_p13, 1, 0 }
  0x3b   : > { %s186_s23 = sshll.u32 %s14259_s22, 4  ;;  %p11992_p1 = pneg %p14407_p13  ;;  %s14411_s23 = int_to_ptr.vmem [resolvable:$true] %s186_s23 }
  0x3c   : > { %s16045_s2 = sld [smem:[#allocation14_spill]]  ;;  %s225_s25 = scalar_lea.vmem [#allocation8], %s10554_s13 }
  0x3d   : > { %s233_s30 = sshll.u32 %s225_s25, 4  ;;  %p14423_p0 = pnand %p11992_p1, %p16032_p11  ;;  %s234_s30 = int_to_ptr.vmem [resolvable:$true] %s233_s30 }
  0x3f   : > { %s16046_s7 = scalar_select %p14423_p0, 1, 0 }
  0x42   : > { %s14419_s29 = scalar_lea.hbm %s16045_s2, %s11912_s24  ;;  %s14114_s26 = scalar_lea.hbm %s16045_s2, 64 }
  0x43   : > { %s14109_s11 = scalar_lea.hbm %s14419_s29, 32  ;;  %p14115_p6 = scmp.lt.u32.totalorder %s14419_s29, %s16045_s2 }
  0x44   : > { %p14110_p3 = scmp.ne.s32.totalorder %s14419_s29, %s14109_s11  ;;  %p14116_p12 = scmp.lt.u32.totalorder %s14114_s26, %s14109_s11 }
  0x45   : > { %p14118_p11 = scmp.lt.u32.totalorder %s14109_s11, %s14419_s29 }
  0x46   : > { %p14112_p2 = pnand %p14110_p3, %p14081_p9  ;;  %p14117_p1 = por %p14116_p12, %p14115_p6 }
  0x48   : > { %p14113_p4 = pneg %p14112_p2  ;;  %p14119_p10 = por %p14118_p11, %p14117_p1 }
  0x4a   : > { %p14120_p8 = pnand %p14119_p10, %p14113_p4 }
  0x4c   : > { %14123 = shalt.err (!%p14120_p8)
}
  0x4d   : > { %s14124_s13 = scalar_lea.vmem %s234_s30, 32  ;;  %s14260_s25 = smov [#allocation8]  }
  0x4e   : > { %p14125_p5 = scmp.ne.s32.totalorder %s234_s30, %s14124_s13  ;;  %s14129_s22 = sshll.u32 %s14260_s25, 4  ;;  %s14130_s22 = int_to_ptr.vmem [resolvable:$false] %s14129_s22 }
  0x4f   : > { %s14131_s24 = scalar_lea.vmem %s14130_s22, 64  ;;  %p14132_p13 = scmp.lt.s32.totalorder %s234_s30, %s14130_s22 }
  0x50   : > { %p14127_p3 = pnand %p14125_p5, %p14081_p9  ;;  %p14133_p0 = scmp.lt.s32.totalorder %s14131_s24, %s14124_s13 }
  0x52   : > { %p14128_p2 = pneg %p14127_p3  ;;  %p14134_p6 = por %p14133_p0, %p14132_p13 }
  0x54   : > { %p14135_p12 = pnand %p14134_p6, %p14128_p2 }
  0x56   : > { %14138 = shalt.err (!%p14135_p12)
}
  0x57   : > { %12002 = dma.hbm_to_vmem [thread:$0]  (!%p14344_p7), %s14419_s29, 32, %s234_s30, %s14350_s9  }
  0x58   : > { %s14139_s26 = scalar_lea.hbm %s16027_s0, 10752  ;;  %p16047_p11 = scmp.ne.s32.totalorder %s16046_s7, 0 }
  0x59   : > { %p14140_p9 = scmp.ne.s32.totalorder %s16027_s0, %s14139_s26  ;;  %p14146_p13 = scmp.lt.u32.totalorder %s14139_s26, %s16027_s0 }
  0x5a   : > { %p14141_p5 = pneg %p16047_p11 }
  0x5c   : > { %p14142_p8 = pnand %p14141_p5, %p14140_p9 }
  0x5e   : > { %p14143_p10 = pneg %p14142_p8 }
  0x60   : > { %p14148_p0 = pnand %p14146_p13, %p14143_p10 }
  0x62   : > { %14151 = shalt.err (!%p14148_p0)
}
  0x63   : > { %s14152_s6 = scalar_lea.vmem %s14411_s23, 10752  ;;  %p14160_p3 = scmp.lt.s32.totalorder %s14411_s23, %s14411_s23 }
  0x64   : > { %p14153_p7 = scmp.ne.s32.totalorder %s14411_s23, %s14152_s6  ;;  %p14161_p2 = scmp.lt.s32.totalorder %s14152_s6, %s14152_s6 }
  0x66   : > { %p14155_p4 = pnand %p14153_p7, %p14141_p5  ;;  %p14162_p6 = por %p14161_p2, %p14160_p3 }
  0x68   : > { %p14156_p1 = pneg %p14155_p4 }
  0x6a   : > { %p14163_p12 = pnand %p14162_p6, %p14156_p1 }
  0x6c   : > { %14166 = shalt.err (!%p14163_p12)
}
  0x6d   : > { %11995 = dma.hbm_to_vmem [thread:$0]  (!%p16047_p11), %s16027_s0, 10752, %s14411_s23, [#allocation4]  }
  0x6e   : > { %p16048_p9 = scmp.ne.s32.totalorder %s16044_s14, 0 }
  0x6f   : > { %p16049_p8 = scmp.eq.s32.totalorder (!%p16048_p9), %s14379_s10, 0 }
  0x70   : > { %251 = sbr.rel (%p16048_p9) target bundleno = 1921 (0x781), region = 36 }
  0x77   : > { %14220 = dma.done.wait (%p16049_p8), [#allocation4], 10752   ;;  %p16050_p5 = pmov %p16049_p8 }
  0x78   : > { %s257_s29 = sand.u32 1, %s14379_s10   ;;  %s14476_s30 = sand.u32 1, %s14237_s16  }
  0x79   : > { %14222 = vsyncadd (%p16050_p5), [#allocation4], 4294956544  ;;  %s11981_s7 = smul.u32 10752, %s14476_s30  ;;  %s258_s22 = scalar_lea.sflag [#allocation7], %s257_s29 }
  0x7a   : > { %p16051_p11 = scmp.ne.s32.totalorder %s16041_s12, 0 }
  0x7b   : > { %s14479_s24 = scalar_lea.vmem [#allocation6], %s11981_s7 }
  0x7c   : > { %14224 = dma.done.wait (%p16051_p11), %s258_s22, 172064  }
  0x7d   : > { %14226 = vsyncadd (%p16051_p11), %s258_s22, 4294795232  ;;  %v12063_v0 = vld [vmem:[%s14479_s24 + $0x4] ss:$8 sps:$4 sm:$0xff]   ;;  %v12067_v2 = vld [vmem:[%s14479_s24] ss:$8 sps:$4 sm:$0xff]   ;;  %s10561_s10 = sshll.u32 %s14245_s18, 5 }
  0x7e   : > { %v12065_v1 = vld [vmem:[%s14479_s24 + $0x104] ss:$8 sps:$4 sm:$0xff]   ;;  %8555 = vmatprep.subr.bf16.mxu0 %v12063_v0  ;;  %v12068_v3 = vld [vmem:[%s14479_s24 + $0x100] ss:$8 sps:$4 sm:$0xff]   ;;  %v12069_v4 = vld [vmem:[%s14479_s24 + $0x14] ss:$8 sps:$4 sm:$0xff]  }
  0x7f   : > { %8596 = vmatprep.subr.bf16.mxu1 %v12065_v1  ;;  %8556 = vmatpush1.bf16.msra.mxu0 %v12067_v2  ;;  %v12071_v5 = vld [vmem:[%s14479_s24 + $0x114] ss:$8 sps:$4 sm:$0xff]   ;;  %v12073_v6 = vld [vmem:[%s14479_s24 + $0x10] ss:$8 sps:$4 sm:$0xff]   ;;  %v12075_v8 = vld [vmem:[%s14479_s24 + $0x24] ss:$8 sps:$4 sm:$0xff]  }
  0x80   : > { %8597 = vmatpush1.bf16.msra.mxu1 %v12068_v3  ;;  %8557 = vmatprep.subr.bf16.mxu0 %v12069_v4  ;;  %v12074_v7 = vld [vmem:[%s14479_s24 + $0x110] ss:$8 sps:$4 sm:$0xff]   ;;  %v12077_v9 = vld [vmem:[%s14479_s24 + $0x124] ss:$8 sps:$4 sm:$0xff]   ;;  %v12079_v10 = vld [vmem:[%s14479_s24 + $0x20] ss:$8 sps:$4 sm:$0xff]  }
  0x81   : > { %8598 = vmatprep.subr.bf16.mxu1 %v12071_v5  ;;  %v12080_v11 = vld [vmem:[%s14479_s24 + $0x120] ss:$8 sps:$4 sm:$0xff]   ;;  %v12081_v12 = vld [vmem:[%s14479_s24 + $0x34] ss:$8 sps:$4 sm:$0xff]   ;;  %v12085_v14 = vld [vmem:[%s14479_s24 + $0x30] ss:$8 sps:$4 sm:$0xff]  }
  0x82   : > { %v12083_v13 = vld [vmem:[%s14479_s24 + $0x134] ss:$8 sps:$4 sm:$0xff]   ;;  %v12086_v15 = vld [vmem:[%s14479_s24 + $0x130] ss:$8 sps:$4 sm:$0xff]   ;;  %v12087_v16 = vld [vmem:[%s14479_s24 + $0x44] ss:$8 sps:$4 sm:$0xff]  }
  0x83   : > { %8558 = vmatpush1.bf16.msra.mxu0 %v12073_v6  ;;  %v12089_v17 = vld [vmem:[%s14479_s24 + $0x144] ss:$8 sps:$4 sm:$0xff]   ;;  %v12091_v18 = vld [vmem:[%s14479_s24 + $0x40] ss:$8 sps:$4 sm:$0xff]   ;;  %v12093_v20 = vld [vmem:[%s14479_s24 + $0x54] ss:$8 sps:$4 sm:$0xff]  }
  0x84   : > { %8599 = vmatpush1.bf16.msra.mxu1 %v12074_v7  ;;  %8559 = vmatprep.subr.bf16.mxu0 %v12075_v8  ;;  %v12092_v19 = vld [vmem:[%s14479_s24 + $0x140] ss:$8 sps:$4 sm:$0xff]   ;;  %v12095_v21 = vld [vmem:[%s14479_s24 + $0x154] ss:$8 sps:$4 sm:$0xff]   ;;  %v12097_v22 = vld [vmem:[%s14479_s24 + $0x50] ss:$8 sps:$4 sm:$0xff]  }
  0x85   : > { %8600 = vmatprep.subr.bf16.mxu1 %v12077_v9  ;;  %v12098_v23 = vld [vmem:[%s14479_s24 + $0x150] ss:$8 sps:$4 sm:$0xff]   ;;  %v12099_v24 = vld [vmem:[%s14479_s24 + $0x64] ss:$8 sps:$4 sm:$0xff]   ;;  %v12103_v26 = vld [vmem:[%s14479_s24 + $0x60] ss:$8 sps:$4 sm:$0xff]  }
  0x86   : > { %v12101_v25 = vld [vmem:[%s14479_s24 + $0x164] ss:$8 sps:$4 sm:$0xff]   ;;  %v12104_v27 = vld [vmem:[%s14479_s24 + $0x160] ss:$8 sps:$4 sm:$0xff]   ;;  %v12105_v28 = vld [vmem:[%s14479_s24 + $0x74] ss:$8 sps:$4 sm:$0xff]  }
  0x87   : > { %8560 = vmatpush1.bf16.msra.mxu0 %v12079_v10  ;;  %v12107_v29 = vld [vmem:[%s14479_s24 + $0x174] ss:$8 sps:$4 sm:$0xff]   ;;  %v12109_v30 = vld [vmem:[%s14479_s24 + $0x70] ss:$8 sps:$4 sm:$0xff]   ;;  %v12111_v32 = vld [vmem:[%s14479_s24 + $0x84] ss:$8 sps:$4 sm:$0xff]  }
  0x88   : > { %8601 = vmatpush1.bf16.msra.mxu1 %v12080_v11  ;;  %8561 = vmatprep.subr.bf16.mxu0 %v12081_v12  ;;  %v12110_v31 = vld [vmem:[%s14479_s24 + $0x170] ss:$8 sps:$4 sm:$0xff]   ;;  %v12113_v33 = vld [vmem:[%s14479_s24 + $0x184] ss:$8 sps:$4 sm:$0xff]   ;;  %v12115_v34 = vld [vmem:[%s14479_s24 + $0x80] ss:$8 sps:$4 sm:$0xff]  }
  0x89   : > { %8602 = vmatprep.subr.bf16.mxu1 %v12083_v13  ;;  %v12116_v35 = vld [vmem:[%s14479_s24 + $0x180] ss:$8 sps:$4 sm:$0xff]   ;;  %v12117_v36 = vld [vmem:[%s14479_s24 + $0x94] ss:$8 sps:$4 sm:$0xff]   ;;  %v12121_v38 = vld [vmem:[%s14479_s24 + $0x90] ss:$8 sps:$4 sm:$0xff]  }
  0x8a   : > { %v12119_v37 = vld [vmem:[%s14479_s24 + $0x194] ss:$8 sps:$4 sm:$0xff]   ;;  %v12122_v39 = vld [vmem:[%s14479_s24 + $0x190] ss:$8 sps:$4 sm:$0xff]   ;;  %v12123_v40 = vld [vmem:[%s14479_s24 + $0xa4] ss:$8 sps:$4 sm:$0xff]  }
  0x8b   : > { %8562 = vmatpush1.bf16.msra.mxu0 %v12085_v14  ;;  %v12125_v41 = vld [vmem:[%s14479_s24 + $0x1a4] ss:$8 sps:$4 sm:$0xff]   ;;  %v12127_v42 = vld [vmem:[%s14479_s24 + $0xa0] ss:$8 sps:$4 sm:$0xff]   ;;  %v12129_v44 = vld [vmem:[%s14479_s24 + $0xb4] ss:$8 sps:$4 sm:$0xff]  }
  0x8c   : > { %8603 = vmatpush1.bf16.msra.mxu1 %v12086_v15  ;;  %8563 = vmatprep.subr.bf16.mxu0 %v12087_v16  ;;  %v12128_v43 = vld [vmem:[%s14479_s24 + $0x1a0] ss:$8 sps:$4 sm:$0xff]   ;;  %v12131_v45 = vld [vmem:[%s14479_s24 + $0x1b4] ss:$8 sps:$4 sm:$0xff]   ;;  %v12133_v47 = vld [vmem:[%s14479_s24 + $0xb0] ss:$8 sps:$4 sm:$0xff]  }
  0x8d   : > { %8604 = vmatprep.subr.bf16.mxu1 %v12089_v17  ;;  %v322_v46 = vld [vmem:[#allocation3 + $0x8] sm:$0xff]  ;;  %v12134_v48 = vld [vmem:[%s14479_s24 + $0x1b0] ss:$8 sps:$4 sm:$0xff]   ;;  %v12141_v56 = vld [vmem:[%s14479_s24 + $0xd4] ss:$8 sps:$4 sm:$0xff]   ;;  %p310_p10 = scmp.lt.s32.totalorder %s10561_s10, 63 }
  0x8e   : > { %v406_v49 = vpack.c.bf16 %v322_v46, %v322_v46  ;;  %v324_v50 = vld [vmem:[#allocation3 + $0x18] sm:$0xff]  ;;  %v12135_v51 = vld [vmem:[%s14479_s24 + $0xc4] ss:$8 sps:$4 sm:$0xff]   ;;  %v12139_v54 = vld [vmem:[%s14479_s24 + $0xc0] ss:$8 sps:$4 sm:$0xff]   ;;  %s10559_s11 = sshll.u32 %s14476_s30, 1 }
  0x8f   : > { %8564 = vmatpush1.bf16.msra.mxu0 %v12091_v18  ;;  %v408_v52 = vpack.c.bf16 %v324_v50, %v324_v50  ;;  %v12137_v53 = vld [vmem:[%s14479_s24 + $0x1c4] ss:$8 sps:$4 sm:$0xff]   ;;  %v12140_v55 = vld [vmem:[%s14479_s24 + $0x1c0] ss:$8 sps:$4 sm:$0xff]   ;;  %v12143_v57 = vld [vmem:[%s14479_s24 + $0x1d4] ss:$8 sps:$4 sm:$0xff]  }
  0x90   : > { %8605 = vmatpush1.bf16.msra.mxu1 %v12092_v19  ;;  %8565 = vmatprep.subr.bf16.mxu0 %v12093_v20  ;;  %v12145_v58 = vld [vmem:[%s14479_s24 + $0xd0] ss:$8 sps:$4 sm:$0xff]   ;;  %v12147_v60 = vld [vmem:[%s14479_s24 + $0xe4] ss:$8 sps:$4 sm:$0xff]   ;;  %v12151_v62 = vld [vmem:[%s14479_s24 + $0xe0] ss:$8 sps:$4 sm:$0xff]  }
  0x91   : > { %8606 = vmatprep.subr.bf16.mxu1 %v12095_v21  ;;  %8587 = vmatprep.mubr.bf16.mxu0 %v406_v49  ;;  %v12146_v59 = vld [vmem:[%s14479_s24 + $0x1d0] ss:$8 sps:$4 sm:$0xff]   ;;  %v12149_v61 = vld [vmem:[%s14479_s24 + $0x1e4] ss:$8 sps:$4 sm:$0xff]   ;;  %v12152_v63 = vld [vmem:[%s14479_s24 + $0x1e0] ss:$8 sps:$4 sm:$0xff]  }
  0x92   : > { %8628 = vmatprep.mubr.bf16.mxu1 %v408_v52  ;;  %v12153_v0 = vld [vmem:[%s14479_s24 + $0xf4] ss:$8 sps:$4 sm:$0xff]   ;;  %v12157_v2 = vld [vmem:[%s14479_s24 + $0xf0] ss:$8 sps:$4 sm:$0xff]   ;;  %v321_v4 = vld [vmem:[#allocation3] sm:$0xff]  ;;  %s16063_s10 = smov (!%p310_p10, %s10561_s10), 63 }
  0x93   : > { %8566 = vmatpush1.bf16.msra.mxu0 %v12097_v22  ;;  %v12155_v1 = vld [vmem:[%s14479_s24 + $0x1f4] ss:$8 sps:$4 sm:$0xff]   ;;  %v12158_v3 = vld [vmem:[%s14479_s24 + $0x1f0] ss:$8 sps:$4 sm:$0xff]   ;;  %v12161_v6 = vld [vmem:[%s14479_s24 + $0x204] ss:$8 sps:$4 sm:$0xff]   ;;  %v405_v8 = vpack.c.bf16 %v321_v4, %v321_v4 }
  0x94   : > { %8607 = vmatpush1.bf16.msra.mxu1 %v12098_v23  ;;  %8567 = vmatprep.subr.bf16.mxu0 %v12099_v24  ;;  %v323_v5 = vld [vmem:[#allocation3 + $0x10] sm:$0xff]  ;;  %v12164_v7 = vld [vmem:[%s14479_s24 + $0x304] ss:$8 sps:$4 sm:$0xff]   ;;  %v12159_v10 = vld [vmem:[%s14479_s24 + $0x200] ss:$8 sps:$4 sm:$0xff]   ;;  %s10562_s12 = sshll.u32 %s16063_s10, 3 }
  0x95   : > { %8608 = vmatprep.subr.bf16.mxu1 %v12101_v25  ;;  %v407_v9 = vpack.c.bf16 %v323_v5, %v323_v5  ;;  %v12162_v11 = vld [vmem:[%s14479_s24 + $0x300] ss:$8 sps:$4 sm:$0xff]   ;;  %v12167_v12 = vld [vmem:[%s14479_s24 + $0x214] ss:$8 sps:$4 sm:$0xff]   ;;  %v12165_v14 = vld [vmem:[%s14479_s24 + $0x210] ss:$8 sps:$4 sm:$0xff]   ;;  %s15937_s1 = scalar_lea.vmem %s16030_s3, %s10562_s12 }
  0x96   : > { %v12170_v13 = vld [vmem:[%s14479_s24 + $0x314] ss:$8 sps:$4 sm:$0xff]   ;;  %v12168_v15 = vld [vmem:[%s14479_s24 + $0x310] ss:$8 sps:$4 sm:$0xff]   ;;  %v12173_v16 = vld [vmem:[%s14479_s24 + $0x224] ss:$8 sps:$4 sm:$0xff]  }
  0x97   : > { %8568 = vmatpush1.bf16.msra.mxu0 %v12103_v26  ;;  %v12176_v17 = vld [vmem:[%s14479_s24 + $0x324] ss:$8 sps:$4 sm:$0xff]   ;;  %v12171_v18 = vld [vmem:[%s14479_s24 + $0x220] ss:$8 sps:$4 sm:$0xff]   ;;  %v12179_v20 = vld [vmem:[%s14479_s24 + $0x234] ss:$8 sps:$4 sm:$0xff]  }
  0x98   : > { %8609 = vmatpush1.bf16.msra.mxu1 %v12104_v27  ;;  %8569 = vmatprep.subr.bf16.mxu0 %v12105_v28  ;;  %v12174_v19 = vld [vmem:[%s14479_s24 + $0x320] ss:$8 sps:$4 sm:$0xff]   ;;  %v12182_v21 = vld [vmem:[%s14479_s24 + $0x334] ss:$8 sps:$4 sm:$0xff]   ;;  %v12177_v22 = vld [vmem:[%s14479_s24 + $0x230] ss:$8 sps:$4 sm:$0xff]  }
  0x99   : > { %8610 = vmatprep.subr.bf16.mxu1 %v12107_v29  ;;  %v12180_v23 = vld [vmem:[%s14479_s24 + $0x330] ss:$8 sps:$4 sm:$0xff]   ;;  %v12185_v24 = vld [vmem:[%s14479_s24 + $0x244] ss:$8 sps:$4 sm:$0xff]   ;;  %v12183_v26 = vld [vmem:[%s14479_s24 + $0x240] ss:$8 sps:$4 sm:$0xff]  }
  0x9a   : > { %v12188_v25 = vld [vmem:[%s14479_s24 + $0x344] ss:$8 sps:$4 sm:$0xff]   ;;  %v12186_v27 = vld [vmem:[%s14479_s24 + $0x340] ss:$8 sps:$4 sm:$0xff]   ;;  %v12191_v28 = vld [vmem:[%s14479_s24 + $0x254] ss:$8 sps:$4 sm:$0xff]  }
  0x9b   : > { %8570 = vmatpush1.bf16.msra.mxu0 %v12109_v30  ;;  %v12194_v29 = vld [vmem:[%s14479_s24 + $0x354] ss:$8 sps:$4 sm:$0xff]   ;;  %v12189_v30 = vld [vmem:[%s14479_s24 + $0x250] ss:$8 sps:$4 sm:$0xff]   ;;  %v12207_v46 = vld [vmem:[%s14479_s24 + $0x280] ss:$8 sps:$4 sm:$0xff]  }
  0x9c   : > { %8611 = vmatpush1.bf16.msra.mxu1 %v12110_v31  ;;  %8571 = vmatprep.subr.bf16.mxu0 %v12111_v32  ;;  %v12192_v31 = vld [vmem:[%s14479_s24 + $0x350] ss:$8 sps:$4 sm:$0xff]   ;;  %v12197_v32 = vld [vmem:[%s14479_s24 + $0x264] ss:$8 sps:$4 sm:$0xff]   ;;  %v12218_v49 = vld [vmem:[%s14479_s24 + $0x394] ss:$8 sps:$4 sm:$0xff]  }
  0x9d   : > { %8612 = vmatprep.subr.bf16.mxu1 %v12113_v33  ;;  %v12200_v33 = vld [vmem:[%s14479_s24 + $0x364] ss:$8 sps:$4 sm:$0xff]   ;;  %v12213_v50 = vld [vmem:[%s14479_s24 + $0x290] ss:$8 sps:$4 sm:$0xff]   ;;  %s270_s26 = scalar_lea.vmem [#allocation8], %s10559_s11  ;;  %s10560_s28 = sshll.u32 %s14476_s30, 3 }
  0x9e   : > { %v12221_v52 = vld [vmem:[%s14479_s24 + $0x2a4] ss:$8 sps:$4 sm:$0xff]   ;;  %s11908_s13 = sshll.u32 %s14245_s18, 7  ;;  %s304_s25 = scalar_lea.vmem [#allocation9], %s10560_s28  ;;  %vm10404_vm0 = vcmask 261120  }
  0x9f   : > { %8572 = vmatpush1.bf16.msra.mxu0 %v12115_v34  ;;  %v326_v34 = vld [vmem:[#allocation3 + $0x28] sm:$0xff]  ;;  %s10420_s6 = sshll.u32 %s304_s25, 4  ;;  %s15978_s29 = scalar_lea.hbm %s16031_s4, %s11908_s13  ;;  %s15980_s6 = int_to_ptr.vmem [resolvable:$true] %s10420_s6 }
  0xa0   : > { %8613 = vmatpush1.bf16.msra.mxu1 %v12116_v35  ;;  %8573 = vmatprep.subr.bf16.mxu0 %v12117_v36  ;;  %v12195_v35 = vld [vmem:[%s14479_s24 + $0x260] ss:$8 sps:$4 sm:$0xff]   ;;  %v12245_v4 = vld [vmem:[%s14479_s24 + $0x2e4] ss:$8 sps:$4 sm:$0xff]   ;;  %s10407_s7 = scalar_lea.sflag [#allocation5], %s14476_s30  ;;  %s14167_s22 = scalar_lea.vmem %s15980_s6, 128 }
  0xa1   : > { %8614 = vmatprep.subr.bf16.mxu1 %v12119_v37  ;;  %v12198_v36 = vld [vmem:[%s14479_s24 + $0x360] ss:$8 sps:$4 sm:$0xff]   ;;  %v410_v37 = vpack.c.bf16 %v326_v34, %v326_v34  ;;  %v12248_v5 = vld [vmem:[%s14479_s24 + $0x3e4] ss:$8 sps:$4 sm:$0xff]   ;;  %v12273_v34 = vld [vmem:[%s14479_s24 + $0x430] ss:$8 sps:$4 sm:$0xff]   ;;  %p14168_p13 = scmp.ne.s32.totalorder %s15980_s6, %s14167_s22 }
  0xa2   : > { %p16052_p0 = scmp.ne.s32.totalorder %s16042_s5, 0  ;;  %s14261_s18 = smov [#allocation9]  }
  0xa3   : > { %8574 = vmatpush1.bf16.msra.mxu0 %v12121_v38  ;;  %v328_v38 = vld [vmem:[#allocation3 + $0x38] sm:$0xff] }
  0xa4   : > { %8615 = vmatpush1.bf16.msra.mxu1 %v12122_v39  ;;  %8575 = vmatprep.subr.bf16.mxu0 %v12123_v40  ;;  %v12203_v39 = vld [vmem:[%s14479_s24 + $0x274] ss:$8 sps:$4 sm:$0xff]   ;;  %v412_v40 = vpack.c.bf16 %v328_v38, %v328_v38  ;;  %v12279_v38 = vld [vmem:[%s14479_s24 + $0x440] ss:$8 sps:$4 sm:$0xff]   ;;  %p14169_p7 = pnand %p14168_p13, %p16052_p0 }
  0xa5   : > { %8616 = vmatprep.subr.bf16.mxu1 %v12125_v41  ;;  %v12206_v41 = vld [vmem:[%s14479_s24 + $0x374] ss:$8 sps:$4 sm:$0xff]  }
  0xa6   : > { %p14170_p4 = pneg %p14169_p7 }
  0xa7   : > { %8576 = vmatpush1.bf16.msra.mxu0 %v12127_v42  ;;  %v12201_v42 = vld [vmem:[%s14479_s24 + $0x270] ss:$8 sps:$4 sm:$0xff]  }
  0xa8   : > { %8617 = vmatpush1.bf16.msra.mxu1 %v12128_v43  ;;  %8577 = vmatprep.subr.bf16.mxu0 %v12129_v44  ;;  %v12204_v43 = vld [vmem:[%s14479_s24 + $0x370] ss:$8 sps:$4 sm:$0xff]   ;;  %v12209_v44 = vld [vmem:[%s14479_s24 + $0x284] ss:$8 sps:$4 sm:$0xff]  }
  0xa9   : > { %8618 = vmatprep.subr.bf16.mxu1 %v12131_v45  ;;  %v12212_v45 = vld [vmem:[%s14479_s24 + $0x384] ss:$8 sps:$4 sm:$0xff]  }
  0xab   : > { %8578 = vmatpush1.bf16.msra.mxu0 %v12133_v47  ;;  %v12210_v47 = vld [vmem:[%s14479_s24 + $0x380] ss:$8 sps:$4 sm:$0xff]  }
  0xac   : > { %8619 = vmatpush1.bf16.msra.mxu1 %v12134_v48  ;;  %8579 = vmatprep.subr.bf16.mxu0 %v12135_v51  ;;  %v12215_v48 = vld [vmem:[%s14479_s24 + $0x294] ss:$8 sps:$4 sm:$0xff]   ;;  %v12216_v51 = vld [vmem:[%s14479_s24 + $0x390] ss:$8 sps:$4 sm:$0xff]  }
  0xad   : > { %8620 = vmatprep.subr.bf16.mxu1 %v12137_v53  ;;  %v12224_v53 = vld [vmem:[%s14479_s24 + $0x3a4] ss:$8 sps:$4 sm:$0xff]  }
  0xaf   : > { %8580 = vmatpush1.bf16.msra.mxu0 %v12139_v54  ;;  %v12219_v54 = vld [vmem:[%s14479_s24 + $0x2a0] ss:$8 sps:$4 sm:$0xff]  }
  0xb0   : > { %8621 = vmatpush1.bf16.msra.mxu1 %v12140_v55  ;;  %8581 = vmatprep.subr.bf16.mxu0 %v12141_v56  ;;  %v12222_v55 = vld [vmem:[%s14479_s24 + $0x3a0] ss:$8 sps:$4 sm:$0xff]   ;;  %v12227_v56 = vld [vmem:[%s14479_s24 + $0x2b4] ss:$8 sps:$4 sm:$0xff]  }
  0xb1   : > { %8622 = vmatprep.subr.bf16.mxu1 %v12143_v57  ;;  %v12230_v57 = vld [vmem:[%s14479_s24 + $0x3b4] ss:$8 sps:$4 sm:$0xff]  }
  0xb3   : > { %8582 = vmatpush1.bf16.msra.mxu0 %v12145_v58  ;;  %v12225_v58 = vld [vmem:[%s14479_s24 + $0x2b0] ss:$8 sps:$4 sm:$0xff]  }
  0xb4   : > { %8623 = vmatpush1.bf16.msra.mxu1 %v12146_v59  ;;  %8583 = vmatprep.subr.bf16.mxu0 %v12147_v60  ;;  %v12228_v59 = vld [vmem:[%s14479_s24 + $0x3b0] ss:$8 sps:$4 sm:$0xff]   ;;  %v12233_v60 = vld [vmem:[%s14479_s24 + $0x2c4] ss:$8 sps:$4 sm:$0xff]  }
  0xb5   : > { %8624 = vmatprep.subr.bf16.mxu1 %v12149_v61  ;;  %v12236_v61 = vld [vmem:[%s14479_s24 + $0x3c4] ss:$8 sps:$4 sm:$0xff]  }
  0xb7   : > { %8584 = vmatpush1.bf16.msra.mxu0 %v12151_v62  ;;  %v12231_v62 = vld [vmem:[%s14479_s24 + $0x2c0] ss:$8 sps:$4 sm:$0xff]  }
  0xb8   : > { %8625 = vmatpush1.bf16.msra.mxu1 %v12152_v63  ;;  %8585 = vmatprep.subr.bf16.mxu0 %v12153_v0  ;;  %v12234_v63 = vld [vmem:[%s14479_s24 + $0x3c0] ss:$8 sps:$4 sm:$0xff]   ;;  %v12239_v0 = vld [vmem:[%s14479_s24 + $0x2d4] ss:$8 sps:$4 sm:$0xff]  }
  0xb9   : > { %8626 = vmatprep.subr.bf16.mxu1 %v12155_v1  ;;  %v12242_v1 = vld [vmem:[%s14479_s24 + $0x3d4] ss:$8 sps:$4 sm:$0xff]  }
  0xbb   : > { %8586 = vmatpush1.bf16.msra.mxu0 %v12157_v2  ;;  %v12237_v2 = vld [vmem:[%s14479_s24 + $0x2d0] ss:$8 sps:$4 sm:$0xff]  }
  0xbc   : > { %8627 = vmatpush1.bf16.msra.mxu1 %v12158_v3  ;;  %8637 = vmatprep.subr.bf16.mxu0 %v12161_v6  ;;  %v12240_v3 = vld [vmem:[%s14479_s24 + $0x3d0] ss:$8 sps:$4 sm:$0xff]   ;;  %v12243_v6 = vld [vmem:[%s14479_s24 + $0x2e0] ss:$8 sps:$4 sm:$0xff]  }
  0xbd   : > { %8678 = vmatprep.subr.bf16.mxu1 %v12164_v7  ;;  %v12246_v7 = vld [vmem:[%s14479_s24 + $0x3e0] ss:$8 sps:$4 sm:$0xff]  }
  0xbe   : > { %8588 = vmatmul.mubr.bf16.vlgmr.msra.gmra.mrb[0].mxu0 %v405_v8  ;;  %v12251_v8 = vld [vmem:[%s14479_s24 + $0x2f4] ss:$8 sps:$4 sm:$0xff]  }
  0xbf   : > { %8629 = vmatmul.mubr.bf16.vlgmr.msra.gmra.mrb[0].mxu1 %v407_v9  ;;  %8638 = vmatpush1.bf16.msra.mxu0 %v12159_v10  ;;  %v12254_v9 = vld [vmem:[%s14479_s24 + $0x3f4] ss:$8 sps:$4 sm:$0xff]   ;;  %v12249_v10 = vld [vmem:[%s14479_s24 + $0x2f0] ss:$8 sps:$4 sm:$0xff]  }
  0xc0   : > { %8679 = vmatpush1.bf16.msra.mxu1 %v12162_v11  ;;  %8639 = vmatprep.subr.bf16.mxu0 %v12167_v12  ;;  %v12252_v11 = vld [vmem:[%s14479_s24 + $0x3f0] ss:$8 sps:$4 sm:$0xff]   ;;  %v325_v12 = vld [vmem:[#allocation3 + $0x20] sm:$0xff] }
  0xc1   : > { %8680 = vmatprep.subr.bf16.mxu1 %v12170_v13  ;;  %8669 = vmatprep.mubr.bf16.mxu0 %v410_v37  ;;  %v327_v13 = vld [vmem:[#allocation3 + $0x30] sm:$0xff]  ;;  %v12284_v37 = vld [vmem:[%s14479_s24 + $0x544] ss:$8 sps:$4 sm:$0xff]  }
  0xc2   : > { %8710 = vmatprep.mubr.bf16.mxu1 %v412_v40  ;;  %v12287_v40 = vld [vmem:[%s14479_s24 + $0x454] ss:$8 sps:$4 sm:$0xff]  }
  0xc3   : > { %8640 = vmatpush1.bf16.msra.mxu0 %v12165_v14  ;;  %v12257_v14 = vld [vmem:[%s14479_s24 + $0x404] ss:$8 sps:$4 sm:$0xff]  }
  0xc4   : > { %8681 = vmatpush1.bf16.msra.mxu1 %v12168_v15  ;;  %8641 = vmatprep.subr.bf16.mxu0 %v12173_v16  ;;  %v12260_v15 = vld [vmem:[%s14479_s24 + $0x504] ss:$8 sps:$4 sm:$0xff]   ;;  %v409_v16 = vpack.c.bf16 %v325_v12, %v325_v12 }
  0xc5   : > { %8682 = vmatprep.subr.bf16.mxu1 %v12176_v17  ;;  %v411_v17 = vpack.c.bf16 %v327_v13, %v327_v13  ;;  %v12341_v12 = vld [vmem:[%s14479_s24 + $0x4e4] ss:$8 sps:$4 sm:$0xff]  }
  0xc6   : > { %v12344_v13 = vld [vmem:[%s14479_s24 + $0x5e4] ss:$8 sps:$4 sm:$0xff]  }
  0xc7   : > { %8642 = vmatpush1.bf16.msra.mxu0 %v12171_v18  ;;  %v12255_v18 = vld [vmem:[%s14479_s24 + $0x400] ss:$8 sps:$4 sm:$0xff]  }
  0xc8   : > { %8683 = vmatpush1.bf16.msra.mxu1 %v12174_v19  ;;  %8643 = vmatprep.subr.bf16.mxu0 %v12179_v20  ;;  %v12258_v19 = vld [vmem:[%s14479_s24 + $0x500] ss:$8 sps:$4 sm:$0xff]   ;;  %v12263_v20 = vld [vmem:[%s14479_s24 + $0x414] ss:$8 sps:$4 sm:$0xff]  }
  0xc9   : > { %8684 = vmatprep.subr.bf16.mxu1 %v12182_v21  ;;  %v12266_v21 = vld [vmem:[%s14479_s24 + $0x514] ss:$8 sps:$4 sm:$0xff]  }
  0xcb   : > { %8644 = vmatpush1.bf16.msra.mxu0 %v12177_v22  ;;  %v330_v22 = vld [vmem:[#allocation3 + $0x48] sm:$0xff] }
  0xcc   : > { %8685 = vmatpush1.bf16.msra.mxu1 %v12180_v23  ;;  %8645 = vmatprep.subr.bf16.mxu0 %v12185_v24  ;;  %v12261_v23 = vld [vmem:[%s14479_s24 + $0x410] ss:$8 sps:$4 sm:$0xff]  }
  0xcd   : > { %8686 = vmatprep.subr.bf16.mxu1 %v12188_v25  ;;  %v12264_v24 = vld [vmem:[%s14479_s24 + $0x510] ss:$8 sps:$4 sm:$0xff]   ;;  %v414_v25 = vpack.c.bf16 %v330_v22, %v330_v22  ;;  %v12353_v22 = vld [vmem:[%s14479_s24 + $0x604] ss:$8 sps:$4 sm:$0xff]  }
  0xcf   : > { %8646 = vmatpush1.bf16.msra.mxu0 %v12183_v26  ;;  %v332_v26 = vld [vmem:[#allocation3 + $0x58] sm:$0xff] }
  0xd0   : > { %8687 = vmatpush1.bf16.msra.mxu1 %v12186_v27  ;;  %8647 = vmatprep.subr.bf16.mxu0 %v12191_v28  ;;  %v12269_v27 = vld [vmem:[%s14479_s24 + $0x424] ss:$8 sps:$4 sm:$0xff]   ;;  %v416_v28 = vpack.c.bf16 %v332_v26, %v332_v26 }
  0xd1   : > { %8688 = vmatprep.subr.bf16.mxu1 %v12194_v29  ;;  %v12272_v29 = vld [vmem:[%s14479_s24 + $0x524] ss:$8 sps:$4 sm:$0xff]  }
  0xd3   : > { %8648 = vmatpush1.bf16.msra.mxu0 %v12189_v30  ;;  %v12267_v30 = vld [vmem:[%s14479_s24 + $0x420] ss:$8 sps:$4 sm:$0xff]  }
  0xd4   : > { %8689 = vmatpush1.bf16.msra.mxu1 %v12192_v31  ;;  %8649 = vmatprep.subr.bf16.mxu0 %v12197_v32  ;;  %v12270_v31 = vld [vmem:[%s14479_s24 + $0x520] ss:$8 sps:$4 sm:$0xff]   ;;  %v12275_v32 = vld [vmem:[%s14479_s24 + $0x434] ss:$8 sps:$4 sm:$0xff]  }
  0xd5   : > { %8690 = vmatprep.subr.bf16.mxu1 %v12200_v33  ;;  %v12278_v33 = vld [vmem:[%s14479_s24 + $0x534] ss:$8 sps:$4 sm:$0xff]  }
  0xd7   : > { %8650 = vmatpush1.bf16.msra.mxu0 %v12195_v35  ;;  %v12276_v35 = vld [vmem:[%s14479_s24 + $0x530] ss:$8 sps:$4 sm:$0xff]  }
  0xd8   : > { %8691 = vmatpush1.bf16.msra.mxu1 %v12198_v36  ;;  %8651 = vmatprep.subr.bf16.mxu0 %v12203_v39  ;;  %v12281_v36 = vld [vmem:[%s14479_s24 + $0x444] ss:$8 sps:$4 sm:$0xff]   ;;  %v12282_v39 = vld [vmem:[%s14479_s24 + $0x540] ss:$8 sps:$4 sm:$0xff]  }
  0xd9   : > { %8692 = vmatprep.subr.bf16.mxu1 %v12206_v41  ;;  %v12290_v41 = vld [vmem:[%s14479_s24 + $0x554] ss:$8 sps:$4 sm:$0xff]  }
  0xdb   : > { %8652 = vmatpush1.bf16.msra.mxu0 %v12201_v42  ;;  %v12285_v42 = vld [vmem:[%s14479_s24 + $0x450] ss:$8 sps:$4 sm:$0xff]  }
  0xdc   : > { %8693 = vmatpush1.bf16.msra.mxu1 %v12204_v43  ;;  %8653 = vmatprep.subr.bf16.mxu0 %v12209_v44  ;;  %v12288_v43 = vld [vmem:[%s14479_s24 + $0x550] ss:$8 sps:$4 sm:$0xff]   ;;  %v12293_v44 = vld [vmem:[%s14479_s24 + $0x464] ss:$8 sps:$4 sm:$0xff]  }
  0xdd   : > { %8694 = vmatprep.subr.bf16.mxu1 %v12212_v45  ;;  %v12296_v45 = vld [vmem:[%s14479_s24 + $0x564] ss:$8 sps:$4 sm:$0xff]  }
  0xdf   : > { %8654 = vmatpush1.bf16.msra.mxu0 %v12207_v46  ;;  %v12291_v46 = vld [vmem:[%s14479_s24 + $0x460] ss:$8 sps:$4 sm:$0xff]  }
  0xe0   : > { %8695 = vmatpush1.bf16.msra.mxu1 %v12210_v47  ;;  %8655 = vmatprep.subr.bf16.mxu0 %v12215_v48  ;;  %v12294_v47 = vld [vmem:[%s14479_s24 + $0x560] ss:$8 sps:$4 sm:$0xff]   ;;  %v12299_v48 = vld [vmem:[%s14479_s24 + $0x474] ss:$8 sps:$4 sm:$0xff]  }
  0xe1   : > { %8696 = vmatprep.subr.bf16.mxu1 %v12218_v49  ;;  %v12302_v49 = vld [vmem:[%s14479_s24 + $0x574] ss:$8 sps:$4 sm:$0xff]  }
  0xe3   : > { %8656 = vmatpush1.bf16.msra.mxu0 %v12213_v50  ;;  %v12297_v50 = vld [vmem:[%s14479_s24 + $0x470] ss:$8 sps:$4 sm:$0xff]  }
  0xe4   : > { %8697 = vmatpush1.bf16.msra.mxu1 %v12216_v51  ;;  %8657 = vmatprep.subr.bf16.mxu0 %v12221_v52  ;;  %v12300_v51 = vld [vmem:[%s14479_s24 + $0x570] ss:$8 sps:$4 sm:$0xff]   ;;  %v12305_v52 = vld [vmem:[%s14479_s24 + $0x484] ss:$8 sps:$4 sm:$0xff]  }
  0xe5   : > { %8698 = vmatprep.subr.bf16.mxu1 %v12224_v53  ;;  %v12308_v53 = vld [vmem:[%s14479_s24 + $0x584] ss:$8 sps:$4 sm:$0xff]  }
  0xe7   : > { %8658 = vmatpush1.bf16.msra.mxu0 %v12219_v54  ;;  %v12303_v54 = vld [vmem:[%s14479_s24 + $0x480] ss:$8 sps:$4 sm:$0xff]  }
  0xe8   : > { %8699 = vmatpush1.bf16.msra.mxu1 %v12222_v55  ;;  %8659 = vmatprep.subr.bf16.mxu0 %v12227_v56  ;;  %v12306_v55 = vld [vmem:[%s14479_s24 + $0x580] ss:$8 sps:$4 sm:$0xff]   ;;  %v12311_v56 = vld [vmem:[%s14479_s24 + $0x494] ss:$8 sps:$4 sm:$0xff]  }
  0xe9   : > { %8700 = vmatprep.subr.bf16.mxu1 %v12230_v57  ;;  %v12314_v57 = vld [vmem:[%s14479_s24 + $0x594] ss:$8 sps:$4 sm:$0xff]  }
  0xeb   : > { %8660 = vmatpush1.bf16.msra.mxu0 %v12225_v58  ;;  %v12309_v58 = vld [vmem:[%s14479_s24 + $0x490] ss:$8 sps:$4 sm:$0xff]  }
  0xec   : > { %8701 = vmatpush1.bf16.msra.mxu1 %v12228_v59  ;;  %8661 = vmatprep.subr.bf16.mxu0 %v12233_v60  ;;  %v12312_v59 = vld [vmem:[%s14479_s24 + $0x590] ss:$8 sps:$4 sm:$0xff]   ;;  %v12317_v60 = vld [vmem:[%s14479_s24 + $0x4a4] ss:$8 sps:$4 sm:$0xff]  }
  0xed   : > { %8702 = vmatprep.subr.bf16.mxu1 %v12236_v61  ;;  %v12320_v61 = vld [vmem:[%s14479_s24 + $0x5a4] ss:$8 sps:$4 sm:$0xff]  }
  0xef   : > { %8662 = vmatpush1.bf16.msra.mxu0 %v12231_v62  ;;  %v12315_v62 = vld [vmem:[%s14479_s24 + $0x4a0] ss:$8 sps:$4 sm:$0xff]  }
  0xf0   : > { %8703 = vmatpush1.bf16.msra.mxu1 %v12234_v63  ;;  %8663 = vmatprep.subr.bf16.mxu0 %v12239_v0  ;;  %v12318_v63 = vld [vmem:[%s14479_s24 + $0x5a0] ss:$8 sps:$4 sm:$0xff]   ;;  %v12323_v0 = vld [vmem:[%s14479_s24 + $0x4b4] ss:$8 sps:$4 sm:$0xff]  }
  0xf1   : > { %8704 = vmatprep.subr.bf16.mxu1 %v12242_v1  ;;  %v12326_v1 = vld [vmem:[%s14479_s24 + $0x5b4] ss:$8 sps:$4 sm:$0xff]  }
  0xf3   : > { %8664 = vmatpush1.bf16.msra.mxu0 %v12237_v2  ;;  %v12321_v2 = vld [vmem:[%s14479_s24 + $0x4b0] ss:$8 sps:$4 sm:$0xff]  }
  0xf4   : > { %8705 = vmatpush1.bf16.msra.mxu1 %v12240_v3  ;;  %8665 = vmatprep.subr.bf16.mxu0 %v12245_v4  ;;  %v12324_v3 = vld [vmem:[%s14479_s24 + $0x5b0] ss:$8 sps:$4 sm:$0xff]   ;;  %v12329_v4 = vld [vmem:[%s14479_s24 + $0x4c4] ss:$8 sps:$4 sm:$0xff]  }
  0xf5   : > { %8706 = vmatprep.subr.bf16.mxu1 %v12248_v5  ;;  %v12332_v5 = vld [vmem:[%s14479_s24 + $0x5c4] ss:$8 sps:$4 sm:$0xff]  }
  0xf7   : > { %8666 = vmatpush1.bf16.msra.mxu0 %v12243_v6  ;;  %v12327_v6 = vld [vmem:[%s14479_s24 + $0x4c0] ss:$8 sps:$4 sm:$0xff]  }
  0xf8   : > { %8707 = vmatpush1.bf16.msra.mxu1 %v12246_v7  ;;  %8667 = vmatprep.subr.bf16.mxu0 %v12251_v8  ;;  %v12330_v7 = vld [vmem:[%s14479_s24 + $0x5c0] ss:$8 sps:$4 sm:$0xff]   ;;  %v12335_v8 = vld [vmem:[%s14479_s24 + $0x4d4] ss:$8 sps:$4 sm:$0xff]  }
  0xf9   : > { %8708 = vmatprep.subr.bf16.mxu1 %v12254_v9  ;;  %v12338_v9 = vld [vmem:[%s14479_s24 + $0x5d4] ss:$8 sps:$4 sm:$0xff]  }
  0xfb   : > { %8668 = vmatpush1.bf16.msra.mxu0 %v12249_v10  ;;  %v12333_v10 = vld [vmem:[%s14479_s24 + $0x4d0] ss:$8 sps:$4 sm:$0xff]  }
  0xfc   : > { %8709 = vmatpush1.bf16.msra.mxu1 %v12252_v11  ;;  %8719 = vmatprep.subr.bf16.mxu0 %v12257_v14  ;;  %v12336_v11 = vld [vmem:[%s14479_s24 + $0x5d0] ss:$8 sps:$4 sm:$0xff]   ;;  %v12339_v14 = vld [vmem:[%s14479_s24 + $0x4e0] ss:$8 sps:$4 sm:$0xff]  }
  0xfd   : > { %8760 = vmatprep.subr.bf16.mxu1 %v12260_v15  ;;  %v12342_v15 = vld [vmem:[%s14479_s24 + $0x5e0] ss:$8 sps:$4 sm:$0xff]  }
  0xfe   : > { %8670 = vmatmul.mubr.bf16.vlgmr.msra.gmra.mrb[4].mxu0 %v409_v16  ;;  %v12347_v16 = vld [vmem:[%s14479_s24 + $0x4f4] ss:$8 sps:$4 sm:$0xff]  }
  0xff   : > { %8711 = vmatmul.mubr.bf16.vlgmr.msra.gmra.mrb[4].mxu1 %v411_v17  ;;  %8720 = vmatpush1.bf16.msra.mxu0 %v12255_v18  ;;  %v12350_v17 = vld [vmem:[%s14479_s24 + $0x5f4] ss:$8 sps:$4 sm:$0xff]   ;;  %v12345_v18 = vld [vmem:[%s14479_s24 + $0x4f0] ss:$8 sps:$4 sm:$0xff]  }
 0x100   : > { %8761 = vmatpush1.bf16.msra.mxu1 %v12258_v19  ;;  %8721 = vmatprep.subr.bf16.mxu0 %v12263_v20  ;;  %v12348_v19 = vld [vmem:[%s14479_s24 + $0x5f0] ss:$8 sps:$4 sm:$0xff]   ;;  %v329_v20 = vld [vmem:[#allocation3 + $0x40] sm:$0xff] }
 0x101   : > { %8762 = vmatprep.subr.bf16.mxu1 %v12266_v21  ;;  %8751 = vmatprep.mubr.bf16.mxu0 %v414_v25  ;;  %v331_v21 = vld [vmem:[#allocation3 + $0x50] sm:$0xff]  ;;  %v12354_v25 = vld [vmem:[%s14479_s24 + $0x700] ss:$8 sps:$4 sm:$0xff]   ;;  %v413_v26 = vpack.c.bf16 %v329_v20, %v329_v20  ;;  %v12437_v20 = vld [vmem:[%s14479_s24 + $0x6e4] ss:$8 sps:$4 sm:$0xff]  }
 0x102   : > { %8792 = vmatprep.mubr.bf16.mxu1 %v416_v28  ;;  %v334_v28 = vld [vmem:[#allocation3 + $0x68] sm:$0xff] }
 0x103   : > { %8722 = vmatpush1.bf16.msra.mxu0 %v12261_v23  ;;  %v12356_v23 = vld [vmem:[%s14479_s24 + $0x704] ss:$8 sps:$4 sm:$0xff]  }
 0x104   : > { %8763 = vmatpush1.bf16.msra.mxu1 %v12264_v24  ;;  %8723 = vmatprep.subr.bf16.mxu0 %v12269_v27  ;;  %v12351_v24 = vld [vmem:[%s14479_s24 + $0x600] ss:$8 sps:$4 sm:$0xff]   ;;  %v415_v27 = vpack.c.bf16 %v331_v21, %v331_v21  ;;  %v12440_v21 = vld [vmem:[%s14479_s24 + $0x7e4] ss:$8 sps:$4 sm:$0xff]  }
 0x105   : > { %8764 = vmatprep.subr.bf16.mxu1 %v12272_v29  ;;  %v336_v29 = vld [vmem:[#allocation3 + $0x78] sm:$0xff] }
 0x107   : > { %8724 = vmatpush1.bf16.msra.mxu0 %v12267_v30  ;;  %v12359_v30 = vld [vmem:[%s14479_s24 + $0x614] ss:$8 sps:$4 sm:$0xff]  }
 0x108   : > { %8765 = vmatpush1.bf16.msra.mxu1 %v12270_v31  ;;  %8725 = vmatprep.subr.bf16.mxu0 %v12275_v32  ;;  %v12362_v31 = vld [vmem:[%s14479_s24 + $0x714] ss:$8 sps:$4 sm:$0xff]   ;;  %v418_v32 = vpack.c.bf16 %v334_v28, %v334_v28  ;;  %v333_v28 = vld [vmem:[#allocation3 + $0x60] sm:$0xff] }
 0x109   : > { %8766 = vmatprep.subr.bf16.mxu1 %v12278_v33  ;;  %v420_v33 = vpack.c.bf16 %v336_v29, %v336_v29  ;;  %v335_v29 = vld [vmem:[#allocation3 + $0x70] sm:$0xff] }
 0x10b   : > { %8726 = vmatpush1.bf16.msra.mxu0 %v12273_v34  ;;  %v12357_v34 = vld [vmem:[%s14479_s24 + $0x610] ss:$8 sps:$4 sm:$0xff]  }
 0x10c   : > { %8767 = vmatpush1.bf16.msra.mxu1 %v12276_v35  ;;  %8727 = vmatprep.subr.bf16.mxu0 %v12281_v36  ;;  %v12360_v35 = vld [vmem:[%s14479_s24 + $0x710] ss:$8 sps:$4 sm:$0xff]   ;;  %v12365_v36 = vld [vmem:[%s14479_s24 + $0x624] ss:$8 sps:$4 sm:$0xff]  }
 0x10d   : > { %8768 = vmatprep.subr.bf16.mxu1 %v12284_v37  ;;  %v12368_v37 = vld [vmem:[%s14479_s24 + $0x724] ss:$8 sps:$4 sm:$0xff]  }
 0x10f   : > { %8728 = vmatpush1.bf16.msra.mxu0 %v12279_v38  ;;  %v12363_v38 = vld [vmem:[%s14479_s24 + $0x620] ss:$8 sps:$4 sm:$0xff]  }
 0x110   : > { %8769 = vmatpush1.bf16.msra.mxu1 %v12282_v39  ;;  %8729 = vmatprep.subr.bf16.mxu0 %v12287_v40  ;;  %v12366_v39 = vld [vmem:[%s14479_s24 + $0x720] ss:$8 sps:$4 sm:$0xff]   ;;  %v12371_v40 = vld [vmem:[%s14479_s24 + $0x634] ss:$8 sps:$4 sm:$0xff]  }
 0x111   : > { %8770 = vmatprep.subr.bf16.mxu1 %v12290_v41  ;;  %v12374_v41 = vld [vmem:[%s14479_s24 + $0x734] ss:$8 sps:$4 sm:$0xff]  }
 0x113   : > { %8730 = vmatpush1.bf16.msra.mxu0 %v12285_v42  ;;  %v12369_v42 = vld [vmem:[%s14479_s24 + $0x630] ss:$8 sps:$4 sm:$0xff]  }
 0x114   : > { %8771 = vmatpush1.bf16.msra.mxu1 %v12288_v43  ;;  %8731 = vmatprep.subr.bf16.mxu0 %v12293_v44  ;;  %v12372_v43 = vld [vmem:[%s14479_s24 + $0x730] ss:$8 sps:$4 sm:$0xff]   ;;  %v12377_v44 = vld [vmem:[%s14479_s24 + $0x644] ss:$8 sps:$4 sm:$0xff]  }
 0x115   : > { %8772 = vmatprep.subr.bf16.mxu1 %v12296_v45  ;;  %v12380_v45 = vld [vmem:[%s14479_s24 + $0x744] ss:$8 sps:$4 sm:$0xff]  }
 0x117   : > { %8732 = vmatpush1.bf16.msra.mxu0 %v12291_v46  ;;  %v12375_v46 = vld [vmem:[%s14479_s24 + $0x640] ss:$8 sps:$4 sm:$0xff]  }
 0x118   : > { %8773 = vmatpush1.bf16.msra.mxu1 %v12294_v47  ;;  %8733 = vmatprep.subr.bf16.mxu0 %v12299_v48  ;;  %v12378_v47 = vld [vmem:[%s14479_s24 + $0x740] ss:$8 sps:$4 sm:$0xff]   ;;  %v12383_v48 = vld [vmem:[%s14479_s24 + $0x654] ss:$8 sps:$4 sm:$0xff]  }
 0x119   : > { %8774 = vmatprep.subr.bf16.mxu1 %v12302_v49  ;;  %v12386_v49 = vld [vmem:[%s14479_s24 + $0x754] ss:$8 sps:$4 sm:$0xff]  }
 0x11b   : > { %8734 = vmatpush1.bf16.msra.mxu0 %v12297_v50  ;;  %v12381_v50 = vld [vmem:[%s14479_s24 + $0x650] ss:$8 sps:$4 sm:$0xff]  }
 0x11c   : > { %8775 = vmatpush1.bf16.msra.mxu1 %v12300_v51  ;;  %8735 = vmatprep.subr.bf16.mxu0 %v12305_v52  ;;  %v12384_v51 = vld [vmem:[%s14479_s24 + $0x750] ss:$8 sps:$4 sm:$0xff]   ;;  %v12389_v52 = vld [vmem:[%s14479_s24 + $0x664] ss:$8 sps:$4 sm:$0xff]  }
 0x11d   : > { %8776 = vmatprep.subr.bf16.mxu1 %v12308_v53  ;;  %v12392_v53 = vld [vmem:[%s14479_s24 + $0x764] ss:$8 sps:$4 sm:$0xff]  }
 0x11f   : > { %8736 = vmatpush1.bf16.msra.mxu0 %v12303_v54  ;;  %v12387_v54 = vld [vmem:[%s14479_s24 + $0x660] ss:$8 sps:$4 sm:$0xff]  }
 0x120   : > { %8777 = vmatpush1.bf16.msra.mxu1 %v12306_v55  ;;  %8737 = vmatprep.subr.bf16.mxu0 %v12311_v56  ;;  %v12390_v55 = vld [vmem:[%s14479_s24 + $0x760] ss:$8 sps:$4 sm:$0xff]   ;;  %v12395_v56 = vld [vmem:[%s14479_s24 + $0x674] ss:$8 sps:$4 sm:$0xff]  }
 0x121   : > { %8778 = vmatprep.subr.bf16.mxu1 %v12314_v57  ;;  %v12398_v57 = vld [vmem:[%s14479_s24 + $0x774] ss:$8 sps:$4 sm:$0xff]  }
 0x123   : > { %8738 = vmatpush1.bf16.msra.mxu0 %v12309_v58  ;;  %v12393_v58 = vld [vmem:[%s14479_s24 + $0x670] ss:$8 sps:$4 sm:$0xff]  }
 0x124   : > { %8779 = vmatpush1.bf16.msra.mxu1 %v12312_v59  ;;  %8739 = vmatprep.subr.bf16.mxu0 %v12317_v60  ;;  %v12396_v59 = vld [vmem:[%s14479_s24 + $0x770] ss:$8 sps:$4 sm:$0xff]   ;;  %v12401_v60 = vld [vmem:[%s14479_s24 + $0x684] ss:$8 sps:$4 sm:$0xff]  }
 0x125   : > { %8780 = vmatprep.subr.bf16.mxu1 %v12320_v61  ;;  %v12404_v61 = vld [vmem:[%s14479_s24 + $0x784] ss:$8 sps:$4 sm:$0xff]  }
 0x127   : > { %8740 = vmatpush1.bf16.msra.mxu0 %v12315_v62  ;;  %v12399_v62 = vld [vmem:[%s14479_s24 + $0x680] ss:$8 sps:$4 sm:$0xff]  }
 0x128   : > { %8781 = vmatpush1.bf16.msra.mxu1 %v12318_v63  ;;  %8741 = vmatprep.subr.bf16.mxu0 %v12323_v0  ;;  %v12402_v63 = vld [vmem:[%s14479_s24 + $0x780] ss:$8 sps:$4 sm:$0xff]   ;;  %v12407_v0 = vld [vmem:[%s14479_s24 + $0x694] ss:$8 sps:$4 sm:$0xff]  }
 0x129   : > { %8782 = vmatprep.subr.bf16.mxu1 %v12326_v1  ;;  %v12410_v1 = vld [vmem:[%s14479_s24 + $0x794] ss:$8 sps:$4 sm:$0xff]  }
 0x12b   : > { %8742 = vmatpush1.bf16.msra.mxu0 %v12321_v2  ;;  %v12405_v2 = vld [vmem:[%s14479_s24 + $0x690] ss:$8 sps:$4 sm:$0xff]  }
 0x12c   : > { %8783 = vmatpush1.bf16.msra.mxu1 %v12324_v3  ;;  %8743 = vmatprep.subr.bf16.mxu0 %v12329_v4  ;;  %v12408_v3 = vld [vmem:[%s14479_s24 + $0x790] ss:$8 sps:$4 sm:$0xff]   ;;  %v12413_v4 = vld [vmem:[%s14479_s24 + $0x6a4] ss:$8 sps:$4 sm:$0xff]  }
 0x12d   : > { %8784 = vmatprep.subr.bf16.mxu1 %v12332_v5  ;;  %v12416_v5 = vld [vmem:[%s14479_s24 + $0x7a4] ss:$8 sps:$4 sm:$0xff]  }
 0x12f   : > { %8744 = vmatpush1.bf16.msra.mxu0 %v12327_v6  ;;  %v12411_v6 = vld [vmem:[%s14479_s24 + $0x6a0] ss:$8 sps:$4 sm:$0xff]  }
 0x130   : > { %8785 = vmatpush1.bf16.msra.mxu1 %v12330_v7  ;;  %8745 = vmatprep.subr.bf16.mxu0 %v12335_v8  ;;  %v12414_v7 = vld [vmem:[%s14479_s24 + $0x7a0] ss:$8 sps:$4 sm:$0xff]   ;;  %v12419_v8 = vld [vmem:[%s14479_s24 + $0x6b4] ss:$8 sps:$4 sm:$0xff]  }
 0x131   : > { %8786 = vmatprep.subr.bf16.mxu1 %v12338_v9  ;;  %v12422_v9 = vld [vmem:[%s14479_s24 + $0x7b4] ss:$8 sps:$4 sm:$0xff]  }
 0x133   : > { %8746 = vmatpush1.bf16.msra.mxu0 %v12333_v10  ;;  %v12417_v10 = vld [vmem:[%s14479_s24 + $0x6b0] ss:$8 sps:$4 sm:$0xff]  }
 0x134   : > { %8787 = vmatpush1.bf16.msra.mxu1 %v12336_v11  ;;  %8747 = vmatprep.subr.bf16.mxu0 %v12341_v12  ;;  %v12420_v11 = vld [vmem:[%s14479_s24 + $0x7b0] ss:$8 sps:$4 sm:$0xff]   ;;  %v12425_v12 = vld [vmem:[%s14479_s24 + $0x6c4] ss:$8 sps:$4 sm:$0xff]  }
 0x135   : > { %8788 = vmatprep.subr.bf16.mxu1 %v12344_v13  ;;  %v12428_v13 = vld [vmem:[%s14479_s24 + $0x7c4] ss:$8 sps:$4 sm:$0xff]  }
 0x137   : > { %8748 = vmatpush1.bf16.msra.mxu0 %v12339_v14  ;;  %v12423_v14 = vld [vmem:[%s14479_s24 + $0x6c0] ss:$8 sps:$4 sm:$0xff]  }
 0x138   : > { %8789 = vmatpush1.bf16.msra.mxu1 %v12342_v15  ;;  %8749 = vmatprep.subr.bf16.mxu0 %v12347_v16  ;;  %v12426_v15 = vld [vmem:[%s14479_s24 + $0x7c0] ss:$8 sps:$4 sm:$0xff]   ;;  %v12431_v16 = vld [vmem:[%s14479_s24 + $0x6d4] ss:$8 sps:$4 sm:$0xff]  }
 0x139   : > { %8790 = vmatprep.subr.bf16.mxu1 %v12350_v17  ;;  %v12434_v17 = vld [vmem:[%s14479_s24 + $0x7d4] ss:$8 sps:$4 sm:$0xff]  }
 0x13b   : > { %8750 = vmatpush1.bf16.msra.mxu0 %v12345_v18  ;;  %v12429_v18 = vld [vmem:[%s14479_s24 + $0x6d0] ss:$8 sps:$4 sm:$0xff]  }
 0x13c   : > { %8791 = vmatpush1.bf16.msra.mxu1 %v12348_v19  ;;  %8801 = vmatprep.subr.bf16.mxu0 %v12353_v22  ;;  %v12432_v19 = vld [vmem:[%s14479_s24 + $0x7d0] ss:$8 sps:$4 sm:$0xff]   ;;  %v12435_v22 = vld [vmem:[%s14479_s24 + $0x6e0] ss:$8 sps:$4 sm:$0xff]  }
 0x13d   : > { %8842 = vmatprep.subr.bf16.mxu1 %v12356_v23  ;;  %v12438_v23 = vld [vmem:[%s14479_s24 + $0x7e0] ss:$8 sps:$4 sm:$0xff]  }
 0x13e   : > { %8752 = vmatmul.mubr.bf16.vlgmr.msra.gmra.mrb[8].mxu0 %v413_v26  ;;  %v12441_v26 = vld [vmem:[%s14479_s24 + $0x6f0] ss:$8 sps:$4 sm:$0xff]  }
 0x13f   : > { %8793 = vmatmul.mubr.bf16.vlgmr.msra.gmra.mrb[8].mxu1 %v415_v27  ;;  %8802 = vmatpush1.bf16.msra.mxu0 %v12351_v24  ;;  %v12443_v24 = vld [vmem:[%s14479_s24 + $0x6f4] ss:$8 sps:$4 sm:$0xff]   ;;  %v12444_v27 = vld [vmem:[%s14479_s24 + $0x7f0] ss:$8 sps:$4 sm:$0xff]  }
 0x140   : > { %8843 = vmatpush1.bf16.msra.mxu1 %v12354_v25  ;;  %8803 = vmatprep.subr.bf16.mxu0 %v12359_v30  ;;  %v12446_v25 = vld [vmem:[%s14479_s24 + $0x7f4] ss:$8 sps:$4 sm:$0xff]   ;;  %v12449_v30 = vld [vmem:[%s14479_s24 + $0x804] ss:$8 sps:$4 sm:$0xff]  }
 0x141   : > { %8844 = vmatprep.subr.bf16.mxu1 %v12362_v31  ;;  %8833 = vmatprep.mubr.bf16.mxu0 %v418_v32  ;;  %v12452_v31 = vld [vmem:[%s14479_s24 + $0x904] ss:$8 sps:$4 sm:$0xff]   ;;  %v12447_v32 = vld [vmem:[%s14479_s24 + $0x800] ss:$8 sps:$4 sm:$0xff]  }
 0x142   : > { %8874 = vmatprep.mubr.bf16.mxu1 %v420_v33  ;;  %v12450_v33 = vld [vmem:[%s14479_s24 + $0x900] ss:$8 sps:$4 sm:$0xff]  }
 0x143   : > { %8804 = vmatpush1.bf16.msra.mxu0 %v12357_v34  ;;  %v417_v34 = vpack.c.bf16 %v333_v28, %v333_v28  ;;  %v12513_v28 = vld [vmem:[%s14479_s24 + $0x8b0] ss:$8 sps:$4 sm:$0xff]  }
 0x144   : > { %8845 = vmatpush1.bf16.msra.mxu1 %v12360_v35  ;;  %8805 = vmatprep.subr.bf16.mxu0 %v12365_v36  ;;  %v419_v35 = vpack.c.bf16 %v335_v29, %v335_v29  ;;  %v338_v36 = vld [vmem:[#allocation3 + $0x88] sm:$0xff]  ;;  %v12516_v29 = vld [vmem:[%s14479_s24 + $0x9b0] ss:$8 sps:$4 sm:$0xff]  }
 0x145   : > { %8846 = vmatprep.subr.bf16.mxu1 %v12368_v37  ;;  %v340_v37 = vld [vmem:[#allocation3 + $0x98] sm:$0xff] }
 0x147   : > { %8806 = vmatpush1.bf16.msra.mxu0 %v12363_v38  ;;  %v12455_v38 = vld [vmem:[%s14479_s24 + $0x814] ss:$8 sps:$4 sm:$0xff]  }
 0x148   : > { %8847 = vmatpush1.bf16.msra.mxu1 %v12366_v39  ;;  %8807 = vmatprep.subr.bf16.mxu0 %v12371_v40  ;;  %v12458_v39 = vld [vmem:[%s14479_s24 + $0x914] ss:$8 sps:$4 sm:$0xff]   ;;  %v422_v40 = vpack.c.bf16 %v338_v36, %v338_v36  ;;  %v12525_v36 = vld [vmem:[%s14479_s24 + $0x8d0] ss:$8 sps:$4 sm:$0xff]  }
 0x149   : > { %8848 = vmatprep.subr.bf16.mxu1 %v12374_v41  ;;  %v424_v41 = vpack.c.bf16 %v340_v37, %v340_v37  ;;  %v12528_v37 = vld [vmem:[%s14479_s24 + $0x9d0] ss:$8 sps:$4 sm:$0xff]  }
 0x14b   : > { %8808 = vmatpush1.bf16.msra.mxu0 %v12369_v42  ;;  %v12453_v42 = vld [vmem:[%s14479_s24 + $0x810] ss:$8 sps:$4 sm:$0xff]  }
 0x14c   : > { %8849 = vmatpush1.bf16.msra.mxu1 %v12372_v43  ;;  %8809 = vmatprep.subr.bf16.mxu0 %v12377_v44  ;;  %v12456_v43 = vld [vmem:[%s14479_s24 + $0x910] ss:$8 sps:$4 sm:$0xff]   ;;  %v12461_v44 = vld [vmem:[%s14479_s24 + $0x824] ss:$8 sps:$4 sm:$0xff]  }
 0x14d   : > { %8850 = vmatprep.subr.bf16.mxu1 %v12380_v45  ;;  %v12464_v45 = vld [vmem:[%s14479_s24 + $0x924] ss:$8 sps:$4 sm:$0xff]  }
 0x14f   : > { %8810 = vmatpush1.bf16.msra.mxu0 %v12375_v46  ;;  %v12459_v46 = vld [vmem:[%s14479_s24 + $0x820] ss:$8 sps:$4 sm:$0xff]  }
 0x150   : > { %8851 = vmatpush1.bf16.msra.mxu1 %v12378_v47  ;;  %8811 = vmatprep.subr.bf16.mxu0 %v12383_v48  ;;  %v12462_v47 = vld [vmem:[%s14479_s24 + $0x920] ss:$8 sps:$4 sm:$0xff]   ;;  %v12467_v48 = vld [vmem:[%s14479_s24 + $0x834] ss:$8 sps:$4 sm:$0xff]  }
 0x151   : > { %8852 = vmatprep.subr.bf16.mxu1 %v12386_v49  ;;  %v12470_v49 = vld [vmem:[%s14479_s24 + $0x934] ss:$8 sps:$4 sm:$0xff]  }
 0x153   : > { %8812 = vmatpush1.bf16.msra.mxu0 %v12381_v50  ;;  %v12465_v50 = vld [vmem:[%s14479_s24 + $0x830] ss:$8 sps:$4 sm:$0xff]  }
 0x154   : > { %8853 = vmatpush1.bf16.msra.mxu1 %v12384_v51  ;;  %8813 = vmatprep.subr.bf16.mxu0 %v12389_v52  ;;  %v12468_v51 = vld [vmem:[%s14479_s24 + $0x930] ss:$8 sps:$4 sm:$0xff]   ;;  %v12473_v52 = vld [vmem:[%s14479_s24 + $0x844] ss:$8 sps:$4 sm:$0xff]  }
 0x155   : > { %8854 = vmatprep.subr.bf16.mxu1 %v12392_v53  ;;  %v12476_v53 = vld [vmem:[%s14479_s24 + $0x944] ss:$8 sps:$4 sm:$0xff]  }
 0x157   : > { %8814 = vmatpush1.bf16.msra.mxu0 %v12387_v54  ;;  %v12471_v54 = vld [vmem:[%s14479_s24 + $0x840] ss:$8 sps:$4 sm:$0xff]  }
 0x158   : > { %8855 = vmatpush1.bf16.msra.mxu1 %v12390_v55  ;;  %8815 = vmatprep.subr.bf16.mxu0 %v12395_v56  ;;  %v12474_v55 = vld [vmem:[%s14479_s24 + $0x940] ss:$8 sps:$4 sm:$0xff]   ;;  %v12479_v56 = vld [vmem:[%s14479_s24 + $0x854] ss:$8 sps:$4 sm:$0xff]  }
 0x159   : > { %8856 = vmatprep.subr.bf16.mxu1 %v12398_v57  ;;  %v12482_v57 = vld [vmem:[%s14479_s24 + $0x954] ss:$8 sps:$4 sm:$0xff]  }
 0x15b   : > { %8816 = vmatpush1.bf16.msra.mxu0 %v12393_v58  ;;  %v12477_v58 = vld [vmem:[%s14479_s24 + $0x850] ss:$8 sps:$4 sm:$0xff]  }
 0x15c   : > { %8857 = vmatpush1.bf16.msra.mxu1 %v12396_v59  ;;  %8817 = vmatprep.subr.bf16.mxu0 %v12401_v60  ;;  %v12480_v59 = vld [vmem:[%s14479_s24 + $0x950] ss:$8 sps:$4 sm:$0xff]   ;;  %v12485_v60 = vld [vmem:[%s14479_s24 + $0x864] ss:$8 sps:$4 sm:$0xff]  }
 0x15d   : > { %8858 = vmatprep.subr.bf16.mxu1 %v12404_v61  ;;  %v12488_v61 = vld [vmem:[%s14479_s24 + $0x964] ss:$8 sps:$4 sm:$0xff]  }
 0x15f   : > { %8818 = vmatpush1.bf16.msra.mxu0 %v12399_v62 }
 0x160   : > { %8859 = vmatpush1.bf16.msra.mxu1 %v12402_v63  ;;  %8819 = vmatprep.subr.bf16.mxu0 %v12407_v0  ;;  %v12483_v0 = vld [vmem:[%s14479_s24 + $0x860] ss:$8 sps:$4 sm:$0xff]  }
 0x161   : > { %8860 = vmatprep.subr.bf16.mxu1 %v12410_v1 }
 0x163   : > { %8820 = vmatpush1.bf16.msra.mxu0 %v12405_v2 }
 0x164   : > { %8861 = vmatpush1.bf16.msra.mxu1 %v12408_v3  ;;  %8821 = vmatprep.subr.bf16.mxu0 %v12413_v4  ;;  %v12486_v4 = vld [vmem:[%s14479_s24 + $0x960] ss:$8 sps:$4 sm:$0xff]  }
 0x165   : > { %8862 = vmatprep.subr.bf16.mxu1 %v12416_v5 }
 0x167   : > { %8822 = vmatpush1.bf16.msra.mxu0 %v12411_v6 }
 0x168   : > { %8863 = vmatpush1.bf16.msra.mxu1 %v12414_v7  ;;  %8823 = vmatprep.subr.bf16.mxu0 %v12419_v8  ;;  %v12491_v8 = vld [vmem:[%s14479_s24 + $0x874] ss:$8 sps:$4 sm:$0xff]  }
 0x169   : > { %8864 = vmatprep.subr.bf16.mxu1 %v12422_v9 }
 0x16b   : > { %8824 = vmatpush1.bf16.msra.mxu0 %v12417_v10 }
 0x16c   : > { %8865 = vmatpush1.bf16.msra.mxu1 %v12420_v11  ;;  %8825 = vmatprep.subr.bf16.mxu0 %v12425_v12  ;;  %v12494_v11 = vld [vmem:[%s14479_s24 + $0x974] ss:$8 sps:$4 sm:$0xff]   ;;  %v12489_v12 = vld [vmem:[%s14479_s24 + $0x870] ss:$8 sps:$4 sm:$0xff]  }
 0x16d   : > { %8866 = vmatprep.subr.bf16.mxu1 %v12428_v13  ;;  %v12492_v13 = vld [vmem:[%s14479_s24 + $0x970] ss:$8 sps:$4 sm:$0xff]  }
 0x16f   : > { %8826 = vmatpush1.bf16.msra.mxu0 %v12423_v14  ;;  %v12497_v14 = vld [vmem:[%s14479_s24 + $0x884] ss:$8 sps:$4 sm:$0xff]  }
 0x170   : > { %8867 = vmatpush1.bf16.msra.mxu1 %v12426_v15  ;;  %8827 = vmatprep.subr.bf16.mxu0 %v12431_v16  ;;  %v12500_v15 = vld [vmem:[%s14479_s24 + $0x984] ss:$8 sps:$4 sm:$0xff]   ;;  %v12495_v16 = vld [vmem:[%s14479_s24 + $0x880] ss:$8 sps:$4 sm:$0xff]  }
 0x171   : > { %8868 = vmatprep.subr.bf16.mxu1 %v12434_v17  ;;  %v12498_v17 = vld [vmem:[%s14479_s24 + $0x980] ss:$8 sps:$4 sm:$0xff]  }
 0x173   : > { %8828 = vmatpush1.bf16.msra.mxu0 %v12429_v18  ;;  %v12503_v18 = vld [vmem:[%s14479_s24 + $0x894] ss:$8 sps:$4 sm:$0xff]  }
 0x174   : > { %8869 = vmatpush1.bf16.msra.mxu1 %v12432_v19  ;;  %8829 = vmatprep.subr.bf16.mxu0 %v12437_v20  ;;  %v12506_v19 = vld [vmem:[%s14479_s24 + $0x994] ss:$8 sps:$4 sm:$0xff]   ;;  %v12501_v20 = vld [vmem:[%s14479_s24 + $0x890] ss:$8 sps:$4 sm:$0xff]  }
 0x175   : > { %8870 = vmatprep.subr.bf16.mxu1 %v12440_v21  ;;  %v12504_v21 = vld [vmem:[%s14479_s24 + $0x990] ss:$8 sps:$4 sm:$0xff]  }
 0x177   : > { %8830 = vmatpush1.bf16.msra.mxu0 %v12435_v22  ;;  %v12509_v22 = vld [vmem:[%s14479_s24 + $0x8a4] ss:$8 sps:$4 sm:$0xff]  }
 0x178   : > { %8871 = vmatpush1.bf16.msra.mxu1 %v12438_v23  ;;  %8831 = vmatprep.subr.bf16.mxu0 %v12443_v24  ;;  %v12512_v23 = vld [vmem:[%s14479_s24 + $0x9a4] ss:$8 sps:$4 sm:$0xff]   ;;  %v12507_v24 = vld [vmem:[%s14479_s24 + $0x8a0] ss:$8 sps:$4 sm:$0xff]  }
 0x179   : > { %8872 = vmatprep.subr.bf16.mxu1 %v12446_v25  ;;  %v12510_v25 = vld [vmem:[%s14479_s24 + $0x9a0] ss:$8 sps:$4 sm:$0xff]  }
 0x17b   : > { %8832 = vmatpush1.bf16.msra.mxu0 %v12441_v26  ;;  %v12515_v26 = vld [vmem:[%s14479_s24 + $0x8b4] ss:$8 sps:$4 sm:$0xff]  }
 0x17c   : > { %8873 = vmatpush1.bf16.msra.mxu1 %v12444_v27  ;;  %8883 = vmatprep.subr.bf16.mxu0 %v12449_v30  ;;  %v12518_v27 = vld [vmem:[%s14479_s24 + $0x9b4] ss:$8 sps:$4 sm:$0xff]   ;;  %v12521_v30 = vld [vmem:[%s14479_s24 + $0x8c4] ss:$8 sps:$4 sm:$0xff]  }
 0x17d   : > { %8924 = vmatprep.subr.bf16.mxu1 %v12452_v31  ;;  %v12524_v31 = vld [vmem:[%s14479_s24 + $0x9c4] ss:$8 sps:$4 sm:$0xff]  }
 0x17e   : > { %8834 = vmatmul.mubr.bf16.vlgmr.msra.gmra.mrb[12].mxu0 %v417_v34  ;;  %v12527_v34 = vld [vmem:[%s14479_s24 + $0x8d4] ss:$8 sps:$4 sm:$0xff]  }
 0x17f   : > { %8875 = vmatmul.mubr.bf16.vlgmr.msra.gmra.mrb[12].mxu1 %v419_v35  ;;  %8884 = vmatpush1.bf16.msra.mxu0 %v12447_v32  ;;  %v12519_v32 = vld [vmem:[%s14479_s24 + $0x8c0] ss:$8 sps:$4 sm:$0xff]   ;;  %v12530_v35 = vld [vmem:[%s14479_s24 + $0x9d4] ss:$8 sps:$4 sm:$0xff]  }
 0x180   : > { %8925 = vmatpush1.bf16.msra.mxu1 %v12450_v33  ;;  %8885 = vmatprep.subr.bf16.mxu0 %v12455_v38  ;;  %v12522_v33 = vld [vmem:[%s14479_s24 + $0x9c0] ss:$8 sps:$4 sm:$0xff]   ;;  %v12533_v38 = vld [vmem:[%s14479_s24 + $0x8e4] ss:$8 sps:$4 sm:$0xff]  }
 0x181   : > { %8926 = vmatprep.subr.bf16.mxu1 %v12458_v39  ;;  %8915 = vmatprep.mubr.bf16.mxu0 %v422_v40  ;;  %v12536_v39 = vld [vmem:[%s14479_s24 + $0x9e4] ss:$8 sps:$4 sm:$0xff]   ;;  %v12531_v40 = vld [vmem:[%s14479_s24 + $0x8e0] ss:$8 sps:$4 sm:$0xff]  }
 0x182   : > { %8956 = vmatprep.mubr.bf16.mxu1 %v424_v41  ;;  %v12534_v41 = vld [vmem:[%s14479_s24 + $0x9e0] ss:$8 sps:$4 sm:$0xff]  }
 0x183   : > { %8886 = vmatpush1.bf16.msra.mxu0 %v12453_v42  ;;  %v12539_v42 = vld [vmem:[%s14479_s24 + $0x8f4] ss:$8 sps:$4 sm:$0xff]  }
 0x184   : > { %8927 = vmatpush1.bf16.msra.mxu1 %v12456_v43  ;;  %8887 = vmatprep.subr.bf16.mxu0 %v12461_v44  ;;  %v12542_v43 = vld [vmem:[%s14479_s24 + $0x9f4] ss:$8 sps:$4 sm:$0xff]   ;;  %v12537_v44 = vld [vmem:[%s14479_s24 + $0x8f0] ss:$8 sps:$4 sm:$0xff]  }
 0x185   : > { %8928 = vmatprep.subr.bf16.mxu1 %v12464_v45  ;;  %v12540_v45 = vld [vmem:[%s14479_s24 + $0x9f0] ss:$8 sps:$4 sm:$0xff]  }
 0x187   : > { %8888 = vmatpush1.bf16.msra.mxu0 %v12459_v46  ;;  %v337_v46 = vld [vmem:[#allocation3 + $0x80] sm:$0xff] }
 0x188   : > { %8929 = vmatpush1.bf16.msra.mxu1 %v12462_v47  ;;  %8889 = vmatprep.subr.bf16.mxu0 %v12467_v48  ;;  %v339_v47 = vld [vmem:[#allocation3 + $0x90] sm:$0xff]  ;;  %v12545_v48 = vld [vmem:[%s14479_s24 + $0xa04] ss:$8 sps:$4 sm:$0xff]  }
 0x189   : > { %8930 = vmatprep.subr.bf16.mxu1 %v12470_v49  ;;  %v12548_v49 = vld [vmem:[%s14479_s24 + $0xb04] ss:$8 sps:$4 sm:$0xff]  }
 0x18b   : > { %8890 = vmatpush1.bf16.msra.mxu0 %v12465_v50  ;;  %v421_v50 = vpack.c.bf16 %v337_v46, %v337_v46  ;;  %v12611_v46 = vld [vmem:[%s14479_s24 + $0xab4] ss:$8 sps:$4 sm:$0xff]  }
 0x18c   : > { %8931 = vmatpush1.bf16.msra.mxu1 %v12468_v51  ;;  %8891 = vmatprep.subr.bf16.mxu0 %v12473_v52  ;;  %v423_v51 = vpack.c.bf16 %v339_v47, %v339_v47  ;;  %v342_v52 = vld [vmem:[#allocation3 + $0xa8] sm:$0xff]  ;;  %v12614_v47 = vld [vmem:[%s14479_s24 + $0xbb4] ss:$8 sps:$4 sm:$0xff]  }
 0x18d   : > { %8932 = vmatprep.subr.bf16.mxu1 %v12476_v53  ;;  %v344_v53 = vld [vmem:[#allocation3 + $0xb8] sm:$0xff] }
 0x18f   : > { %8892 = vmatpush1.bf16.msra.mxu0 %v12471_v54  ;;  %v12543_v54 = vld [vmem:[%s14479_s24 + $0xa00] ss:$8 sps:$4 sm:$0xff]  }
 0x190   : > { %8933 = vmatpush1.bf16.msra.mxu1 %v12474_v55  ;;  %8893 = vmatprep.subr.bf16.mxu0 %v12479_v56  ;;  %v12546_v55 = vld [vmem:[%s14479_s24 + $0xb00] ss:$8 sps:$4 sm:$0xff]   ;;  %v12551_v56 = vld [vmem:[%s14479_s24 + $0xa14] ss:$8 sps:$4 sm:$0xff]  }
 0x191   : > { %8934 = vmatprep.subr.bf16.mxu1 %v12482_v57  ;;  %v8589_v62 = vpop.f32.mrb[0].mxu0  ;;  %v12554_v57 = vld [vmem:[%s14479_s24 + $0xb14] ss:$8 sps:$4 sm:$0xff]  }
 0x192   : > { %v8630_v63 = vpop.f32.mrb[0].mxu1  ;;  %v8591_v2 = vpop.f32.mrb[1].mxu0 }
 0x193   : > { %v14768_v1 = vadd.f32 %v8630_v63, %v8589_v62  ;;  %v8632_v3 = vpop.f32.mrb[1].mxu1  ;;  %v8593_v6 = vpop.f32.mrb[2].mxu0  ;;  %8894 = vmatpush1.bf16.msra.mxu0 %v12477_v58  ;;  %v426_v58 = vpack.c.bf16 %v342_v52, %v342_v52  ;;  %v12557_v62 = vld [vmem:[%s14479_s24 + $0xa24] ss:$8 sps:$4 sm:$0xff]   ;;  %v12615_v52 = vld [vmem:[%s14479_s24 + $0xac0] ss:$8 sps:$4 sm:$0xff]  }
 0x194   : > { %v14771_v5 = vadd.f32 %v8632_v3, %v8591_v2  ;;  %v8634_v7 = vpop.f32.mrb[2].mxu1  ;;  %8935 = vmatpush1.bf16.msra.mxu1 %v12480_v59  ;;  %v8594_v9 = vpop.f32.mrb[3].mxu0  ;;  %8895 = vmatprep.subr.bf16.mxu0 %v12485_v60  ;;  %v428_v59 = vpack.c.bf16 %v344_v53, %v344_v53  ;;  %v12549_v60 = vld [vmem:[%s14479_s24 + $0xa10] ss:$8 sps:$4 sm:$0xff]   ;;  %v12560_v63 = vld [vmem:[%s14479_s24 + $0xb24] ss:$8 sps:$4 sm:$0xff]  }
 0x195   : > { %v8635_v10 = vpop.f32.mrb[3].mxu1  ;;  %8936 = vmatprep.subr.bf16.mxu1 %v12488_v61  ;;  %v12552_v61 = vld [vmem:[%s14479_s24 + $0xb10] ss:$8 sps:$4 sm:$0xff]   ;;  %v12558_v2 = vld [vmem:[%s14479_s24 + $0xb20] ss:$8 sps:$4 sm:$0xff]  }
 0x196   : > { %v12563_v3 = vld [vmem:[%s14479_s24 + $0xa34] ss:$8 sps:$4 sm:$0xff]   ;;  %v12561_v6 = vld [vmem:[%s14479_s24 + $0xa30] ss:$8 sps:$4 sm:$0xff]   ;;  %v12572_v9 = vld [vmem:[%s14479_s24 + $0xb44] ss:$8 sps:$4 sm:$0xff]  }
 0x197   : > { %8896 = vmatpush1.bf16.msra.mxu0 %v12483_v0  ;;  %v12555_v0 = vld [vmem:[%s14479_s24 + $0xa20] ss:$8 sps:$4 sm:$0xff]   ;;  %v12564_v7 = vld [vmem:[%s14479_s24 + $0xb30] ss:$8 sps:$4 sm:$0xff]  }
 0x198   : > { %8937 = vmatpush1.bf16.msra.mxu1 %v12486_v4  ;;  %8897 = vmatprep.subr.bf16.mxu0 %v12491_v8  ;;  %v12566_v4 = vld [vmem:[%s14479_s24 + $0xb34] ss:$8 sps:$4 sm:$0xff]   ;;  %v12569_v8 = vld [vmem:[%s14479_s24 + $0xa44] ss:$8 sps:$4 sm:$0xff]   ;;  %v12567_v10 = vld [vmem:[%s14479_s24 + $0xa40] ss:$8 sps:$4 sm:$0xff]  }
 0x199   : > { %8938 = vmatprep.subr.bf16.mxu1 %v12494_v11  ;;  %v12570_v11 = vld [vmem:[%s14479_s24 + $0xb40] ss:$8 sps:$4 sm:$0xff]  }
 0x19a   : > { %v12618_v53 = vld [vmem:[%s14479_s24 + $0xbc0] ss:$8 sps:$4 sm:$0xff]  }
 0x19b   : > { %8898 = vmatpush1.bf16.msra.mxu0 %v12489_v12  ;;  %v12575_v12 = vld [vmem:[%s14479_s24 + $0xa54] ss:$8 sps:$4 sm:$0xff]  }
 0x19c   : > { %8939 = vmatpush1.bf16.msra.mxu1 %v12492_v13  ;;  %8899 = vmatprep.subr.bf16.mxu0 %v12497_v14  ;;  %v12578_v13 = vld [vmem:[%s14479_s24 + $0xb54] ss:$8 sps:$4 sm:$0xff]   ;;  %v12573_v14 = vld [vmem:[%s14479_s24 + $0xa50] ss:$8 sps:$4 sm:$0xff]  }
 0x19d   : > { %8940 = vmatprep.subr.bf16.mxu1 %v12500_v15  ;;  %v12576_v15 = vld [vmem:[%s14479_s24 + $0xb50] ss:$8 sps:$4 sm:$0xff]  }
 0x19f   : > { %8900 = vmatpush1.bf16.msra.mxu0 %v12495_v16  ;;  %v12581_v16 = vld [vmem:[%s14479_s24 + $0xa64] ss:$8 sps:$4 sm:$0xff]  }
 0x1a0   : > { %8941 = vmatpush1.bf16.msra.mxu1 %v12498_v17  ;;  %8901 = vmatprep.subr.bf16.mxu0 %v12503_v18  ;;  %v12584_v17 = vld [vmem:[%s14479_s24 + $0xb64] ss:$8 sps:$4 sm:$0xff]  }
 0x1a1   : > { %8942 = vmatprep.subr.bf16.mxu1 %v12506_v19 }
 0x1a3   : > { %8902 = vmatpush1.bf16.msra.mxu0 %v12501_v20  ;;  %v12579_v20 = vld [vmem:[%s14479_s24 + $0xa60] ss:$8 sps:$4 sm:$0xff]  }
 0x1a4   : > { %8943 = vmatpush1.bf16.msra.mxu1 %v12504_v21  ;;  %8903 = vmatprep.subr.bf16.mxu0 %v12509_v22  ;;  %v12582_v21 = vld [vmem:[%s14479_s24 + $0xb60] ss:$8 sps:$4 sm:$0xff]  }
 0x1a5   : > { %8944 = vmatprep.subr.bf16.mxu1 %v12512_v23 }
 0x1a7   : > { %8904 = vmatpush1.bf16.msra.mxu0 %v12507_v24 }
 0x1a8   : > { %8945 = vmatpush1.bf16.msra.mxu1 %v12510_v25  ;;  %8905 = vmatprep.subr.bf16.mxu0 %v12515_v26 }
 0x1a9   : > { %8946 = vmatprep.subr.bf16.mxu1 %v12518_v27 }
 0x1ab   : > { %8906 = vmatpush1.bf16.msra.mxu0 %v12513_v28 }
 0x1ac   : > { %8947 = vmatpush1.bf16.msra.mxu1 %v12516_v29  ;;  %8907 = vmatprep.subr.bf16.mxu0 %v12521_v30 }
 0x1ad   : > { %8948 = vmatprep.subr.bf16.mxu1 %v12524_v31  ;;  %v12590_v31 = vld [vmem:[%s14479_s24 + $0xb74] ss:$8 sps:$4 sm:$0xff]  }
 0x1af   : > { %8908 = vmatpush1.bf16.msra.mxu0 %v12519_v32 }
 0x1b0   : > { %8949 = vmatpush1.bf16.msra.mxu1 %v12522_v33  ;;  %8909 = vmatprep.subr.bf16.mxu0 %v12527_v34  ;;  %v12588_v33 = vld [vmem:[%s14479_s24 + $0xb70] ss:$8 sps:$4 sm:$0xff]   ;;  %v12593_v34 = vld [vmem:[%s14479_s24 + $0xa84] ss:$8 sps:$4 sm:$0xff]  }
 0x1b1   : > { %8950 = vmatprep.subr.bf16.mxu1 %v12530_v35  ;;  %v12596_v35 = vld [vmem:[%s14479_s24 + $0xb84] ss:$8 sps:$4 sm:$0xff]  }
 0x1b3   : > { %8910 = vmatpush1.bf16.msra.mxu0 %v12525_v36  ;;  %v12591_v36 = vld [vmem:[%s14479_s24 + $0xa80] ss:$8 sps:$4 sm:$0xff]  }
 0x1b4   : > { %8951 = vmatpush1.bf16.msra.mxu1 %v12528_v37  ;;  %8911 = vmatprep.subr.bf16.mxu0 %v12533_v38  ;;  %v12594_v37 = vld [vmem:[%s14479_s24 + $0xb80] ss:$8 sps:$4 sm:$0xff]   ;;  %v12599_v38 = vld [vmem:[%s14479_s24 + $0xa94] ss:$8 sps:$4 sm:$0xff]  }
 0x1b5   : > { %8952 = vmatprep.subr.bf16.mxu1 %v12536_v39  ;;  %v12602_v39 = vld [vmem:[%s14479_s24 + $0xb94] ss:$8 sps:$4 sm:$0xff]  }
 0x1b7   : > { %8912 = vmatpush1.bf16.msra.mxu0 %v12531_v40  ;;  %v12597_v40 = vld [vmem:[%s14479_s24 + $0xa90] ss:$8 sps:$4 sm:$0xff]  }
 0x1b8   : > { %8953 = vmatpush1.bf16.msra.mxu1 %v12534_v41  ;;  %8913 = vmatprep.subr.bf16.mxu0 %v12539_v42  ;;  %v12600_v41 = vld [vmem:[%s14479_s24 + $0xb90] ss:$8 sps:$4 sm:$0xff]   ;;  %v12605_v42 = vld [vmem:[%s14479_s24 + $0xaa4] ss:$8 sps:$4 sm:$0xff]  }
 0x1b9   : > { %8954 = vmatprep.subr.bf16.mxu1 %v12542_v43  ;;  %v12608_v43 = vld [vmem:[%s14479_s24 + $0xba4] ss:$8 sps:$4 sm:$0xff]  }
 0x1bb   : > { %8914 = vmatpush1.bf16.msra.mxu0 %v12537_v44  ;;  %v12603_v44 = vld [vmem:[%s14479_s24 + $0xaa0] ss:$8 sps:$4 sm:$0xff]  }
 0x1bc   : > { %8955 = vmatpush1.bf16.msra.mxu1 %v12540_v45  ;;  %8965 = vmatprep.subr.bf16.mxu0 %v12545_v48  ;;  %v12606_v45 = vld [vmem:[%s14479_s24 + $0xba0] ss:$8 sps:$4 sm:$0xff]   ;;  %v12609_v48 = vld [vmem:[%s14479_s24 + $0xab0] ss:$8 sps:$4 sm:$0xff]  }
 0x1bd   : > { %9006 = vmatprep.subr.bf16.mxu1 %v12548_v49  ;;  %v12612_v49 = vld [vmem:[%s14479_s24 + $0xbb0] ss:$8 sps:$4 sm:$0xff]  }
 0x1be   : > { %8916 = vmatmul.mubr.bf16.vlgmr.msra.gmra.mrb[16].mxu0 %v421_v50  ;;  %v12617_v50 = vld [vmem:[%s14479_s24 + $0xac4] ss:$8 sps:$4 sm:$0xff]  }
 0x1bf   : > { %8957 = vmatmul.mubr.bf16.vlgmr.msra.gmra.mrb[16].mxu1 %v423_v51  ;;  %8966 = vmatpush1.bf16.msra.mxu0 %v12543_v54  ;;  %v12620_v51 = vld [vmem:[%s14479_s24 + $0xbc4] ss:$8 sps:$4 sm:$0xff]   ;;  %v12623_v54 = vld [vmem:[%s14479_s24 + $0xad4] ss:$8 sps:$4 sm:$0xff]  }
 0x1c0   : > { %9007 = vmatpush1.bf16.msra.mxu1 %v12546_v55  ;;  %8967 = vmatprep.subr.bf16.mxu0 %v12551_v56  ;;  %v12626_v55 = vld [vmem:[%s14479_s24 + $0xbd4] ss:$8 sps:$4 sm:$0xff]   ;;  %v12621_v56 = vld [vmem:[%s14479_s24 + $0xad0] ss:$8 sps:$4 sm:$0xff]  }
 0x1c1   : > { %9008 = vmatprep.subr.bf16.mxu1 %v12554_v57  ;;  %8997 = vmatprep.mubr.bf16.mxu0 %v426_v58  ;;  %v12624_v57 = vld [vmem:[%s14479_s24 + $0xbd0] ss:$8 sps:$4 sm:$0xff]   ;;  %v12629_v58 = vld [vmem:[%s14479_s24 + $0xae4] ss:$8 sps:$4 sm:$0xff]  }
 0x1c2   : > { %9038 = vmatprep.mubr.bf16.mxu1 %v428_v59  ;;  %v12632_v59 = vld [vmem:[%s14479_s24 + $0xbe4] ss:$8 sps:$4 sm:$0xff]  }
 0x1c3   : > { %8968 = vmatpush1.bf16.msra.mxu0 %v12549_v60  ;;  %v12627_v60 = vld [vmem:[%s14479_s24 + $0xae0] ss:$8 sps:$4 sm:$0xff]  }
 0x1c4   : > { %9009 = vmatpush1.bf16.msra.mxu1 %v12552_v61  ;;  %8969 = vmatprep.subr.bf16.mxu0 %v12557_v62  ;;  %v12630_v61 = vld [vmem:[%s14479_s24 + $0xbe0] ss:$8 sps:$4 sm:$0xff]   ;;  %v12635_v62 = vld [vmem:[%s14479_s24 + $0xaf4] ss:$8 sps:$4 sm:$0xff]  }
 0x1c5   : > { %9010 = vmatprep.subr.bf16.mxu1 %v12560_v63  ;;  %v12638_v63 = vld [vmem:[%s14479_s24 + $0xbf4] ss:$8 sps:$4 sm:$0xff]  }
 0x1c7   : > { %8970 = vmatpush1.bf16.msra.mxu0 %v12555_v0  ;;  %v12633_v0 = vld [vmem:[%s14479_s24 + $0xaf0] ss:$8 sps:$4 sm:$0xff]  }
 0x1c8   : > { %9011 = vmatpush1.bf16.msra.mxu1 %v12558_v2  ;;  %8971 = vmatprep.subr.bf16.mxu0 %v12563_v3  ;;  %v12636_v2 = vld [vmem:[%s14479_s24 + $0xbf0] ss:$8 sps:$4 sm:$0xff]   ;;  %v341_v3 = vld [vmem:[#allocation3 + $0xa0] sm:$0xff] }
 0x1c9   : > { %9012 = vmatprep.subr.bf16.mxu1 %v12566_v4  ;;  %v343_v4 = vld [vmem:[#allocation3 + $0xb0] sm:$0xff] }
 0x1cb   : > { %8972 = vmatpush1.bf16.msra.mxu0 %v12561_v6  ;;  %v12641_v6 = vld [vmem:[%s14479_s24 + $0xc04] ss:$8 sps:$4 sm:$0xff]  }
 0x1cc   : > { %9013 = vmatpush1.bf16.msra.mxu1 %v12564_v7  ;;  %8973 = vmatprep.subr.bf16.mxu0 %v12569_v8  ;;  %v12644_v7 = vld [vmem:[%s14479_s24 + $0xd04] ss:$8 sps:$4 sm:$0xff]   ;;  %v425_v8 = vpack.c.bf16 %v341_v3, %v341_v3  ;;  %v12707_v3 = vld [vmem:[%s14479_s24 + $0xcb4] ss:$8 sps:$4 sm:$0xff]  }
 0x1cd   : > { %9014 = vmatprep.subr.bf16.mxu1 %v12572_v9  ;;  %v427_v9 = vpack.c.bf16 %v343_v4, %v343_v4  ;;  %v12710_v4 = vld [vmem:[%s14479_s24 + $0xdb4] ss:$8 sps:$4 sm:$0xff]  }
 0x1cf   : > { %8974 = vmatpush1.bf16.msra.mxu0 %v12567_v10  ;;  %v346_v10 = vld [vmem:[#allocation3 + $0xc8] sm:$0xff] }
 0x1d0   : > { %9015 = vmatpush1.bf16.msra.mxu1 %v12570_v11  ;;  %8975 = vmatprep.subr.bf16.mxu0 %v12575_v12  ;;  %v348_v11 = vld [vmem:[#allocation3 + $0xd8] sm:$0xff]  ;;  %v12639_v12 = vld [vmem:[%s14479_s24 + $0xc00] ss:$8 sps:$4 sm:$0xff]  }
 0x1d1   : > { %9016 = vmatprep.subr.bf16.mxu1 %v12578_v13  ;;  %v8671_v18 = vpop.f32.mrb[4].mxu0  ;;  %v12642_v13 = vld [vmem:[%s14479_s24 + $0xd00] ss:$8 sps:$4 sm:$0xff]  }
 0x1d2   : > { %v8712_v19 = vpop.f32.mrb[4].mxu1  ;;  %v8672_v22 = vadd.f32 %v8671_v18, %v14768_v1  ;;  %v8673_v23 = vpop.f32.mrb[5].mxu0  ;;  %v12587_v1 = vld [vmem:[%s14479_s24 + $0xa74] ss:$8 sps:$4 sm:$0xff]   ;;  %v12645_v18 = vld [vmem:[%s14479_s24 + $0xc10] ss:$8 sps:$4 sm:$0xff]  }
 0x1d3   : > { %v8714_v24 = vpop.f32.mrb[5].mxu1  ;;  %v8674_v25 = vadd.f32 %v8673_v23, %v14771_v5  ;;  %v8675_v26 = vpop.f32.mrb[6].mxu0  ;;  %8976 = vmatpush1.bf16.msra.mxu0 %v12573_v14  ;;  %v12585_v5 = vld [vmem:[%s14479_s24 + $0xa70] ss:$8 sps:$4 sm:$0xff]   ;;  %v12647_v14 = vld [vmem:[%s14479_s24 + $0xc14] ss:$8 sps:$4 sm:$0xff]  }
 0x1d4   : > { %v8716_v27 = vpop.f32.mrb[6].mxu1  ;;  %9017 = vmatpush1.bf16.msra.mxu1 %v12576_v15  ;;  %v14839_v28 = vadd.f32 %v8712_v19, %v8672_v22  ;;  %v8676_v29 = vpop.f32.mrb[7].mxu0  ;;  %8977 = vmatprep.subr.bf16.mxu0 %v12581_v16  ;;  %v12650_v15 = vld [vmem:[%s14479_s24 + $0xd14] ss:$8 sps:$4 sm:$0xff]   ;;  %v430_v16 = vpack.c.bf16 %v346_v10, %v346_v10  ;;  %v12648_v19 = vld [vmem:[%s14479_s24 + $0xd10] ss:$8 sps:$4 sm:$0xff]  }
 0x1d5   : > { %v8717_v30 = vpop.f32.mrb[7].mxu1  ;;  %9018 = vmatprep.subr.bf16.mxu1 %v12584_v17  ;;  %v14843_v32 = vadd.f32 %v8714_v24, %v8674_v25  ;;  %v432_v17 = vpack.c.bf16 %v348_v11, %v348_v11  ;;  %v12651_v22 = vld [vmem:[%s14479_s24 + $0xc20] ss:$8 sps:$4 sm:$0xff]   ;;  %v12659_v24 = vld [vmem:[%s14479_s24 + $0xc34] ss:$8 sps:$4 sm:$0xff]  }
 0x1d6   : > { %v12654_v23 = vld [vmem:[%s14479_s24 + $0xd20] ss:$8 sps:$4 sm:$0xff]   ;;  %v12662_v25 = vld [vmem:[%s14479_s24 + $0xd34] ss:$8 sps:$4 sm:$0xff]   ;;  %v12657_v26 = vld [vmem:[%s14479_s24 + $0xc30] ss:$8 sps:$4 sm:$0xff]  }
 0x1d7   : > { %8978 = vmatpush1.bf16.msra.mxu0 %v12579_v20  ;;  %v12653_v20 = vld [vmem:[%s14479_s24 + $0xc24] ss:$8 sps:$4 sm:$0xff]   ;;  %v12660_v27 = vld [vmem:[%s14479_s24 + $0xd30] ss:$8 sps:$4 sm:$0xff]   ;;  %v12711_v10 = vld [vmem:[%s14479_s24 + $0xcc0] ss:$8 sps:$4 sm:$0xff]  }
 0x1d8   : > { %9019 = vmatpush1.bf16.msra.mxu1 %v12582_v21  ;;  %8979 = vmatprep.subr.bf16.mxu0 %v12587_v1  ;;  %v12656_v21 = vld [vmem:[%s14479_s24 + $0xd24] ss:$8 sps:$4 sm:$0xff]   ;;  %v12663_v1 = vld [vmem:[%s14479_s24 + $0xc40] ss:$8 sps:$4 sm:$0xff]  }
 0x1d9   : > { %9020 = vmatprep.subr.bf16.mxu1 %v12590_v31  ;;  %v12665_v29 = vld [vmem:[%s14479_s24 + $0xc44] ss:$8 sps:$4 sm:$0xff]   ;;  %v12666_v31 = vld [vmem:[%s14479_s24 + $0xd40] ss:$8 sps:$4 sm:$0xff]  }
 0x1da   : > { %v12668_v30 = vld [vmem:[%s14479_s24 + $0xd44] ss:$8 sps:$4 sm:$0xff]   ;;  %v12714_v11 = vld [vmem:[%s14479_s24 + $0xdc0] ss:$8 sps:$4 sm:$0xff]  }
 0x1db   : > { %8980 = vmatpush1.bf16.msra.mxu0 %v12585_v5  ;;  %v12671_v5 = vld [vmem:[%s14479_s24 + $0xc54] ss:$8 sps:$4 sm:$0xff]  }
 0x1dc   : > { %9021 = vmatpush1.bf16.msra.mxu1 %v12588_v33  ;;  %8981 = vmatprep.subr.bf16.mxu0 %v12593_v34  ;;  %v12674_v33 = vld [vmem:[%s14479_s24 + $0xd54] ss:$8 sps:$4 sm:$0xff]   ;;  %v12669_v34 = vld [vmem:[%s14479_s24 + $0xc50] ss:$8 sps:$4 sm:$0xff]  }
 0x1dd   : > { %9022 = vmatprep.subr.bf16.mxu1 %v12596_v35  ;;  %v12672_v35 = vld [vmem:[%s14479_s24 + $0xd50] ss:$8 sps:$4 sm:$0xff]  }
 0x1df   : > { %8982 = vmatpush1.bf16.msra.mxu0 %v12591_v36  ;;  %v12677_v36 = vld [vmem:[%s14479_s24 + $0xc64] ss:$8 sps:$4 sm:$0xff]  }
 0x1e0   : > { %9023 = vmatpush1.bf16.msra.mxu1 %v12594_v37  ;;  %8983 = vmatprep.subr.bf16.mxu0 %v12599_v38  ;;  %v12680_v37 = vld [vmem:[%s14479_s24 + $0xd64] ss:$8 sps:$4 sm:$0xff]  }
 0x1e1   : > { %9024 = vmatprep.subr.bf16.mxu1 %v12602_v39 }
 0x1e3   : > { %8984 = vmatpush1.bf16.msra.mxu0 %v12597_v40  ;;  %v12675_v40 = vld [vmem:[%s14479_s24 + $0xc60] ss:$8 sps:$4 sm:$0xff]  }
 0x1e4   : > { %9025 = vmatpush1.bf16.msra.mxu1 %v12600_v41  ;;  %8985 = vmatprep.subr.bf16.mxu0 %v12605_v42  ;;  %v12678_v41 = vld [vmem:[%s14479_s24 + $0xd60] ss:$8 sps:$4 sm:$0xff]  }
 0x1e5   : > { %9026 = vmatprep.subr.bf16.mxu1 %v12608_v43 }
 0x1e7   : > { %8986 = vmatpush1.bf16.msra.mxu0 %v12603_v44 }
 0x1e8   : > { %9027 = vmatpush1.bf16.msra.mxu1 %v12606_v45  ;;  %8987 = vmatprep.subr.bf16.mxu0 %v12611_v46 }
 0x1e9   : > { %9028 = vmatprep.subr.bf16.mxu1 %v12614_v47 }
 0x1eb   : > { %8988 = vmatpush1.bf16.msra.mxu0 %v12609_v48 }
 0x1ec   : > { %9029 = vmatpush1.bf16.msra.mxu1 %v12612_v49  ;;  %8989 = vmatprep.subr.bf16.mxu0 %v12617_v50 }
 0x1ed   : > { %9030 = vmatprep.subr.bf16.mxu1 %v12620_v51  ;;  %v12686_v51 = vld [vmem:[%s14479_s24 + $0xd74] ss:$8 sps:$4 sm:$0xff]  }
 0x1ef   : > { %8990 = vmatpush1.bf16.msra.mxu0 %v12615_v52 }
 0x1f0   : > { %9031 = vmatpush1.bf16.msra.mxu1 %v12618_v53  ;;  %8991 = vmatprep.subr.bf16.mxu0 %v12623_v54  ;;  %v12684_v53 = vld [vmem:[%s14479_s24 + $0xd70] ss:$8 sps:$4 sm:$0xff]   ;;  %v12689_v54 = vld [vmem:[%s14479_s24 + $0xc84] ss:$8 sps:$4 sm:$0xff]  }
 0x1f1   : > { %9032 = vmatprep.subr.bf16.mxu1 %v12626_v55  ;;  %v12692_v55 = vld [vmem:[%s14479_s24 + $0xd84] ss:$8 sps:$4 sm:$0xff]  }
 0x1f3   : > { %8992 = vmatpush1.bf16.msra.mxu0 %v12621_v56  ;;  %v12687_v56 = vld [vmem:[%s14479_s24 + $0xc80] ss:$8 sps:$4 sm:$0xff]  }
 0x1f4   : > { %9033 = vmatpush1.bf16.msra.mxu1 %v12624_v57  ;;  %8993 = vmatprep.subr.bf16.mxu0 %v12629_v58  ;;  %v12690_v57 = vld [vmem:[%s14479_s24 + $0xd80] ss:$8 sps:$4 sm:$0xff]   ;;  %v12695_v58 = vld [vmem:[%s14479_s24 + $0xc94] ss:$8 sps:$4 sm:$0xff]  }
 0x1f5   : > { %9034 = vmatprep.subr.bf16.mxu1 %v12632_v59  ;;  %v12698_v59 = vld [vmem:[%s14479_s24 + $0xd94] ss:$8 sps:$4 sm:$0xff]  }
 0x1f7   : > { %8994 = vmatpush1.bf16.msra.mxu0 %v12627_v60  ;;  %v12693_v60 = vld [vmem:[%s14479_s24 + $0xc90] ss:$8 sps:$4 sm:$0xff]  }
 0x1f8   : > { %9035 = vmatpush1.bf16.msra.mxu1 %v12630_v61  ;;  %8995 = vmatprep.subr.bf16.mxu0 %v12635_v62  ;;  %v12696_v61 = vld [vmem:[%s14479_s24 + $0xd90] ss:$8 sps:$4 sm:$0xff]   ;;  %v12701_v62 = vld [vmem:[%s14479_s24 + $0xca4] ss:$8 sps:$4 sm:$0xff]  }
 0x1f9   : > { %9036 = vmatprep.subr.bf16.mxu1 %v12638_v63  ;;  %v12704_v63 = vld [vmem:[%s14479_s24 + $0xda4] ss:$8 sps:$4 sm:$0xff]  }
 0x1fb   : > { %8996 = vmatpush1.bf16.msra.mxu0 %v12633_v0  ;;  %v12699_v0 = vld [vmem:[%s14479_s24 + $0xca0] ss:$8 sps:$4 sm:$0xff]  }
 0x1fc   : > { %9037 = vmatpush1.bf16.msra.mxu1 %v12636_v2  ;;  %9047 = vmatprep.subr.bf16.mxu0 %v12641_v6  ;;  %v12702_v2 = vld [vmem:[%s14479_s24 + $0xda0] ss:$8 sps:$4 sm:$0xff]   ;;  %v12705_v6 = vld [vmem:[%s14479_s24 + $0xcb0] ss:$8 sps:$4 sm:$0xff]  }
 0x1fd   : > { %9088 = vmatprep.subr.bf16.mxu1 %v12644_v7  ;;  %v12708_v7 = vld [vmem:[%s14479_s24 + $0xdb0] ss:$8 sps:$4 sm:$0xff]  }
 0x1fe   : > { %8998 = vmatmul.mubr.bf16.vlgmr.msra.gmra.mrb[20].mxu0 %v425_v8  ;;  %v12713_v8 = vld [vmem:[%s14479_s24 + $0xcc4] ss:$8 sps:$4 sm:$0xff]  }
 0x1ff   : > { %9039 = vmatmul.mubr.bf16.vlgmr.msra.gmra.mrb[20].mxu1 %v427_v9  ;;  %9048 = vmatpush1.bf16.msra.mxu0 %v12639_v12  ;;  %v12716_v9 = vld [vmem:[%s14479_s24 + $0xdc4] ss:$8 sps:$4 sm:$0xff]   ;;  %v12719_v12 = vld [vmem:[%s14479_s24 + $0xcd4] ss:$8 sps:$4 sm:$0xff]  }
 0x200   : > { %9089 = vmatpush1.bf16.msra.mxu1 %v12642_v13  ;;  %9049 = vmatprep.subr.bf16.mxu0 %v12647_v14  ;;  %v12722_v13 = vld [vmem:[%s14479_s24 + $0xdd4] ss:$8 sps:$4 sm:$0xff]   ;;  %v12717_v14 = vld [vmem:[%s14479_s24 + $0xcd0] ss:$8 sps:$4 sm:$0xff]  }
 0x201   : > { %9090 = vmatprep.subr.bf16.mxu1 %v12650_v15  ;;  %9079 = vmatprep.mubr.bf16.mxu0 %v430_v16  ;;  %v12720_v15 = vld [vmem:[%s14479_s24 + $0xdd0] ss:$8 sps:$4 sm:$0xff]   ;;  %v12725_v16 = vld [vmem:[%s14479_s24 + $0xce4] ss:$8 sps:$4 sm:$0xff]  }
 0x202   : > { %9120 = vmatprep.mubr.bf16.mxu1 %v432_v17  ;;  %v12728_v17 = vld [vmem:[%s14479_s24 + $0xde4] ss:$8 sps:$4 sm:$0xff]  }
 0x203   : > { %9050 = vmatpush1.bf16.msra.mxu0 %v12645_v18  ;;  %v12723_v18 = vld [vmem:[%s14479_s24 + $0xce0] ss:$8 sps:$4 sm:$0xff]  }
 0x204   : > { %9091 = vmatpush1.bf16.msra.mxu1 %v12648_v19  ;;  %9051 = vmatprep.subr.bf16.mxu0 %v12653_v20  ;;  %v12726_v19 = vld [vmem:[%s14479_s24 + $0xde0] ss:$8 sps:$4 sm:$0xff]   ;;  %v12731_v20 = vld [vmem:[%s14479_s24 + $0xcf4] ss:$8 sps:$4 sm:$0xff]  }
 0x205   : > { %9092 = vmatprep.subr.bf16.mxu1 %v12656_v21  ;;  %v12734_v21 = vld [vmem:[%s14479_s24 + $0xdf4] ss:$8 sps:$4 sm:$0xff]  }
 0x207   : > { %9052 = vmatpush1.bf16.msra.mxu0 %v12651_v22  ;;  %v12729_v22 = vld [vmem:[%s14479_s24 + $0xcf0] ss:$8 sps:$4 sm:$0xff]  }
 0x208   : > { %9093 = vmatpush1.bf16.msra.mxu1 %v12654_v23  ;;  %9053 = vmatprep.subr.bf16.mxu0 %v12659_v24  ;;  %v12732_v23 = vld [vmem:[%s14479_s24 + $0xdf0] ss:$8 sps:$4 sm:$0xff]   ;;  %v345_v24 = vld [vmem:[#allocation3 + $0xc0] sm:$0xff] }
 0x209   : > { %9094 = vmatprep.subr.bf16.mxu1 %v12662_v25  ;;  %v347_v25 = vld [vmem:[#allocation3 + $0xd0] sm:$0xff] }
 0x20b   : > { %9054 = vmatpush1.bf16.msra.mxu0 %v12657_v26  ;;  %v12737_v26 = vld [vmem:[%s14479_s24 + $0xe04] ss:$8 sps:$4 sm:$0xff]  }
 0x20c   : > { %9095 = vmatpush1.bf16.msra.mxu1 %v12660_v27  ;;  %9055 = vmatprep.subr.bf16.mxu0 %v12665_v29  ;;  %v12740_v27 = vld [vmem:[%s14479_s24 + $0xf04] ss:$8 sps:$4 sm:$0xff]   ;;  %v429_v29 = vpack.c.bf16 %v345_v24, %v345_v24  ;;  %v12803_v24 = vld [vmem:[%s14479_s24 + $0xeb4] ss:$8 sps:$4 sm:$0xff]  }
 0x20d   : > { %9096 = vmatprep.subr.bf16.mxu1 %v12668_v30  ;;  %v431_v30 = vpack.c.bf16 %v347_v25, %v347_v25  ;;  %v12806_v25 = vld [vmem:[%s14479_s24 + $0xfb4] ss:$8 sps:$4 sm:$0xff]  }
 0x20f   : > { %9056 = vmatpush1.bf16.msra.mxu0 %v12663_v1  ;;  %v350_v1 = vld [vmem:[#allocation3 + $0xe8] sm:$0xff] }
 0x210   : > { %9097 = vmatpush1.bf16.msra.mxu1 %v12666_v31  ;;  %9057 = vmatprep.subr.bf16.mxu0 %v12671_v5  ;;  %v352_v31 = vld [vmem:[#allocation3 + $0xf8] sm:$0xff]  ;;  %v12735_v5 = vld [vmem:[%s14479_s24 + $0xe00] ss:$8 sps:$4 sm:$0xff]  }
 0x211   : > { %9098 = vmatprep.subr.bf16.mxu1 %v12674_v33  ;;  %v8753_v38 = vpop.f32.mrb[8].mxu0  ;;  %v12738_v33 = vld [vmem:[%s14479_s24 + $0xf00] ss:$8 sps:$4 sm:$0xff]  }
 0x212   : > { %v8794_v39 = vpop.f32.mrb[8].mxu1  ;;  %v8754_v42 = vadd.f32 %v8753_v38, %v14839_v28  ;;  %v8755_v43 = vpop.f32.mrb[9].mxu0  ;;  %v12683_v28 = vld [vmem:[%s14479_s24 + $0xc74] ss:$8 sps:$4 sm:$0xff]   ;;  %v12741_v38 = vld [vmem:[%s14479_s24 + $0xe10] ss:$8 sps:$4 sm:$0xff]  }
 0x213   : > { %v8796_v44 = vpop.f32.mrb[9].mxu1  ;;  %v8756_v45 = vadd.f32 %v8755_v43, %v14843_v32  ;;  %v8757_v46 = vpop.f32.mrb[10].mxu0  ;;  %9058 = vmatpush1.bf16.msra.mxu0 %v12669_v34  ;;  %v12681_v32 = vld [vmem:[%s14479_s24 + $0xc70] ss:$8 sps:$4 sm:$0xff]   ;;  %v12743_v34 = vld [vmem:[%s14479_s24 + $0xe14] ss:$8 sps:$4 sm:$0xff]  }
 0x214   : > { %v8798_v47 = vpop.f32.mrb[10].mxu1  ;;  %9099 = vmatpush1.bf16.msra.mxu1 %v12672_v35  ;;  %v14909_v48 = vadd.f32 %v8794_v39, %v8754_v42  ;;  %v8758_v49 = vpop.f32.mrb[11].mxu0  ;;  %9059 = vmatprep.subr.bf16.mxu0 %v12677_v36  ;;  %v12746_v35 = vld [vmem:[%s14479_s24 + $0xf14] ss:$8 sps:$4 sm:$0xff]   ;;  %v434_v36 = vpack.c.bf16 %v350_v1, %v350_v1  ;;  %v12744_v39 = vld [vmem:[%s14479_s24 + $0xf10] ss:$8 sps:$4 sm:$0xff]  }
 0x215   : > { %v8799_v50 = vpop.f32.mrb[11].mxu1  ;;  %9100 = vmatprep.subr.bf16.mxu1 %v12680_v37  ;;  %v14913_v52 = vadd.f32 %v8796_v44, %v8756_v45  ;;  %v436_v37 = vpack.c.bf16 %v352_v31, %v352_v31  ;;  %v12747_v42 = vld [vmem:[%s14479_s24 + $0xe20] ss:$8 sps:$4 sm:$0xff]   ;;  %v12755_v44 = vld [vmem:[%s14479_s24 + $0xe34] ss:$8 sps:$4 sm:$0xff]  }
 0x216   : > { %v12750_v43 = vld [vmem:[%s14479_s24 + $0xf20] ss:$8 sps:$4 sm:$0xff]   ;;  %v12758_v45 = vld [vmem:[%s14479_s24 + $0xf34] ss:$8 sps:$4 sm:$0xff]   ;;  %v12753_v46 = vld [vmem:[%s14479_s24 + $0xe30] ss:$8 sps:$4 sm:$0xff]  }
 0x217   : > { %9060 = vmatpush1.bf16.msra.mxu0 %v12675_v40  ;;  %v12749_v40 = vld [vmem:[%s14479_s24 + $0xe24] ss:$8 sps:$4 sm:$0xff]   ;;  %v12756_v47 = vld [vmem:[%s14479_s24 + $0xf30] ss:$8 sps:$4 sm:$0xff]   ;;  %v12807_v1 = vld [vmem:[%s14479_s24 + $0xec0] ss:$8 sps:$4 sm:$0xff]  }
 0x218   : > { %9101 = vmatpush1.bf16.msra.mxu1 %v12678_v41  ;;  %9061 = vmatprep.subr.bf16.mxu0 %v12683_v28  ;;  %v12752_v41 = vld [vmem:[%s14479_s24 + $0xf24] ss:$8 sps:$4 sm:$0xff]   ;;  %v12759_v28 = vld [vmem:[%s14479_s24 + $0xe40] ss:$8 sps:$4 sm:$0xff]  }
 0x219   : > { %9102 = vmatprep.subr.bf16.mxu1 %v12686_v51  ;;  %v12761_v49 = vld [vmem:[%s14479_s24 + $0xe44] ss:$8 sps:$4 sm:$0xff]   ;;  %v12762_v51 = vld [vmem:[%s14479_s24 + $0xf40] ss:$8 sps:$4 sm:$0xff]  }
 0x21a   : > { %v12764_v50 = vld [vmem:[%s14479_s24 + $0xf44] ss:$8 sps:$4 sm:$0xff]   ;;  %v12810_v31 = vld [vmem:[%s14479_s24 + $0xfc0] ss:$8 sps:$4 sm:$0xff]  }
 0x21b   : > { %9062 = vmatpush1.bf16.msra.mxu0 %v12681_v32  ;;  %v12767_v32 = vld [vmem:[%s14479_s24 + $0xe54] ss:$8 sps:$4 sm:$0xff]  }
 0x21c   : > { %9103 = vmatpush1.bf16.msra.mxu1 %v12684_v53  ;;  %9063 = vmatprep.subr.bf16.mxu0 %v12689_v54  ;;  %v12770_v53 = vld [vmem:[%s14479_s24 + $0xf54] ss:$8 sps:$4 sm:$0xff]   ;;  %v12765_v54 = vld [vmem:[%s14479_s24 + $0xe50] ss:$8 sps:$4 sm:$0xff]  }
 0x21d   : > { %9104 = vmatprep.subr.bf16.mxu1 %v12692_v55  ;;  %v12768_v55 = vld [vmem:[%s14479_s24 + $0xf50] ss:$8 sps:$4 sm:$0xff]  }
 0x21f   : > { %9064 = vmatpush1.bf16.msra.mxu0 %v12687_v56  ;;  %v12773_v56 = vld [vmem:[%s14479_s24 + $0xe64] ss:$8 sps:$4 sm:$0xff]  }
 0x220   : > { %9105 = vmatpush1.bf16.msra.mxu1 %v12690_v57  ;;  %9065 = vmatprep.subr.bf16.mxu0 %v12695_v58  ;;  %v12776_v57 = vld [vmem:[%s14479_s24 + $0xf64] ss:$8 sps:$4 sm:$0xff]  }
 0x221   : > { %9106 = vmatprep.subr.bf16.mxu1 %v12698_v59 }
 0x223   : > { %9066 = vmatpush1.bf16.msra.mxu0 %v12693_v60  ;;  %v12771_v60 = vld [vmem:[%s14479_s24 + $0xe60] ss:$8 sps:$4 sm:$0xff]  }
 0x224   : > { %9107 = vmatpush1.bf16.msra.mxu1 %v12696_v61  ;;  %9067 = vmatprep.subr.bf16.mxu0 %v12701_v62  ;;  %v12774_v61 = vld [vmem:[%s14479_s24 + $0xf60] ss:$8 sps:$4 sm:$0xff]  }
 0x225   : > { %9108 = vmatprep.subr.bf16.mxu1 %v12704_v63 }
 0x227   : > { %9068 = vmatpush1.bf16.msra.mxu0 %v12699_v0 }
 0x228   : > { %9109 = vmatpush1.bf16.msra.mxu1 %v12702_v2  ;;  %9069 = vmatprep.subr.bf16.mxu0 %v12707_v3 }
 0x229   : > { %9110 = vmatprep.subr.bf16.mxu1 %v12710_v4 }
 0x22b   : > { %9070 = vmatpush1.bf16.msra.mxu0 %v12705_v6 }
 0x22c   : > { %9111 = vmatpush1.bf16.msra.mxu1 %v12708_v7  ;;  %9071 = vmatprep.subr.bf16.mxu0 %v12713_v8 }
 0x22d   : > { %9112 = vmatprep.subr.bf16.mxu1 %v12716_v9  ;;  %v12782_v9 = vld [vmem:[%s14479_s24 + $0xf74] ss:$8 sps:$4 sm:$0xff]  }
 0x22f   : > { %9072 = vmatpush1.bf16.msra.mxu0 %v12711_v10 }
 0x230   : > { %9113 = vmatpush1.bf16.msra.mxu1 %v12714_v11  ;;  %9073 = vmatprep.subr.bf16.mxu0 %v12719_v12  ;;  %v12780_v11 = vld [vmem:[%s14479_s24 + $0xf70] ss:$8 sps:$4 sm:$0xff]   ;;  %v12785_v12 = vld [vmem:[%s14479_s24 + $0xe84] ss:$8 sps:$4 sm:$0xff]  }
 0x231   : > { %9114 = vmatprep.subr.bf16.mxu1 %v12722_v13  ;;  %v12788_v13 = vld [vmem:[%s14479_s24 + $0xf84] ss:$8 sps:$4 sm:$0xff]  }
 0x233   : > { %9074 = vmatpush1.bf16.msra.mxu0 %v12717_v14  ;;  %v12783_v14 = vld [vmem:[%s14479_s24 + $0xe80] ss:$8 sps:$4 sm:$0xff]  }
 0x234   : > { %9115 = vmatpush1.bf16.msra.mxu1 %v12720_v15  ;;  %9075 = vmatprep.subr.bf16.mxu0 %v12725_v16  ;;  %v12786_v15 = vld [vmem:[%s14479_s24 + $0xf80] ss:$8 sps:$4 sm:$0xff]   ;;  %v12791_v16 = vld [vmem:[%s14479_s24 + $0xe94] ss:$8 sps:$4 sm:$0xff]  }
 0x235   : > { %9116 = vmatprep.subr.bf16.mxu1 %v12728_v17  ;;  %v12794_v17 = vld [vmem:[%s14479_s24 + $0xf94] ss:$8 sps:$4 sm:$0xff]  }
 0x237   : > { %9076 = vmatpush1.bf16.msra.mxu0 %v12723_v18  ;;  %v12789_v18 = vld [vmem:[%s14479_s24 + $0xe90] ss:$8 sps:$4 sm:$0xff]  }
 0x238   : > { %9117 = vmatpush1.bf16.msra.mxu1 %v12726_v19  ;;  %9077 = vmatprep.subr.bf16.mxu0 %v12731_v20  ;;  %v12792_v19 = vld [vmem:[%s14479_s24 + $0xf90] ss:$8 sps:$4 sm:$0xff]   ;;  %v12797_v20 = vld [vmem:[%s14479_s24 + $0xea4] ss:$8 sps:$4 sm:$0xff]  }
 0x239   : > { %9118 = vmatprep.subr.bf16.mxu1 %v12734_v21  ;;  %v12800_v21 = vld [vmem:[%s14479_s24 + $0xfa4] ss:$8 sps:$4 sm:$0xff]  }
 0x23b   : > { %9078 = vmatpush1.bf16.msra.mxu0 %v12729_v22  ;;  %v12795_v22 = vld [vmem:[%s14479_s24 + $0xea0] ss:$8 sps:$4 sm:$0xff]  }
 0x23c   : > { %9119 = vmatpush1.bf16.msra.mxu1 %v12732_v23  ;;  %9129 = vmatprep.subr.bf16.mxu0 %v12737_v26  ;;  %v12798_v23 = vld [vmem:[%s14479_s24 + $0xfa0] ss:$8 sps:$4 sm:$0xff]   ;;  %v12801_v26 = vld [vmem:[%s14479_s24 + $0xeb0] ss:$8 sps:$4 sm:$0xff]  }
 0x23d   : > { %9170 = vmatprep.subr.bf16.mxu1 %v12740_v27  ;;  %v12804_v27 = vld [vmem:[%s14479_s24 + $0xfb0] ss:$8 sps:$4 sm:$0xff]  }
 0x23e   : > { %9080 = vmatmul.mubr.bf16.vlgmr.msra.gmra.mrb[24].mxu0 %v429_v29  ;;  %v12809_v29 = vld [vmem:[%s14479_s24 + $0xec4] ss:$8 sps:$4 sm:$0xff]  }
 0x23f   : > { %9121 = vmatmul.mubr.bf16.vlgmr.msra.gmra.mrb[24].mxu1 %v431_v30  ;;  %9130 = vmatpush1.bf16.msra.mxu0 %v12735_v5  ;;  %v12812_v30 = vld [vmem:[%s14479_s24 + $0xfc4] ss:$8 sps:$4 sm:$0xff]   ;;  %v12815_v5 = vld [vmem:[%s14479_s24 + $0xed4] ss:$8 sps:$4 sm:$0xff]  }
 0x240   : > { %9171 = vmatpush1.bf16.msra.mxu1 %v12738_v33  ;;  %9131 = vmatprep.subr.bf16.mxu0 %v12743_v34  ;;  %v12818_v33 = vld [vmem:[%s14479_s24 + $0xfd4] ss:$8 sps:$4 sm:$0xff]   ;;  %v12813_v34 = vld [vmem:[%s14479_s24 + $0xed0] ss:$8 sps:$4 sm:$0xff]  }
 0x241   : > { %9172 = vmatprep.subr.bf16.mxu1 %v12746_v35  ;;  %9161 = vmatprep.mubr.bf16.mxu0 %v434_v36  ;;  %v12816_v35 = vld [vmem:[%s14479_s24 + $0xfd0] ss:$8 sps:$4 sm:$0xff]   ;;  %v12821_v36 = vld [vmem:[%s14479_s24 + $0xee4] ss:$8 sps:$4 sm:$0xff]  }
 0x242   : > { %9202 = vmatprep.mubr.bf16.mxu1 %v436_v37  ;;  %v12824_v37 = vld [vmem:[%s14479_s24 + $0xfe4] ss:$8 sps:$4 sm:$0xff]  }
 0x243   : > { %9132 = vmatpush1.bf16.msra.mxu0 %v12741_v38  ;;  %v12819_v38 = vld [vmem:[%s14479_s24 + $0xee0] ss:$8 sps:$4 sm:$0xff]  }
 0x244   : > { %9173 = vmatpush1.bf16.msra.mxu1 %v12744_v39  ;;  %9133 = vmatprep.subr.bf16.mxu0 %v12749_v40  ;;  %v12822_v39 = vld [vmem:[%s14479_s24 + $0xfe0] ss:$8 sps:$4 sm:$0xff]   ;;  %v12827_v40 = vld [vmem:[%s14479_s24 + $0xef4] ss:$8 sps:$4 sm:$0xff]  }
 0x245   : > { %9174 = vmatprep.subr.bf16.mxu1 %v12752_v41  ;;  %v12830_v41 = vld [vmem:[%s14479_s24 + $0xff4] ss:$8 sps:$4 sm:$0xff]  }
 0x247   : > { %9134 = vmatpush1.bf16.msra.mxu0 %v12747_v42  ;;  %v12825_v42 = vld [vmem:[%s14479_s24 + $0xef0] ss:$8 sps:$4 sm:$0xff]  }
 0x248   : > { %9175 = vmatpush1.bf16.msra.mxu1 %v12750_v43  ;;  %9135 = vmatprep.subr.bf16.mxu0 %v12755_v44  ;;  %v12828_v43 = vld [vmem:[%s14479_s24 + $0xff0] ss:$8 sps:$4 sm:$0xff]   ;;  %v349_v44 = vld [vmem:[#allocation3 + $0xe0] sm:$0xff] }
 0x249   : > { %9176 = vmatprep.subr.bf16.mxu1 %v12758_v45  ;;  %v351_v45 = vld [vmem:[#allocation3 + $0xf0] sm:$0xff] }
 0x24b   : > { %9136 = vmatpush1.bf16.msra.mxu0 %v12753_v46  ;;  %v12833_v46 = vld [vmem:[%s14479_s24 + $0x1004] ss:$8 sps:$4 sm:$0xff]  }
 0x24c   : > { %9177 = vmatpush1.bf16.msra.mxu1 %v12756_v47  ;;  %9137 = vmatprep.subr.bf16.mxu0 %v12761_v49  ;;  %v12836_v47 = vld [vmem:[%s14479_s24 + $0x1104] ss:$8 sps:$4 sm:$0xff]   ;;  %v433_v49 = vpack.c.bf16 %v349_v44, %v349_v44  ;;  %v12899_v44 = vld [vmem:[%s14479_s24 + $0x10b4] ss:$8 sps:$4 sm:$0xff]  }
 0x24d   : > { %9178 = vmatprep.subr.bf16.mxu1 %v12764_v50  ;;  %v435_v50 = vpack.c.bf16 %v351_v45, %v351_v45  ;;  %v12902_v45 = vld [vmem:[%s14479_s24 + $0x11b4] ss:$8 sps:$4 sm:$0xff]  }
 0x24f   : > { %9138 = vmatpush1.bf16.msra.mxu0 %v12759_v28  ;;  %v354_v28 = vld [vmem:[#allocation3 + $0x108] sm:$0xff] }
 0x250   : > { %9179 = vmatpush1.bf16.msra.mxu1 %v12762_v51  ;;  %9139 = vmatprep.subr.bf16.mxu0 %v12767_v32  ;;  %v356_v51 = vld [vmem:[#allocation3 + $0x118] sm:$0xff]  ;;  %v12831_v32 = vld [vmem:[%s14479_s24 + $0x1000] ss:$8 sps:$4 sm:$0xff]  }
 0x251   : > { %9180 = vmatprep.subr.bf16.mxu1 %v12770_v53  ;;  %v8835_v58 = vpop.f32.mrb[12].mxu0  ;;  %v12834_v53 = vld [vmem:[%s14479_s24 + $0x1100] ss:$8 sps:$4 sm:$0xff]  }
 0x252   : > { %v8876_v59 = vpop.f32.mrb[12].mxu1  ;;  %v8836_v62 = vadd.f32 %v8835_v58, %v14909_v48  ;;  %v8837_v63 = vpop.f32.mrb[13].mxu0  ;;  %v12779_v48 = vld [vmem:[%s14479_s24 + $0xe74] ss:$8 sps:$4 sm:$0xff]   ;;  %v12837_v58 = vld [vmem:[%s14479_s24 + $0x1010] ss:$8 sps:$4 sm:$0xff]  }
 0x253   : > { %v8878_v0 = vpop.f32.mrb[13].mxu1  ;;  %v8838_v2 = vadd.f32 %v8837_v63, %v14913_v52  ;;  %v8839_v3 = vpop.f32.mrb[14].mxu0  ;;  %9140 = vmatpush1.bf16.msra.mxu0 %v12765_v54  ;;  %v12777_v52 = vld [vmem:[%s14479_s24 + $0xe70] ss:$8 sps:$4 sm:$0xff]   ;;  %v12839_v54 = vld [vmem:[%s14479_s24 + $0x1014] ss:$8 sps:$4 sm:$0xff]  }
 0x254   : > { %v8880_v4 = vpop.f32.mrb[14].mxu1  ;;  %9181 = vmatpush1.bf16.msra.mxu1 %v12768_v55  ;;  %v14979_v6 = vadd.f32 %v8876_v59, %v8836_v62  ;;  %v8840_v7 = vpop.f32.mrb[15].mxu0  ;;  %9141 = vmatprep.subr.bf16.mxu0 %v12773_v56  ;;  %v12842_v55 = vld [vmem:[%s14479_s24 + $0x1114] ss:$8 sps:$4 sm:$0xff]   ;;  %v438_v56 = vpack.c.bf16 %v354_v28, %v354_v28  ;;  %v12840_v59 = vld [vmem:[%s14479_s24 + $0x1110] ss:$8 sps:$4 sm:$0xff]  }
 0x255   : > { %v8881_v8 = vpop.f32.mrb[15].mxu1  ;;  %9182 = vmatprep.subr.bf16.mxu1 %v12776_v57  ;;  %v14983_v10 = vadd.f32 %v8878_v0, %v8838_v2  ;;  %v440_v57 = vpack.c.bf16 %v356_v51, %v356_v51  ;;  %v12843_v62 = vld [vmem:[%s14479_s24 + $0x1020] ss:$8 sps:$4 sm:$0xff]   ;;  %v12851_v0 = vld [vmem:[%s14479_s24 + $0x1034] ss:$8 sps:$4 sm:$0xff]  }
 0x256   : > { %v12846_v63 = vld [vmem:[%s14479_s24 + $0x1120] ss:$8 sps:$4 sm:$0xff]   ;;  %v12854_v2 = vld [vmem:[%s14479_s24 + $0x1134] ss:$8 sps:$4 sm:$0xff]   ;;  %v12849_v3 = vld [vmem:[%s14479_s24 + $0x1030] ss:$8 sps:$4 sm:$0xff]  }
 0x257   : > { %9142 = vmatpush1.bf16.msra.mxu0 %v12771_v60  ;;  %v12845_v60 = vld [vmem:[%s14479_s24 + $0x1024] ss:$8 sps:$4 sm:$0xff]   ;;  %v12852_v4 = vld [vmem:[%s14479_s24 + $0x1130] ss:$8 sps:$4 sm:$0xff]   ;;  %v12903_v28 = vld [vmem:[%s14479_s24 + $0x10c0] ss:$8 sps:$4 sm:$0xff]  }
 0x258   : > { %9183 = vmatpush1.bf16.msra.mxu1 %v12774_v61  ;;  %9143 = vmatprep.subr.bf16.mxu0 %v12779_v48  ;;  %v12848_v61 = vld [vmem:[%s14479_s24 + $0x1124] ss:$8 sps:$4 sm:$0xff]   ;;  %v12855_v48 = vld [vmem:[%s14479_s24 + $0x1040] ss:$8 sps:$4 sm:$0xff]  }
 0x259   : > { %9184 = vmatprep.subr.bf16.mxu1 %v12782_v9  ;;  %v12857_v7 = vld [vmem:[%s14479_s24 + $0x1044] ss:$8 sps:$4 sm:$0xff]   ;;  %v12858_v9 = vld [vmem:[%s14479_s24 + $0x1140] ss:$8 sps:$4 sm:$0xff]  }
 0x25a   : > { %v12860_v8 = vld [vmem:[%s14479_s24 + $0x1144] ss:$8 sps:$4 sm:$0xff]   ;;  %v12906_v51 = vld [vmem:[%s14479_s24 + $0x11c0] ss:$8 sps:$4 sm:$0xff]  }
 0x25b   : > { %9144 = vmatpush1.bf16.msra.mxu0 %v12777_v52  ;;  %v12863_v52 = vld [vmem:[%s14479_s24 + $0x1054] ss:$8 sps:$4 sm:$0xff]  }
 0x25c   : > { %9185 = vmatpush1.bf16.msra.mxu1 %v12780_v11  ;;  %9145 = vmatprep.subr.bf16.mxu0 %v12785_v12  ;;  %v12866_v11 = vld [vmem:[%s14479_s24 + $0x1154] ss:$8 sps:$4 sm:$0xff]   ;;  %v12861_v12 = vld [vmem:[%s14479_s24 + $0x1050] ss:$8 sps:$4 sm:$0xff]  }
 0x25d   : > { %9186 = vmatprep.subr.bf16.mxu1 %v12788_v13  ;;  %v12864_v13 = vld [vmem:[%s14479_s24 + $0x1150] ss:$8 sps:$4 sm:$0xff]  }
 0x25f   : > { %9146 = vmatpush1.bf16.msra.mxu0 %v12783_v14  ;;  %v12869_v14 = vld [vmem:[%s14479_s24 + $0x1064] ss:$8 sps:$4 sm:$0xff]  }
 0x260   : > { %9187 = vmatpush1.bf16.msra.mxu1 %v12786_v15  ;;  %9147 = vmatprep.subr.bf16.mxu0 %v12791_v16  ;;  %v12872_v15 = vld [vmem:[%s14479_s24 + $0x1164] ss:$8 sps:$4 sm:$0xff]  }
 0x261   : > { %9188 = vmatprep.subr.bf16.mxu1 %v12794_v17 }
 0x263   : > { %9148 = vmatpush1.bf16.msra.mxu0 %v12789_v18  ;;  %v12867_v18 = vld [vmem:[%s14479_s24 + $0x1060] ss:$8 sps:$4 sm:$0xff]  }
 0x264   : > { %9189 = vmatpush1.bf16.msra.mxu1 %v12792_v19  ;;  %9149 = vmatprep.subr.bf16.mxu0 %v12797_v20  ;;  %v12870_v19 = vld [vmem:[%s14479_s24 + $0x1160] ss:$8 sps:$4 sm:$0xff]  }
 0x265   : > { %9190 = vmatprep.subr.bf16.mxu1 %v12800_v21 }
 0x267   : > { %9150 = vmatpush1.bf16.msra.mxu0 %v12795_v22 }
 0x268   : > { %9191 = vmatpush1.bf16.msra.mxu1 %v12798_v23  ;;  %9151 = vmatprep.subr.bf16.mxu0 %v12803_v24 }
 0x269   : > { %9192 = vmatprep.subr.bf16.mxu1 %v12806_v25 }
 0x26b   : > { %9152 = vmatpush1.bf16.msra.mxu0 %v12801_v26 }
 0x26c   : > { %9193 = vmatpush1.bf16.msra.mxu1 %v12804_v27  ;;  %9153 = vmatprep.subr.bf16.mxu0 %v12809_v29 }
 0x26d   : > { %9194 = vmatprep.subr.bf16.mxu1 %v12812_v30  ;;  %v12878_v30 = vld [vmem:[%s14479_s24 + $0x1174] ss:$8 sps:$4 sm:$0xff]  }
 0x26f   : > { %9154 = vmatpush1.bf16.msra.mxu0 %v12807_v1 }
 0x270   : > { %9195 = vmatpush1.bf16.msra.mxu1 %v12810_v31  ;;  %9155 = vmatprep.subr.bf16.mxu0 %v12815_v5  ;;  %v12876_v31 = vld [vmem:[%s14479_s24 + $0x1170] ss:$8 sps:$4 sm:$0xff]   ;;  %v12881_v5 = vld [vmem:[%s14479_s24 + $0x1084] ss:$8 sps:$4 sm:$0xff]  }
 0x271   : > { %9196 = vmatprep.subr.bf16.mxu1 %v12818_v33  ;;  %v12884_v33 = vld [vmem:[%s14479_s24 + $0x1184] ss:$8 sps:$4 sm:$0xff]  }
 0x273   : > { %9156 = vmatpush1.bf16.msra.mxu0 %v12813_v34  ;;  %v12879_v34 = vld [vmem:[%s14479_s24 + $0x1080] ss:$8 sps:$4 sm:$0xff]  }
 0x274   : > { %9197 = vmatpush1.bf16.msra.mxu1 %v12816_v35  ;;  %9157 = vmatprep.subr.bf16.mxu0 %v12821_v36  ;;  %v12882_v35 = vld [vmem:[%s14479_s24 + $0x1180] ss:$8 sps:$4 sm:$0xff]   ;;  %v12887_v36 = vld [vmem:[%s14479_s24 + $0x1094] ss:$8 sps:$4 sm:$0xff]  }
 0x275   : > { %9198 = vmatprep.subr.bf16.mxu1 %v12824_v37  ;;  %v12890_v37 = vld [vmem:[%s14479_s24 + $0x1194] ss:$8 sps:$4 sm:$0xff]  }
 0x277   : > { %9158 = vmatpush1.bf16.msra.mxu0 %v12819_v38  ;;  %v12885_v38 = vld [vmem:[%s14479_s24 + $0x1090] ss:$8 sps:$4 sm:$0xff]  }
 0x278   : > { %9199 = vmatpush1.bf16.msra.mxu1 %v12822_v39  ;;  %9159 = vmatprep.subr.bf16.mxu0 %v12827_v40  ;;  %v12888_v39 = vld [vmem:[%s14479_s24 + $0x1190] ss:$8 sps:$4 sm:$0xff]   ;;  %v12893_v40 = vld [vmem:[%s14479_s24 + $0x10a4] ss:$8 sps:$4 sm:$0xff]  }
 0x279   : > { %9200 = vmatprep.subr.bf16.mxu1 %v12830_v41  ;;  %v12896_v41 = vld [vmem:[%s14479_s24 + $0x11a4] ss:$8 sps:$4 sm:$0xff]  }
 0x27b   : > { %9160 = vmatpush1.bf16.msra.mxu0 %v12825_v42  ;;  %v12891_v42 = vld [vmem:[%s14479_s24 + $0x10a0] ss:$8 sps:$4 sm:$0xff]  }
 0x27c   : > { %9201 = vmatpush1.bf16.msra.mxu1 %v12828_v43  ;;  %9211 = vmatprep.subr.bf16.mxu0 %v12833_v46  ;;  %v12894_v43 = vld [vmem:[%s14479_s24 + $0x11a0] ss:$8 sps:$4 sm:$0xff]   ;;  %v12897_v46 = vld [vmem:[%s14479_s24 + $0x10b0] ss:$8 sps:$4 sm:$0xff]  }
 0x27d   : > { %9252 = vmatprep.subr.bf16.mxu1 %v12836_v47  ;;  %v12900_v47 = vld [vmem:[%s14479_s24 + $0x11b0] ss:$8 sps:$4 sm:$0xff]  }
 0x27e   : > { %9162 = vmatmul.mubr.bf16.vlgmr.msra.gmra.mrb[28].mxu0 %v433_v49  ;;  %v12905_v49 = vld [vmem:[%s14479_s24 + $0x10c4] ss:$8 sps:$4 sm:$0xff]  }
 0x27f   : > { %9203 = vmatmul.mubr.bf16.vlgmr.msra.gmra.mrb[28].mxu1 %v435_v50  ;;  %9212 = vmatpush1.bf16.msra.mxu0 %v12831_v32  ;;  %v12908_v50 = vld [vmem:[%s14479_s24 + $0x11c4] ss:$8 sps:$4 sm:$0xff]   ;;  %v12911_v32 = vld [vmem:[%s14479_s24 + $0x10d4] ss:$8 sps:$4 sm:$0xff]  }
 0x280   : > { %9253 = vmatpush1.bf16.msra.mxu1 %v12834_v53  ;;  %9213 = vmatprep.subr.bf16.mxu0 %v12839_v54  ;;  %v12914_v53 = vld [vmem:[%s14479_s24 + $0x11d4] ss:$8 sps:$4 sm:$0xff]   ;;  %v12909_v54 = vld [vmem:[%s14479_s24 + $0x10d0] ss:$8 sps:$4 sm:$0xff]  }
 0x281   : > { %9254 = vmatprep.subr.bf16.mxu1 %v12842_v55  ;;  %9243 = vmatprep.mubr.bf16.mxu0 %v438_v56  ;;  %v12912_v55 = vld [vmem:[%s14479_s24 + $0x11d0] ss:$8 sps:$4 sm:$0xff]   ;;  %v12917_v56 = vld [vmem:[%s14479_s24 + $0x10e4] ss:$8 sps:$4 sm:$0xff]  }
 0x282   : > { %9284 = vmatprep.mubr.bf16.mxu1 %v440_v57  ;;  %v12920_v57 = vld [vmem:[%s14479_s24 + $0x11e4] ss:$8 sps:$4 sm:$0xff]  }
 0x283   : > { %9214 = vmatpush1.bf16.msra.mxu0 %v12837_v58  ;;  %v12915_v58 = vld [vmem:[%s14479_s24 + $0x10e0] ss:$8 sps:$4 sm:$0xff]  }
 0x284   : > { %9255 = vmatpush1.bf16.msra.mxu1 %v12840_v59  ;;  %9215 = vmatprep.subr.bf16.mxu0 %v12845_v60  ;;  %v12918_v59 = vld [vmem:[%s14479_s24 + $0x11e0] ss:$8 sps:$4 sm:$0xff]   ;;  %v12923_v60 = vld [vmem:[%s14479_s24 + $0x10f4] ss:$8 sps:$4 sm:$0xff]  }
 0x285   : > { %9256 = vmatprep.subr.bf16.mxu1 %v12848_v61  ;;  %v12926_v61 = vld [vmem:[%s14479_s24 + $0x11f4] ss:$8 sps:$4 sm:$0xff]  }
 0x287   : > { %9216 = vmatpush1.bf16.msra.mxu0 %v12843_v62  ;;  %v12921_v62 = vld [vmem:[%s14479_s24 + $0x10f0] ss:$8 sps:$4 sm:$0xff]  }
 0x288   : > { %9257 = vmatpush1.bf16.msra.mxu1 %v12846_v63  ;;  %9217 = vmatprep.subr.bf16.mxu0 %v12851_v0  ;;  %v12924_v63 = vld [vmem:[%s14479_s24 + $0x11f0] ss:$8 sps:$4 sm:$0xff]   ;;  %v353_v0 = vld [vmem:[#allocation3 + $0x100] sm:$0xff] }
 0x289   : > { %9258 = vmatprep.subr.bf16.mxu1 %v12854_v2  ;;  %v355_v2 = vld [vmem:[#allocation3 + $0x110] sm:$0xff] }
 0x28b   : > { %9218 = vmatpush1.bf16.msra.mxu0 %v12849_v3  ;;  %v12929_v3 = vld [vmem:[%s14479_s24 + $0x1204] ss:$8 sps:$4 sm:$0xff]  }
 0x28c   : > { %9259 = vmatpush1.bf16.msra.mxu1 %v12852_v4  ;;  %9219 = vmatprep.subr.bf16.mxu0 %v12857_v7  ;;  %v12932_v4 = vld [vmem:[%s14479_s24 + $0x1304] ss:$8 sps:$4 sm:$0xff]   ;;  %v437_v7 = vpack.c.bf16 %v353_v0, %v353_v0  ;;  %v12995_v0 = vld [vmem:[%s14479_s24 + $0x12b4] ss:$8 sps:$4 sm:$0xff]  }
 0x28d   : > { %9260 = vmatprep.subr.bf16.mxu1 %v12860_v8  ;;  %v439_v8 = vpack.c.bf16 %v355_v2, %v355_v2  ;;  %v12998_v2 = vld [vmem:[%s14479_s24 + $0x13b4] ss:$8 sps:$4 sm:$0xff]  }
 0x28f   : > { %9220 = vmatpush1.bf16.msra.mxu0 %v12855_v48  ;;  %v358_v48 = vld [vmem:[#allocation3 + $0x128] sm:$0xff] }
 0x290   : > { %9261 = vmatpush1.bf16.msra.mxu1 %v12858_v9  ;;  %9221 = vmatprep.subr.bf16.mxu0 %v12863_v52  ;;  %v360_v9 = vld [vmem:[#allocation3 + $0x138] sm:$0xff]  ;;  %v12927_v52 = vld [vmem:[%s14479_s24 + $0x1200] ss:$8 sps:$4 sm:$0xff]  }
 0x291   : > { %9262 = vmatprep.subr.bf16.mxu1 %v12866_v11  ;;  %v8917_v16 = vpop.f32.mrb[16].mxu0  ;;  %v12930_v11 = vld [vmem:[%s14479_s24 + $0x1300] ss:$8 sps:$4 sm:$0xff]  }
 0x292   : > { %v8958_v17 = vpop.f32.mrb[16].mxu1  ;;  %v8918_v20 = vadd.f32 %v8917_v16, %v14979_v6  ;;  %v8919_v21 = vpop.f32.mrb[17].mxu0  ;;  %v12875_v6 = vld [vmem:[%s14479_s24 + $0x1074] ss:$8 sps:$4 sm:$0xff]   ;;  %v12933_v16 = vld [vmem:[%s14479_s24 + $0x1210] ss:$8 sps:$4 sm:$0xff]  }
 0x293   : > { %v8960_v22 = vpop.f32.mrb[17].mxu1  ;;  %v8920_v23 = vadd.f32 %v8919_v21, %v14983_v10  ;;  %v8921_v24 = vpop.f32.mrb[18].mxu0  ;;  %9222 = vmatpush1.bf16.msra.mxu0 %v12861_v12  ;;  %v12873_v10 = vld [vmem:[%s14479_s24 + $0x1070] ss:$8 sps:$4 sm:$0xff]   ;;  %v12935_v12 = vld [vmem:[%s14479_s24 + $0x1214] ss:$8 sps:$4 sm:$0xff]  }
 0x294   : > { %v8962_v25 = vpop.f32.mrb[18].mxu1  ;;  %9263 = vmatpush1.bf16.msra.mxu1 %v12864_v13  ;;  %v15049_v26 = vadd.f32 %v8958_v17, %v8918_v20  ;;  %v8922_v27 = vpop.f32.mrb[19].mxu0  ;;  %9223 = vmatprep.subr.bf16.mxu0 %v12869_v14  ;;  %v12938_v13 = vld [vmem:[%s14479_s24 + $0x1314] ss:$8 sps:$4 sm:$0xff]   ;;  %v442_v14 = vpack.c.bf16 %v358_v48, %v358_v48  ;;  %v12936_v17 = vld [vmem:[%s14479_s24 + $0x1310] ss:$8 sps:$4 sm:$0xff]  }
 0x295   : > { %v8963_v29 = vpop.f32.mrb[19].mxu1  ;;  %9264 = vmatprep.subr.bf16.mxu1 %v12872_v15  ;;  %v15053_v1 = vadd.f32 %v8960_v22, %v8920_v23  ;;  %v444_v15 = vpack.c.bf16 %v360_v9, %v360_v9  ;;  %v12939_v20 = vld [vmem:[%s14479_s24 + $0x1220] ss:$8 sps:$4 sm:$0xff]   ;;  %v12947_v22 = vld [vmem:[%s14479_s24 + $0x1234] ss:$8 sps:$4 sm:$0xff]  }
 0x296   : > { %v12942_v21 = vld [vmem:[%s14479_s24 + $0x1320] ss:$8 sps:$4 sm:$0xff]   ;;  %v12950_v23 = vld [vmem:[%s14479_s24 + $0x1334] ss:$8 sps:$4 sm:$0xff]   ;;  %v12945_v24 = vld [vmem:[%s14479_s24 + $0x1230] ss:$8 sps:$4 sm:$0xff]  }
 0x297   : > { %9224 = vmatpush1.bf16.msra.mxu0 %v12867_v18  ;;  %v12941_v18 = vld [vmem:[%s14479_s24 + $0x1224] ss:$8 sps:$4 sm:$0xff]   ;;  %v12948_v25 = vld [vmem:[%s14479_s24 + $0x1330] ss:$8 sps:$4 sm:$0xff]   ;;  %v12999_v48 = vld [vmem:[%s14479_s24 + $0x12c0] ss:$8 sps:$4 sm:$0xff]  }
 0x298   : > { %9265 = vmatpush1.bf16.msra.mxu1 %v12870_v19  ;;  %9225 = vmatprep.subr.bf16.mxu0 %v12875_v6  ;;  %v12944_v19 = vld [vmem:[%s14479_s24 + $0x1324] ss:$8 sps:$4 sm:$0xff]   ;;  %v12951_v6 = vld [vmem:[%s14479_s24 + $0x1240] ss:$8 sps:$4 sm:$0xff]  }
 0x299   : > { %9266 = vmatprep.subr.bf16.mxu1 %v12878_v30  ;;  %v12953_v27 = vld [vmem:[%s14479_s24 + $0x1244] ss:$8 sps:$4 sm:$0xff]   ;;  %v12954_v30 = vld [vmem:[%s14479_s24 + $0x1340] ss:$8 sps:$4 sm:$0xff]  }
 0x29a   : > { %v12956_v29 = vld [vmem:[%s14479_s24 + $0x1344] ss:$8 sps:$4 sm:$0xff]   ;;  %v13002_v9 = vld [vmem:[%s14479_s24 + $0x13c0] ss:$8 sps:$4 sm:$0xff]  }
 0x29b   : > { %9226 = vmatpush1.bf16.msra.mxu0 %v12873_v10  ;;  %v12959_v10 = vld [vmem:[%s14479_s24 + $0x1254] ss:$8 sps:$4 sm:$0xff]  }
 0x29c   : > { %9267 = vmatpush1.bf16.msra.mxu1 %v12876_v31  ;;  %9227 = vmatprep.subr.bf16.mxu0 %v12881_v5  ;;  %v12962_v31 = vld [vmem:[%s14479_s24 + $0x1354] ss:$8 sps:$4 sm:$0xff]   ;;  %v12957_v5 = vld [vmem:[%s14479_s24 + $0x1250] ss:$8 sps:$4 sm:$0xff]  }
 0x29d   : > { %9268 = vmatprep.subr.bf16.mxu1 %v12884_v33  ;;  %v12960_v33 = vld [vmem:[%s14479_s24 + $0x1350] ss:$8 sps:$4 sm:$0xff]  }
 0x29f   : > { %9228 = vmatpush1.bf16.msra.mxu0 %v12879_v34  ;;  %v12965_v34 = vld [vmem:[%s14479_s24 + $0x1264] ss:$8 sps:$4 sm:$0xff]  }
 0x2a0   : > { %9269 = vmatpush1.bf16.msra.mxu1 %v12882_v35  ;;  %9229 = vmatprep.subr.bf16.mxu0 %v12887_v36  ;;  %v12968_v35 = vld [vmem:[%s14479_s24 + $0x1364] ss:$8 sps:$4 sm:$0xff]  }
 0x2a1   : > { %9270 = vmatprep.subr.bf16.mxu1 %v12890_v37 }
 0x2a3   : > { %9230 = vmatpush1.bf16.msra.mxu0 %v12885_v38  ;;  %v12963_v38 = vld [vmem:[%s14479_s24 + $0x1260] ss:$8 sps:$4 sm:$0xff]  }
 0x2a4   : > { %9271 = vmatpush1.bf16.msra.mxu1 %v12888_v39  ;;  %9231 = vmatprep.subr.bf16.mxu0 %v12893_v40  ;;  %v12966_v39 = vld [vmem:[%s14479_s24 + $0x1360] ss:$8 sps:$4 sm:$0xff]  }
 0x2a5   : > { %9272 = vmatprep.subr.bf16.mxu1 %v12896_v41 }
 0x2a7   : > { %9232 = vmatpush1.bf16.msra.mxu0 %v12891_v42 }
 0x2a8   : > { %9273 = vmatpush1.bf16.msra.mxu1 %v12894_v43  ;;  %9233 = vmatprep.subr.bf16.mxu0 %v12899_v44 }
 0x2a9   : > { %9274 = vmatprep.subr.bf16.mxu1 %v12902_v45 }
 0x2ab   : > { %9234 = vmatpush1.bf16.msra.mxu0 %v12897_v46 }
 0x2ac   : > { %9275 = vmatpush1.bf16.msra.mxu1 %v12900_v47  ;;  %9235 = vmatprep.subr.bf16.mxu0 %v12905_v49 }
 0x2ad   : > { %9276 = vmatprep.subr.bf16.mxu1 %v12908_v50  ;;  %v12974_v50 = vld [vmem:[%s14479_s24 + $0x1374] ss:$8 sps:$4 sm:$0xff]  }
 0x2af   : > { %9236 = vmatpush1.bf16.msra.mxu0 %v12903_v28 }
 0x2b0   : > { %9277 = vmatpush1.bf16.msra.mxu1 %v12906_v51  ;;  %9237 = vmatprep.subr.bf16.mxu0 %v12911_v32  ;;  %v12972_v51 = vld [vmem:[%s14479_s24 + $0x1370] ss:$8 sps:$4 sm:$0xff]   ;;  %v12977_v32 = vld [vmem:[%s14479_s24 + $0x1284] ss:$8 sps:$4 sm:$0xff]  }
 0x2b1   : > { %9278 = vmatprep.subr.bf16.mxu1 %v12914_v53  ;;  %v12980_v53 = vld [vmem:[%s14479_s24 + $0x1384] ss:$8 sps:$4 sm:$0xff]  }
 0x2b3   : > { %9238 = vmatpush1.bf16.msra.mxu0 %v12909_v54  ;;  %v12975_v54 = vld [vmem:[%s14479_s24 + $0x1280] ss:$8 sps:$4 sm:$0xff]  }
 0x2b4   : > { %9279 = vmatpush1.bf16.msra.mxu1 %v12912_v55  ;;  %9239 = vmatprep.subr.bf16.mxu0 %v12917_v56  ;;  %v12978_v55 = vld [vmem:[%s14479_s24 + $0x1380] ss:$8 sps:$4 sm:$0xff]   ;;  %v12983_v56 = vld [vmem:[%s14479_s24 + $0x1294] ss:$8 sps:$4 sm:$0xff]  }
 0x2b5   : > { %9280 = vmatprep.subr.bf16.mxu1 %v12920_v57  ;;  %v12986_v57 = vld [vmem:[%s14479_s24 + $0x1394] ss:$8 sps:$4 sm:$0xff]  }
 0x2b7   : > { %9240 = vmatpush1.bf16.msra.mxu0 %v12915_v58  ;;  %v12981_v58 = vld [vmem:[%s14479_s24 + $0x1290] ss:$8 sps:$4 sm:$0xff]  }
 0x2b8   : > { %9281 = vmatpush1.bf16.msra.mxu1 %v12918_v59  ;;  %9241 = vmatprep.subr.bf16.mxu0 %v12923_v60  ;;  %v12984_v59 = vld [vmem:[%s14479_s24 + $0x1390] ss:$8 sps:$4 sm:$0xff]   ;;  %v12989_v60 = vld [vmem:[%s14479_s24 + $0x12a4] ss:$8 sps:$4 sm:$0xff]  }
 0x2b9   : > { %9282 = vmatprep.subr.bf16.mxu1 %v12926_v61  ;;  %v12992_v61 = vld [vmem:[%s14479_s24 + $0x13a4] ss:$8 sps:$4 sm:$0xff]  }
 0x2bb   : > { %9242 = vmatpush1.bf16.msra.mxu0 %v12921_v62  ;;  %v12987_v62 = vld [vmem:[%s14479_s24 + $0x12a0] ss:$8 sps:$4 sm:$0xff]  }
 0x2bc   : > { %9283 = vmatpush1.bf16.msra.mxu1 %v12924_v63  ;;  %9293 = vmatprep.subr.bf16.mxu0 %v12929_v3  ;;  %v12990_v63 = vld [vmem:[%s14479_s24 + $0x13a0] ss:$8 sps:$4 sm:$0xff]   ;;  %v12993_v3 = vld [vmem:[%s14479_s24 + $0x12b0] ss:$8 sps:$4 sm:$0xff]  }
 0x2bd   : > { %9334 = vmatprep.subr.bf16.mxu1 %v12932_v4  ;;  %v12996_v4 = vld [vmem:[%s14479_s24 + $0x13b0] ss:$8 sps:$4 sm:$0xff]  }
 0x2be   : > { %9244 = vmatmul.mubr.bf16.vlgmr.msra.gmra.mrb[32].mxu0 %v437_v7  ;;  %v13001_v7 = vld [vmem:[%s14479_s24 + $0x12c4] ss:$8 sps:$4 sm:$0xff]  }
 0x2bf   : > { %9285 = vmatmul.mubr.bf16.vlgmr.msra.gmra.mrb[32].mxu1 %v439_v8  ;;  %9294 = vmatpush1.bf16.msra.mxu0 %v12927_v52  ;;  %v13004_v8 = vld [vmem:[%s14479_s24 + $0x13c4] ss:$8 sps:$4 sm:$0xff]   ;;  %v13007_v52 = vld [vmem:[%s14479_s24 + $0x12d4] ss:$8 sps:$4 sm:$0xff]  }
 0x2c0   : > { %9335 = vmatpush1.bf16.msra.mxu1 %v12930_v11  ;;  %9295 = vmatprep.subr.bf16.mxu0 %v12935_v12  ;;  %v13010_v11 = vld [vmem:[%s14479_s24 + $0x13d4] ss:$8 sps:$4 sm:$0xff]   ;;  %v13005_v12 = vld [vmem:[%s14479_s24 + $0x12d0] ss:$8 sps:$4 sm:$0xff]  }
 0x2c1   : > { %9336 = vmatprep.subr.bf16.mxu1 %v12938_v13  ;;  %9325 = vmatprep.mubr.bf16.mxu0 %v442_v14  ;;  %v13008_v13 = vld [vmem:[%s14479_s24 + $0x13d0] ss:$8 sps:$4 sm:$0xff]   ;;  %v13013_v14 = vld [vmem:[%s14479_s24 + $0x12e4] ss:$8 sps:$4 sm:$0xff]  }
 0x2c2   : > { %9366 = vmatprep.mubr.bf16.mxu1 %v444_v15  ;;  %v13016_v15 = vld [vmem:[%s14479_s24 + $0x13e4] ss:$8 sps:$4 sm:$0xff]  }
 0x2c3   : > { %9296 = vmatpush1.bf16.msra.mxu0 %v12933_v16  ;;  %v13011_v16 = vld [vmem:[%s14479_s24 + $0x12e0] ss:$8 sps:$4 sm:$0xff]  }
 0x2c4   : > { %9337 = vmatpush1.bf16.msra.mxu1 %v12936_v17  ;;  %9297 = vmatprep.subr.bf16.mxu0 %v12941_v18  ;;  %v13014_v17 = vld [vmem:[%s14479_s24 + $0x13e0] ss:$8 sps:$4 sm:$0xff]   ;;  %v13019_v18 = vld [vmem:[%s14479_s24 + $0x12f4] ss:$8 sps:$4 sm:$0xff]  }
 0x2c5   : > { %9338 = vmatprep.subr.bf16.mxu1 %v12944_v19  ;;  %v13022_v19 = vld [vmem:[%s14479_s24 + $0x13f4] ss:$8 sps:$4 sm:$0xff]  }
 0x2c7   : > { %9298 = vmatpush1.bf16.msra.mxu0 %v12939_v20  ;;  %v13017_v20 = vld [vmem:[%s14479_s24 + $0x12f0] ss:$8 sps:$4 sm:$0xff]  }
 0x2c8   : > { %9339 = vmatpush1.bf16.msra.mxu1 %v12942_v21  ;;  %9299 = vmatprep.subr.bf16.mxu0 %v12947_v22  ;;  %v13020_v21 = vld [vmem:[%s14479_s24 + $0x13f0] ss:$8 sps:$4 sm:$0xff]   ;;  %v357_v22 = vld [vmem:[#allocation3 + $0x120] sm:$0xff] }
 0x2c9   : > { %9340 = vmatprep.subr.bf16.mxu1 %v12950_v23  ;;  %v359_v23 = vld [vmem:[#allocation3 + $0x130] sm:$0xff] }
 0x2cb   : > { %9300 = vmatpush1.bf16.msra.mxu0 %v12945_v24  ;;  %v13025_v24 = vld [vmem:[%s14479_s24 + $0x1404] ss:$8 sps:$4 sm:$0xff]  }
 0x2cc   : > { %9341 = vmatpush1.bf16.msra.mxu1 %v12948_v25  ;;  %9301 = vmatprep.subr.bf16.mxu0 %v12953_v27  ;;  %v13028_v25 = vld [vmem:[%s14479_s24 + $0x1504] ss:$8 sps:$4 sm:$0xff]   ;;  %v441_v27 = vpack.c.bf16 %v357_v22, %v357_v22  ;;  %v13091_v22 = vld [vmem:[%s14479_s24 + $0x14b4] ss:$8 sps:$4 sm:$0xff]  }
 0x2cd   : > { %9342 = vmatprep.subr.bf16.mxu1 %v12956_v29  ;;  %v443_v29 = vpack.c.bf16 %v359_v23, %v359_v23  ;;  %v13094_v23 = vld [vmem:[%s14479_s24 + $0x15b4] ss:$8 sps:$4 sm:$0xff]  }
 0x2cf   : > { %9302 = vmatpush1.bf16.msra.mxu0 %v12951_v6  ;;  %v362_v6 = vld [vmem:[#allocation3 + $0x148] sm:$0xff] }
 0x2d0   : > { %9343 = vmatpush1.bf16.msra.mxu1 %v12954_v30  ;;  %9303 = vmatprep.subr.bf16.mxu0 %v12959_v10  ;;  %v364_v30 = vld [vmem:[#allocation3 + $0x158] sm:$0xff]  ;;  %v13023_v10 = vld [vmem:[%s14479_s24 + $0x1400] ss:$8 sps:$4 sm:$0xff]  }
 0x2d1   : > { %9344 = vmatprep.subr.bf16.mxu1 %v12962_v31  ;;  %v8999_v36 = vpop.f32.mrb[20].mxu0  ;;  %v13026_v31 = vld [vmem:[%s14479_s24 + $0x1500] ss:$8 sps:$4 sm:$0xff]  }
 0x2d2   : > { %v9040_v37 = vpop.f32.mrb[20].mxu1  ;;  %v9000_v40 = vadd.f32 %v8999_v36, %v15049_v26  ;;  %v9001_v41 = vpop.f32.mrb[21].mxu0  ;;  %v12971_v26 = vld [vmem:[%s14479_s24 + $0x1274] ss:$8 sps:$4 sm:$0xff]   ;;  %v13029_v36 = vld [vmem:[%s14479_s24 + $0x1410] ss:$8 sps:$4 sm:$0xff]  }
 0x2d3   : > { %v9042_v42 = vpop.f32.mrb[21].mxu1  ;;  %v9002_v43 = vadd.f32 %v9001_v41, %v15053_v1  ;;  %v9003_v44 = vpop.f32.mrb[22].mxu0  ;;  %9304 = vmatpush1.bf16.msra.mxu0 %v12957_v5  ;;  %v12969_v1 = vld [vmem:[%s14479_s24 + $0x1270] ss:$8 sps:$4 sm:$0xff]   ;;  %v13031_v5 = vld [vmem:[%s14479_s24 + $0x1414] ss:$8 sps:$4 sm:$0xff]  }
 0x2d4   : > { %v9044_v45 = vpop.f32.mrb[22].mxu1  ;;  %9345 = vmatpush1.bf16.msra.mxu1 %v12960_v33  ;;  %v15119_v46 = vadd.f32 %v9040_v37, %v9000_v40  ;;  %v9004_v47 = vpop.f32.mrb[23].mxu0  ;;  %9305 = vmatprep.subr.bf16.mxu0 %v12965_v34  ;;  %v13034_v33 = vld [vmem:[%s14479_s24 + $0x1514] ss:$8 sps:$4 sm:$0xff]   ;;  %v446_v34 = vpack.c.bf16 %v362_v6, %v362_v6  ;;  %v13032_v37 = vld [vmem:[%s14479_s24 + $0x1510] ss:$8 sps:$4 sm:$0xff]  }
 0x2d5   : > { %v9045_v49 = vpop.f32.mrb[23].mxu1  ;;  %9346 = vmatprep.subr.bf16.mxu1 %v12968_v35  ;;  %v15123_v28 = vadd.f32 %v9042_v42, %v9002_v43  ;;  %v448_v35 = vpack.c.bf16 %v364_v30, %v364_v30  ;;  %v13035_v40 = vld [vmem:[%s14479_s24 + $0x1420] ss:$8 sps:$4 sm:$0xff]   ;;  %v13043_v42 = vld [vmem:[%s14479_s24 + $0x1434] ss:$8 sps:$4 sm:$0xff]  }
 0x2d6   : > { %v13038_v41 = vld [vmem:[%s14479_s24 + $0x1520] ss:$8 sps:$4 sm:$0xff]   ;;  %v13046_v43 = vld [vmem:[%s14479_s24 + $0x1534] ss:$8 sps:$4 sm:$0xff]   ;;  %v13041_v44 = vld [vmem:[%s14479_s24 + $0x1430] ss:$8 sps:$4 sm:$0xff]  }
 0x2d7   : > { %9306 = vmatpush1.bf16.msra.mxu0 %v12963_v38  ;;  %v13037_v38 = vld [vmem:[%s14479_s24 + $0x1424] ss:$8 sps:$4 sm:$0xff]   ;;  %v13044_v45 = vld [vmem:[%s14479_s24 + $0x1530] ss:$8 sps:$4 sm:$0xff]   ;;  %v13095_v6 = vld [vmem:[%s14479_s24 + $0x14c0] ss:$8 sps:$4 sm:$0xff]  }
 0x2d8   : > { %9347 = vmatpush1.bf16.msra.mxu1 %v12966_v39  ;;  %9307 = vmatprep.subr.bf16.mxu0 %v12971_v26  ;;  %v13040_v39 = vld [vmem:[%s14479_s24 + $0x1524] ss:$8 sps:$4 sm:$0xff]   ;;  %v13047_v26 = vld [vmem:[%s14479_s24 + $0x1440] ss:$8 sps:$4 sm:$0xff]  }
 0x2d9   : > { %9348 = vmatprep.subr.bf16.mxu1 %v12974_v50  ;;  %v13049_v47 = vld [vmem:[%s14479_s24 + $0x1444] ss:$8 sps:$4 sm:$0xff]   ;;  %v13050_v50 = vld [vmem:[%s14479_s24 + $0x1540] ss:$8 sps:$4 sm:$0xff]  }
 0x2da   : > { %v13052_v49 = vld [vmem:[%s14479_s24 + $0x1544] ss:$8 sps:$4 sm:$0xff]   ;;  %v13098_v30 = vld [vmem:[%s14479_s24 + $0x15c0] ss:$8 sps:$4 sm:$0xff]  }
 0x2db   : > { %9308 = vmatpush1.bf16.msra.mxu0 %v12969_v1  ;;  %v13055_v1 = vld [vmem:[%s14479_s24 + $0x1454] ss:$8 sps:$4 sm:$0xff]  }
 0x2dc   : > { %9349 = vmatpush1.bf16.msra.mxu1 %v12972_v51  ;;  %9309 = vmatprep.subr.bf16.mxu0 %v12977_v32  ;;  %v13058_v51 = vld [vmem:[%s14479_s24 + $0x1554] ss:$8 sps:$4 sm:$0xff]   ;;  %v13053_v32 = vld [vmem:[%s14479_s24 + $0x1450] ss:$8 sps:$4 sm:$0xff]  }
 0x2dd   : > { %9350 = vmatprep.subr.bf16.mxu1 %v12980_v53  ;;  %v13056_v53 = vld [vmem:[%s14479_s24 + $0x1550] ss:$8 sps:$4 sm:$0xff]  }
 0x2df   : > { %9310 = vmatpush1.bf16.msra.mxu0 %v12975_v54  ;;  %v13061_v54 = vld [vmem:[%s14479_s24 + $0x1464] ss:$8 sps:$4 sm:$0xff]  }
 0x2e0   : > { %9351 = vmatpush1.bf16.msra.mxu1 %v12978_v55  ;;  %9311 = vmatprep.subr.bf16.mxu0 %v12983_v56  ;;  %v13064_v55 = vld [vmem:[%s14479_s24 + $0x1564] ss:$8 sps:$4 sm:$0xff]  }
 0x2e1   : > { %9352 = vmatprep.subr.bf16.mxu1 %v12986_v57 }
 0x2e3   : > { %9312 = vmatpush1.bf16.msra.mxu0 %v12981_v58  ;;  %v13059_v58 = vld [vmem:[%s14479_s24 + $0x1460] ss:$8 sps:$4 sm:$0xff]  }
 0x2e4   : > { %9353 = vmatpush1.bf16.msra.mxu1 %v12984_v59  ;;  %9313 = vmatprep.subr.bf16.mxu0 %v12989_v60  ;;  %v13062_v59 = vld [vmem:[%s14479_s24 + $0x1560] ss:$8 sps:$4 sm:$0xff]  }
 0x2e5   : > { %9354 = vmatprep.subr.bf16.mxu1 %v12992_v61 }
 0x2e7   : > { %9314 = vmatpush1.bf16.msra.mxu0 %v12987_v62 }
 0x2e8   : > { %9355 = vmatpush1.bf16.msra.mxu1 %v12990_v63  ;;  %9315 = vmatprep.subr.bf16.mxu0 %v12995_v0 }
 0x2e9   : > { %9356 = vmatprep.subr.bf16.mxu1 %v12998_v2 }
 0x2eb   : > { %9316 = vmatpush1.bf16.msra.mxu0 %v12993_v3 }
 0x2ec   : > { %9357 = vmatpush1.bf16.msra.mxu1 %v12996_v4  ;;  %9317 = vmatprep.subr.bf16.mxu0 %v13001_v7 }
 0x2ed   : > { %9358 = vmatprep.subr.bf16.mxu1 %v13004_v8  ;;  %v13070_v8 = vld [vmem:[%s14479_s24 + $0x1574] ss:$8 sps:$4 sm:$0xff]  }
 0x2ef   : > { %9318 = vmatpush1.bf16.msra.mxu0 %v12999_v48 }
 0x2f0   : > { %9359 = vmatpush1.bf16.msra.mxu1 %v13002_v9  ;;  %9319 = vmatprep.subr.bf16.mxu0 %v13007_v52  ;;  %v13068_v9 = vld [vmem:[%s14479_s24 + $0x1570] ss:$8 sps:$4 sm:$0xff]   ;;  %v13073_v52 = vld [vmem:[%s14479_s24 + $0x1484] ss:$8 sps:$4 sm:$0xff]  }
 0x2f1   : > { %9360 = vmatprep.subr.bf16.mxu1 %v13010_v11  ;;  %v13076_v11 = vld [vmem:[%s14479_s24 + $0x1584] ss:$8 sps:$4 sm:$0xff]  }
 0x2f3   : > { %9320 = vmatpush1.bf16.msra.mxu0 %v13005_v12  ;;  %v13071_v12 = vld [vmem:[%s14479_s24 + $0x1480] ss:$8 sps:$4 sm:$0xff]  }
 0x2f4   : > { %9361 = vmatpush1.bf16.msra.mxu1 %v13008_v13  ;;  %9321 = vmatprep.subr.bf16.mxu0 %v13013_v14  ;;  %v13074_v13 = vld [vmem:[%s14479_s24 + $0x1580] ss:$8 sps:$4 sm:$0xff]   ;;  %v13079_v14 = vld [vmem:[%s14479_s24 + $0x1494] ss:$8 sps:$4 sm:$0xff]  }
 0x2f5   : > { %9362 = vmatprep.subr.bf16.mxu1 %v13016_v15  ;;  %v13082_v15 = vld [vmem:[%s14479_s24 + $0x1594] ss:$8 sps:$4 sm:$0xff]  }
 0x2f7   : > { %9322 = vmatpush1.bf16.msra.mxu0 %v13011_v16  ;;  %v13077_v16 = vld [vmem:[%s14479_s24 + $0x1490] ss:$8 sps:$4 sm:$0xff]  }
 0x2f8   : > { %9363 = vmatpush1.bf16.msra.mxu1 %v13014_v17  ;;  %9323 = vmatprep.subr.bf16.mxu0 %v13019_v18  ;;  %v13080_v17 = vld [vmem:[%s14479_s24 + $0x1590] ss:$8 sps:$4 sm:$0xff]   ;;  %v13085_v18 = vld [vmem:[%s14479_s24 + $0x14a4] ss:$8 sps:$4 sm:$0xff]  }
 0x2f9   : > { %9364 = vmatprep.subr.bf16.mxu1 %v13022_v19  ;;  %v13088_v19 = vld [vmem:[%s14479_s24 + $0x15a4] ss:$8 sps:$4 sm:$0xff]  }
 0x2fb   : > { %9324 = vmatpush1.bf16.msra.mxu0 %v13017_v20  ;;  %v13083_v20 = vld [vmem:[%s14479_s24 + $0x14a0] ss:$8 sps:$4 sm:$0xff]  }
 0x2fc   : > { %9365 = vmatpush1.bf16.msra.mxu1 %v13020_v21  ;;  %9375 = vmatprep.subr.bf16.mxu0 %v13025_v24  ;;  %v13086_v21 = vld [vmem:[%s14479_s24 + $0x15a0] ss:$8 sps:$4 sm:$0xff]   ;;  %v13089_v24 = vld [vmem:[%s14479_s24 + $0x14b0] ss:$8 sps:$4 sm:$0xff]  }
 0x2fd   : > { %9416 = vmatprep.subr.bf16.mxu1 %v13028_v25  ;;  %v13092_v25 = vld [vmem:[%s14479_s24 + $0x15b0] ss:$8 sps:$4 sm:$0xff]  }
 0x2fe   : > { %9326 = vmatmul.mubr.bf16.vlgmr.msra.gmra.mrb[36].mxu0 %v441_v27  ;;  %v13097_v27 = vld [vmem:[%s14479_s24 + $0x14c4] ss:$8 sps:$4 sm:$0xff]  }
 0x2ff   : > { %9367 = vmatmul.mubr.bf16.vlgmr.msra.gmra.mrb[36].mxu1 %v443_v29  ;;  %9376 = vmatpush1.bf16.msra.mxu0 %v13023_v10  ;;  %v13100_v29 = vld [vmem:[%s14479_s24 + $0x15c4] ss:$8 sps:$4 sm:$0xff]   ;;  %v13103_v10 = vld [vmem:[%s14479_s24 + $0x14d4] ss:$8 sps:$4 sm:$0xff]  }
 0x300   : > { %9417 = vmatpush1.bf16.msra.mxu1 %v13026_v31  ;;  %9377 = vmatprep.subr.bf16.mxu0 %v13031_v5  ;;  %v13106_v31 = vld [vmem:[%s14479_s24 + $0x15d4] ss:$8 sps:$4 sm:$0xff]   ;;  %v13101_v5 = vld [vmem:[%s14479_s24 + $0x14d0] ss:$8 sps:$4 sm:$0xff]  }
 0x301   : > { %9418 = vmatprep.subr.bf16.mxu1 %v13034_v33  ;;  %9407 = vmatprep.mubr.bf16.mxu0 %v446_v34  ;;  %v13104_v33 = vld [vmem:[%s14479_s24 + $0x15d0] ss:$8 sps:$4 sm:$0xff]   ;;  %v13109_v34 = vld [vmem:[%s14479_s24 + $0x14e4] ss:$8 sps:$4 sm:$0xff]  }
 0x302   : > { %9448 = vmatprep.mubr.bf16.mxu1 %v448_v35  ;;  %v13112_v35 = vld [vmem:[%s14479_s24 + $0x15e4] ss:$8 sps:$4 sm:$0xff]  }
 0x303   : > { %9378 = vmatpush1.bf16.msra.mxu0 %v13029_v36  ;;  %v13107_v36 = vld [vmem:[%s14479_s24 + $0x14e0] ss:$8 sps:$4 sm:$0xff]  }
 0x304   : > { %9419 = vmatpush1.bf16.msra.mxu1 %v13032_v37  ;;  %9379 = vmatprep.subr.bf16.mxu0 %v13037_v38  ;;  %v13110_v37 = vld [vmem:[%s14479_s24 + $0x15e0] ss:$8 sps:$4 sm:$0xff]   ;;  %v13115_v38 = vld [vmem:[%s14479_s24 + $0x14f4] ss:$8 sps:$4 sm:$0xff]  }
 0x305   : > { %9420 = vmatprep.subr.bf16.mxu1 %v13040_v39  ;;  %v13118_v39 = vld [vmem:[%s14479_s24 + $0x15f4] ss:$8 sps:$4 sm:$0xff]  }
 0x307   : > { %9380 = vmatpush1.bf16.msra.mxu0 %v13035_v40  ;;  %v13113_v40 = vld [vmem:[%s14479_s24 + $0x14f0] ss:$8 sps:$4 sm:$0xff]  }
 0x308   : > { %9421 = vmatpush1.bf16.msra.mxu1 %v13038_v41  ;;  %9381 = vmatprep.subr.bf16.mxu0 %v13043_v42  ;;  %v13116_v41 = vld [vmem:[%s14479_s24 + $0x15f0] ss:$8 sps:$4 sm:$0xff]   ;;  %v361_v42 = vld [vmem:[#allocation3 + $0x140] sm:$0xff] }
 0x309   : > { %9422 = vmatprep.subr.bf16.mxu1 %v13046_v43  ;;  %v363_v43 = vld [vmem:[#allocation3 + $0x150] sm:$0xff] }
 0x30b   : > { %9382 = vmatpush1.bf16.msra.mxu0 %v13041_v44  ;;  %v13121_v44 = vld [vmem:[%s14479_s24 + $0x1604] ss:$8 sps:$4 sm:$0xff]  }
 0x30c   : > { %9423 = vmatpush1.bf16.msra.mxu1 %v13044_v45  ;;  %9383 = vmatprep.subr.bf16.mxu0 %v13049_v47  ;;  %v13124_v45 = vld [vmem:[%s14479_s24 + $0x1704] ss:$8 sps:$4 sm:$0xff]   ;;  %v445_v47 = vpack.c.bf16 %v361_v42, %v361_v42  ;;  %v13187_v42 = vld [vmem:[%s14479_s24 + $0x16b4] ss:$8 sps:$4 sm:$0xff]  }
 0x30d   : > { %9424 = vmatprep.subr.bf16.mxu1 %v13052_v49  ;;  %v447_v49 = vpack.c.bf16 %v363_v43, %v363_v43  ;;  %v13190_v43 = vld [vmem:[%s14479_s24 + $0x17b4] ss:$8 sps:$4 sm:$0xff]  }
 0x30f   : > { %9384 = vmatpush1.bf16.msra.mxu0 %v13047_v26  ;;  %v366_v26 = vld [vmem:[#allocation3 + $0x168] sm:$0xff] }
 0x310   : > { %9425 = vmatpush1.bf16.msra.mxu1 %v13050_v50  ;;  %9385 = vmatprep.subr.bf16.mxu0 %v13055_v1  ;;  %v368_v50 = vld [vmem:[#allocation3 + $0x178] sm:$0xff]  ;;  %v13119_v1 = vld [vmem:[%s14479_s24 + $0x1600] ss:$8 sps:$4 sm:$0xff]  }
 0x311   : > { %9426 = vmatprep.subr.bf16.mxu1 %v13058_v51  ;;  %v9081_v56 = vpop.f32.mrb[24].mxu0  ;;  %v13122_v51 = vld [vmem:[%s14479_s24 + $0x1700] ss:$8 sps:$4 sm:$0xff]  }
 0x312   : > { %v9122_v57 = vpop.f32.mrb[24].mxu1  ;;  %v9082_v60 = vadd.f32 %v9081_v56, %v15119_v46  ;;  %v9083_v61 = vpop.f32.mrb[25].mxu0  ;;  %v13067_v46 = vld [vmem:[%s14479_s24 + $0x1474] ss:$8 sps:$4 sm:$0xff]   ;;  %v13125_v56 = vld [vmem:[%s14479_s24 + $0x1610] ss:$8 sps:$4 sm:$0xff]  }
 0x313   : > { %v9124_v62 = vpop.f32.mrb[25].mxu1  ;;  %v9084_v63 = vadd.f32 %v9083_v61, %v15123_v28  ;;  %v9085_v0 = vpop.f32.mrb[26].mxu0  ;;  %9386 = vmatpush1.bf16.msra.mxu0 %v13053_v32  ;;  %v13065_v28 = vld [vmem:[%s14479_s24 + $0x1470] ss:$8 sps:$4 sm:$0xff]   ;;  %v13127_v32 = vld [vmem:[%s14479_s24 + $0x1614] ss:$8 sps:$4 sm:$0xff]  }
 0x314   : > { %v9126_v2 = vpop.f32.mrb[26].mxu1  ;;  %9427 = vmatpush1.bf16.msra.mxu1 %v13056_v53  ;;  %v15189_v3 = vadd.f32 %v9122_v57, %v9082_v60  ;;  %v9086_v4 = vpop.f32.mrb[27].mxu0  ;;  %9387 = vmatprep.subr.bf16.mxu0 %v13061_v54  ;;  %v13130_v53 = vld [vmem:[%s14479_s24 + $0x1714] ss:$8 sps:$4 sm:$0xff]   ;;  %v450_v54 = vpack.c.bf16 %v366_v26, %v366_v26  ;;  %v13128_v57 = vld [vmem:[%s14479_s24 + $0x1710] ss:$8 sps:$4 sm:$0xff]  }
 0x315   : > { %v9127_v7 = vpop.f32.mrb[27].mxu1  ;;  %9428 = vmatprep.subr.bf16.mxu1 %v13064_v55  ;;  %v15193_v48 = vadd.f32 %v9124_v62, %v9084_v63  ;;  %v452_v55 = vpack.c.bf16 %v368_v50, %v368_v50  ;;  %v13131_v60 = vld [vmem:[%s14479_s24 + $0x1620] ss:$8 sps:$4 sm:$0xff]   ;;  %v13139_v62 = vld [vmem:[%s14479_s24 + $0x1634] ss:$8 sps:$4 sm:$0xff]  }
 0x316   : > { %v13134_v61 = vld [vmem:[%s14479_s24 + $0x1720] ss:$8 sps:$4 sm:$0xff]   ;;  %v13142_v63 = vld [vmem:[%s14479_s24 + $0x1734] ss:$8 sps:$4 sm:$0xff]   ;;  %v13137_v0 = vld [vmem:[%s14479_s24 + $0x1630] ss:$8 sps:$4 sm:$0xff]  }
 0x317   : > { %9388 = vmatpush1.bf16.msra.mxu0 %v13059_v58  ;;  %v13133_v58 = vld [vmem:[%s14479_s24 + $0x1624] ss:$8 sps:$4 sm:$0xff]   ;;  %v13140_v2 = vld [vmem:[%s14479_s24 + $0x1730] ss:$8 sps:$4 sm:$0xff]   ;;  %v13191_v26 = vld [vmem:[%s14479_s24 + $0x16c0] ss:$8 sps:$4 sm:$0xff]  }
 0x318   : > { %9429 = vmatpush1.bf16.msra.mxu1 %v13062_v59  ;;  %9389 = vmatprep.subr.bf16.mxu0 %v13067_v46  ;;  %v13136_v59 = vld [vmem:[%s14479_s24 + $0x1724] ss:$8 sps:$4 sm:$0xff]   ;;  %v13143_v46 = vld [vmem:[%s14479_s24 + $0x1640] ss:$8 sps:$4 sm:$0xff]  }
 0x319   : > { %9430 = vmatprep.subr.bf16.mxu1 %v13070_v8  ;;  %v13145_v4 = vld [vmem:[%s14479_s24 + $0x1644] ss:$8 sps:$4 sm:$0xff]   ;;  %v13146_v8 = vld [vmem:[%s14479_s24 + $0x1740] ss:$8 sps:$4 sm:$0xff]  }
 0x31a   : > { %v13148_v7 = vld [vmem:[%s14479_s24 + $0x1744] ss:$8 sps:$4 sm:$0xff]   ;;  %v13194_v50 = vld [vmem:[%s14479_s24 + $0x17c0] ss:$8 sps:$4 sm:$0xff]  }
 0x31b   : > { %9390 = vmatpush1.bf16.msra.mxu0 %v13065_v28  ;;  %v13151_v28 = vld [vmem:[%s14479_s24 + $0x1654] ss:$8 sps:$4 sm:$0xff]  }
 0x31c   : > { %9431 = vmatpush1.bf16.msra.mxu1 %v13068_v9  ;;  %9391 = vmatprep.subr.bf16.mxu0 %v13073_v52  ;;  %v13154_v9 = vld [vmem:[%s14479_s24 + $0x1754] ss:$8 sps:$4 sm:$0xff]   ;;  %v13149_v52 = vld [vmem:[%s14479_s24 + $0x1650] ss:$8 sps:$4 sm:$0xff]  }
 0x31d   : > { %9432 = vmatprep.subr.bf16.mxu1 %v13076_v11  ;;  %v13152_v11 = vld [vmem:[%s14479_s24 + $0x1750] ss:$8 sps:$4 sm:$0xff]  }
 0x31f   : > { %9392 = vmatpush1.bf16.msra.mxu0 %v13071_v12  ;;  %v13157_v12 = vld [vmem:[%s14479_s24 + $0x1664] ss:$8 sps:$4 sm:$0xff]  }
 0x320   : > { %9433 = vmatpush1.bf16.msra.mxu1 %v13074_v13  ;;  %9393 = vmatprep.subr.bf16.mxu0 %v13079_v14  ;;  %v13160_v13 = vld [vmem:[%s14479_s24 + $0x1764] ss:$8 sps:$4 sm:$0xff]  }
 0x321   : > { %9434 = vmatprep.subr.bf16.mxu1 %v13082_v15 }
 0x323   : > { %9394 = vmatpush1.bf16.msra.mxu0 %v13077_v16  ;;  %v13155_v16 = vld [vmem:[%s14479_s24 + $0x1660] ss:$8 sps:$4 sm:$0xff]  }
 0x324   : > { %9435 = vmatpush1.bf16.msra.mxu1 %v13080_v17  ;;  %9395 = vmatprep.subr.bf16.mxu0 %v13085_v18  ;;  %v13158_v17 = vld [vmem:[%s14479_s24 + $0x1760] ss:$8 sps:$4 sm:$0xff]  }
 0x325   : > { %9436 = vmatprep.subr.bf16.mxu1 %v13088_v19 }
 0x327   : > { %9396 = vmatpush1.bf16.msra.mxu0 %v13083_v20 }
 0x328   : > { %9437 = vmatpush1.bf16.msra.mxu1 %v13086_v21  ;;  %9397 = vmatprep.subr.bf16.mxu0 %v13091_v22 }
 0x329   : > { %9438 = vmatprep.subr.bf16.mxu1 %v13094_v23 }
 0x32b   : > { %9398 = vmatpush1.bf16.msra.mxu0 %v13089_v24 }
 0x32c   : > { %9439 = vmatpush1.bf16.msra.mxu1 %v13092_v25  ;;  %9399 = vmatprep.subr.bf16.mxu0 %v13097_v27 }
 0x32d   : > { %9440 = vmatprep.subr.bf16.mxu1 %v13100_v29  ;;  %v13166_v29 = vld [vmem:[%s14479_s24 + $0x1774] ss:$8 sps:$4 sm:$0xff]  }
 0x32f   : > { %9400 = vmatpush1.bf16.msra.mxu0 %v13095_v6 }
 0x330   : > { %9441 = vmatpush1.bf16.msra.mxu1 %v13098_v30  ;;  %9401 = vmatprep.subr.bf16.mxu0 %v13103_v10  ;;  %v13164_v30 = vld [vmem:[%s14479_s24 + $0x1770] ss:$8 sps:$4 sm:$0xff]   ;;  %v13169_v10 = vld [vmem:[%s14479_s24 + $0x1684] ss:$8 sps:$4 sm:$0xff]  }
 0x331   : > { %9442 = vmatprep.subr.bf16.mxu1 %v13106_v31  ;;  %v13172_v31 = vld [vmem:[%s14479_s24 + $0x1784] ss:$8 sps:$4 sm:$0xff]  }
 0x333   : > { %9402 = vmatpush1.bf16.msra.mxu0 %v13101_v5  ;;  %v13167_v5 = vld [vmem:[%s14479_s24 + $0x1680] ss:$8 sps:$4 sm:$0xff]  }
 0x334   : > { %9443 = vmatpush1.bf16.msra.mxu1 %v13104_v33  ;;  %9403 = vmatprep.subr.bf16.mxu0 %v13109_v34  ;;  %v13170_v33 = vld [vmem:[%s14479_s24 + $0x1780] ss:$8 sps:$4 sm:$0xff]   ;;  %v13175_v34 = vld [vmem:[%s14479_s24 + $0x1694] ss:$8 sps:$4 sm:$0xff]  }
 0x335   : > { %9444 = vmatprep.subr.bf16.mxu1 %v13112_v35  ;;  %v13178_v35 = vld [vmem:[%s14479_s24 + $0x1794] ss:$8 sps:$4 sm:$0xff]  }
 0x337   : > { %9404 = vmatpush1.bf16.msra.mxu0 %v13107_v36  ;;  %v13173_v36 = vld [vmem:[%s14479_s24 + $0x1690] ss:$8 sps:$4 sm:$0xff]  }
 0x338   : > { %9445 = vmatpush1.bf16.msra.mxu1 %v13110_v37  ;;  %9405 = vmatprep.subr.bf16.mxu0 %v13115_v38  ;;  %v13176_v37 = vld [vmem:[%s14479_s24 + $0x1790] ss:$8 sps:$4 sm:$0xff]   ;;  %v13181_v38 = vld [vmem:[%s14479_s24 + $0x16a4] ss:$8 sps:$4 sm:$0xff]  }
 0x339   : > { %9446 = vmatprep.subr.bf16.mxu1 %v13118_v39  ;;  %v13184_v39 = vld [vmem:[%s14479_s24 + $0x17a4] ss:$8 sps:$4 sm:$0xff]  }
 0x33b   : > { %9406 = vmatpush1.bf16.msra.mxu0 %v13113_v40  ;;  %v13179_v40 = vld [vmem:[%s14479_s24 + $0x16a0] ss:$8 sps:$4 sm:$0xff]  }
 0x33c   : > { %9447 = vmatpush1.bf16.msra.mxu1 %v13116_v41  ;;  %9457 = vmatprep.subr.bf16.mxu0 %v13121_v44  ;;  %v13182_v41 = vld [vmem:[%s14479_s24 + $0x17a0] ss:$8 sps:$4 sm:$0xff]   ;;  %v13185_v44 = vld [vmem:[%s14479_s24 + $0x16b0] ss:$8 sps:$4 sm:$0xff]  }
 0x33d   : > { %9498 = vmatprep.subr.bf16.mxu1 %v13124_v45  ;;  %v13188_v45 = vld [vmem:[%s14479_s24 + $0x17b0] ss:$8 sps:$4 sm:$0xff]  }
 0x33e   : > { %9408 = vmatmul.mubr.bf16.vlgmr.msra.gmra.mrb[40].mxu0 %v445_v47  ;;  %v13193_v47 = vld [vmem:[%s14479_s24 + $0x16c4] ss:$8 sps:$4 sm:$0xff]  }
 0x33f   : > { %9449 = vmatmul.mubr.bf16.vlgmr.msra.gmra.mrb[40].mxu1 %v447_v49  ;;  %9458 = vmatpush1.bf16.msra.mxu0 %v13119_v1  ;;  %v13196_v49 = vld [vmem:[%s14479_s24 + $0x17c4] ss:$8 sps:$4 sm:$0xff]   ;;  %v13199_v1 = vld [vmem:[%s14479_s24 + $0x16d4] ss:$8 sps:$4 sm:$0xff]  }
 0x340   : > { %9499 = vmatpush1.bf16.msra.mxu1 %v13122_v51  ;;  %9459 = vmatprep.subr.bf16.mxu0 %v13127_v32  ;;  %v13202_v51 = vld [vmem:[%s14479_s24 + $0x17d4] ss:$8 sps:$4 sm:$0xff]   ;;  %v13197_v32 = vld [vmem:[%s14479_s24 + $0x16d0] ss:$8 sps:$4 sm:$0xff]  }
 0x341   : > { %9500 = vmatprep.subr.bf16.mxu1 %v13130_v53  ;;  %9489 = vmatprep.mubr.bf16.mxu0 %v450_v54  ;;  %v13200_v53 = vld [vmem:[%s14479_s24 + $0x17d0] ss:$8 sps:$4 sm:$0xff]   ;;  %v13205_v54 = vld [vmem:[%s14479_s24 + $0x16e4] ss:$8 sps:$4 sm:$0xff]  }
 0x342   : > { %9530 = vmatprep.mubr.bf16.mxu1 %v452_v55  ;;  %v13208_v55 = vld [vmem:[%s14479_s24 + $0x17e4] ss:$8 sps:$4 sm:$0xff]  }
 0x343   : > { %9460 = vmatpush1.bf16.msra.mxu0 %v13125_v56  ;;  %v13203_v56 = vld [vmem:[%s14479_s24 + $0x16e0] ss:$8 sps:$4 sm:$0xff]  }
 0x344   : > { %9501 = vmatpush1.bf16.msra.mxu1 %v13128_v57  ;;  %9461 = vmatprep.subr.bf16.mxu0 %v13133_v58  ;;  %v13206_v57 = vld [vmem:[%s14479_s24 + $0x17e0] ss:$8 sps:$4 sm:$0xff]   ;;  %v13211_v58 = vld [vmem:[%s14479_s24 + $0x16f4] ss:$8 sps:$4 sm:$0xff]  }
 0x345   : > { %9502 = vmatprep.subr.bf16.mxu1 %v13136_v59  ;;  %v13214_v59 = vld [vmem:[%s14479_s24 + $0x17f4] ss:$8 sps:$4 sm:$0xff]  }
 0x347   : > { %9462 = vmatpush1.bf16.msra.mxu0 %v13131_v60  ;;  %v13209_v60 = vld [vmem:[%s14479_s24 + $0x16f0] ss:$8 sps:$4 sm:$0xff]  }
 0x348   : > { %9503 = vmatpush1.bf16.msra.mxu1 %v13134_v61  ;;  %9463 = vmatprep.subr.bf16.mxu0 %v13139_v62  ;;  %v13212_v61 = vld [vmem:[%s14479_s24 + $0x17f0] ss:$8 sps:$4 sm:$0xff]   ;;  %v365_v62 = vld [vmem:[#allocation3 + $0x160] sm:$0xff] }
 0x349   : > { %9504 = vmatprep.subr.bf16.mxu1 %v13142_v63  ;;  %v367_v63 = vld [vmem:[#allocation3 + $0x170] sm:$0xff] }
 0x34b   : > { %9464 = vmatpush1.bf16.msra.mxu0 %v13137_v0  ;;  %v13217_v0 = vld [vmem:[%s14479_s24 + $0x1804] ss:$8 sps:$4 sm:$0xff]  }
 0x34c   : > { %9505 = vmatpush1.bf16.msra.mxu1 %v13140_v2  ;;  %9465 = vmatprep.subr.bf16.mxu0 %v13145_v4  ;;  %v13220_v2 = vld [vmem:[%s14479_s24 + $0x1904] ss:$8 sps:$4 sm:$0xff]   ;;  %v449_v4 = vpack.c.bf16 %v365_v62, %v365_v62  ;;  %v13283_v62 = vld [vmem:[%s14479_s24 + $0x18b4] ss:$8 sps:$4 sm:$0xff]  }
 0x34d   : > { %9506 = vmatprep.subr.bf16.mxu1 %v13148_v7  ;;  %v451_v7 = vpack.c.bf16 %v367_v63, %v367_v63  ;;  %v13286_v63 = vld [vmem:[%s14479_s24 + $0x19b4] ss:$8 sps:$4 sm:$0xff]  }
 0x34f   : > { %9466 = vmatpush1.bf16.msra.mxu0 %v13143_v46  ;;  %v370_v46 = vld [vmem:[#allocation3 + $0x188] sm:$0xff] }
 0x350   : > { %9507 = vmatpush1.bf16.msra.mxu1 %v13146_v8  ;;  %9467 = vmatprep.subr.bf16.mxu0 %v13151_v28  ;;  %v372_v8 = vld [vmem:[#allocation3 + $0x198] sm:$0xff]  ;;  %v13215_v28 = vld [vmem:[%s14479_s24 + $0x1800] ss:$8 sps:$4 sm:$0xff]  }
 0x351   : > { %9508 = vmatprep.subr.bf16.mxu1 %v13154_v9  ;;  %v9163_v14 = vpop.f32.mrb[28].mxu0  ;;  %v13218_v9 = vld [vmem:[%s14479_s24 + $0x1900] ss:$8 sps:$4 sm:$0xff]  }
 0x352   : > { %v9204_v15 = vpop.f32.mrb[28].mxu1  ;;  %v9164_v18 = vadd.f32 %v9163_v14, %v15189_v3  ;;  %v9165_v19 = vpop.f32.mrb[29].mxu0  ;;  %v13163_v3 = vld [vmem:[%s14479_s24 + $0x1674] ss:$8 sps:$4 sm:$0xff]   ;;  %v13221_v14 = vld [vmem:[%s14479_s24 + $0x1810] ss:$8 sps:$4 sm:$0xff]  }
 0x353   : > { %v9206_v20 = vpop.f32.mrb[29].mxu1  ;;  %v9166_v21 = vadd.f32 %v9165_v19, %v15193_v48  ;;  %v9167_v22 = vpop.f32.mrb[30].mxu0  ;;  %9468 = vmatpush1.bf16.msra.mxu0 %v13149_v52  ;;  %v13161_v48 = vld [vmem:[%s14479_s24 + $0x1670] ss:$8 sps:$4 sm:$0xff]   ;;  %v13223_v52 = vld [vmem:[%s14479_s24 + $0x1814] ss:$8 sps:$4 sm:$0xff]  }
 0x354   : > { %v9208_v23 = vpop.f32.mrb[30].mxu1  ;;  %9509 = vmatpush1.bf16.msra.mxu1 %v13152_v11  ;;  %v15259_v24 = vadd.f32 %v9204_v15, %v9164_v18  ;;  %v9168_v25 = vpop.f32.mrb[31].mxu0  ;;  %9469 = vmatprep.subr.bf16.mxu0 %v13157_v12  ;;  %v13226_v11 = vld [vmem:[%s14479_s24 + $0x1914] ss:$8 sps:$4 sm:$0xff]   ;;  %v454_v12 = vpack.c.bf16 %v370_v46, %v370_v46  ;;  %v13224_v15 = vld [vmem:[%s14479_s24 + $0x1910] ss:$8 sps:$4 sm:$0xff]  }
 0x355   : > { %v9209_v27 = vpop.f32.mrb[31].mxu1  ;;  %9510 = vmatprep.subr.bf16.mxu1 %v13160_v13  ;;  %v15263_v6 = vadd.f32 %v9206_v20, %v9166_v21  ;;  %v456_v13 = vpack.c.bf16 %v372_v8, %v372_v8  ;;  %v13227_v18 = vld [vmem:[%s14479_s24 + $0x1820] ss:$8 sps:$4 sm:$0xff]   ;;  %v13235_v20 = vld [vmem:[%s14479_s24 + $0x1834] ss:$8 sps:$4 sm:$0xff]  }
 0x356   : > { %v13230_v19 = vld [vmem:[%s14479_s24 + $0x1920] ss:$8 sps:$4 sm:$0xff]   ;;  %v13238_v21 = vld [vmem:[%s14479_s24 + $0x1934] ss:$8 sps:$4 sm:$0xff]   ;;  %v13233_v22 = vld [vmem:[%s14479_s24 + $0x1830] ss:$8 sps:$4 sm:$0xff]  }
 0x357   : > { %9470 = vmatpush1.bf16.msra.mxu0 %v13155_v16  ;;  %v13229_v16 = vld [vmem:[%s14479_s24 + $0x1824] ss:$8 sps:$4 sm:$0xff]   ;;  %v13236_v23 = vld [vmem:[%s14479_s24 + $0x1930] ss:$8 sps:$4 sm:$0xff]   ;;  %v13287_v46 = vld [vmem:[%s14479_s24 + $0x18c0] ss:$8 sps:$4 sm:$0xff]  }
 0x358   : > { %9511 = vmatpush1.bf16.msra.mxu1 %v13158_v17  ;;  %9471 = vmatprep.subr.bf16.mxu0 %v13163_v3  ;;  %v13232_v17 = vld [vmem:[%s14479_s24 + $0x1924] ss:$8 sps:$4 sm:$0xff]   ;;  %v13239_v3 = vld [vmem:[%s14479_s24 + $0x1840] ss:$8 sps:$4 sm:$0xff]  }
 0x359   : > { %9512 = vmatprep.subr.bf16.mxu1 %v13166_v29  ;;  %v13241_v25 = vld [vmem:[%s14479_s24 + $0x1844] ss:$8 sps:$4 sm:$0xff]   ;;  %v13242_v29 = vld [vmem:[%s14479_s24 + $0x1940] ss:$8 sps:$4 sm:$0xff]  }
 0x35a   : > { %v13244_v27 = vld [vmem:[%s14479_s24 + $0x1944] ss:$8 sps:$4 sm:$0xff]   ;;  %v13290_v8 = vld [vmem:[%s14479_s24 + $0x19c0] ss:$8 sps:$4 sm:$0xff]  }
 0x35b   : > { %9472 = vmatpush1.bf16.msra.mxu0 %v13161_v48  ;;  %v13247_v48 = vld [vmem:[%s14479_s24 + $0x1854] ss:$8 sps:$4 sm:$0xff]  }
 0x35c   : > { %9513 = vmatpush1.bf16.msra.mxu1 %v13164_v30  ;;  %9473 = vmatprep.subr.bf16.mxu0 %v13169_v10  ;;  %v13250_v30 = vld [vmem:[%s14479_s24 + $0x1954] ss:$8 sps:$4 sm:$0xff]   ;;  %v13245_v10 = vld [vmem:[%s14479_s24 + $0x1850] ss:$8 sps:$4 sm:$0xff]  }
 0x35d   : > { %9514 = vmatprep.subr.bf16.mxu1 %v13172_v31  ;;  %v13248_v31 = vld [vmem:[%s14479_s24 + $0x1950] ss:$8 sps:$4 sm:$0xff]  }
 0x35f   : > { %9474 = vmatpush1.bf16.msra.mxu0 %v13167_v5  ;;  %v13253_v5 = vld [vmem:[%s14479_s24 + $0x1864] ss:$8 sps:$4 sm:$0xff]  }
 0x360   : > { %9515 = vmatpush1.bf16.msra.mxu1 %v13170_v33  ;;  %9475 = vmatprep.subr.bf16.mxu0 %v13175_v34  ;;  %v13256_v33 = vld [vmem:[%s14479_s24 + $0x1964] ss:$8 sps:$4 sm:$0xff]  }
 0x361   : > { %9516 = vmatprep.subr.bf16.mxu1 %v13178_v35 }
 0x363   : > { %9476 = vmatpush1.bf16.msra.mxu0 %v13173_v36 }
 0x364   : > { %9517 = vmatpush1.bf16.msra.mxu1 %v13176_v37  ;;  %9477 = vmatprep.subr.bf16.mxu0 %v13181_v38 }
 0x365   : > { %9518 = vmatprep.subr.bf16.mxu1 %v13184_v39 }
 0x367   : > { %9478 = vmatpush1.bf16.msra.mxu0 %v13179_v40 }
 0x368   : > { %9519 = vmatpush1.bf16.msra.mxu1 %v13182_v41  ;;  %9479 = vmatprep.subr.bf16.mxu0 %v13187_v42  ;;  %v13251_v42 = vld [vmem:[%s14479_s24 + $0x1860] ss:$8 sps:$4 sm:$0xff]  }
 0x369   : > { %9520 = vmatprep.subr.bf16.mxu1 %v13190_v43  ;;  %v13254_v43 = vld [vmem:[%s14479_s24 + $0x1960] ss:$8 sps:$4 sm:$0xff]  }
 0x36b   : > { %9480 = vmatpush1.bf16.msra.mxu0 %v13185_v44 }
 0x36c   : > { %9521 = vmatpush1.bf16.msra.mxu1 %v13188_v45  ;;  %9481 = vmatprep.subr.bf16.mxu0 %v13193_v47 }
 0x36d   : > { %9522 = vmatprep.subr.bf16.mxu1 %v13196_v49 }
 0x36f   : > { %9482 = vmatpush1.bf16.msra.mxu0 %v13191_v26  ;;  %v13257_v26 = vld [vmem:[%s14479_s24 + $0x1870] ss:$8 sps:$4 sm:$0xff]  }
 0x370   : > { %9523 = vmatpush1.bf16.msra.mxu1 %v13194_v50  ;;  %9483 = vmatprep.subr.bf16.mxu0 %v13199_v1  ;;  %v13260_v50 = vld [vmem:[%s14479_s24 + $0x1970] ss:$8 sps:$4 sm:$0xff]   ;;  %v13265_v1 = vld [vmem:[%s14479_s24 + $0x1884] ss:$8 sps:$4 sm:$0xff]  }
 0x371   : > { %9524 = vmatprep.subr.bf16.mxu1 %v13202_v51  ;;  %v13268_v51 = vld [vmem:[%s14479_s24 + $0x1984] ss:$8 sps:$4 sm:$0xff]  }
 0x373   : > { %9484 = vmatpush1.bf16.msra.mxu0 %v13197_v32  ;;  %v13263_v32 = vld [vmem:[%s14479_s24 + $0x1880] ss:$8 sps:$4 sm:$0xff]  }
 0x374   : > { %9525 = vmatpush1.bf16.msra.mxu1 %v13200_v53  ;;  %9485 = vmatprep.subr.bf16.mxu0 %v13205_v54  ;;  %v13266_v53 = vld [vmem:[%s14479_s24 + $0x1980] ss:$8 sps:$4 sm:$0xff]   ;;  %v13271_v54 = vld [vmem:[%s14479_s24 + $0x1894] ss:$8 sps:$4 sm:$0xff]  }
 0x375   : > { %9526 = vmatprep.subr.bf16.mxu1 %v13208_v55  ;;  %v13274_v55 = vld [vmem:[%s14479_s24 + $0x1994] ss:$8 sps:$4 sm:$0xff]  }
 0x377   : > { %9486 = vmatpush1.bf16.msra.mxu0 %v13203_v56  ;;  %v13269_v56 = vld [vmem:[%s14479_s24 + $0x1890] ss:$8 sps:$4 sm:$0xff]  }
 0x378   : > { %9527 = vmatpush1.bf16.msra.mxu1 %v13206_v57  ;;  %9487 = vmatprep.subr.bf16.mxu0 %v13211_v58  ;;  %v13272_v57 = vld [vmem:[%s14479_s24 + $0x1990] ss:$8 sps:$4 sm:$0xff]   ;;  %v13277_v58 = vld [vmem:[%s14479_s24 + $0x18a4] ss:$8 sps:$4 sm:$0xff]  }
 0x379   : > { %9528 = vmatprep.subr.bf16.mxu1 %v13214_v59  ;;  %v13280_v59 = vld [vmem:[%s14479_s24 + $0x19a4] ss:$8 sps:$4 sm:$0xff]  }
 0x37b   : > { %9488 = vmatpush1.bf16.msra.mxu0 %v13209_v60  ;;  %v13275_v60 = vld [vmem:[%s14479_s24 + $0x18a0] ss:$8 sps:$4 sm:$0xff]  }
 0x37c   : > { %9529 = vmatpush1.bf16.msra.mxu1 %v13212_v61  ;;  %9539 = vmatprep.subr.bf16.mxu0 %v13217_v0  ;;  %v13278_v61 = vld [vmem:[%s14479_s24 + $0x19a0] ss:$8 sps:$4 sm:$0xff]   ;;  %v13281_v0 = vld [vmem:[%s14479_s24 + $0x18b0] ss:$8 sps:$4 sm:$0xff]  }
 0x37d   : > { %9580 = vmatprep.subr.bf16.mxu1 %v13220_v2  ;;  %v13284_v2 = vld [vmem:[%s14479_s24 + $0x19b0] ss:$8 sps:$4 sm:$0xff]  }
 0x37e   : > { %9490 = vmatmul.mubr.bf16.vlgmr.msra.gmra.mrb[44].mxu0 %v449_v4  ;;  %v13289_v4 = vld [vmem:[%s14479_s24 + $0x18c4] ss:$8 sps:$4 sm:$0xff]  }
 0x37f   : > { %9531 = vmatmul.mubr.bf16.vlgmr.msra.gmra.mrb[44].mxu1 %v451_v7  ;;  %9540 = vmatpush1.bf16.msra.mxu0 %v13215_v28  ;;  %v13292_v7 = vld [vmem:[%s14479_s24 + $0x19c4] ss:$8 sps:$4 sm:$0xff]   ;;  %v13295_v28 = vld [vmem:[%s14479_s24 + $0x18d4] ss:$8 sps:$4 sm:$0xff]  }
 0x380   : > { %9581 = vmatpush1.bf16.msra.mxu1 %v13218_v9  ;;  %9541 = vmatprep.subr.bf16.mxu0 %v13223_v52  ;;  %v13298_v9 = vld [vmem:[%s14479_s24 + $0x19d4] ss:$8 sps:$4 sm:$0xff]   ;;  %v13293_v52 = vld [vmem:[%s14479_s24 + $0x18d0] ss:$8 sps:$4 sm:$0xff]  }
 0x381   : > { %9582 = vmatprep.subr.bf16.mxu1 %v13226_v11  ;;  %9571 = vmatprep.mubr.bf16.mxu0 %v454_v12  ;;  %v13296_v11 = vld [vmem:[%s14479_s24 + $0x19d0] ss:$8 sps:$4 sm:$0xff]   ;;  %v13301_v12 = vld [vmem:[%s14479_s24 + $0x18e4] ss:$8 sps:$4 sm:$0xff]  }
 0x382   : > { %9612 = vmatprep.mubr.bf16.mxu1 %v456_v13  ;;  %v13304_v13 = vld [vmem:[%s14479_s24 + $0x19e4] ss:$8 sps:$4 sm:$0xff]  }
 0x383   : > { %9542 = vmatpush1.bf16.msra.mxu0 %v13221_v14  ;;  %v13299_v14 = vld [vmem:[%s14479_s24 + $0x18e0] ss:$8 sps:$4 sm:$0xff]  }
 0x384   : > { %9583 = vmatpush1.bf16.msra.mxu1 %v13224_v15  ;;  %9543 = vmatprep.subr.bf16.mxu0 %v13229_v16  ;;  %v13302_v15 = vld [vmem:[%s14479_s24 + $0x19e0] ss:$8 sps:$4 sm:$0xff]   ;;  %v13307_v16 = vld [vmem:[%s14479_s24 + $0x18f4] ss:$8 sps:$4 sm:$0xff]  }
 0x385   : > { %9584 = vmatprep.subr.bf16.mxu1 %v13232_v17  ;;  %v13310_v17 = vld [vmem:[%s14479_s24 + $0x19f4] ss:$8 sps:$4 sm:$0xff]  }
 0x387   : > { %9544 = vmatpush1.bf16.msra.mxu0 %v13227_v18  ;;  %v13305_v18 = vld [vmem:[%s14479_s24 + $0x18f0] ss:$8 sps:$4 sm:$0xff]  }
 0x388   : > { %9585 = vmatpush1.bf16.msra.mxu1 %v13230_v19  ;;  %9545 = vmatprep.subr.bf16.mxu0 %v13235_v20  ;;  %v13308_v19 = vld [vmem:[%s14479_s24 + $0x19f0] ss:$8 sps:$4 sm:$0xff]   ;;  %v369_v20 = vld [vmem:[#allocation3 + $0x180] sm:$0xff] }
 0x389   : > { %9586 = vmatprep.subr.bf16.mxu1 %v13238_v21  ;;  %v371_v21 = vld [vmem:[#allocation3 + $0x190] sm:$0xff] }
 0x38b   : > { %9546 = vmatpush1.bf16.msra.mxu0 %v13233_v22  ;;  %v13313_v22 = vld [vmem:[%s14479_s24 + $0x1a04] ss:$8 sps:$4 sm:$0xff]  }
 0x38c   : > { %9587 = vmatpush1.bf16.msra.mxu1 %v13236_v23  ;;  %9547 = vmatprep.subr.bf16.mxu0 %v13241_v25  ;;  %v13316_v23 = vld [vmem:[%s14479_s24 + $0x1b04] ss:$8 sps:$4 sm:$0xff]   ;;  %v453_v25 = vpack.c.bf16 %v369_v20, %v369_v20  ;;  %v13379_v20 = vld [vmem:[%s14479_s24 + $0x1ab4] ss:$8 sps:$4 sm:$0xff]  }
 0x38d   : > { %9588 = vmatprep.subr.bf16.mxu1 %v13244_v27  ;;  %v455_v27 = vpack.c.bf16 %v371_v21, %v371_v21  ;;  %v13382_v21 = vld [vmem:[%s14479_s24 + $0x1bb4] ss:$8 sps:$4 sm:$0xff]  }
 0x38f   : > { %9548 = vmatpush1.bf16.msra.mxu0 %v13239_v3  ;;  %v374_v3 = vld [vmem:[#allocation3 + $0x1a8] sm:$0xff] }
 0x390   : > { %9589 = vmatpush1.bf16.msra.mxu1 %v13242_v29  ;;  %9549 = vmatprep.subr.bf16.mxu0 %v13247_v48  ;;  %v376_v29 = vld [vmem:[#allocation3 + $0x1b8] sm:$0xff]  ;;  %v13311_v48 = vld [vmem:[%s14479_s24 + $0x1a00] ss:$8 sps:$4 sm:$0xff]  }
 0x391   : > { %9590 = vmatprep.subr.bf16.mxu1 %v13250_v30  ;;  %v9245_v34 = vpop.f32.mrb[32].mxu0  ;;  %v13314_v30 = vld [vmem:[%s14479_s24 + $0x1b00] ss:$8 sps:$4 sm:$0xff]  }
 0x392   : > { %v9286_v35 = vpop.f32.mrb[32].mxu1  ;;  %v9246_v36 = vadd.f32 %v9245_v34, %v15259_v24  ;;  %v9247_v37 = vpop.f32.mrb[33].mxu0  ;;  %v13259_v24 = vld [vmem:[%s14479_s24 + $0x1874] ss:$8 sps:$4 sm:$0xff]   ;;  %v13317_v34 = vld [vmem:[%s14479_s24 + $0x1a10] ss:$8 sps:$4 sm:$0xff]  }
 0x393   : > { %v9288_v38 = vpop.f32.mrb[33].mxu1  ;;  %v9248_v39 = vadd.f32 %v9247_v37, %v15263_v6  ;;  %v9249_v40 = vpop.f32.mrb[34].mxu0  ;;  %9550 = vmatpush1.bf16.msra.mxu0 %v13245_v10  ;;  %v13262_v6 = vld [vmem:[%s14479_s24 + $0x1974] ss:$8 sps:$4 sm:$0xff]   ;;  %v13328_v37 = vld [vmem:[%s14479_s24 + $0x1b24] ss:$8 sps:$4 sm:$0xff]  }
 0x394   : > { %v9290_v41 = vpop.f32.mrb[34].mxu1  ;;  %9591 = vmatpush1.bf16.msra.mxu1 %v13248_v31  ;;  %v15329_v44 = vadd.f32 %v9286_v35, %v9246_v36  ;;  %v9250_v45 = vpop.f32.mrb[35].mxu0  ;;  %9551 = vmatprep.subr.bf16.mxu0 %v13253_v5  ;;  %v13319_v10 = vld [vmem:[%s14479_s24 + $0x1a14] ss:$8 sps:$4 sm:$0xff]   ;;  %v458_v5 = vpack.c.bf16 %v374_v3, %v374_v3  ;;  %v13320_v35 = vld [vmem:[%s14479_s24 + $0x1b10] ss:$8 sps:$4 sm:$0xff]  }
 0x395   : > { %v9291_v47 = vpop.f32.mrb[35].mxu1  ;;  %9592 = vmatprep.subr.bf16.mxu1 %v13256_v33  ;;  %v15333_v49 = vadd.f32 %v9288_v38, %v9248_v39  ;;  %v13322_v31 = vld [vmem:[%s14479_s24 + $0x1b14] ss:$8 sps:$4 sm:$0xff]   ;;  %v460_v33 = vpack.c.bf16 %v376_v29, %v376_v29  ;;  %v13325_v36 = vld [vmem:[%s14479_s24 + $0x1a24] ss:$8 sps:$4 sm:$0xff]  }
 0x396   : > { %v13323_v38 = vld [vmem:[%s14479_s24 + $0x1a20] ss:$8 sps:$4 sm:$0xff]   ;;  %v13331_v40 = vld [vmem:[%s14479_s24 + $0x1a34] ss:$8 sps:$4 sm:$0xff]   ;;  %v13337_v45 = vld [vmem:[%s14479_s24 + $0x1a44] ss:$8 sps:$4 sm:$0xff]  }
 0x397   : > { %9552 = vmatpush1.bf16.msra.mxu0 %v13251_v42  ;;  %v13326_v39 = vld [vmem:[%s14479_s24 + $0x1b20] ss:$8 sps:$4 sm:$0xff]   ;;  %v13334_v41 = vld [vmem:[%s14479_s24 + $0x1b34] ss:$8 sps:$4 sm:$0xff]   ;;  %v13329_v42 = vld [vmem:[%s14479_s24 + $0x1a30] ss:$8 sps:$4 sm:$0xff]  }
 0x398   : > { %9593 = vmatpush1.bf16.msra.mxu1 %v13254_v43  ;;  %9553 = vmatprep.subr.bf16.mxu0 %v13259_v24  ;;  %v13332_v43 = vld [vmem:[%s14479_s24 + $0x1b30] ss:$8 sps:$4 sm:$0xff]   ;;  %v13340_v47 = vld [vmem:[%s14479_s24 + $0x1b44] ss:$8 sps:$4 sm:$0xff]   ;;  %v13335_v24 = vld [vmem:[%s14479_s24 + $0x1a40] ss:$8 sps:$4 sm:$0xff]  }
 0x399   : > { %9594 = vmatprep.subr.bf16.mxu1 %v13262_v6  ;;  %v13338_v6 = vld [vmem:[%s14479_s24 + $0x1b40] ss:$8 sps:$4 sm:$0xff]  }
 0x39a   : > { %v13383_v3 = vld [vmem:[%s14479_s24 + $0x1ac0] ss:$8 sps:$4 sm:$0xff]  }
 0x39b   : > { %9554 = vmatpush1.bf16.msra.mxu0 %v13257_v26  ;;  %v13343_v26 = vld [vmem:[%s14479_s24 + $0x1a54] ss:$8 sps:$4 sm:$0xff]   ;;  %v13386_v29 = vld [vmem:[%s14479_s24 + $0x1bc0] ss:$8 sps:$4 sm:$0xff]  }
 0x39c   : > { %9595 = vmatpush1.bf16.msra.mxu1 %v13260_v50  ;;  %9555 = vmatprep.subr.bf16.mxu0 %v13265_v1  ;;  %v13346_v50 = vld [vmem:[%s14479_s24 + $0x1b54] ss:$8 sps:$4 sm:$0xff]   ;;  %v13341_v1 = vld [vmem:[%s14479_s24 + $0x1a50] ss:$8 sps:$4 sm:$0xff]  }
 0x39d   : > { %9596 = vmatprep.subr.bf16.mxu1 %v13268_v51  ;;  %v13344_v51 = vld [vmem:[%s14479_s24 + $0x1b50] ss:$8 sps:$4 sm:$0xff]  }
 0x39f   : > { %9556 = vmatpush1.bf16.msra.mxu0 %v13263_v32  ;;  %v13349_v32 = vld [vmem:[%s14479_s24 + $0x1a64] ss:$8 sps:$4 sm:$0xff]  }
 0x3a0   : > { %9597 = vmatpush1.bf16.msra.mxu1 %v13266_v53  ;;  %9557 = vmatprep.subr.bf16.mxu0 %v13271_v54  ;;  %v13352_v53 = vld [vmem:[%s14479_s24 + $0x1b64] ss:$8 sps:$4 sm:$0xff]  }
 0x3a1   : > { %9598 = vmatprep.subr.bf16.mxu1 %v13274_v55 }
 0x3a3   : > { %9558 = vmatpush1.bf16.msra.mxu0 %v13269_v56 }
 0x3a4   : > { %9599 = vmatpush1.bf16.msra.mxu1 %v13272_v57  ;;  %9559 = vmatprep.subr.bf16.mxu0 %v13277_v58 }
 0x3a5   : > { %9600 = vmatprep.subr.bf16.mxu1 %v13280_v59 }
 0x3a7   : > { %9560 = vmatpush1.bf16.msra.mxu0 %v13275_v60 }
 0x3a8   : > { %9601 = vmatpush1.bf16.msra.mxu1 %v13278_v61  ;;  %9561 = vmatprep.subr.bf16.mxu0 %v13283_v62  ;;  %v13347_v62 = vld [vmem:[%s14479_s24 + $0x1a60] ss:$8 sps:$4 sm:$0xff]  }
 0x3a9   : > { %9602 = vmatprep.subr.bf16.mxu1 %v13286_v63  ;;  %v13350_v63 = vld [vmem:[%s14479_s24 + $0x1b60] ss:$8 sps:$4 sm:$0xff]  }
 0x3ab   : > { %9562 = vmatpush1.bf16.msra.mxu0 %v13281_v0 }
 0x3ac   : > { %9603 = vmatpush1.bf16.msra.mxu1 %v13284_v2  ;;  %9563 = vmatprep.subr.bf16.mxu0 %v13289_v4 }
 0x3ad   : > { %9604 = vmatprep.subr.bf16.mxu1 %v13292_v7 }
 0x3af   : > { %9564 = vmatpush1.bf16.msra.mxu0 %v13287_v46  ;;  %v13353_v46 = vld [vmem:[%s14479_s24 + $0x1a70] ss:$8 sps:$4 sm:$0xff]  }
 0x3b0   : > { %9605 = vmatpush1.bf16.msra.mxu1 %v13290_v8  ;;  %9565 = vmatprep.subr.bf16.mxu0 %v13295_v28  ;;  %v13356_v8 = vld [vmem:[%s14479_s24 + $0x1b70] ss:$8 sps:$4 sm:$0xff]   ;;  %v13361_v28 = vld [vmem:[%s14479_s24 + $0x1a84] ss:$8 sps:$4 sm:$0xff]  }
 0x3b1   : > { %9606 = vmatprep.subr.bf16.mxu1 %v13298_v9  ;;  %v13364_v9 = vld [vmem:[%s14479_s24 + $0x1b84] ss:$8 sps:$4 sm:$0xff]  }
 0x3b3   : > { %9566 = vmatpush1.bf16.msra.mxu0 %v13293_v52  ;;  %v13359_v52 = vld [vmem:[%s14479_s24 + $0x1a80] ss:$8 sps:$4 sm:$0xff]  }
 0x3b4   : > { %9607 = vmatpush1.bf16.msra.mxu1 %v13296_v11  ;;  %9567 = vmatprep.subr.bf16.mxu0 %v13301_v12  ;;  %v13362_v11 = vld [vmem:[%s14479_s24 + $0x1b80] ss:$8 sps:$4 sm:$0xff]   ;;  %v13367_v12 = vld [vmem:[%s14479_s24 + $0x1a94] ss:$8 sps:$4 sm:$0xff]  }
 0x3b5   : > { %9608 = vmatprep.subr.bf16.mxu1 %v13304_v13  ;;  %v13370_v13 = vld [vmem:[%s14479_s24 + $0x1b94] ss:$8 sps:$4 sm:$0xff]  }
 0x3b7   : > { %9568 = vmatpush1.bf16.msra.mxu0 %v13299_v14  ;;  %v13365_v14 = vld [vmem:[%s14479_s24 + $0x1a90] ss:$8 sps:$4 sm:$0xff]  }
 0x3b8   : > { %9609 = vmatpush1.bf16.msra.mxu1 %v13302_v15  ;;  %9569 = vmatprep.subr.bf16.mxu0 %v13307_v16  ;;  %v13368_v15 = vld [vmem:[%s14479_s24 + $0x1b90] ss:$8 sps:$4 sm:$0xff]   ;;  %v13373_v16 = vld [vmem:[%s14479_s24 + $0x1aa4] ss:$8 sps:$4 sm:$0xff]  }
 0x3b9   : > { %9610 = vmatprep.subr.bf16.mxu1 %v13310_v17  ;;  %v13376_v17 = vld [vmem:[%s14479_s24 + $0x1ba4] ss:$8 sps:$4 sm:$0xff]  }
 0x3bb   : > { %9570 = vmatpush1.bf16.msra.mxu0 %v13305_v18  ;;  %v13371_v18 = vld [vmem:[%s14479_s24 + $0x1aa0] ss:$8 sps:$4 sm:$0xff]  }
 0x3bc   : > { %9611 = vmatpush1.bf16.msra.mxu1 %v13308_v19  ;;  %9621 = vmatprep.subr.bf16.mxu0 %v13313_v22  ;;  %v13374_v19 = vld [vmem:[%s14479_s24 + $0x1ba0] ss:$8 sps:$4 sm:$0xff]   ;;  %v13377_v22 = vld [vmem:[%s14479_s24 + $0x1ab0] ss:$8 sps:$4 sm:$0xff]  }
 0x3bd   : > { %9662 = vmatprep.subr.bf16.mxu1 %v13316_v23  ;;  %v13380_v23 = vld [vmem:[%s14479_s24 + $0x1bb0] ss:$8 sps:$4 sm:$0xff]  }
 0x3be   : > { %9572 = vmatmul.mubr.bf16.vlgmr.msra.gmra.mrb[48].mxu0 %v453_v25  ;;  %v13385_v25 = vld [vmem:[%s14479_s24 + $0x1ac4] ss:$8 sps:$4 sm:$0xff]  }
 0x3bf   : > { %9613 = vmatmul.mubr.bf16.vlgmr.msra.gmra.mrb[48].mxu1 %v455_v27  ;;  %9622 = vmatpush1.bf16.msra.mxu0 %v13311_v48  ;;  %v13388_v27 = vld [vmem:[%s14479_s24 + $0x1bc4] ss:$8 sps:$4 sm:$0xff]   ;;  %v13391_v48 = vld [vmem:[%s14479_s24 + $0x1ad4] ss:$8 sps:$4 sm:$0xff]  }
 0x3c0   : > { %9663 = vmatpush1.bf16.msra.mxu1 %v13314_v30  ;;  %9623 = vmatprep.subr.bf16.mxu0 %v13319_v10  ;;  %v13394_v30 = vld [vmem:[%s14479_s24 + $0x1bd4] ss:$8 sps:$4 sm:$0xff]   ;;  %v13389_v10 = vld [vmem:[%s14479_s24 + $0x1ad0] ss:$8 sps:$4 sm:$0xff]  }
 0x3c1   : > { %9664 = vmatprep.subr.bf16.mxu1 %v13322_v31  ;;  %9653 = vmatprep.mubr.bf16.mxu0 %v458_v5  ;;  %v13392_v31 = vld [vmem:[%s14479_s24 + $0x1bd0] ss:$8 sps:$4 sm:$0xff]   ;;  %v13397_v5 = vld [vmem:[%s14479_s24 + $0x1ae4] ss:$8 sps:$4 sm:$0xff]  }
 0x3c2   : > { %9694 = vmatprep.mubr.bf16.mxu1 %v460_v33  ;;  %v13400_v33 = vld [vmem:[%s14479_s24 + $0x1be4] ss:$8 sps:$4 sm:$0xff]  }
 0x3c3   : > { %9624 = vmatpush1.bf16.msra.mxu0 %v13317_v34  ;;  %v13395_v34 = vld [vmem:[%s14479_s24 + $0x1ae0] ss:$8 sps:$4 sm:$0xff]  }
 0x3c4   : > { %9665 = vmatpush1.bf16.msra.mxu1 %v13320_v35  ;;  %9625 = vmatprep.subr.bf16.mxu0 %v13325_v36  ;;  %v13398_v35 = vld [vmem:[%s14479_s24 + $0x1be0] ss:$8 sps:$4 sm:$0xff]   ;;  %v13403_v36 = vld [vmem:[%s14479_s24 + $0x1af4] ss:$8 sps:$4 sm:$0xff]  }
 0x3c5   : > { %9666 = vmatprep.subr.bf16.mxu1 %v13328_v37  ;;  %v13406_v37 = vld [vmem:[%s14479_s24 + $0x1bf4] ss:$8 sps:$4 sm:$0xff]  }
 0x3c7   : > { %9626 = vmatpush1.bf16.msra.mxu0 %v13323_v38  ;;  %v13401_v38 = vld [vmem:[%s14479_s24 + $0x1af0] ss:$8 sps:$4 sm:$0xff]  }
 0x3c8   : > { %9667 = vmatpush1.bf16.msra.mxu1 %v13326_v39  ;;  %9627 = vmatprep.subr.bf16.mxu0 %v13331_v40  ;;  %v13404_v39 = vld [vmem:[%s14479_s24 + $0x1bf0] ss:$8 sps:$4 sm:$0xff]   ;;  %v373_v40 = vld [vmem:[#allocation3 + $0x1a0] sm:$0xff] }
 0x3c9   : > { %9668 = vmatprep.subr.bf16.mxu1 %v13334_v41  ;;  %v375_v41 = vld [vmem:[#allocation3 + $0x1b0] sm:$0xff] }
 0x3cb   : > { %9628 = vmatpush1.bf16.msra.mxu0 %v13329_v42  ;;  %v13409_v42 = vld [vmem:[%s14479_s24 + $0x1c04] ss:$8 sps:$4 sm:$0xff]  }
 0x3cc   : > { %9669 = vmatpush1.bf16.msra.mxu1 %v13332_v43  ;;  %9629 = vmatprep.subr.bf16.mxu0 %v13337_v45  ;;  %v13412_v43 = vld [vmem:[%s14479_s24 + $0x1d04] ss:$8 sps:$4 sm:$0xff]   ;;  %v457_v45 = vpack.c.bf16 %v373_v40, %v373_v40  ;;  %v13475_v40 = vld [vmem:[%s14479_s24 + $0x1cb4] ss:$8 sps:$4 sm:$0xff]  }
 0x3cd   : > { %9670 = vmatprep.subr.bf16.mxu1 %v13340_v47  ;;  %v459_v47 = vpack.c.bf16 %v375_v41, %v375_v41  ;;  %v13478_v41 = vld [vmem:[%s14479_s24 + $0x1db4] ss:$8 sps:$4 sm:$0xff]  }
 0x3cf   : > { %9630 = vmatpush1.bf16.msra.mxu0 %v13335_v24  ;;  %v378_v24 = vld [vmem:[#allocation3 + $0x1c8] sm:$0xff] }
 0x3d0   : > { %9671 = vmatpush1.bf16.msra.mxu1 %v13338_v6  ;;  %9631 = vmatprep.subr.bf16.mxu0 %v13343_v26  ;;  %v380_v6 = vld [vmem:[#allocation3 + $0x1d8] sm:$0xff]  ;;  %v13407_v26 = vld [vmem:[%s14479_s24 + $0x1c00] ss:$8 sps:$4 sm:$0xff]  }
 0x3d1   : > { %9672 = vmatprep.subr.bf16.mxu1 %v13346_v50  ;;  %v9327_v54 = vpop.f32.mrb[36].mxu0  ;;  %v13410_v50 = vld [vmem:[%s14479_s24 + $0x1d00] ss:$8 sps:$4 sm:$0xff]  }
 0x3d2   : > { %v9368_v55 = vpop.f32.mrb[36].mxu1  ;;  %v9328_v56 = vadd.f32 %v9327_v54, %v15329_v44  ;;  %v9329_v57 = vpop.f32.mrb[37].mxu0  ;;  %v13355_v44 = vld [vmem:[%s14479_s24 + $0x1a74] ss:$8 sps:$4 sm:$0xff]   ;;  %v13413_v54 = vld [vmem:[%s14479_s24 + $0x1c10] ss:$8 sps:$4 sm:$0xff]  }
 0x3d3   : > { %v9370_v58 = vpop.f32.mrb[37].mxu1  ;;  %v9330_v59 = vadd.f32 %v9329_v57, %v15333_v49  ;;  %v9331_v60 = vpop.f32.mrb[38].mxu0  ;;  %9632 = vmatpush1.bf16.msra.mxu0 %v13341_v1  ;;  %v13358_v49 = vld [vmem:[%s14479_s24 + $0x1b74] ss:$8 sps:$4 sm:$0xff]   ;;  %v13424_v57 = vld [vmem:[%s14479_s24 + $0x1d24] ss:$8 sps:$4 sm:$0xff]  }
 0x3d4   : > { %v9372_v61 = vpop.f32.mrb[38].mxu1  ;;  %9673 = vmatpush1.bf16.msra.mxu1 %v13344_v51  ;;  %v15399_v0 = vadd.f32 %v9368_v55, %v9328_v56  ;;  %v9332_v2 = vpop.f32.mrb[39].mxu0  ;;  %9633 = vmatprep.subr.bf16.mxu0 %v13349_v32  ;;  %v13415_v1 = vld [vmem:[%s14479_s24 + $0x1c14] ss:$8 sps:$4 sm:$0xff]   ;;  %v462_v32 = vpack.c.bf16 %v378_v24, %v378_v24  ;;  %v13416_v55 = vld [vmem:[%s14479_s24 + $0x1d10] ss:$8 sps:$4 sm:$0xff]  }
 0x3d5   : > { %v9373_v4 = vpop.f32.mrb[39].mxu1  ;;  %9674 = vmatprep.subr.bf16.mxu1 %v13352_v53  ;;  %v15403_v7 = vadd.f32 %v9370_v58, %v9330_v59  ;;  %v13418_v51 = vld [vmem:[%s14479_s24 + $0x1d14] ss:$8 sps:$4 sm:$0xff]   ;;  %v464_v53 = vpack.c.bf16 %v380_v6, %v380_v6  ;;  %v13421_v56 = vld [vmem:[%s14479_s24 + $0x1c24] ss:$8 sps:$4 sm:$0xff]  }
 0x3d6   : > { %v13419_v58 = vld [vmem:[%s14479_s24 + $0x1c20] ss:$8 sps:$4 sm:$0xff]   ;;  %v13427_v60 = vld [vmem:[%s14479_s24 + $0x1c34] ss:$8 sps:$4 sm:$0xff]   ;;  %v13433_v2 = vld [vmem:[%s14479_s24 + $0x1c44] ss:$8 sps:$4 sm:$0xff]  }
 0x3d7   : > { %9634 = vmatpush1.bf16.msra.mxu0 %v13347_v62  ;;  %v13422_v59 = vld [vmem:[%s14479_s24 + $0x1d20] ss:$8 sps:$4 sm:$0xff]   ;;  %v13430_v61 = vld [vmem:[%s14479_s24 + $0x1d34] ss:$8 sps:$4 sm:$0xff]   ;;  %v13425_v62 = vld [vmem:[%s14479_s24 + $0x1c30] ss:$8 sps:$4 sm:$0xff]  }
 0x3d8   : > { %9675 = vmatpush1.bf16.msra.mxu1 %v13350_v63  ;;  %9635 = vmatprep.subr.bf16.mxu0 %v13355_v44  ;;  %v13428_v63 = vld [vmem:[%s14479_s24 + $0x1d30] ss:$8 sps:$4 sm:$0xff]   ;;  %v13436_v4 = vld [vmem:[%s14479_s24 + $0x1d44] ss:$8 sps:$4 sm:$0xff]   ;;  %v13431_v44 = vld [vmem:[%s14479_s24 + $0x1c40] ss:$8 sps:$4 sm:$0xff]  }
 0x3d9   : > { %9676 = vmatprep.subr.bf16.mxu1 %v13358_v49  ;;  %v13434_v49 = vld [vmem:[%s14479_s24 + $0x1d40] ss:$8 sps:$4 sm:$0xff]  }
 0x3da   : > { %v13479_v24 = vld [vmem:[%s14479_s24 + $0x1cc0] ss:$8 sps:$4 sm:$0xff]  }
 0x3db   : > { %9636 = vmatpush1.bf16.msra.mxu0 %v13353_v46  ;;  %v13439_v46 = vld [vmem:[%s14479_s24 + $0x1c54] ss:$8 sps:$4 sm:$0xff]   ;;  %v13482_v6 = vld [vmem:[%s14479_s24 + $0x1dc0] ss:$8 sps:$4 sm:$0xff]  }
 0x3dc   : > { %9677 = vmatpush1.bf16.msra.mxu1 %v13356_v8  ;;  %9637 = vmatprep.subr.bf16.mxu0 %v13361_v28  ;;  %v13442_v8 = vld [vmem:[%s14479_s24 + $0x1d54] ss:$8 sps:$4 sm:$0xff]   ;;  %v13437_v28 = vld [vmem:[%s14479_s24 + $0x1c50] ss:$8 sps:$4 sm:$0xff]  }
 0x3dd   : > { %9678 = vmatprep.subr.bf16.mxu1 %v13364_v9  ;;  %v13440_v9 = vld [vmem:[%s14479_s24 + $0x1d50] ss:$8 sps:$4 sm:$0xff]  }
 0x3df   : > { %9638 = vmatpush1.bf16.msra.mxu0 %v13359_v52  ;;  %v13445_v52 = vld [vmem:[%s14479_s24 + $0x1c64] ss:$8 sps:$4 sm:$0xff]  }
 0x3e0   : > { %9679 = vmatpush1.bf16.msra.mxu1 %v13362_v11  ;;  %9639 = vmatprep.subr.bf16.mxu0 %v13367_v12  ;;  %v13448_v11 = vld [vmem:[%s14479_s24 + $0x1d64] ss:$8 sps:$4 sm:$0xff]  }
 0x3e1   : > { %9680 = vmatprep.subr.bf16.mxu1 %v13370_v13 }
 0x3e3   : > { %9640 = vmatpush1.bf16.msra.mxu0 %v13365_v14 }
 0x3e4   : > { %9681 = vmatpush1.bf16.msra.mxu1 %v13368_v15  ;;  %9641 = vmatprep.subr.bf16.mxu0 %v13373_v16 }
 0x3e5   : > { %9682 = vmatprep.subr.bf16.mxu1 %v13376_v17 }
 0x3e7   : > { %9642 = vmatpush1.bf16.msra.mxu0 %v13371_v18 }
 0x3e8   : > { %9683 = vmatpush1.bf16.msra.mxu1 %v13374_v19  ;;  %9643 = vmatprep.subr.bf16.mxu0 %v13379_v20  ;;  %v13443_v20 = vld [vmem:[%s14479_s24 + $0x1c60] ss:$8 sps:$4 sm:$0xff]  }
 0x3e9   : > { %9684 = vmatprep.subr.bf16.mxu1 %v13382_v21  ;;  %v13446_v21 = vld [vmem:[%s14479_s24 + $0x1d60] ss:$8 sps:$4 sm:$0xff]  }
 0x3eb   : > { %9644 = vmatpush1.bf16.msra.mxu0 %v13377_v22 }
 0x3ec   : > { %9685 = vmatpush1.bf16.msra.mxu1 %v13380_v23  ;;  %9645 = vmatprep.subr.bf16.mxu0 %v13385_v25 }
 0x3ed   : > { %9686 = vmatprep.subr.bf16.mxu1 %v13388_v27 }
 0x3ef   : > { %9646 = vmatpush1.bf16.msra.mxu0 %v13383_v3  ;;  %v13449_v3 = vld [vmem:[%s14479_s24 + $0x1c70] ss:$8 sps:$4 sm:$0xff]  }
 0x3f0   : > { %9687 = vmatpush1.bf16.msra.mxu1 %v13386_v29  ;;  %9647 = vmatprep.subr.bf16.mxu0 %v13391_v48  ;;  %v13452_v29 = vld [vmem:[%s14479_s24 + $0x1d70] ss:$8 sps:$4 sm:$0xff]   ;;  %v13457_v48 = vld [vmem:[%s14479_s24 + $0x1c84] ss:$8 sps:$4 sm:$0xff]  }
 0x3f1   : > { %9688 = vmatprep.subr.bf16.mxu1 %v13394_v30  ;;  %v13460_v30 = vld [vmem:[%s14479_s24 + $0x1d84] ss:$8 sps:$4 sm:$0xff]  }
 0x3f3   : > { %9648 = vmatpush1.bf16.msra.mxu0 %v13389_v10  ;;  %v13455_v10 = vld [vmem:[%s14479_s24 + $0x1c80] ss:$8 sps:$4 sm:$0xff]  }
 0x3f4   : > { %9689 = vmatpush1.bf16.msra.mxu1 %v13392_v31  ;;  %9649 = vmatprep.subr.bf16.mxu0 %v13397_v5  ;;  %v13458_v31 = vld [vmem:[%s14479_s24 + $0x1d80] ss:$8 sps:$4 sm:$0xff]   ;;  %v13463_v5 = vld [vmem:[%s14479_s24 + $0x1c94] ss:$8 sps:$4 sm:$0xff]  }
 0x3f5   : > { %9690 = vmatprep.subr.bf16.mxu1 %v13400_v33  ;;  %v13466_v33 = vld [vmem:[%s14479_s24 + $0x1d94] ss:$8 sps:$4 sm:$0xff]  }
 0x3f7   : > { %9650 = vmatpush1.bf16.msra.mxu0 %v13395_v34  ;;  %v13461_v34 = vld [vmem:[%s14479_s24 + $0x1c90] ss:$8 sps:$4 sm:$0xff]  }
 0x3f8   : > { %9691 = vmatpush1.bf16.msra.mxu1 %v13398_v35  ;;  %9651 = vmatprep.subr.bf16.mxu0 %v13403_v36  ;;  %v13464_v35 = vld [vmem:[%s14479_s24 + $0x1d90] ss:$8 sps:$4 sm:$0xff]   ;;  %v13469_v36 = vld [vmem:[%s14479_s24 + $0x1ca4] ss:$8 sps:$4 sm:$0xff]  }
 0x3f9   : > { %9692 = vmatprep.subr.bf16.mxu1 %v13406_v37  ;;  %v13472_v37 = vld [vmem:[%s14479_s24 + $0x1da4] ss:$8 sps:$4 sm:$0xff]  }
 0x3fb   : > { %9652 = vmatpush1.bf16.msra.mxu0 %v13401_v38  ;;  %v13467_v38 = vld [vmem:[%s14479_s24 + $0x1ca0] ss:$8 sps:$4 sm:$0xff]  }
 0x3fc   : > { %9693 = vmatpush1.bf16.msra.mxu1 %v13404_v39  ;;  %9703 = vmatprep.subr.bf16.mxu0 %v13409_v42  ;;  %v13470_v39 = vld [vmem:[%s14479_s24 + $0x1da0] ss:$8 sps:$4 sm:$0xff]   ;;  %v13473_v42 = vld [vmem:[%s14479_s24 + $0x1cb0] ss:$8 sps:$4 sm:$0xff]  }
 0x3fd   : > { %9744 = vmatprep.subr.bf16.mxu1 %v13412_v43  ;;  %v13476_v43 = vld [vmem:[%s14479_s24 + $0x1db0] ss:$8 sps:$4 sm:$0xff]  }
 0x3fe   : > { %9654 = vmatmul.mubr.bf16.vlgmr.msra.gmra.mrb[52].mxu0 %v457_v45  ;;  %v13481_v45 = vld [vmem:[%s14479_s24 + $0x1cc4] ss:$8 sps:$4 sm:$0xff]  }
 0x3ff   : > { %9695 = vmatmul.mubr.bf16.vlgmr.msra.gmra.mrb[52].mxu1 %v459_v47  ;;  %9704 = vmatpush1.bf16.msra.mxu0 %v13407_v26  ;;  %v13484_v47 = vld [vmem:[%s14479_s24 + $0x1dc4] ss:$8 sps:$4 sm:$0xff]   ;;  %v13487_v26 = vld [vmem:[%s14479_s24 + $0x1cd4] ss:$8 sps:$4 sm:$0xff]  }
 0x400   : > { %9745 = vmatpush1.bf16.msra.mxu1 %v13410_v50  ;;  %9705 = vmatprep.subr.bf16.mxu0 %v13415_v1  ;;  %v13490_v50 = vld [vmem:[%s14479_s24 + $0x1dd4] ss:$8 sps:$4 sm:$0xff]   ;;  %v13485_v1 = vld [vmem:[%s14479_s24 + $0x1cd0] ss:$8 sps:$4 sm:$0xff]  }
 0x401   : > { %9746 = vmatprep.subr.bf16.mxu1 %v13418_v51  ;;  %9735 = vmatprep.mubr.bf16.mxu0 %v462_v32  ;;  %v13488_v51 = vld [vmem:[%s14479_s24 + $0x1dd0] ss:$8 sps:$4 sm:$0xff]   ;;  %v13493_v32 = vld [vmem:[%s14479_s24 + $0x1ce4] ss:$8 sps:$4 sm:$0xff]  }
 0x402   : > { %9776 = vmatprep.mubr.bf16.mxu1 %v464_v53  ;;  %v13496_v53 = vld [vmem:[%s14479_s24 + $0x1de4] ss:$8 sps:$4 sm:$0xff]  }
 0x403   : > { %9706 = vmatpush1.bf16.msra.mxu0 %v13413_v54  ;;  %v13491_v54 = vld [vmem:[%s14479_s24 + $0x1ce0] ss:$8 sps:$4 sm:$0xff]  }
 0x404   : > { %9747 = vmatpush1.bf16.msra.mxu1 %v13416_v55  ;;  %9707 = vmatprep.subr.bf16.mxu0 %v13421_v56  ;;  %v13494_v55 = vld [vmem:[%s14479_s24 + $0x1de0] ss:$8 sps:$4 sm:$0xff]   ;;  %v13499_v56 = vld [vmem:[%s14479_s24 + $0x1cf4] ss:$8 sps:$4 sm:$0xff]  }
 0x405   : > { %9748 = vmatprep.subr.bf16.mxu1 %v13424_v57  ;;  %v13502_v57 = vld [vmem:[%s14479_s24 + $0x1df4] ss:$8 sps:$4 sm:$0xff]  }
 0x407   : > { %9708 = vmatpush1.bf16.msra.mxu0 %v13419_v58  ;;  %v13497_v58 = vld [vmem:[%s14479_s24 + $0x1cf0] ss:$8 sps:$4 sm:$0xff]  }
 0x408   : > { %9749 = vmatpush1.bf16.msra.mxu1 %v13422_v59  ;;  %9709 = vmatprep.subr.bf16.mxu0 %v13427_v60  ;;  %v13500_v59 = vld [vmem:[%s14479_s24 + $0x1df0] ss:$8 sps:$4 sm:$0xff]   ;;  %v377_v60 = vld [vmem:[#allocation3 + $0x1c0] sm:$0xff] }
 0x409   : > { %9750 = vmatprep.subr.bf16.mxu1 %v13430_v61  ;;  %v379_v61 = vld [vmem:[#allocation3 + $0x1d0] sm:$0xff] }
 0x40b   : > { %9710 = vmatpush1.bf16.msra.mxu0 %v13425_v62  ;;  %v13505_v62 = vld [vmem:[%s14479_s24 + $0x1e04] ss:$8 sps:$4 sm:$0xff]  }
 0x40c   : > { %9751 = vmatpush1.bf16.msra.mxu1 %v13428_v63  ;;  %9711 = vmatprep.subr.bf16.mxu0 %v13433_v2  ;;  %v13508_v63 = vld [vmem:[%s14479_s24 + $0x1f04] ss:$8 sps:$4 sm:$0xff]   ;;  %v461_v2 = vpack.c.bf16 %v377_v60, %v377_v60  ;;  %v13571_v60 = vld [vmem:[%s14479_s24 + $0x1eb4] ss:$8 sps:$4 sm:$0xff]  }
 0x40d   : > { %9752 = vmatprep.subr.bf16.mxu1 %v13436_v4  ;;  %v463_v4 = vpack.c.bf16 %v379_v61, %v379_v61  ;;  %v13574_v61 = vld [vmem:[%s14479_s24 + $0x1fb4] ss:$8 sps:$4 sm:$0xff]  }
 0x40f   : > { %9712 = vmatpush1.bf16.msra.mxu0 %v13431_v44  ;;  %v382_v44 = vld [vmem:[#allocation3 + $0x1e8] sm:$0xff] }
 0x410   : > { %9753 = vmatpush1.bf16.msra.mxu1 %v13434_v49  ;;  %9713 = vmatprep.subr.bf16.mxu0 %v13439_v46  ;;  %v384_v49 = vld [vmem:[#allocation3 + $0x1f8] sm:$0xff]  ;;  %v13503_v46 = vld [vmem:[%s14479_s24 + $0x1e00] ss:$8 sps:$4 sm:$0xff]  }
 0x411   : > { %9754 = vmatprep.subr.bf16.mxu1 %v13442_v8  ;;  %v9409_v12 = vpop.f32.mrb[40].mxu0  ;;  %v13506_v8 = vld [vmem:[%s14479_s24 + $0x1f00] ss:$8 sps:$4 sm:$0xff]  }
 0x412   : > { %v9450_v13 = vpop.f32.mrb[40].mxu1  ;;  %v9410_v14 = vadd.f32 %v9409_v12, %v15399_v0  ;;  %v9411_v15 = vpop.f32.mrb[41].mxu0  ;;  %v13451_v0 = vld [vmem:[%s14479_s24 + $0x1c74] ss:$8 sps:$4 sm:$0xff]   ;;  %v13509_v12 = vld [vmem:[%s14479_s24 + $0x1e10] ss:$8 sps:$4 sm:$0xff]  }
 0x413   : > { %v9452_v16 = vpop.f32.mrb[41].mxu1  ;;  %v9412_v17 = vadd.f32 %v9411_v15, %v15403_v7  ;;  %v9413_v18 = vpop.f32.mrb[42].mxu0  ;;  %9714 = vmatpush1.bf16.msra.mxu0 %v13437_v28  ;;  %v13454_v7 = vld [vmem:[%s14479_s24 + $0x1d74] ss:$8 sps:$4 sm:$0xff]   ;;  %v13520_v15 = vld [vmem:[%s14479_s24 + $0x1f24] ss:$8 sps:$4 sm:$0xff]  }
 0x414   : > { %v9454_v19 = vpop.f32.mrb[42].mxu1  ;;  %9755 = vmatpush1.bf16.msra.mxu1 %v13440_v9  ;;  %v15469_v22 = vadd.f32 %v9450_v13, %v9410_v14  ;;  %v9414_v23 = vpop.f32.mrb[43].mxu0  ;;  %9715 = vmatprep.subr.bf16.mxu0 %v13445_v52  ;;  %v13511_v28 = vld [vmem:[%s14479_s24 + $0x1e14] ss:$8 sps:$4 sm:$0xff]   ;;  %v466_v52 = vpack.c.bf16 %v382_v44, %v382_v44  ;;  %v13512_v13 = vld [vmem:[%s14479_s24 + $0x1f10] ss:$8 sps:$4 sm:$0xff]  }
 0x415   : > { %v9455_v25 = vpop.f32.mrb[43].mxu1  ;;  %9756 = vmatprep.subr.bf16.mxu1 %v13448_v11  ;;  %v15473_v27 = vadd.f32 %v9452_v16, %v9412_v17  ;;  %v13514_v9 = vld [vmem:[%s14479_s24 + $0x1f14] ss:$8 sps:$4 sm:$0xff]   ;;  %v468_v11 = vpack.c.bf16 %v384_v49, %v384_v49  ;;  %v13517_v14 = vld [vmem:[%s14479_s24 + $0x1e24] ss:$8 sps:$4 sm:$0xff]  }
 0x416   : > { %v13515_v16 = vld [vmem:[%s14479_s24 + $0x1e20] ss:$8 sps:$4 sm:$0xff]   ;;  %v13523_v18 = vld [vmem:[%s14479_s24 + $0x1e34] ss:$8 sps:$4 sm:$0xff]   ;;  %v13529_v23 = vld [vmem:[%s14479_s24 + $0x1e44] ss:$8 sps:$4 sm:$0xff]  }
 0x417   : > { %9716 = vmatpush1.bf16.msra.mxu0 %v13443_v20  ;;  %v13518_v17 = vld [vmem:[%s14479_s24 + $0x1f20] ss:$8 sps:$4 sm:$0xff]   ;;  %v13526_v19 = vld [vmem:[%s14479_s24 + $0x1f34] ss:$8 sps:$4 sm:$0xff]   ;;  %v13521_v20 = vld [vmem:[%s14479_s24 + $0x1e30] ss:$8 sps:$4 sm:$0xff]  }
 0x418   : > { %9757 = vmatpush1.bf16.msra.mxu1 %v13446_v21  ;;  %9717 = vmatprep.subr.bf16.mxu0 %v13451_v0  ;;  %v13524_v21 = vld [vmem:[%s14479_s24 + $0x1f30] ss:$8 sps:$4 sm:$0xff]   ;;  %v13532_v25 = vld [vmem:[%s14479_s24 + $0x1f44] ss:$8 sps:$4 sm:$0xff]   ;;  %v13527_v0 = vld [vmem:[%s14479_s24 + $0x1e40] ss:$8 sps:$4 sm:$0xff]  }
 0x419   : > { %9758 = vmatprep.subr.bf16.mxu1 %v13454_v7  ;;  %v13530_v7 = vld [vmem:[%s14479_s24 + $0x1f40] ss:$8 sps:$4 sm:$0xff]  }
 0x41a   : > { %v13575_v44 = vld [vmem:[%s14479_s24 + $0x1ec0] ss:$8 sps:$4 sm:$0xff]  }
 0x41b   : > { %9718 = vmatpush1.bf16.msra.mxu0 %v13449_v3  ;;  %v13535_v3 = vld [vmem:[%s14479_s24 + $0x1e54] ss:$8 sps:$4 sm:$0xff]   ;;  %v13578_v49 = vld [vmem:[%s14479_s24 + $0x1fc0] ss:$8 sps:$4 sm:$0xff]  }
 0x41c   : > { %9759 = vmatpush1.bf16.msra.mxu1 %v13452_v29  ;;  %9719 = vmatprep.subr.bf16.mxu0 %v13457_v48  ;;  %v13538_v29 = vld [vmem:[%s14479_s24 + $0x1f54] ss:$8 sps:$4 sm:$0xff]   ;;  %v13533_v48 = vld [vmem:[%s14479_s24 + $0x1e50] ss:$8 sps:$4 sm:$0xff]  }
 0x41d   : > { %9760 = vmatprep.subr.bf16.mxu1 %v13460_v30  ;;  %v13536_v30 = vld [vmem:[%s14479_s24 + $0x1f50] ss:$8 sps:$4 sm:$0xff]  }
 0x41f   : > { %9720 = vmatpush1.bf16.msra.mxu0 %v13455_v10  ;;  %v13541_v10 = vld [vmem:[%s14479_s24 + $0x1e64] ss:$8 sps:$4 sm:$0xff]  }
 0x420   : > { %9761 = vmatpush1.bf16.msra.mxu1 %v13458_v31  ;;  %9721 = vmatprep.subr.bf16.mxu0 %v13463_v5  ;;  %v13544_v31 = vld [vmem:[%s14479_s24 + $0x1f64] ss:$8 sps:$4 sm:$0xff]  }
 0x421   : > { %9762 = vmatprep.subr.bf16.mxu1 %v13466_v33 }
 0x423   : > { %9722 = vmatpush1.bf16.msra.mxu0 %v13461_v34 }
 0x424   : > { %9763 = vmatpush1.bf16.msra.mxu1 %v13464_v35  ;;  %9723 = vmatprep.subr.bf16.mxu0 %v13469_v36 }
 0x425   : > { %9764 = vmatprep.subr.bf16.mxu1 %v13472_v37 }
 0x427   : > { %9724 = vmatpush1.bf16.msra.mxu0 %v13467_v38 }
 0x428   : > { %9765 = vmatpush1.bf16.msra.mxu1 %v13470_v39  ;;  %9725 = vmatprep.subr.bf16.mxu0 %v13475_v40  ;;  %v13539_v40 = vld [vmem:[%s14479_s24 + $0x1e60] ss:$8 sps:$4 sm:$0xff]  }
 0x429   : > { %9766 = vmatprep.subr.bf16.mxu1 %v13478_v41  ;;  %v13542_v41 = vld [vmem:[%s14479_s24 + $0x1f60] ss:$8 sps:$4 sm:$0xff]  }
 0x42b   : > { %9726 = vmatpush1.bf16.msra.mxu0 %v13473_v42 }
 0x42c   : > { %9767 = vmatpush1.bf16.msra.mxu1 %v13476_v43  ;;  %9727 = vmatprep.subr.bf16.mxu0 %v13481_v45 }
 0x42d   : > { %9768 = vmatprep.subr.bf16.mxu1 %v13484_v47 }
 0x42f   : > { %9728 = vmatpush1.bf16.msra.mxu0 %v13479_v24  ;;  %v13545_v24 = vld [vmem:[%s14479_s24 + $0x1e70] ss:$8 sps:$4 sm:$0xff]  }
 0x430   : > { %9769 = vmatpush1.bf16.msra.mxu1 %v13482_v6  ;;  %9729 = vmatprep.subr.bf16.mxu0 %v13487_v26  ;;  %v13548_v6 = vld [vmem:[%s14479_s24 + $0x1f70] ss:$8 sps:$4 sm:$0xff]   ;;  %v13553_v26 = vld [vmem:[%s14479_s24 + $0x1e84] ss:$8 sps:$4 sm:$0xff]  }
 0x431   : > { %9770 = vmatprep.subr.bf16.mxu1 %v13490_v50  ;;  %v13556_v50 = vld [vmem:[%s14479_s24 + $0x1f84] ss:$8 sps:$4 sm:$0xff]  }
 0x433   : > { %9730 = vmatpush1.bf16.msra.mxu0 %v13485_v1  ;;  %v13551_v1 = vld [vmem:[%s14479_s24 + $0x1e80] ss:$8 sps:$4 sm:$0xff]  }
 0x434   : > { %9771 = vmatpush1.bf16.msra.mxu1 %v13488_v51  ;;  %9731 = vmatprep.subr.bf16.mxu0 %v13493_v32  ;;  %v13554_v51 = vld [vmem:[%s14479_s24 + $0x1f80] ss:$8 sps:$4 sm:$0xff]   ;;  %v13559_v32 = vld [vmem:[%s14479_s24 + $0x1e94] ss:$8 sps:$4 sm:$0xff]  }
 0x435   : > { %9772 = vmatprep.subr.bf16.mxu1 %v13496_v53  ;;  %v13562_v53 = vld [vmem:[%s14479_s24 + $0x1f94] ss:$8 sps:$4 sm:$0xff]  }
 0x437   : > { %9732 = vmatpush1.bf16.msra.mxu0 %v13491_v54  ;;  %v13557_v54 = vld [vmem:[%s14479_s24 + $0x1e90] ss:$8 sps:$4 sm:$0xff]  }
 0x438   : > { %9773 = vmatpush1.bf16.msra.mxu1 %v13494_v55  ;;  %9733 = vmatprep.subr.bf16.mxu0 %v13499_v56  ;;  %v13560_v55 = vld [vmem:[%s14479_s24 + $0x1f90] ss:$8 sps:$4 sm:$0xff]   ;;  %v13565_v56 = vld [vmem:[%s14479_s24 + $0x1ea4] ss:$8 sps:$4 sm:$0xff]  }
 0x439   : > { %9774 = vmatprep.subr.bf16.mxu1 %v13502_v57  ;;  %v13568_v57 = vld [vmem:[%s14479_s24 + $0x1fa4] ss:$8 sps:$4 sm:$0xff]  }
 0x43b   : > { %9734 = vmatpush1.bf16.msra.mxu0 %v13497_v58  ;;  %v13563_v58 = vld [vmem:[%s14479_s24 + $0x1ea0] ss:$8 sps:$4 sm:$0xff]  }
 0x43c   : > { %9775 = vmatpush1.bf16.msra.mxu1 %v13500_v59  ;;  %9785 = vmatprep.subr.bf16.mxu0 %v13505_v62  ;;  %v13566_v59 = vld [vmem:[%s14479_s24 + $0x1fa0] ss:$8 sps:$4 sm:$0xff]   ;;  %v13569_v62 = vld [vmem:[%s14479_s24 + $0x1eb0] ss:$8 sps:$4 sm:$0xff]  }
 0x43d   : > { %9826 = vmatprep.subr.bf16.mxu1 %v13508_v63  ;;  %v13572_v63 = vld [vmem:[%s14479_s24 + $0x1fb0] ss:$8 sps:$4 sm:$0xff]  }
 0x43e   : > { %9736 = vmatmul.mubr.bf16.vlgmr.msra.gmra.mrb[56].mxu0 %v461_v2  ;;  %v13577_v2 = vld [vmem:[%s14479_s24 + $0x1ec4] ss:$8 sps:$4 sm:$0xff]  }
 0x43f   : > { %9777 = vmatmul.mubr.bf16.vlgmr.msra.gmra.mrb[56].mxu1 %v463_v4  ;;  %9786 = vmatpush1.bf16.msra.mxu0 %v13503_v46  ;;  %v13580_v4 = vld [vmem:[%s14479_s24 + $0x1fc4] ss:$8 sps:$4 sm:$0xff]   ;;  %v13583_v46 = vld [vmem:[%s14479_s24 + $0x1ed4] ss:$8 sps:$4 sm:$0xff]  }
 0x440   : > { %9827 = vmatpush1.bf16.msra.mxu1 %v13506_v8  ;;  %9787 = vmatprep.subr.bf16.mxu0 %v13511_v28  ;;  %v13586_v8 = vld [vmem:[%s14479_s24 + $0x1fd4] ss:$8 sps:$4 sm:$0xff]   ;;  %v13581_v28 = vld [vmem:[%s14479_s24 + $0x1ed0] ss:$8 sps:$4 sm:$0xff]  }
 0x441   : > { %9828 = vmatprep.subr.bf16.mxu1 %v13514_v9  ;;  %9817 = vmatprep.mubr.bf16.mxu0 %v466_v52  ;;  %v13584_v9 = vld [vmem:[%s14479_s24 + $0x1fd0] ss:$8 sps:$4 sm:$0xff]   ;;  %v13589_v52 = vld [vmem:[%s14479_s24 + $0x1ee4] ss:$8 sps:$4 sm:$0xff]  }
 0x442   : > { %9858 = vmatprep.mubr.bf16.mxu1 %v468_v11  ;;  %v13592_v11 = vld [vmem:[%s14479_s24 + $0x1fe4] ss:$8 sps:$4 sm:$0xff]  }
 0x443   : > { %9788 = vmatpush1.bf16.msra.mxu0 %v13509_v12  ;;  %v13587_v12 = vld [vmem:[%s14479_s24 + $0x1ee0] ss:$8 sps:$4 sm:$0xff]  }
 0x444   : > { %9829 = vmatpush1.bf16.msra.mxu1 %v13512_v13  ;;  %9789 = vmatprep.subr.bf16.mxu0 %v13517_v14  ;;  %v13590_v13 = vld [vmem:[%s14479_s24 + $0x1fe0] ss:$8 sps:$4 sm:$0xff]   ;;  %v13595_v14 = vld [vmem:[%s14479_s24 + $0x1ef4] ss:$8 sps:$4 sm:$0xff]  }
 0x445   : > { %9830 = vmatprep.subr.bf16.mxu1 %v13520_v15  ;;  %v13598_v15 = vld [vmem:[%s14479_s24 + $0x1ff4] ss:$8 sps:$4 sm:$0xff]  }
 0x447   : > { %9790 = vmatpush1.bf16.msra.mxu0 %v13515_v16  ;;  %v13593_v16 = vld [vmem:[%s14479_s24 + $0x1ef0] ss:$8 sps:$4 sm:$0xff]  }
 0x448   : > { %9831 = vmatpush1.bf16.msra.mxu1 %v13518_v17  ;;  %9791 = vmatprep.subr.bf16.mxu0 %v13523_v18  ;;  %v13596_v17 = vld [vmem:[%s14479_s24 + $0x1ff0] ss:$8 sps:$4 sm:$0xff]   ;;  %v381_v18 = vld [vmem:[#allocation3 + $0x1e0] sm:$0xff] }
 0x449   : > { %9832 = vmatprep.subr.bf16.mxu1 %v13526_v19  ;;  %v383_v19 = vld [vmem:[#allocation3 + $0x1f0] sm:$0xff] }
 0x44b   : > { %9792 = vmatpush1.bf16.msra.mxu0 %v13521_v20  ;;  %v13601_v20 = vld [vmem:[%s14479_s24 + $0x2004] ss:$8 sps:$4 sm:$0xff]  }
 0x44c   : > { %9833 = vmatpush1.bf16.msra.mxu1 %v13524_v21  ;;  %9793 = vmatprep.subr.bf16.mxu0 %v13529_v23  ;;  %v13604_v21 = vld [vmem:[%s14479_s24 + $0x2104] ss:$8 sps:$4 sm:$0xff]   ;;  %v465_v23 = vpack.c.bf16 %v381_v18, %v381_v18  ;;  %v13667_v18 = vld [vmem:[%s14479_s24 + $0x20b4] ss:$8 sps:$4 sm:$0xff]  }
 0x44d   : > { %9834 = vmatprep.subr.bf16.mxu1 %v13532_v25  ;;  %v467_v25 = vpack.c.bf16 %v383_v19, %v383_v19  ;;  %v13670_v19 = vld [vmem:[%s14479_s24 + $0x21b4] ss:$8 sps:$4 sm:$0xff]  }
 0x44f   : > { %9794 = vmatpush1.bf16.msra.mxu0 %v13527_v0  ;;  %v386_v0 = vld [vmem:[#allocation3 + $0x208] sm:$0xff] }
 0x450   : > { %9835 = vmatpush1.bf16.msra.mxu1 %v13530_v7  ;;  %9795 = vmatprep.subr.bf16.mxu0 %v13535_v3  ;;  %v388_v7 = vld [vmem:[#allocation3 + $0x218] sm:$0xff]  ;;  %v13599_v3 = vld [vmem:[%s14479_s24 + $0x2000] ss:$8 sps:$4 sm:$0xff]  }
 0x451   : > { %9836 = vmatprep.subr.bf16.mxu1 %v13538_v29  ;;  %v9491_v5 = vpop.f32.mrb[44].mxu0  ;;  %v13602_v29 = vld [vmem:[%s14479_s24 + $0x2100] ss:$8 sps:$4 sm:$0xff]  }
 0x452   : > { %v9532_v33 = vpop.f32.mrb[44].mxu1  ;;  %v9492_v34 = vadd.f32 %v9491_v5, %v15469_v22  ;;  %v9493_v35 = vpop.f32.mrb[45].mxu0  ;;  %v13547_v22 = vld [vmem:[%s14479_s24 + $0x1e74] ss:$8 sps:$4 sm:$0xff]   ;;  %v13605_v5 = vld [vmem:[%s14479_s24 + $0x2010] ss:$8 sps:$4 sm:$0xff]  }
 0x453   : > { %v9534_v36 = vpop.f32.mrb[45].mxu1  ;;  %v9494_v37 = vadd.f32 %v9493_v35, %v15473_v27  ;;  %v9495_v38 = vpop.f32.mrb[46].mxu0  ;;  %9796 = vmatpush1.bf16.msra.mxu0 %v13533_v48  ;;  %v13550_v27 = vld [vmem:[%s14479_s24 + $0x1f74] ss:$8 sps:$4 sm:$0xff]   ;;  %v13616_v35 = vld [vmem:[%s14479_s24 + $0x2124] ss:$8 sps:$4 sm:$0xff]  }
 0x454   : > { %v9536_v39 = vpop.f32.mrb[46].mxu1  ;;  %9837 = vmatpush1.bf16.msra.mxu1 %v13536_v30  ;;  %v15539_v42 = vadd.f32 %v9532_v33, %v9492_v34  ;;  %v9496_v43 = vpop.f32.mrb[47].mxu0  ;;  %9797 = vmatprep.subr.bf16.mxu0 %v13541_v10  ;;  %v13607_v48 = vld [vmem:[%s14479_s24 + $0x2014] ss:$8 sps:$4 sm:$0xff]   ;;  %v470_v10 = vpack.c.bf16 %v386_v0, %v386_v0  ;;  %v13608_v33 = vld [vmem:[%s14479_s24 + $0x2110] ss:$8 sps:$4 sm:$0xff]  }
 0x455   : > { %v9537_v45 = vpop.f32.mrb[47].mxu1  ;;  %9838 = vmatprep.subr.bf16.mxu1 %v13544_v31  ;;  %v15543_v47 = vadd.f32 %v9534_v36, %v9494_v37  ;;  %v13610_v30 = vld [vmem:[%s14479_s24 + $0x2114] ss:$8 sps:$4 sm:$0xff]   ;;  %v472_v31 = vpack.c.bf16 %v388_v7, %v388_v7  ;;  %v13613_v34 = vld [vmem:[%s14479_s24 + $0x2024] ss:$8 sps:$4 sm:$0xff]  }
 0x456   : > { %v13611_v36 = vld [vmem:[%s14479_s24 + $0x2020] ss:$8 sps:$4 sm:$0xff]   ;;  %v13619_v38 = vld [vmem:[%s14479_s24 + $0x2034] ss:$8 sps:$4 sm:$0xff]   ;;  %v13625_v43 = vld [vmem:[%s14479_s24 + $0x2044] ss:$8 sps:$4 sm:$0xff]  }
 0x457   : > { %9798 = vmatpush1.bf16.msra.mxu0 %v13539_v40  ;;  %v13614_v37 = vld [vmem:[%s14479_s24 + $0x2120] ss:$8 sps:$4 sm:$0xff]   ;;  %v13622_v39 = vld [vmem:[%s14479_s24 + $0x2134] ss:$8 sps:$4 sm:$0xff]   ;;  %v13617_v40 = vld [vmem:[%s14479_s24 + $0x2030] ss:$8 sps:$4 sm:$0xff]  }
 0x458   : > { %9839 = vmatpush1.bf16.msra.mxu1 %v13542_v41  ;;  %9799 = vmatprep.subr.bf16.mxu0 %v13547_v22  ;;  %v13620_v41 = vld [vmem:[%s14479_s24 + $0x2130] ss:$8 sps:$4 sm:$0xff]   ;;  %v13628_v45 = vld [vmem:[%s14479_s24 + $0x2144] ss:$8 sps:$4 sm:$0xff]   ;;  %v13623_v22 = vld [vmem:[%s14479_s24 + $0x2040] ss:$8 sps:$4 sm:$0xff]  }
 0x459   : > { %9840 = vmatprep.subr.bf16.mxu1 %v13550_v27  ;;  %v13626_v27 = vld [vmem:[%s14479_s24 + $0x2140] ss:$8 sps:$4 sm:$0xff]  }
 0x45a   : > { %v13671_v0 = vld [vmem:[%s14479_s24 + $0x20c0] ss:$8 sps:$4 sm:$0xff]  }
 0x45b   : > { %9800 = vmatpush1.bf16.msra.mxu0 %v13545_v24  ;;  %v13631_v24 = vld [vmem:[%s14479_s24 + $0x2054] ss:$8 sps:$4 sm:$0xff]   ;;  %v13674_v7 = vld [vmem:[%s14479_s24 + $0x21c0] ss:$8 sps:$4 sm:$0xff]  }
 0x45c   : > { %9841 = vmatpush1.bf16.msra.mxu1 %v13548_v6  ;;  %9801 = vmatprep.subr.bf16.mxu0 %v13553_v26  ;;  %v13634_v6 = vld [vmem:[%s14479_s24 + $0x2154] ss:$8 sps:$4 sm:$0xff]   ;;  %v13629_v26 = vld [vmem:[%s14479_s24 + $0x2050] ss:$8 sps:$4 sm:$0xff]  }
 0x45d   : > { %9842 = vmatprep.subr.bf16.mxu1 %v13556_v50  ;;  %v13632_v50 = vld [vmem:[%s14479_s24 + $0x2150] ss:$8 sps:$4 sm:$0xff]  }
 0x45f   : > { %9802 = vmatpush1.bf16.msra.mxu0 %v13551_v1  ;;  %v13637_v1 = vld [vmem:[%s14479_s24 + $0x2064] ss:$8 sps:$4 sm:$0xff]  }
 0x460   : > { %9843 = vmatpush1.bf16.msra.mxu1 %v13554_v51  ;;  %9803 = vmatprep.subr.bf16.mxu0 %v13559_v32  ;;  %v13640_v51 = vld [vmem:[%s14479_s24 + $0x2164] ss:$8 sps:$4 sm:$0xff]  }
 0x461   : > { %9844 = vmatprep.subr.bf16.mxu1 %v13562_v53 }
 0x463   : > { %9804 = vmatpush1.bf16.msra.mxu0 %v13557_v54 }
 0x464   : > { %9845 = vmatpush1.bf16.msra.mxu1 %v13560_v55  ;;  %9805 = vmatprep.subr.bf16.mxu0 %v13565_v56 }
 0x465   : > { %9846 = vmatprep.subr.bf16.mxu1 %v13568_v57 }
 0x467   : > { %9806 = vmatpush1.bf16.msra.mxu0 %v13563_v58 }
 0x468   : > { %9847 = vmatpush1.bf16.msra.mxu1 %v13566_v59  ;;  %9807 = vmatprep.subr.bf16.mxu0 %v13571_v60  ;;  %v13635_v60 = vld [vmem:[%s14479_s24 + $0x2060] ss:$8 sps:$4 sm:$0xff]  }
 0x469   : > { %9848 = vmatprep.subr.bf16.mxu1 %v13574_v61  ;;  %v13638_v61 = vld [vmem:[%s14479_s24 + $0x2160] ss:$8 sps:$4 sm:$0xff]  }
 0x46b   : > { %9808 = vmatpush1.bf16.msra.mxu0 %v13569_v62 }
 0x46c   : > { %9849 = vmatpush1.bf16.msra.mxu1 %v13572_v63  ;;  %9809 = vmatprep.subr.bf16.mxu0 %v13577_v2 }
 0x46d   : > { %9850 = vmatprep.subr.bf16.mxu1 %v13580_v4 }
 0x46f   : > { %9810 = vmatpush1.bf16.msra.mxu0 %v13575_v44  ;;  %v13641_v44 = vld [vmem:[%s14479_s24 + $0x2070] ss:$8 sps:$4 sm:$0xff]  }
 0x470   : > { %9851 = vmatpush1.bf16.msra.mxu1 %v13578_v49  ;;  %9811 = vmatprep.subr.bf16.mxu0 %v13583_v46  ;;  %v13644_v49 = vld [vmem:[%s14479_s24 + $0x2170] ss:$8 sps:$4 sm:$0xff]   ;;  %v13649_v46 = vld [vmem:[%s14479_s24 + $0x2084] ss:$8 sps:$4 sm:$0xff]  }
 0x471   : > { %9852 = vmatprep.subr.bf16.mxu1 %v13586_v8  ;;  %v13652_v8 = vld [vmem:[%s14479_s24 + $0x2184] ss:$8 sps:$4 sm:$0xff]  }
 0x473   : > { %9812 = vmatpush1.bf16.msra.mxu0 %v13581_v28  ;;  %v13647_v28 = vld [vmem:[%s14479_s24 + $0x2080] ss:$8 sps:$4 sm:$0xff]  }
 0x474   : > { %9853 = vmatpush1.bf16.msra.mxu1 %v13584_v9  ;;  %9813 = vmatprep.subr.bf16.mxu0 %v13589_v52  ;;  %v13650_v9 = vld [vmem:[%s14479_s24 + $0x2180] ss:$8 sps:$4 sm:$0xff]   ;;  %v13655_v52 = vld [vmem:[%s14479_s24 + $0x2094] ss:$8 sps:$4 sm:$0xff]  }
 0x475   : > { %9854 = vmatprep.subr.bf16.mxu1 %v13592_v11  ;;  %v13658_v11 = vld [vmem:[%s14479_s24 + $0x2194] ss:$8 sps:$4 sm:$0xff]  }
 0x477   : > { %9814 = vmatpush1.bf16.msra.mxu0 %v13587_v12  ;;  %v13653_v12 = vld [vmem:[%s14479_s24 + $0x2090] ss:$8 sps:$4 sm:$0xff]  }
 0x478   : > { %9855 = vmatpush1.bf16.msra.mxu1 %v13590_v13  ;;  %9815 = vmatprep.subr.bf16.mxu0 %v13595_v14  ;;  %v13656_v13 = vld [vmem:[%s14479_s24 + $0x2190] ss:$8 sps:$4 sm:$0xff]   ;;  %v13661_v14 = vld [vmem:[%s14479_s24 + $0x20a4] ss:$8 sps:$4 sm:$0xff]  }
 0x479   : > { %9856 = vmatprep.subr.bf16.mxu1 %v13598_v15  ;;  %v13664_v15 = vld [vmem:[%s14479_s24 + $0x21a4] ss:$8 sps:$4 sm:$0xff]  }
 0x47b   : > { %9816 = vmatpush1.bf16.msra.mxu0 %v13593_v16  ;;  %v13659_v16 = vld [vmem:[%s14479_s24 + $0x20a0] ss:$8 sps:$4 sm:$0xff]  }
 0x47c   : > { %9857 = vmatpush1.bf16.msra.mxu1 %v13596_v17  ;;  %9867 = vmatprep.subr.bf16.mxu0 %v13601_v20  ;;  %v13662_v17 = vld [vmem:[%s14479_s24 + $0x21a0] ss:$8 sps:$4 sm:$0xff]   ;;  %v13665_v20 = vld [vmem:[%s14479_s24 + $0x20b0] ss:$8 sps:$4 sm:$0xff]  }
 0x47d   : > { %9908 = vmatprep.subr.bf16.mxu1 %v13604_v21  ;;  %v13668_v21 = vld [vmem:[%s14479_s24 + $0x21b0] ss:$8 sps:$4 sm:$0xff]  }
 0x47e   : > { %9818 = vmatmul.mubr.bf16.vlgmr.msra.gmra.mrb[60].mxu0 %v465_v23  ;;  %v13673_v23 = vld [vmem:[%s14479_s24 + $0x20c4] ss:$8 sps:$4 sm:$0xff]  }
 0x47f   : > { %9859 = vmatmul.mubr.bf16.vlgmr.msra.gmra.mrb[60].mxu1 %v467_v25  ;;  %9868 = vmatpush1.bf16.msra.mxu0 %v13599_v3  ;;  %v13676_v25 = vld [vmem:[%s14479_s24 + $0x21c4] ss:$8 sps:$4 sm:$0xff]   ;;  %v13679_v3 = vld [vmem:[%s14479_s24 + $0x20d4] ss:$8 sps:$4 sm:$0xff]  }
 0x480   : > { %9909 = vmatpush1.bf16.msra.mxu1 %v13602_v29  ;;  %9869 = vmatprep.subr.bf16.mxu0 %v13607_v48  ;;  %v13682_v29 = vld [vmem:[%s14479_s24 + $0x21d4] ss:$8 sps:$4 sm:$0xff]   ;;  %v13677_v48 = vld [vmem:[%s14479_s24 + $0x20d0] ss:$8 sps:$4 sm:$0xff]  }
 0x481   : > { %9910 = vmatprep.subr.bf16.mxu1 %v13610_v30  ;;  %9899 = vmatprep.mubr.bf16.mxu0 %v470_v10  ;;  %v13680_v30 = vld [vmem:[%s14479_s24 + $0x21d0] ss:$8 sps:$4 sm:$0xff]   ;;  %v13685_v10 = vld [vmem:[%s14479_s24 + $0x20e4] ss:$8 sps:$4 sm:$0xff]  }
 0x482   : > { %9940 = vmatprep.mubr.bf16.mxu1 %v472_v31  ;;  %v13688_v31 = vld [vmem:[%s14479_s24 + $0x21e4] ss:$8 sps:$4 sm:$0xff]  }
 0x483   : > { %9870 = vmatpush1.bf16.msra.mxu0 %v13605_v5  ;;  %v13683_v5 = vld [vmem:[%s14479_s24 + $0x20e0] ss:$8 sps:$4 sm:$0xff]  }
 0x484   : > { %9911 = vmatpush1.bf16.msra.mxu1 %v13608_v33  ;;  %9871 = vmatprep.subr.bf16.mxu0 %v13613_v34  ;;  %v13686_v33 = vld [vmem:[%s14479_s24 + $0x21e0] ss:$8 sps:$4 sm:$0xff]   ;;  %v13691_v34 = vld [vmem:[%s14479_s24 + $0x20f4] ss:$8 sps:$4 sm:$0xff]  }
 0x485   : > { %9912 = vmatprep.subr.bf16.mxu1 %v13616_v35  ;;  %v13694_v35 = vld [vmem:[%s14479_s24 + $0x21f4] ss:$8 sps:$4 sm:$0xff]  }
 0x487   : > { %9872 = vmatpush1.bf16.msra.mxu0 %v13611_v36  ;;  %v13689_v36 = vld [vmem:[%s14479_s24 + $0x20f0] ss:$8 sps:$4 sm:$0xff]  }
 0x488   : > { %9913 = vmatpush1.bf16.msra.mxu1 %v13614_v37  ;;  %9873 = vmatprep.subr.bf16.mxu0 %v13619_v38  ;;  %v13692_v37 = vld [vmem:[%s14479_s24 + $0x21f0] ss:$8 sps:$4 sm:$0xff]   ;;  %v385_v38 = vld [vmem:[#allocation3 + $0x200] sm:$0xff] }
 0x489   : > { %9914 = vmatprep.subr.bf16.mxu1 %v13622_v39  ;;  %v387_v39 = vld [vmem:[#allocation3 + $0x210] sm:$0xff] }
 0x48b   : > { %9874 = vmatpush1.bf16.msra.mxu0 %v13617_v40  ;;  %v13697_v40 = vld [vmem:[%s14479_s24 + $0x2204] ss:$8 sps:$4 sm:$0xff]  }
 0x48c   : > { %9915 = vmatpush1.bf16.msra.mxu1 %v13620_v41  ;;  %9875 = vmatprep.subr.bf16.mxu0 %v13625_v43  ;;  %v13700_v41 = vld [vmem:[%s14479_s24 + $0x2304] ss:$8 sps:$4 sm:$0xff]   ;;  %v469_v43 = vpack.c.bf16 %v385_v38, %v385_v38  ;;  %v13763_v38 = vld [vmem:[%s14479_s24 + $0x22b4] ss:$8 sps:$4 sm:$0xff]  }
 0x48d   : > { %9916 = vmatprep.subr.bf16.mxu1 %v13628_v45  ;;  %v471_v45 = vpack.c.bf16 %v387_v39, %v387_v39  ;;  %v13766_v39 = vld [vmem:[%s14479_s24 + $0x23b4] ss:$8 sps:$4 sm:$0xff]  }
 0x48f   : > { %9876 = vmatpush1.bf16.msra.mxu0 %v13623_v22  ;;  %v390_v22 = vld [vmem:[#allocation3 + $0x228] sm:$0xff] }
 0x490   : > { %9917 = vmatpush1.bf16.msra.mxu1 %v13626_v27  ;;  %9877 = vmatprep.subr.bf16.mxu0 %v13631_v24  ;;  %v392_v27 = vld [vmem:[#allocation3 + $0x238] sm:$0xff]  ;;  %v13695_v24 = vld [vmem:[%s14479_s24 + $0x2200] ss:$8 sps:$4 sm:$0xff]  }
 0x491   : > { %9918 = vmatprep.subr.bf16.mxu1 %v13634_v6  ;;  %v9573_v32 = vpop.f32.mrb[48].mxu0  ;;  %v13698_v6 = vld [vmem:[%s14479_s24 + $0x2300] ss:$8 sps:$4 sm:$0xff]  }
 0x492   : > { %v9614_v53 = vpop.f32.mrb[48].mxu1  ;;  %v9574_v54 = vadd.f32 %v9573_v32, %v15539_v42  ;;  %v9575_v55 = vpop.f32.mrb[49].mxu0  ;;  %v13643_v42 = vld [vmem:[%s14479_s24 + $0x2074] ss:$8 sps:$4 sm:$0xff]   ;;  %v13701_v32 = vld [vmem:[%s14479_s24 + $0x2210] ss:$8 sps:$4 sm:$0xff]  }
 0x493   : > { %v9616_v56 = vpop.f32.mrb[49].mxu1  ;;  %v9576_v57 = vadd.f32 %v9575_v55, %v15543_v47  ;;  %v9577_v58 = vpop.f32.mrb[50].mxu0  ;;  %9878 = vmatpush1.bf16.msra.mxu0 %v13629_v26  ;;  %v13646_v47 = vld [vmem:[%s14479_s24 + $0x2174] ss:$8 sps:$4 sm:$0xff]   ;;  %v13712_v55 = vld [vmem:[%s14479_s24 + $0x2324] ss:$8 sps:$4 sm:$0xff]  }
 0x494   : > { %v9618_v59 = vpop.f32.mrb[50].mxu1  ;;  %9919 = vmatpush1.bf16.msra.mxu1 %v13632_v50  ;;  %v15609_v62 = vadd.f32 %v9614_v53, %v9574_v54  ;;  %v9578_v63 = vpop.f32.mrb[51].mxu0  ;;  %9879 = vmatprep.subr.bf16.mxu0 %v13637_v1  ;;  %v13703_v26 = vld [vmem:[%s14479_s24 + $0x2214] ss:$8 sps:$4 sm:$0xff]   ;;  %v474_v1 = vpack.c.bf16 %v390_v22, %v390_v22  ;;  %v13704_v53 = vld [vmem:[%s14479_s24 + $0x2310] ss:$8 sps:$4 sm:$0xff]  }
 0x495   : > { %v9619_v2 = vpop.f32.mrb[51].mxu1  ;;  %9920 = vmatprep.subr.bf16.mxu1 %v13640_v51  ;;  %v15613_v4 = vadd.f32 %v9616_v56, %v9576_v57  ;;  %v13706_v50 = vld [vmem:[%s14479_s24 + $0x2314] ss:$8 sps:$4 sm:$0xff]   ;;  %v476_v51 = vpack.c.bf16 %v392_v27, %v392_v27  ;;  %v13709_v54 = vld [vmem:[%s14479_s24 + $0x2224] ss:$8 sps:$4 sm:$0xff]  }
 0x496   : > { %v13707_v56 = vld [vmem:[%s14479_s24 + $0x2220] ss:$8 sps:$4 sm:$0xff]   ;;  %v13715_v58 = vld [vmem:[%s14479_s24 + $0x2234] ss:$8 sps:$4 sm:$0xff]   ;;  %v13721_v63 = vld [vmem:[%s14479_s24 + $0x2244] ss:$8 sps:$4 sm:$0xff]  }
 0x497   : > { %9880 = vmatpush1.bf16.msra.mxu0 %v13635_v60  ;;  %v13710_v57 = vld [vmem:[%s14479_s24 + $0x2320] ss:$8 sps:$4 sm:$0xff]   ;;  %v13718_v59 = vld [vmem:[%s14479_s24 + $0x2334] ss:$8 sps:$4 sm:$0xff]   ;;  %v13713_v60 = vld [vmem:[%s14479_s24 + $0x2230] ss:$8 sps:$4 sm:$0xff]  }
 0x498   : > { %9921 = vmatpush1.bf16.msra.mxu1 %v13638_v61  ;;  %9881 = vmatprep.subr.bf16.mxu0 %v13643_v42  ;;  %v13716_v61 = vld [vmem:[%s14479_s24 + $0x2330] ss:$8 sps:$4 sm:$0xff]   ;;  %v13724_v2 = vld [vmem:[%s14479_s24 + $0x2344] ss:$8 sps:$4 sm:$0xff]   ;;  %v13719_v42 = vld [vmem:[%s14479_s24 + $0x2240] ss:$8 sps:$4 sm:$0xff]  }
 0x499   : > { %9922 = vmatprep.subr.bf16.mxu1 %v13646_v47  ;;  %v13722_v47 = vld [vmem:[%s14479_s24 + $0x2340] ss:$8 sps:$4 sm:$0xff]  }
 0x49a   : > { %v13767_v22 = vld [vmem:[%s14479_s24 + $0x22c0] ss:$8 sps:$4 sm:$0xff]  }
 0x49b   : > { %9882 = vmatpush1.bf16.msra.mxu0 %v13641_v44  ;;  %v13727_v44 = vld [vmem:[%s14479_s24 + $0x2254] ss:$8 sps:$4 sm:$0xff]   ;;  %v13770_v27 = vld [vmem:[%s14479_s24 + $0x23c0] ss:$8 sps:$4 sm:$0xff]  }
 0x49c   : > { %9923 = vmatpush1.bf16.msra.mxu1 %v13644_v49  ;;  %9883 = vmatprep.subr.bf16.mxu0 %v13649_v46  ;;  %v13730_v49 = vld [vmem:[%s14479_s24 + $0x2354] ss:$8 sps:$4 sm:$0xff]   ;;  %v13725_v46 = vld [vmem:[%s14479_s24 + $0x2250] ss:$8 sps:$4 sm:$0xff]  }
 0x49d   : > { %9924 = vmatprep.subr.bf16.mxu1 %v13652_v8  ;;  %v13728_v8 = vld [vmem:[%s14479_s24 + $0x2350] ss:$8 sps:$4 sm:$0xff]  }
 0x49f   : > { %9884 = vmatpush1.bf16.msra.mxu0 %v13647_v28  ;;  %v13733_v28 = vld [vmem:[%s14479_s24 + $0x2264] ss:$8 sps:$4 sm:$0xff]  }
 0x4a0   : > { %9925 = vmatpush1.bf16.msra.mxu1 %v13650_v9  ;;  %9885 = vmatprep.subr.bf16.mxu0 %v13655_v52  ;;  %v13736_v9 = vld [vmem:[%s14479_s24 + $0x2364] ss:$8 sps:$4 sm:$0xff]  }
 0x4a1   : > { %9926 = vmatprep.subr.bf16.mxu1 %v13658_v11 }
 0x4a3   : > { %9886 = vmatpush1.bf16.msra.mxu0 %v13653_v12 }
 0x4a4   : > { %9927 = vmatpush1.bf16.msra.mxu1 %v13656_v13  ;;  %9887 = vmatprep.subr.bf16.mxu0 %v13661_v14 }
 0x4a5   : > { %9928 = vmatprep.subr.bf16.mxu1 %v13664_v15 }
 0x4a7   : > { %9888 = vmatpush1.bf16.msra.mxu0 %v13659_v16 }
 0x4a8   : > { %9929 = vmatpush1.bf16.msra.mxu1 %v13662_v17  ;;  %9889 = vmatprep.subr.bf16.mxu0 %v13667_v18  ;;  %v13731_v18 = vld [vmem:[%s14479_s24 + $0x2260] ss:$8 sps:$4 sm:$0xff]  }
 0x4a9   : > { %9930 = vmatprep.subr.bf16.mxu1 %v13670_v19  ;;  %v13734_v19 = vld [vmem:[%s14479_s24 + $0x2360] ss:$8 sps:$4 sm:$0xff]  }
 0x4ab   : > { %9890 = vmatpush1.bf16.msra.mxu0 %v13665_v20 }
 0x4ac   : > { %9931 = vmatpush1.bf16.msra.mxu1 %v13668_v21  ;;  %9891 = vmatprep.subr.bf16.mxu0 %v13673_v23 }
 0x4ad   : > { %9932 = vmatprep.subr.bf16.mxu1 %v13676_v25 }
 0x4af   : > { %9892 = vmatpush1.bf16.msra.mxu0 %v13671_v0  ;;  %v13737_v0 = vld [vmem:[%s14479_s24 + $0x2270] ss:$8 sps:$4 sm:$0xff]  }
 0x4b0   : > { %9933 = vmatpush1.bf16.msra.mxu1 %v13674_v7  ;;  %9893 = vmatprep.subr.bf16.mxu0 %v13679_v3  ;;  %v13740_v7 = vld [vmem:[%s14479_s24 + $0x2370] ss:$8 sps:$4 sm:$0xff]   ;;  %v13745_v3 = vld [vmem:[%s14479_s24 + $0x2284] ss:$8 sps:$4 sm:$0xff]  }
 0x4b1   : > { %9934 = vmatprep.subr.bf16.mxu1 %v13682_v29  ;;  %v13748_v29 = vld [vmem:[%s14479_s24 + $0x2384] ss:$8 sps:$4 sm:$0xff]  }
 0x4b3   : > { %9894 = vmatpush1.bf16.msra.mxu0 %v13677_v48  ;;  %v13743_v48 = vld [vmem:[%s14479_s24 + $0x2280] ss:$8 sps:$4 sm:$0xff]  }
 0x4b4   : > { %9935 = vmatpush1.bf16.msra.mxu1 %v13680_v30  ;;  %9895 = vmatprep.subr.bf16.mxu0 %v13685_v10  ;;  %v13746_v30 = vld [vmem:[%s14479_s24 + $0x2380] ss:$8 sps:$4 sm:$0xff]   ;;  %v13751_v10 = vld [vmem:[%s14479_s24 + $0x2294] ss:$8 sps:$4 sm:$0xff]  }
 0x4b5   : > { %9936 = vmatprep.subr.bf16.mxu1 %v13688_v31  ;;  %v13754_v31 = vld [vmem:[%s14479_s24 + $0x2394] ss:$8 sps:$4 sm:$0xff]  }
 0x4b7   : > { %9896 = vmatpush1.bf16.msra.mxu0 %v13683_v5  ;;  %v13749_v5 = vld [vmem:[%s14479_s24 + $0x2290] ss:$8 sps:$4 sm:$0xff]  }
 0x4b8   : > { %9937 = vmatpush1.bf16.msra.mxu1 %v13686_v33  ;;  %9897 = vmatprep.subr.bf16.mxu0 %v13691_v34  ;;  %v13752_v33 = vld [vmem:[%s14479_s24 + $0x2390] ss:$8 sps:$4 sm:$0xff]   ;;  %v13757_v34 = vld [vmem:[%s14479_s24 + $0x22a4] ss:$8 sps:$4 sm:$0xff]  }
 0x4b9   : > { %9938 = vmatprep.subr.bf16.mxu1 %v13694_v35  ;;  %v13760_v35 = vld [vmem:[%s14479_s24 + $0x23a4] ss:$8 sps:$4 sm:$0xff]  }
 0x4bb   : > { %9898 = vmatpush1.bf16.msra.mxu0 %v13689_v36  ;;  %v13755_v36 = vld [vmem:[%s14479_s24 + $0x22a0] ss:$8 sps:$4 sm:$0xff]  }
 0x4bc   : > { %9939 = vmatpush1.bf16.msra.mxu1 %v13692_v37  ;;  %9949 = vmatprep.subr.bf16.mxu0 %v13697_v40  ;;  %v13758_v37 = vld [vmem:[%s14479_s24 + $0x23a0] ss:$8 sps:$4 sm:$0xff]   ;;  %v13761_v40 = vld [vmem:[%s14479_s24 + $0x22b0] ss:$8 sps:$4 sm:$0xff]  }
 0x4bd   : > { %9990 = vmatprep.subr.bf16.mxu1 %v13700_v41  ;;  %v13764_v41 = vld [vmem:[%s14479_s24 + $0x23b0] ss:$8 sps:$4 sm:$0xff]  }
 0x4be   : > { %9900 = vmatmul.mubr.bf16.vlgmr.msra.gmra.mrb[64].mxu0 %v469_v43  ;;  %v13769_v43 = vld [vmem:[%s14479_s24 + $0x22c4] ss:$8 sps:$4 sm:$0xff]  }
 0x4bf   : > { %9941 = vmatmul.mubr.bf16.vlgmr.msra.gmra.mrb[64].mxu1 %v471_v45  ;;  %9950 = vmatpush1.bf16.msra.mxu0 %v13695_v24  ;;  %v13772_v45 = vld [vmem:[%s14479_s24 + $0x23c4] ss:$8 sps:$4 sm:$0xff]   ;;  %v13775_v24 = vld [vmem:[%s14479_s24 + $0x22d4] ss:$8 sps:$4 sm:$0xff]  }
 0x4c0   : > { %9991 = vmatpush1.bf16.msra.mxu1 %v13698_v6  ;;  %9951 = vmatprep.subr.bf16.mxu0 %v13703_v26  ;;  %v13778_v6 = vld [vmem:[%s14479_s24 + $0x23d4] ss:$8 sps:$4 sm:$0xff]   ;;  %v13773_v26 = vld [vmem:[%s14479_s24 + $0x22d0] ss:$8 sps:$4 sm:$0xff]  }
 0x4c1   : > { %9992 = vmatprep.subr.bf16.mxu1 %v13706_v50  ;;  %9981 = vmatprep.mubr.bf16.mxu0 %v474_v1  ;;  %v13776_v50 = vld [vmem:[%s14479_s24 + $0x23d0] ss:$8 sps:$4 sm:$0xff]   ;;  %v13781_v1 = vld [vmem:[%s14479_s24 + $0x22e4] ss:$8 sps:$4 sm:$0xff]  }
 0x4c2   : > { %10022 = vmatprep.mubr.bf16.mxu1 %v476_v51  ;;  %v13784_v51 = vld [vmem:[%s14479_s24 + $0x23e4] ss:$8 sps:$4 sm:$0xff]  }
 0x4c3   : > { %9952 = vmatpush1.bf16.msra.mxu0 %v13701_v32  ;;  %v13779_v32 = vld [vmem:[%s14479_s24 + $0x22e0] ss:$8 sps:$4 sm:$0xff]  }
 0x4c4   : > { %9993 = vmatpush1.bf16.msra.mxu1 %v13704_v53  ;;  %9953 = vmatprep.subr.bf16.mxu0 %v13709_v54  ;;  %v13782_v53 = vld [vmem:[%s14479_s24 + $0x23e0] ss:$8 sps:$4 sm:$0xff]   ;;  %v13787_v54 = vld [vmem:[%s14479_s24 + $0x22f4] ss:$8 sps:$4 sm:$0xff]  }
 0x4c5   : > { %9994 = vmatprep.subr.bf16.mxu1 %v13712_v55  ;;  %v13790_v55 = vld [vmem:[%s14479_s24 + $0x23f4] ss:$8 sps:$4 sm:$0xff]  }
 0x4c7   : > { %9954 = vmatpush1.bf16.msra.mxu0 %v13707_v56  ;;  %v13785_v56 = vld [vmem:[%s14479_s24 + $0x22f0] ss:$8 sps:$4 sm:$0xff]  }
 0x4c8   : > { %9995 = vmatpush1.bf16.msra.mxu1 %v13710_v57  ;;  %9955 = vmatprep.subr.bf16.mxu0 %v13715_v58  ;;  %v13788_v57 = vld [vmem:[%s14479_s24 + $0x23f0] ss:$8 sps:$4 sm:$0xff]   ;;  %v389_v58 = vld [vmem:[#allocation3 + $0x220] sm:$0xff] }
 0x4c9   : > { %9996 = vmatprep.subr.bf16.mxu1 %v13718_v59  ;;  %v391_v59 = vld [vmem:[#allocation3 + $0x230] sm:$0xff] }
 0x4cb   : > { %9956 = vmatpush1.bf16.msra.mxu0 %v13713_v60  ;;  %v13793_v60 = vld [vmem:[%s14479_s24 + $0x2404] ss:$8 sps:$4 sm:$0xff]  }
 0x4cc   : > { %9997 = vmatpush1.bf16.msra.mxu1 %v13716_v61  ;;  %9957 = vmatprep.subr.bf16.mxu0 %v13721_v63  ;;  %v13796_v61 = vld [vmem:[%s14479_s24 + $0x2504] ss:$8 sps:$4 sm:$0xff]   ;;  %v473_v63 = vpack.c.bf16 %v389_v58, %v389_v58  ;;  %v13859_v58 = vld [vmem:[%s14479_s24 + $0x24b4] ss:$8 sps:$4 sm:$0xff]  }
 0x4cd   : > { %9998 = vmatprep.subr.bf16.mxu1 %v13724_v2  ;;  %v475_v2 = vpack.c.bf16 %v391_v59, %v391_v59  ;;  %v13862_v59 = vld [vmem:[%s14479_s24 + $0x25b4] ss:$8 sps:$4 sm:$0xff]  }
 0x4cf   : > { %9958 = vmatpush1.bf16.msra.mxu0 %v13719_v42  ;;  %v394_v42 = vld [vmem:[#allocation3 + $0x248] sm:$0xff] }
 0x4d0   : > { %9999 = vmatpush1.bf16.msra.mxu1 %v13722_v47  ;;  %9959 = vmatprep.subr.bf16.mxu0 %v13727_v44  ;;  %v396_v47 = vld [vmem:[#allocation3 + $0x258] sm:$0xff]  ;;  %v13791_v44 = vld [vmem:[%s14479_s24 + $0x2400] ss:$8 sps:$4 sm:$0xff]  }
 0x4d1   : > { %10000 = vmatprep.subr.bf16.mxu1 %v13730_v49  ;;  %v9655_v52 = vpop.f32.mrb[52].mxu0  ;;  %v13794_v49 = vld [vmem:[%s14479_s24 + $0x2500] ss:$8 sps:$4 sm:$0xff]  }
 0x4d2   : > { %v9696_v11 = vpop.f32.mrb[52].mxu1  ;;  %v9656_v12 = vadd.f32 %v9655_v52, %v15609_v62  ;;  %v9657_v13 = vpop.f32.mrb[53].mxu0  ;;  %v13739_v62 = vld [vmem:[%s14479_s24 + $0x2274] ss:$8 sps:$4 sm:$0xff]   ;;  %v13797_v52 = vld [vmem:[%s14479_s24 + $0x2410] ss:$8 sps:$4 sm:$0xff]  }
 0x4d3   : > { %v9698_v14 = vpop.f32.mrb[53].mxu1  ;;  %v9658_v15 = vadd.f32 %v9657_v13, %v15613_v4  ;;  %v9659_v16 = vpop.f32.mrb[54].mxu0  ;;  %9960 = vmatpush1.bf16.msra.mxu0 %v13725_v46  ;;  %v13742_v4 = vld [vmem:[%s14479_s24 + $0x2374] ss:$8 sps:$4 sm:$0xff]   ;;  %v13808_v13 = vld [vmem:[%s14479_s24 + $0x2524] ss:$8 sps:$4 sm:$0xff]  }
 0x4d4   : > { %v9700_v17 = vpop.f32.mrb[54].mxu1  ;;  %10001 = vmatpush1.bf16.msra.mxu1 %v13728_v8  ;;  %v15679_v20 = vadd.f32 %v9696_v11, %v9656_v12  ;;  %v9660_v21 = vpop.f32.mrb[55].mxu0  ;;  %9961 = vmatprep.subr.bf16.mxu0 %v13733_v28  ;;  %v13799_v46 = vld [vmem:[%s14479_s24 + $0x2414] ss:$8 sps:$4 sm:$0xff]   ;;  %v478_v28 = vpack.c.bf16 %v394_v42, %v394_v42  ;;  %v13800_v11 = vld [vmem:[%s14479_s24 + $0x2510] ss:$8 sps:$4 sm:$0xff]  }
 0x4d5   : > { %v9701_v23 = vpop.f32.mrb[55].mxu1  ;;  %10002 = vmatprep.subr.bf16.mxu1 %v13736_v9  ;;  %v15683_v25 = vadd.f32 %v9698_v14, %v9658_v15  ;;  %v13802_v8 = vld [vmem:[%s14479_s24 + $0x2514] ss:$8 sps:$4 sm:$0xff]   ;;  %v480_v9 = vpack.c.bf16 %v396_v47, %v396_v47  ;;  %v13805_v12 = vld [vmem:[%s14479_s24 + $0x2424] ss:$8 sps:$4 sm:$0xff]  }
 0x4d6   : > { %v13803_v14 = vld [vmem:[%s14479_s24 + $0x2420] ss:$8 sps:$4 sm:$0xff]   ;;  %v13811_v16 = vld [vmem:[%s14479_s24 + $0x2434] ss:$8 sps:$4 sm:$0xff]   ;;  %v13817_v21 = vld [vmem:[%s14479_s24 + $0x2444] ss:$8 sps:$4 sm:$0xff]  }
 0x4d7   : > { %9962 = vmatpush1.bf16.msra.mxu0 %v13731_v18  ;;  %v13806_v15 = vld [vmem:[%s14479_s24 + $0x2520] ss:$8 sps:$4 sm:$0xff]   ;;  %v13814_v17 = vld [vmem:[%s14479_s24 + $0x2534] ss:$8 sps:$4 sm:$0xff]   ;;  %v13809_v18 = vld [vmem:[%s14479_s24 + $0x2430] ss:$8 sps:$4 sm:$0xff]  }
 0x4d8   : > { %10003 = vmatpush1.bf16.msra.mxu1 %v13734_v19  ;;  %9963 = vmatprep.subr.bf16.mxu0 %v13739_v62  ;;  %v13812_v19 = vld [vmem:[%s14479_s24 + $0x2530] ss:$8 sps:$4 sm:$0xff]   ;;  %v13820_v23 = vld [vmem:[%s14479_s24 + $0x2544] ss:$8 sps:$4 sm:$0xff]   ;;  %v13815_v62 = vld [vmem:[%s14479_s24 + $0x2440] ss:$8 sps:$4 sm:$0xff]  }
 0x4d9   : > { %10004 = vmatprep.subr.bf16.mxu1 %v13742_v4  ;;  %v13818_v4 = vld [vmem:[%s14479_s24 + $0x2540] ss:$8 sps:$4 sm:$0xff]  }
 0x4da   : > { %v13863_v42 = vld [vmem:[%s14479_s24 + $0x24c0] ss:$8 sps:$4 sm:$0xff]  }
 0x4db   : > { %9964 = vmatpush1.bf16.msra.mxu0 %v13737_v0  ;;  %v13823_v0 = vld [vmem:[%s14479_s24 + $0x2454] ss:$8 sps:$4 sm:$0xff]   ;;  %v13866_v47 = vld [vmem:[%s14479_s24 + $0x25c0] ss:$8 sps:$4 sm:$0xff]  }
 0x4dc   : > { %10005 = vmatpush1.bf16.msra.mxu1 %v13740_v7  ;;  %9965 = vmatprep.subr.bf16.mxu0 %v13745_v3  ;;  %v13826_v7 = vld [vmem:[%s14479_s24 + $0x2554] ss:$8 sps:$4 sm:$0xff]   ;;  %v13821_v3 = vld [vmem:[%s14479_s24 + $0x2450] ss:$8 sps:$4 sm:$0xff]  }
 0x4dd   : > { %10006 = vmatprep.subr.bf16.mxu1 %v13748_v29  ;;  %v13824_v29 = vld [vmem:[%s14479_s24 + $0x2550] ss:$8 sps:$4 sm:$0xff]  }
 0x4df   : > { %9966 = vmatpush1.bf16.msra.mxu0 %v13743_v48  ;;  %v13829_v48 = vld [vmem:[%s14479_s24 + $0x2464] ss:$8 sps:$4 sm:$0xff]  }
 0x4e0   : > { %10007 = vmatpush1.bf16.msra.mxu1 %v13746_v30  ;;  %9967 = vmatprep.subr.bf16.mxu0 %v13751_v10  ;;  %v13832_v30 = vld [vmem:[%s14479_s24 + $0x2564] ss:$8 sps:$4 sm:$0xff]  }
 0x4e1   : > { %10008 = vmatprep.subr.bf16.mxu1 %v13754_v31 }
 0x4e3   : > { %9968 = vmatpush1.bf16.msra.mxu0 %v13749_v5 }
 0x4e4   : > { %10009 = vmatpush1.bf16.msra.mxu1 %v13752_v33  ;;  %9969 = vmatprep.subr.bf16.mxu0 %v13757_v34 }
 0x4e5   : > { %10010 = vmatprep.subr.bf16.mxu1 %v13760_v35 }
 0x4e7   : > { %9970 = vmatpush1.bf16.msra.mxu0 %v13755_v36 }
 0x4e8   : > { %10011 = vmatpush1.bf16.msra.mxu1 %v13758_v37  ;;  %9971 = vmatprep.subr.bf16.mxu0 %v13763_v38  ;;  %v13827_v38 = vld [vmem:[%s14479_s24 + $0x2460] ss:$8 sps:$4 sm:$0xff]  }
 0x4e9   : > { %10012 = vmatprep.subr.bf16.mxu1 %v13766_v39  ;;  %v13830_v39 = vld [vmem:[%s14479_s24 + $0x2560] ss:$8 sps:$4 sm:$0xff]  }
 0x4eb   : > { %9972 = vmatpush1.bf16.msra.mxu0 %v13761_v40 }
 0x4ec   : > { %10013 = vmatpush1.bf16.msra.mxu1 %v13764_v41  ;;  %9973 = vmatprep.subr.bf16.mxu0 %v13769_v43 }
 0x4ed   : > { %10014 = vmatprep.subr.bf16.mxu1 %v13772_v45 }
 0x4ef   : > { %9974 = vmatpush1.bf16.msra.mxu0 %v13767_v22  ;;  %v13833_v22 = vld [vmem:[%s14479_s24 + $0x2470] ss:$8 sps:$4 sm:$0xff]  }
 0x4f0   : > { %10015 = vmatpush1.bf16.msra.mxu1 %v13770_v27  ;;  %9975 = vmatprep.subr.bf16.mxu0 %v13775_v24  ;;  %v13836_v27 = vld [vmem:[%s14479_s24 + $0x2570] ss:$8 sps:$4 sm:$0xff]   ;;  %v13841_v24 = vld [vmem:[%s14479_s24 + $0x2484] ss:$8 sps:$4 sm:$0xff]  }
 0x4f1   : > { %10016 = vmatprep.subr.bf16.mxu1 %v13778_v6  ;;  %v13844_v6 = vld [vmem:[%s14479_s24 + $0x2584] ss:$8 sps:$4 sm:$0xff]  }
 0x4f3   : > { %9976 = vmatpush1.bf16.msra.mxu0 %v13773_v26  ;;  %v13839_v26 = vld [vmem:[%s14479_s24 + $0x2480] ss:$8 sps:$4 sm:$0xff]  }
 0x4f4   : > { %10017 = vmatpush1.bf16.msra.mxu1 %v13776_v50  ;;  %9977 = vmatprep.subr.bf16.mxu0 %v13781_v1  ;;  %v13842_v50 = vld [vmem:[%s14479_s24 + $0x2580] ss:$8 sps:$4 sm:$0xff]   ;;  %v13847_v1 = vld [vmem:[%s14479_s24 + $0x2494] ss:$8 sps:$4 sm:$0xff]  }
 0x4f5   : > { %10018 = vmatprep.subr.bf16.mxu1 %v13784_v51  ;;  %v13850_v51 = vld [vmem:[%s14479_s24 + $0x2594] ss:$8 sps:$4 sm:$0xff]  }
 0x4f7   : > { %9978 = vmatpush1.bf16.msra.mxu0 %v13779_v32  ;;  %v13845_v32 = vld [vmem:[%s14479_s24 + $0x2490] ss:$8 sps:$4 sm:$0xff]  }
 0x4f8   : > { %10019 = vmatpush1.bf16.msra.mxu1 %v13782_v53  ;;  %9979 = vmatprep.subr.bf16.mxu0 %v13787_v54  ;;  %v13848_v53 = vld [vmem:[%s14479_s24 + $0x2590] ss:$8 sps:$4 sm:$0xff]   ;;  %v13853_v54 = vld [vmem:[%s14479_s24 + $0x24a4] ss:$8 sps:$4 sm:$0xff]  }
 0x4f9   : > { %10020 = vmatprep.subr.bf16.mxu1 %v13790_v55  ;;  %v13856_v55 = vld [vmem:[%s14479_s24 + $0x25a4] ss:$8 sps:$4 sm:$0xff]  }
 0x4fb   : > { %9980 = vmatpush1.bf16.msra.mxu0 %v13785_v56  ;;  %v13851_v56 = vld [vmem:[%s14479_s24 + $0x24a0] ss:$8 sps:$4 sm:$0xff]  }
 0x4fc   : > { %10021 = vmatpush1.bf16.msra.mxu1 %v13788_v57  ;;  %10031 = vmatprep.subr.bf16.mxu0 %v13793_v60  ;;  %v13854_v57 = vld [vmem:[%s14479_s24 + $0x25a0] ss:$8 sps:$4 sm:$0xff]   ;;  %v13857_v60 = vld [vmem:[%s14479_s24 + $0x24b0] ss:$8 sps:$4 sm:$0xff]  }
 0x4fd   : > { %10072 = vmatprep.subr.bf16.mxu1 %v13796_v61  ;;  %v13860_v61 = vld [vmem:[%s14479_s24 + $0x25b0] ss:$8 sps:$4 sm:$0xff]  }
 0x4fe   : > { %9982 = vmatmul.mubr.bf16.vlgmr.msra.gmra.mrb[68].mxu0 %v473_v63  ;;  %v13865_v63 = vld [vmem:[%s14479_s24 + $0x24c4] ss:$8 sps:$4 sm:$0xff]  }
 0x4ff   : > { %10023 = vmatmul.mubr.bf16.vlgmr.msra.gmra.mrb[68].mxu1 %v475_v2  ;;  %10032 = vmatpush1.bf16.msra.mxu0 %v13791_v44  ;;  %v13868_v2 = vld [vmem:[%s14479_s24 + $0x25c4] ss:$8 sps:$4 sm:$0xff]   ;;  %v13871_v44 = vld [vmem:[%s14479_s24 + $0x24d4] ss:$8 sps:$4 sm:$0xff]  }
 0x500   : > { %10073 = vmatpush1.bf16.msra.mxu1 %v13794_v49  ;;  %10033 = vmatprep.subr.bf16.mxu0 %v13799_v46  ;;  %v13874_v49 = vld [vmem:[%s14479_s24 + $0x25d4] ss:$8 sps:$4 sm:$0xff]   ;;  %v13869_v46 = vld [vmem:[%s14479_s24 + $0x24d0] ss:$8 sps:$4 sm:$0xff]  }
 0x501   : > { %10074 = vmatprep.subr.bf16.mxu1 %v13802_v8  ;;  %10063 = vmatprep.mubr.bf16.mxu0 %v478_v28  ;;  %v13872_v8 = vld [vmem:[%s14479_s24 + $0x25d0] ss:$8 sps:$4 sm:$0xff]   ;;  %v13877_v28 = vld [vmem:[%s14479_s24 + $0x24e4] ss:$8 sps:$4 sm:$0xff]  }
 0x502   : > { %10104 = vmatprep.mubr.bf16.mxu1 %v480_v9  ;;  %v13880_v9 = vld [vmem:[%s14479_s24 + $0x25e4] ss:$8 sps:$4 sm:$0xff]  }
 0x503   : > { %10034 = vmatpush1.bf16.msra.mxu0 %v13797_v52  ;;  %v13875_v52 = vld [vmem:[%s14479_s24 + $0x24e0] ss:$8 sps:$4 sm:$0xff]  }
 0x504   : > { %10075 = vmatpush1.bf16.msra.mxu1 %v13800_v11  ;;  %10035 = vmatprep.subr.bf16.mxu0 %v13805_v12  ;;  %v13878_v11 = vld [vmem:[%s14479_s24 + $0x25e0] ss:$8 sps:$4 sm:$0xff]   ;;  %v13883_v12 = vld [vmem:[%s14479_s24 + $0x24f4] ss:$8 sps:$4 sm:$0xff]  }
 0x505   : > { %10076 = vmatprep.subr.bf16.mxu1 %v13808_v13  ;;  %v13886_v13 = vld [vmem:[%s14479_s24 + $0x25f4] ss:$8 sps:$4 sm:$0xff]  }
 0x507   : > { %10036 = vmatpush1.bf16.msra.mxu0 %v13803_v14  ;;  %v13881_v14 = vld [vmem:[%s14479_s24 + $0x24f0] ss:$8 sps:$4 sm:$0xff]  }
 0x508   : > { %10077 = vmatpush1.bf16.msra.mxu1 %v13806_v15  ;;  %10037 = vmatprep.subr.bf16.mxu0 %v13811_v16  ;;  %v13884_v15 = vld [vmem:[%s14479_s24 + $0x25f0] ss:$8 sps:$4 sm:$0xff]   ;;  %v393_v16 = vld [vmem:[#allocation3 + $0x240] sm:$0xff] }
 0x509   : > { %10078 = vmatprep.subr.bf16.mxu1 %v13814_v17  ;;  %v395_v17 = vld [vmem:[#allocation3 + $0x250] sm:$0xff] }
 0x50b   : > { %10038 = vmatpush1.bf16.msra.mxu0 %v13809_v18  ;;  %v13889_v18 = vld [vmem:[%s14479_s24 + $0x2604] ss:$8 sps:$4 sm:$0xff]  }
 0x50c   : > { %10079 = vmatpush1.bf16.msra.mxu1 %v13812_v19  ;;  %10039 = vmatprep.subr.bf16.mxu0 %v13817_v21  ;;  %v13892_v19 = vld [vmem:[%s14479_s24 + $0x2704] ss:$8 sps:$4 sm:$0xff]   ;;  %v477_v21 = vpack.c.bf16 %v393_v16, %v393_v16  ;;  %v13955_v16 = vld [vmem:[%s14479_s24 + $0x26b4] ss:$8 sps:$4 sm:$0xff]  }
 0x50d   : > { %10080 = vmatprep.subr.bf16.mxu1 %v13820_v23  ;;  %v479_v23 = vpack.c.bf16 %v395_v17, %v395_v17  ;;  %v13958_v17 = vld [vmem:[%s14479_s24 + $0x27b4] ss:$8 sps:$4 sm:$0xff]  }
 0x50f   : > { %10040 = vmatpush1.bf16.msra.mxu0 %v13815_v62  ;;  %v398_v62 = vld [vmem:[#allocation3 + $0x268] sm:$0xff] }
 0x510   : > { %10081 = vmatpush1.bf16.msra.mxu1 %v13818_v4  ;;  %10041 = vmatprep.subr.bf16.mxu0 %v13823_v0  ;;  %v400_v4 = vld [vmem:[#allocation3 + $0x278] sm:$0xff]  ;;  %v13887_v0 = vld [vmem:[%s14479_s24 + $0x2600] ss:$8 sps:$4 sm:$0xff]  }
 0x511   : > { %10082 = vmatprep.subr.bf16.mxu1 %v13826_v7  ;;  %v9737_v10 = vpop.f32.mrb[56].mxu0  ;;  %v13890_v7 = vld [vmem:[%s14479_s24 + $0x2700] ss:$8 sps:$4 sm:$0xff]  }
 0x512   : > { %v9778_v31 = vpop.f32.mrb[56].mxu1  ;;  %v9738_v5 = vadd.f32 %v9737_v10, %v15679_v20  ;;  %v9739_v33 = vpop.f32.mrb[57].mxu0  ;;  %v13835_v20 = vld [vmem:[%s14479_s24 + $0x2474] ss:$8 sps:$4 sm:$0xff]   ;;  %v13893_v10 = vld [vmem:[%s14479_s24 + $0x2610] ss:$8 sps:$4 sm:$0xff]  }
 0x513   : > { %v9780_v34 = vpop.f32.mrb[57].mxu1  ;;  %v9740_v35 = vadd.f32 %v9739_v33, %v15683_v25  ;;  %v9741_v36 = vpop.f32.mrb[58].mxu0  ;;  %10042 = vmatpush1.bf16.msra.mxu0 %v13821_v3  ;;  %v13838_v25 = vld [vmem:[%s14479_s24 + $0x2574] ss:$8 sps:$4 sm:$0xff]   ;;  %v13904_v33 = vld [vmem:[%s14479_s24 + $0x2724] ss:$8 sps:$4 sm:$0xff]  }
 0x514   : > { %v9782_v37 = vpop.f32.mrb[58].mxu1  ;;  %10083 = vmatpush1.bf16.msra.mxu1 %v13824_v29  ;;  %v15749_v40 = vadd.f32 %v9778_v31, %v9738_v5  ;;  %v9742_v41 = vpop.f32.mrb[59].mxu0  ;;  %10043 = vmatprep.subr.bf16.mxu0 %v13829_v48  ;;  %v13895_v3 = vld [vmem:[%s14479_s24 + $0x2614] ss:$8 sps:$4 sm:$0xff]   ;;  %v482_v48 = vpack.c.bf16 %v398_v62, %v398_v62  ;;  %v13896_v31 = vld [vmem:[%s14479_s24 + $0x2710] ss:$8 sps:$4 sm:$0xff]  }
 0x515   : > { %v9783_v43 = vpop.f32.mrb[59].mxu1  ;;  %10084 = vmatprep.subr.bf16.mxu1 %v13832_v30  ;;  %v15753_v45 = vadd.f32 %v9780_v34, %v9740_v35  ;;  %v13898_v29 = vld [vmem:[%s14479_s24 + $0x2714] ss:$8 sps:$4 sm:$0xff]   ;;  %v484_v30 = vpack.c.bf16 %v400_v4, %v400_v4  ;;  %v13901_v5 = vld [vmem:[%s14479_s24 + $0x2624] ss:$8 sps:$4 sm:$0xff]  }
 0x516   : > { %v13899_v34 = vld [vmem:[%s14479_s24 + $0x2620] ss:$8 sps:$4 sm:$0xff]   ;;  %v13907_v36 = vld [vmem:[%s14479_s24 + $0x2634] ss:$8 sps:$4 sm:$0xff]   ;;  %v13913_v41 = vld [vmem:[%s14479_s24 + $0x2644] ss:$8 sps:$4 sm:$0xff]  }
 0x517   : > { %10044 = vmatpush1.bf16.msra.mxu0 %v13827_v38  ;;  %v13902_v35 = vld [vmem:[%s14479_s24 + $0x2720] ss:$8 sps:$4 sm:$0xff]   ;;  %v13910_v37 = vld [vmem:[%s14479_s24 + $0x2734] ss:$8 sps:$4 sm:$0xff]   ;;  %v13905_v38 = vld [vmem:[%s14479_s24 + $0x2630] ss:$8 sps:$4 sm:$0xff]  }
 0x518   : > { %10085 = vmatpush1.bf16.msra.mxu1 %v13830_v39  ;;  %10045 = vmatprep.subr.bf16.mxu0 %v13835_v20  ;;  %v13908_v39 = vld [vmem:[%s14479_s24 + $0x2730] ss:$8 sps:$4 sm:$0xff]   ;;  %v13916_v43 = vld [vmem:[%s14479_s24 + $0x2744] ss:$8 sps:$4 sm:$0xff]   ;;  %v13911_v20 = vld [vmem:[%s14479_s24 + $0x2640] ss:$8 sps:$4 sm:$0xff]  }
 0x519   : > { %10086 = vmatprep.subr.bf16.mxu1 %v13838_v25  ;;  %v13914_v25 = vld [vmem:[%s14479_s24 + $0x2740] ss:$8 sps:$4 sm:$0xff]  }
 0x51a   : > { %v13959_v62 = vld [vmem:[%s14479_s24 + $0x26c0] ss:$8 sps:$4 sm:$0xff]  }
 0x51b   : > { %10046 = vmatpush1.bf16.msra.mxu0 %v13833_v22  ;;  %v13919_v22 = vld [vmem:[%s14479_s24 + $0x2654] ss:$8 sps:$4 sm:$0xff]   ;;  %v13962_v4 = vld [vmem:[%s14479_s24 + $0x27c0] ss:$8 sps:$4 sm:$0xff]  }
 0x51c   : > { %10087 = vmatpush1.bf16.msra.mxu1 %v13836_v27  ;;  %10047 = vmatprep.subr.bf16.mxu0 %v13841_v24  ;;  %v13922_v27 = vld [vmem:[%s14479_s24 + $0x2754] ss:$8 sps:$4 sm:$0xff]   ;;  %v13917_v24 = vld [vmem:[%s14479_s24 + $0x2650] ss:$8 sps:$4 sm:$0xff]  }
 0x51d   : > { %10088 = vmatprep.subr.bf16.mxu1 %v13844_v6  ;;  %v13920_v6 = vld [vmem:[%s14479_s24 + $0x2750] ss:$8 sps:$4 sm:$0xff]  }
 0x51f   : > { %10048 = vmatpush1.bf16.msra.mxu0 %v13839_v26  ;;  %v13925_v26 = vld [vmem:[%s14479_s24 + $0x2664] ss:$8 sps:$4 sm:$0xff]  }
 0x520   : > { %10089 = vmatpush1.bf16.msra.mxu1 %v13842_v50  ;;  %10049 = vmatprep.subr.bf16.mxu0 %v13847_v1  ;;  %v13928_v50 = vld [vmem:[%s14479_s24 + $0x2764] ss:$8 sps:$4 sm:$0xff]  }
 0x521   : > { %10090 = vmatprep.subr.bf16.mxu1 %v13850_v51 }
 0x523   : > { %10050 = vmatpush1.bf16.msra.mxu0 %v13845_v32 }
 0x524   : > { %10091 = vmatpush1.bf16.msra.mxu1 %v13848_v53  ;;  %10051 = vmatprep.subr.bf16.mxu0 %v13853_v54 }
 0x525   : > { %10092 = vmatprep.subr.bf16.mxu1 %v13856_v55 }
 0x527   : > { %10052 = vmatpush1.bf16.msra.mxu0 %v13851_v56 }
 0x528   : > { %10093 = vmatpush1.bf16.msra.mxu1 %v13854_v57  ;;  %10053 = vmatprep.subr.bf16.mxu0 %v13859_v58  ;;  %v13923_v58 = vld [vmem:[%s14479_s24 + $0x2660] ss:$8 sps:$4 sm:$0xff]  }
 0x529   : > { %10094 = vmatprep.subr.bf16.mxu1 %v13862_v59  ;;  %v13926_v59 = vld [vmem:[%s14479_s24 + $0x2760] ss:$8 sps:$4 sm:$0xff]  }
 0x52b   : > { %10054 = vmatpush1.bf16.msra.mxu0 %v13857_v60 }
 0x52c   : > { %10095 = vmatpush1.bf16.msra.mxu1 %v13860_v61  ;;  %10055 = vmatprep.subr.bf16.mxu0 %v13865_v63 }
 0x52d   : > { %10096 = vmatprep.subr.bf16.mxu1 %v13868_v2 }
 0x52f   : > { %10056 = vmatpush1.bf16.msra.mxu0 %v13863_v42  ;;  %v13929_v42 = vld [vmem:[%s14479_s24 + $0x2670] ss:$8 sps:$4 sm:$0xff]  }
 0x530   : > { %10097 = vmatpush1.bf16.msra.mxu1 %v13866_v47  ;;  %10057 = vmatprep.subr.bf16.mxu0 %v13871_v44  ;;  %v13932_v47 = vld [vmem:[%s14479_s24 + $0x2770] ss:$8 sps:$4 sm:$0xff]   ;;  %v13937_v44 = vld [vmem:[%s14479_s24 + $0x2684] ss:$8 sps:$4 sm:$0xff]  }
 0x531   : > { %10098 = vmatprep.subr.bf16.mxu1 %v13874_v49  ;;  %v13940_v49 = vld [vmem:[%s14479_s24 + $0x2784] ss:$8 sps:$4 sm:$0xff]  }
 0x533   : > { %10058 = vmatpush1.bf16.msra.mxu0 %v13869_v46  ;;  %v13935_v46 = vld [vmem:[%s14479_s24 + $0x2680] ss:$8 sps:$4 sm:$0xff]  }
 0x534   : > { %10099 = vmatpush1.bf16.msra.mxu1 %v13872_v8  ;;  %10059 = vmatprep.subr.bf16.mxu0 %v13877_v28  ;;  %v13938_v8 = vld [vmem:[%s14479_s24 + $0x2780] ss:$8 sps:$4 sm:$0xff]   ;;  %v13943_v28 = vld [vmem:[%s14479_s24 + $0x2694] ss:$8 sps:$4 sm:$0xff]  }
 0x535   : > { %10100 = vmatprep.subr.bf16.mxu1 %v13880_v9  ;;  %v13946_v9 = vld [vmem:[%s14479_s24 + $0x2794] ss:$8 sps:$4 sm:$0xff]  }
 0x537   : > { %10060 = vmatpush1.bf16.msra.mxu0 %v13875_v52  ;;  %v13941_v52 = vld [vmem:[%s14479_s24 + $0x2690] ss:$8 sps:$4 sm:$0xff]  }
 0x538   : > { %10101 = vmatpush1.bf16.msra.mxu1 %v13878_v11  ;;  %10061 = vmatprep.subr.bf16.mxu0 %v13883_v12  ;;  %v13944_v11 = vld [vmem:[%s14479_s24 + $0x2790] ss:$8 sps:$4 sm:$0xff]   ;;  %v13949_v12 = vld [vmem:[%s14479_s24 + $0x26a4] ss:$8 sps:$4 sm:$0xff]  }
 0x539   : > { %10102 = vmatprep.subr.bf16.mxu1 %v13886_v13  ;;  %v13952_v13 = vld [vmem:[%s14479_s24 + $0x27a4] ss:$8 sps:$4 sm:$0xff]  }
 0x53b   : > { %10062 = vmatpush1.bf16.msra.mxu0 %v13881_v14  ;;  %v13947_v14 = vld [vmem:[%s14479_s24 + $0x26a0] ss:$8 sps:$4 sm:$0xff]  }
 0x53c   : > { %10103 = vmatpush1.bf16.msra.mxu1 %v13884_v15  ;;  %10113 = vmatprep.subr.bf16.mxu0 %v13889_v18  ;;  %v13950_v15 = vld [vmem:[%s14479_s24 + $0x27a0] ss:$8 sps:$4 sm:$0xff]   ;;  %v13953_v18 = vld [vmem:[%s14479_s24 + $0x26b0] ss:$8 sps:$4 sm:$0xff]  }
 0x53d   : > { %10154 = vmatprep.subr.bf16.mxu1 %v13892_v19  ;;  %v13956_v19 = vld [vmem:[%s14479_s24 + $0x27b0] ss:$8 sps:$4 sm:$0xff]  }
 0x53e   : > { %10064 = vmatmul.mubr.bf16.vlgmr.msra.gmra.mrb[72].mxu0 %v477_v21  ;;  %v13961_v21 = vld [vmem:[%s14479_s24 + $0x26c4] ss:$8 sps:$4 sm:$0xff]  }
 0x53f   : > { %10105 = vmatmul.mubr.bf16.vlgmr.msra.gmra.mrb[72].mxu1 %v479_v23  ;;  %10114 = vmatpush1.bf16.msra.mxu0 %v13887_v0  ;;  %v13964_v23 = vld [vmem:[%s14479_s24 + $0x27c4] ss:$8 sps:$4 sm:$0xff]   ;;  %v13967_v0 = vld [vmem:[%s14479_s24 + $0x26d4] ss:$8 sps:$4 sm:$0xff]  }
 0x540   : > { %10155 = vmatpush1.bf16.msra.mxu1 %v13890_v7  ;;  %10115 = vmatprep.subr.bf16.mxu0 %v13895_v3  ;;  %v13970_v7 = vld [vmem:[%s14479_s24 + $0x27d4] ss:$8 sps:$4 sm:$0xff]   ;;  %v13965_v3 = vld [vmem:[%s14479_s24 + $0x26d0] ss:$8 sps:$4 sm:$0xff]  }
 0x541   : > { %10156 = vmatprep.subr.bf16.mxu1 %v13898_v29  ;;  %10145 = vmatprep.mubr.bf16.mxu0 %v482_v48  ;;  %v13968_v29 = vld [vmem:[%s14479_s24 + $0x27d0] ss:$8 sps:$4 sm:$0xff]   ;;  %v13973_v48 = vld [vmem:[%s14479_s24 + $0x26e4] ss:$8 sps:$4 sm:$0xff]  }
 0x542   : > { %10186 = vmatprep.mubr.bf16.mxu1 %v484_v30  ;;  %v13976_v30 = vld [vmem:[%s14479_s24 + $0x27e4] ss:$8 sps:$4 sm:$0xff]  }
 0x543   : > { %10116 = vmatpush1.bf16.msra.mxu0 %v13893_v10  ;;  %v13971_v10 = vld [vmem:[%s14479_s24 + $0x26e0] ss:$8 sps:$4 sm:$0xff]  }
 0x544   : > { %10157 = vmatpush1.bf16.msra.mxu1 %v13896_v31  ;;  %10117 = vmatprep.subr.bf16.mxu0 %v13901_v5  ;;  %v13974_v31 = vld [vmem:[%s14479_s24 + $0x27e0] ss:$8 sps:$4 sm:$0xff]   ;;  %v13979_v5 = vld [vmem:[%s14479_s24 + $0x26f4] ss:$8 sps:$4 sm:$0xff]  }
 0x545   : > { %10158 = vmatprep.subr.bf16.mxu1 %v13904_v33  ;;  %v13982_v33 = vld [vmem:[%s14479_s24 + $0x27f4] ss:$8 sps:$4 sm:$0xff]  }
 0x547   : > { %10118 = vmatpush1.bf16.msra.mxu0 %v13899_v34  ;;  %v13977_v34 = vld [vmem:[%s14479_s24 + $0x26f0] ss:$8 sps:$4 sm:$0xff]  }
 0x548   : > { %10159 = vmatpush1.bf16.msra.mxu1 %v13902_v35  ;;  %10119 = vmatprep.subr.bf16.mxu0 %v13907_v36  ;;  %v13980_v35 = vld [vmem:[%s14479_s24 + $0x27f0] ss:$8 sps:$4 sm:$0xff]   ;;  %v397_v36 = vld [vmem:[#allocation3 + $0x260] sm:$0xff] }
 0x549   : > { %10160 = vmatprep.subr.bf16.mxu1 %v13910_v37  ;;  %v399_v37 = vld [vmem:[#allocation3 + $0x270] sm:$0xff] }
 0x54b   : > { %10120 = vmatpush1.bf16.msra.mxu0 %v13905_v38  ;;  %v13985_v38 = vld [vmem:[%s14479_s24 + $0x2804] ss:$8 sps:$4 sm:$0xff]  }
 0x54c   : > { %10161 = vmatpush1.bf16.msra.mxu1 %v13908_v39  ;;  %10121 = vmatprep.subr.bf16.mxu0 %v13913_v41  ;;  %v13988_v39 = vld [vmem:[%s14479_s24 + $0x2904] ss:$8 sps:$4 sm:$0xff]   ;;  %v481_v41 = vpack.c.bf16 %v397_v36, %v397_v36  ;;  %v14051_v36 = vld [vmem:[%s14479_s24 + $0x28b4] ss:$8 sps:$4 sm:$0xff]  }
 0x54d   : > { %10162 = vmatprep.subr.bf16.mxu1 %v13916_v43  ;;  %v483_v43 = vpack.c.bf16 %v399_v37, %v399_v37  ;;  %v14054_v37 = vld [vmem:[%s14479_s24 + $0x29b4] ss:$8 sps:$4 sm:$0xff]  }
 0x54f   : > { %10122 = vmatpush1.bf16.msra.mxu0 %v13911_v20  ;;  %v402_v20 = vld [vmem:[#allocation3 + $0x288] sm:$0xff] }
 0x550   : > { %10163 = vmatpush1.bf16.msra.mxu1 %v13914_v25  ;;  %10123 = vmatprep.subr.bf16.mxu0 %v13919_v22  ;;  %v404_v25 = vld [vmem:[#allocation3 + $0x298] sm:$0xff]  ;;  %v13983_v22 = vld [vmem:[%s14479_s24 + $0x2800] ss:$8 sps:$4 sm:$0xff]  }
 0x551   : > { %10164 = vmatprep.subr.bf16.mxu1 %v13922_v27  ;;  %v9819_v1 = vpop.f32.mrb[60].mxu0  ;;  %v13986_v27 = vld [vmem:[%s14479_s24 + $0x2900] ss:$8 sps:$4 sm:$0xff]  }
 0x552   : > { %v9860_v51 = vpop.f32.mrb[60].mxu1  ;;  %v9820_v32 = vadd.f32 %v9819_v1, %v15749_v40  ;;  %v9821_v53 = vpop.f32.mrb[61].mxu0  ;;  %v13931_v40 = vld [vmem:[%s14479_s24 + $0x2674] ss:$8 sps:$4 sm:$0xff]   ;;  %v13989_v1 = vld [vmem:[%s14479_s24 + $0x2810] ss:$8 sps:$4 sm:$0xff]  }
 0x553   : > { %v9862_v54 = vpop.f32.mrb[61].mxu1  ;;  %v9822_v55 = vadd.f32 %v9821_v53, %v15753_v45  ;;  %v9823_v56 = vpop.f32.mrb[62].mxu0  ;;  %10124 = vmatpush1.bf16.msra.mxu0 %v13917_v24  ;;  %v13934_v45 = vld [vmem:[%s14479_s24 + $0x2774] ss:$8 sps:$4 sm:$0xff]   ;;  %v14000_v53 = vld [vmem:[%s14479_s24 + $0x2924] ss:$8 sps:$4 sm:$0xff]  }
 0x554   : > { %v9864_v57 = vpop.f32.mrb[62].mxu1  ;;  %10165 = vmatpush1.bf16.msra.mxu1 %v13920_v6  ;;  %v15819_v60 = vadd.f32 %v9860_v51, %v9820_v32  ;;  %v9824_v61 = vpop.f32.mrb[63].mxu0  ;;  %10125 = vmatprep.subr.bf16.mxu0 %v13925_v26  ;;  %v13991_v24 = vld [vmem:[%s14479_s24 + $0x2814] ss:$8 sps:$4 sm:$0xff]   ;;  %v486_v26 = vpack.c.bf16 %v402_v20, %v402_v20  ;;  %v13992_v51 = vld [vmem:[%s14479_s24 + $0x2910] ss:$8 sps:$4 sm:$0xff]  }
 0x555   : > { %v9865_v63 = vpop.f32.mrb[63].mxu1  ;;  %10166 = vmatprep.subr.bf16.mxu1 %v13928_v50  ;;  %v15823_v2 = vadd.f32 %v9862_v54, %v9822_v55  ;;  %v13994_v6 = vld [vmem:[%s14479_s24 + $0x2914] ss:$8 sps:$4 sm:$0xff]   ;;  %v488_v50 = vpack.c.bf16 %v404_v25, %v404_v25  ;;  %v13997_v32 = vld [vmem:[%s14479_s24 + $0x2824] ss:$8 sps:$4 sm:$0xff]  }
 0x556   : > { %v13995_v54 = vld [vmem:[%s14479_s24 + $0x2820] ss:$8 sps:$4 sm:$0xff]   ;;  %v14003_v56 = vld [vmem:[%s14479_s24 + $0x2834] ss:$8 sps:$4 sm:$0xff]   ;;  %v14009_v61 = vld [vmem:[%s14479_s24 + $0x2844] ss:$8 sps:$4 sm:$0xff]  }
 0x557   : > { %10126 = vmatpush1.bf16.msra.mxu0 %v13923_v58  ;;  %v13998_v55 = vld [vmem:[%s14479_s24 + $0x2920] ss:$8 sps:$4 sm:$0xff]   ;;  %v14006_v57 = vld [vmem:[%s14479_s24 + $0x2934] ss:$8 sps:$4 sm:$0xff]   ;;  %v14001_v58 = vld [vmem:[%s14479_s24 + $0x2830] ss:$8 sps:$4 sm:$0xff]  }
 0x558   : > { %10167 = vmatpush1.bf16.msra.mxu1 %v13926_v59  ;;  %10127 = vmatprep.subr.bf16.mxu0 %v13931_v40  ;;  %v14004_v59 = vld [vmem:[%s14479_s24 + $0x2930] ss:$8 sps:$4 sm:$0xff]   ;;  %v14012_v63 = vld [vmem:[%s14479_s24 + $0x2944] ss:$8 sps:$4 sm:$0xff]   ;;  %v14007_v40 = vld [vmem:[%s14479_s24 + $0x2840] ss:$8 sps:$4 sm:$0xff]  }
 0x559   : > { %10168 = vmatprep.subr.bf16.mxu1 %v13934_v45  ;;  %v14010_v45 = vld [vmem:[%s14479_s24 + $0x2940] ss:$8 sps:$4 sm:$0xff]  }
 0x55a   : > { %v14055_v20 = vld [vmem:[%s14479_s24 + $0x28c0] ss:$8 sps:$4 sm:$0xff]  }
 0x55b   : > { %10128 = vmatpush1.bf16.msra.mxu0 %v13929_v42  ;;  %v14015_v42 = vld [vmem:[%s14479_s24 + $0x2854] ss:$8 sps:$4 sm:$0xff]   ;;  %v14058_v25 = vld [vmem:[%s14479_s24 + $0x29c0] ss:$8 sps:$4 sm:$0xff]  }
 0x55c   : > { %10169 = vmatpush1.bf16.msra.mxu1 %v13932_v47  ;;  %10129 = vmatprep.subr.bf16.mxu0 %v13937_v44  ;;  %v14018_v47 = vld [vmem:[%s14479_s24 + $0x2954] ss:$8 sps:$4 sm:$0xff]   ;;  %v14013_v44 = vld [vmem:[%s14479_s24 + $0x2850] ss:$8 sps:$4 sm:$0xff]  }
 0x55d   : > { %10170 = vmatprep.subr.bf16.mxu1 %v13940_v49  ;;  %v14016_v49 = vld [vmem:[%s14479_s24 + $0x2950] ss:$8 sps:$4 sm:$0xff]  }
 0x55f   : > { %10130 = vmatpush1.bf16.msra.mxu0 %v13935_v46  ;;  %v14021_v46 = vld [vmem:[%s14479_s24 + $0x2864] ss:$8 sps:$4 sm:$0xff]  }
 0x560   : > { %10171 = vmatpush1.bf16.msra.mxu1 %v13938_v8  ;;  %10131 = vmatprep.subr.bf16.mxu0 %v13943_v28  ;;  %v14024_v8 = vld [vmem:[%s14479_s24 + $0x2964] ss:$8 sps:$4 sm:$0xff]  }
 0x561   : > { %10172 = vmatprep.subr.bf16.mxu1 %v13946_v9 }
 0x563   : > { %10132 = vmatpush1.bf16.msra.mxu0 %v13941_v52 }
 0x564   : > { %10173 = vmatpush1.bf16.msra.mxu1 %v13944_v11  ;;  %10133 = vmatprep.subr.bf16.mxu0 %v13949_v12 }
 0x565   : > { %10174 = vmatprep.subr.bf16.mxu1 %v13952_v13 }
 0x567   : > { %10134 = vmatpush1.bf16.msra.mxu0 %v13947_v14 }
 0x568   : > { %10175 = vmatpush1.bf16.msra.mxu1 %v13950_v15  ;;  %10135 = vmatprep.subr.bf16.mxu0 %v13955_v16  ;;  %v14019_v16 = vld [vmem:[%s14479_s24 + $0x2860] ss:$8 sps:$4 sm:$0xff]  }
 0x569   : > { %10176 = vmatprep.subr.bf16.mxu1 %v13958_v17  ;;  %v14022_v17 = vld [vmem:[%s14479_s24 + $0x2960] ss:$8 sps:$4 sm:$0xff]  }
 0x56b   : > { %10136 = vmatpush1.bf16.msra.mxu0 %v13953_v18 }
 0x56c   : > { %10177 = vmatpush1.bf16.msra.mxu1 %v13956_v19  ;;  %10137 = vmatprep.subr.bf16.mxu0 %v13961_v21 }
 0x56d   : > { %10178 = vmatprep.subr.bf16.mxu1 %v13964_v23 }
 0x56f   : > { %10138 = vmatpush1.bf16.msra.mxu0 %v13959_v62  ;;  %v14025_v62 = vld [vmem:[%s14479_s24 + $0x2870] ss:$8 sps:$4 sm:$0xff]  }
 0x570   : > { %10179 = vmatpush1.bf16.msra.mxu1 %v13962_v4  ;;  %10139 = vmatprep.subr.bf16.mxu0 %v13967_v0  ;;  %v14028_v4 = vld [vmem:[%s14479_s24 + $0x2970] ss:$8 sps:$4 sm:$0xff]   ;;  %v14033_v0 = vld [vmem:[%s14479_s24 + $0x2884] ss:$8 sps:$4 sm:$0xff]  }
 0x571   : > { %10180 = vmatprep.subr.bf16.mxu1 %v13970_v7  ;;  %v14036_v7 = vld [vmem:[%s14479_s24 + $0x2984] ss:$8 sps:$4 sm:$0xff]  }
 0x573   : > { %10140 = vmatpush1.bf16.msra.mxu0 %v13965_v3  ;;  %v14031_v3 = vld [vmem:[%s14479_s24 + $0x2880] ss:$8 sps:$4 sm:$0xff]  }
 0x574   : > { %10181 = vmatpush1.bf16.msra.mxu1 %v13968_v29  ;;  %10141 = vmatprep.subr.bf16.mxu0 %v13973_v48  ;;  %v14034_v29 = vld [vmem:[%s14479_s24 + $0x2980] ss:$8 sps:$4 sm:$0xff]   ;;  %v14039_v48 = vld [vmem:[%s14479_s24 + $0x2894] ss:$8 sps:$4 sm:$0xff]  }
 0x575   : > { %10182 = vmatprep.subr.bf16.mxu1 %v13976_v30  ;;  %v14042_v30 = vld [vmem:[%s14479_s24 + $0x2994] ss:$8 sps:$4 sm:$0xff]  }
 0x577   : > { %10142 = vmatpush1.bf16.msra.mxu0 %v13971_v10  ;;  %v14037_v10 = vld [vmem:[%s14479_s24 + $0x2890] ss:$8 sps:$4 sm:$0xff]  }
 0x578   : > { %10183 = vmatpush1.bf16.msra.mxu1 %v13974_v31  ;;  %10143 = vmatprep.subr.bf16.mxu0 %v13979_v5  ;;  %v14040_v31 = vld [vmem:[%s14479_s24 + $0x2990] ss:$8 sps:$4 sm:$0xff]   ;;  %v14045_v5 = vld [vmem:[%s14479_s24 + $0x28a4] ss:$8 sps:$4 sm:$0xff]  }
 0x579   : > { %10184 = vmatprep.subr.bf16.mxu1 %v13982_v33  ;;  %v14048_v33 = vld [vmem:[%s14479_s24 + $0x29a4] ss:$8 sps:$4 sm:$0xff]  }
 0x57b   : > { %10144 = vmatpush1.bf16.msra.mxu0 %v13977_v34  ;;  %v14043_v34 = vld [vmem:[%s14479_s24 + $0x28a0] ss:$8 sps:$4 sm:$0xff]  }
 0x57c   : > { %10185 = vmatpush1.bf16.msra.mxu1 %v13980_v35  ;;  %10195 = vmatprep.subr.bf16.mxu0 %v13985_v38  ;;  %v14046_v35 = vld [vmem:[%s14479_s24 + $0x29a0] ss:$8 sps:$4 sm:$0xff]   ;;  %v14049_v38 = vld [vmem:[%s14479_s24 + $0x28b0] ss:$8 sps:$4 sm:$0xff]  }
 0x57d   : > { %10236 = vmatprep.subr.bf16.mxu1 %v13988_v39  ;;  %v14052_v39 = vld [vmem:[%s14479_s24 + $0x29b0] ss:$8 sps:$4 sm:$0xff]  }
 0x57e   : > { %10146 = vmatmul.mubr.bf16.vlgmr.msra.gmra.mrb[76].mxu0 %v481_v41  ;;  %v14057_v41 = vld [vmem:[%s14479_s24 + $0x28c4] ss:$8 sps:$4 sm:$0xff]  }
 0x57f   : > { %10187 = vmatmul.mubr.bf16.vlgmr.msra.gmra.mrb[76].mxu1 %v483_v43  ;;  %10196 = vmatpush1.bf16.msra.mxu0 %v13983_v22  ;;  %v14060_v43 = vld [vmem:[%s14479_s24 + $0x29c4] ss:$8 sps:$4 sm:$0xff]   ;;  %v14063_v22 = vld [vmem:[%s14479_s24 + $0x28d4] ss:$8 sps:$4 sm:$0xff]  }
 0x580   : > { %10237 = vmatpush1.bf16.msra.mxu1 %v13986_v27  ;;  %10197 = vmatprep.subr.bf16.mxu0 %v13991_v24  ;;  %v14066_v27 = vld [vmem:[%s14479_s24 + $0x29d4] ss:$8 sps:$4 sm:$0xff]   ;;  %v14061_v24 = vld [vmem:[%s14479_s24 + $0x28d0] ss:$8 sps:$4 sm:$0xff]  }
 0x581   : > { %10238 = vmatprep.subr.bf16.mxu1 %v13994_v6  ;;  %10227 = vmatprep.mubr.bf16.mxu0 %v486_v26  ;;  %v14064_v6 = vld [vmem:[%s14479_s24 + $0x29d0] ss:$8 sps:$4 sm:$0xff]   ;;  %v14069_v26 = vld [vmem:[%s14479_s24 + $0x28e4] ss:$8 sps:$4 sm:$0xff]  }
 0x582   : > { %10268 = vmatprep.mubr.bf16.mxu1 %v488_v50  ;;  %v14072_v50 = vld [vmem:[%s14479_s24 + $0x29e4] ss:$8 sps:$4 sm:$0xff]  }
 0x583   : > { %10198 = vmatpush1.bf16.msra.mxu0 %v13989_v1  ;;  %v14067_v1 = vld [vmem:[%s14479_s24 + $0x28e0] ss:$8 sps:$4 sm:$0xff]  }
 0x584   : > { %10239 = vmatpush1.bf16.msra.mxu1 %v13992_v51  ;;  %10199 = vmatprep.subr.bf16.mxu0 %v13997_v32  ;;  %v14070_v51 = vld [vmem:[%s14479_s24 + $0x29e0] ss:$8 sps:$4 sm:$0xff]   ;;  %v14075_v32 = vld [vmem:[%s14479_s24 + $0x28f4] ss:$8 sps:$4 sm:$0xff]  }
 0x585   : > { %10240 = vmatprep.subr.bf16.mxu1 %v14000_v53  ;;  %v14078_v53 = vld [vmem:[%s14479_s24 + $0x29f4] ss:$8 sps:$4 sm:$0xff]  }
 0x587   : > { %10200 = vmatpush1.bf16.msra.mxu0 %v13995_v54  ;;  %v14073_v54 = vld [vmem:[%s14479_s24 + $0x28f0] ss:$8 sps:$4 sm:$0xff]  }
 0x588   : > { %10241 = vmatpush1.bf16.msra.mxu1 %v13998_v55  ;;  %10201 = vmatprep.subr.bf16.mxu0 %v14003_v56  ;;  %v14076_v55 = vld [vmem:[%s14479_s24 + $0x29f0] ss:$8 sps:$4 sm:$0xff]   ;;  %v401_v56 = vld [vmem:[#allocation3 + $0x280] sm:$0xff] }
 0x589   : > { %10242 = vmatprep.subr.bf16.mxu1 %v14006_v57  ;;  %v403_v57 = vld [vmem:[#allocation3 + $0x290] sm:$0xff] }
 0x58b   : > { %10202 = vmatpush1.bf16.msra.mxu0 %v14001_v58  ;;  %v485_v58 = vpack.c.bf16 %v401_v56, %v401_v56 }
 0x58c   : > { %10243 = vmatpush1.bf16.msra.mxu1 %v14004_v59  ;;  %10203 = vmatprep.subr.bf16.mxu0 %v14009_v61  ;;  %v487_v59 = vpack.c.bf16 %v403_v57, %v403_v57 }
 0x58d   : > { %10244 = vmatprep.subr.bf16.mxu1 %v14012_v63 }
 0x58f   : > { %10204 = vmatpush1.bf16.msra.mxu0 %v14007_v40 }
 0x590   : > { %10245 = vmatpush1.bf16.msra.mxu1 %v14010_v45  ;;  %10205 = vmatprep.subr.bf16.mxu0 %v14015_v42 }
 0x591   : > { %10246 = vmatprep.subr.bf16.mxu1 %v14018_v47  ;;  %v9901_v28 = vpop.f32.mrb[64].mxu0 }
 0x592   : > { %v9942_v9 = vpop.f32.mrb[64].mxu1  ;;  %v9902_v52 = vadd.f32 %v9901_v28, %v15819_v60  ;;  %v9903_v11 = vpop.f32.mrb[65].mxu0  ;;  %v14027_v60 = vld [vmem:[%s14479_s24 + $0x2874] ss:$8 sps:$4 sm:$0xff]  }
 0x593   : > { %v9944_v12 = vpop.f32.mrb[65].mxu1  ;;  %v9904_v13 = vadd.f32 %v9903_v11, %v15823_v2  ;;  %v9905_v14 = vpop.f32.mrb[66].mxu0  ;;  %10206 = vmatpush1.bf16.msra.mxu0 %v14013_v44  ;;  %v14030_v2 = vld [vmem:[%s14479_s24 + $0x2974] ss:$8 sps:$4 sm:$0xff]   ;;  %v10319_v11 = vld [vmem:[%s15937_s1 + $0x88] sm:$0xff]  ;;  %s14171_s24 = sshll.u32 %s14261_s18, 4  ;;  %s14172_s24 = int_to_ptr.vmem [resolvable:$false] %s14171_s24 }
 0x594   : > { %v9946_v15 = vpop.f32.mrb[66].mxu1  ;;  %10247 = vmatpush1.bf16.msra.mxu1 %v14016_v49  ;;  %v15889_v18 = vadd.f32 %v9942_v9, %v9902_v52  ;;  %v9906_v19 = vpop.f32.mrb[67].mxu0  ;;  %10207 = vmatprep.subr.bf16.mxu0 %v14021_v46  ;;  %v10318_v52 = vld [vmem:[%s15937_s1 + $0x80] sm:$0xff]  ;;  %v10303_v14 = vld [vmem:[%s15937_s1 + $0x8] sm:$0xff]  ;;  %s14173_s10 = scalar_lea.vmem %s14172_s24, 256  ;;  %p14174_p1 = scmp.lt.s32.totalorder %s15980_s6, %s14172_s24 }
 0x595   : > { %v9947_v21 = vpop.f32.mrb[67].mxu1  ;;  %10248 = vmatprep.subr.bf16.mxu1 %v14024_v8  ;;  %v15893_v23 = vadd.f32 %v9944_v12, %v9904_v13  ;;  %v10302_v12 = vld [vmem:[%s15937_s1] sm:$0xff]  ;;  %v11948_v13 = vpack.c.bf16 %v10319_v11, %v10318_v52  ;;  %v10320_v15 = vld [vmem:[%s15937_s1 + $0x90] sm:$0xff]  ;;  %p14175_p3 = scmp.lt.s32.totalorder %s14173_s10, %s14167_s22 }
 0x596   : > { %v10304_v19 = vld [vmem:[%s15937_s1 + $0x10] sm:$0xff]  ;;  %v10305_v21 = vld [vmem:[%s15937_s1 + $0x18] sm:$0xff] }
 0x597   : > { %10208 = vmatpush1.bf16.msra.mxu0 %v14019_v16  ;;  %v10321_v16 = vld [vmem:[%s15937_s1 + $0x98] sm:$0xff]  ;;  %p14176_p2 = por %p14175_p3, %p14174_p1 }
 0x598   : > { %10249 = vmatpush1.bf16.msra.mxu1 %v14022_v17  ;;  %10209 = vmatprep.subr.bf16.mxu0 %v14027_v60  ;;  %v11950_v17 = vpack.c.bf16 %v10303_v14, %v10302_v12  ;;  %v10322_v60 = vld [vmem:[%s15937_s1 + $0xa0] sm:$0xff] }
 0x599   : > { %10250 = vmatprep.subr.bf16.mxu1 %v14030_v2  ;;  %v10323_v2 = vld [vmem:[%s15937_s1 + $0xa8] sm:$0xff]  ;;  %p14177_p6 = pnand %p14176_p2, %p14170_p4 }
 0x59b   : > { %10210 = vmatpush1.bf16.msra.mxu0 %v14025_v62  ;;  %v11956_v62 = vpack.c.bf16 %v10323_v2, %v10322_v60  ;;  %v10286_v60 = vld [vmem:[%s270_s26] sm:$0x3] }
 0x59c   : > { %10251 = vmatpush1.bf16.msra.mxu1 %v14028_v4  ;;  %10211 = vmatprep.subr.bf16.mxu0 %v14033_v0  ;;  %v10306_v4 = vld [vmem:[%s15937_s1 + $0x20] sm:$0xff]  ;;  %v10307_v0 = vld [vmem:[%s15937_s1 + $0x28] sm:$0xff] }
 0x59d   : > { %10252 = vmatprep.subr.bf16.mxu1 %v14036_v7  ;;  %v10324_v7 = vld [vmem:[%s15937_s1 + $0xb0] sm:$0xff] }
 0x59f   : > { %10212 = vmatpush1.bf16.msra.mxu0 %v14031_v3  ;;  %v10325_v3 = vld [vmem:[%s15937_s1 + $0xb8] sm:$0xff] }
 0x5a0   : > { %10253 = vmatpush1.bf16.msra.mxu1 %v14034_v29  ;;  %10213 = vmatprep.subr.bf16.mxu0 %v14039_v48  ;;  %v11958_v29 = vpack.c.bf16 %v10307_v0, %v10306_v4  ;;  %v11960_v48 = vpack.c.bf16 %v10325_v3, %v10324_v7 }
 0x5a1   : > { %10254 = vmatprep.subr.bf16.mxu1 %v14042_v30  ;;  %v10308_v30 = vld [vmem:[%s15937_s1 + $0x30] sm:$0xff] }
 0x5a3   : > { %10214 = vmatpush1.bf16.msra.mxu0 %v14037_v10  ;;  %v10309_v10 = vld [vmem:[%s15937_s1 + $0x38] sm:$0xff] }
 0x5a4   : > { %10255 = vmatpush1.bf16.msra.mxu1 %v14040_v31  ;;  %10215 = vmatprep.subr.bf16.mxu0 %v14045_v5  ;;  %v10326_v31 = vld [vmem:[%s15937_s1 + $0xc0] sm:$0xff]  ;;  %v10327_v5 = vld [vmem:[%s15937_s1 + $0xc8] sm:$0xff] }
 0x5a5   : > { %10256 = vmatprep.subr.bf16.mxu1 %v14048_v33  ;;  %v11962_v33 = vpack.c.bf16 %v10309_v10, %v10308_v30 }
 0x5a7   : > { %10216 = vmatpush1.bf16.msra.mxu0 %v14043_v34  ;;  %v11964_v34 = vpack.c.bf16 %v10327_v5, %v10326_v31 }
 0x5a8   : > { %10257 = vmatpush1.bf16.msra.mxu1 %v14046_v35  ;;  %10217 = vmatprep.subr.bf16.mxu0 %v14051_v36  ;;  %v10310_v35 = vld [vmem:[%s15937_s1 + $0x40] sm:$0xff]  ;;  %v10311_v36 = vld [vmem:[%s15937_s1 + $0x48] sm:$0xff] }
 0x5a9   : > { %10258 = vmatprep.subr.bf16.mxu1 %v14054_v37  ;;  %v10328_v37 = vld [vmem:[%s15937_s1 + $0xd0] sm:$0xff] }
 0x5ab   : > { %10218 = vmatpush1.bf16.msra.mxu0 %v14049_v38  ;;  %v10329_v38 = vld [vmem:[%s15937_s1 + $0xd8] sm:$0xff] }
 0x5ac   : > { %10259 = vmatpush1.bf16.msra.mxu1 %v14052_v39  ;;  %10219 = vmatprep.subr.bf16.mxu0 %v14057_v41  ;;  %v11966_v39 = vpack.c.bf16 %v10311_v36, %v10310_v35  ;;  %v11968_v41 = vpack.c.bf16 %v10329_v38, %v10328_v37 }
 0x5ad   : > { %10260 = vmatprep.subr.bf16.mxu1 %v14060_v43  ;;  %v10312_v43 = vld [vmem:[%s15937_s1 + $0x50] sm:$0xff] }
 0x5af   : > { %10220 = vmatpush1.bf16.msra.mxu0 %v14055_v20  ;;  %v10313_v20 = vld [vmem:[%s15937_s1 + $0x58] sm:$0xff] }
 0x5b0   : > { %10261 = vmatpush1.bf16.msra.mxu1 %v14058_v25  ;;  %10221 = vmatprep.subr.bf16.mxu0 %v14063_v22  ;;  %v11970_v25 = vpack.c.bf16 %v10313_v20, %v10312_v43 }
 0x5b1   : > { %10262 = vmatprep.subr.bf16.mxu1 %v14066_v27 }
 0x5b3   : > { %10222 = vmatpush1.bf16.msra.mxu0 %v14061_v24  ;;  %v10330_v24 = vld [vmem:[%s15937_s1 + $0xe0] sm:$0xff] }
 0x5b4   : > { %10263 = vmatpush1.bf16.msra.mxu1 %v14064_v6  ;;  %10223 = vmatprep.subr.bf16.mxu0 %v14069_v26  ;;  %v10331_v6 = vld [vmem:[%s15937_s1 + $0xe8] sm:$0xff] }
 0x5b5   : > { %10264 = vmatprep.subr.bf16.mxu1 %v14072_v50 }
 0x5b7   : > { %10224 = vmatpush1.bf16.msra.mxu0 %v14067_v1 }
 0x5b8   : > { %10265 = vmatpush1.bf16.msra.mxu1 %v14070_v51  ;;  %10225 = vmatprep.subr.bf16.mxu0 %v14075_v32  ;;  %v11972_v51 = vpack.c.bf16 %v10331_v6, %v10330_v24  ;;  %v10314_v32 = vld [vmem:[%s15937_s1 + $0x60] sm:$0xff] }
 0x5b9   : > { %10266 = vmatprep.subr.bf16.mxu1 %v14078_v53  ;;  %v10315_v53 = vld [vmem:[%s15937_s1 + $0x68] sm:$0xff] }
 0x5ba   : > { %v11974_v57 = vpack.c.bf16 %v10315_v53, %v10314_v32 }
 0x5bb   : > { %10226 = vmatpush1.bf16.msra.mxu0 %v14073_v54 }
 0x5bc   : > { %10267 = vmatpush1.bf16.msra.mxu1 %v14076_v55  ;;  %11949 = vmatprep.subr.bf16.mxu0 %v11948_v13 }
 0x5be   : > { %10228 = vmatmul.mubr.bf16.vlgmr.msra.gmra.mrb[80].mxu0 %v485_v58 }
 0x5bf   : > { %10269 = vmatmul.mubr.bf16.vlgmr.msra.gmra.mrb[80].mxu1 %v487_v59  ;;  %11951 = vmatpush3.bf16.msra.mxu0 %v11950_v17 }
 0x5d1   : > { %v9983_v61 = vpop.f32.mrb[68].mxu0 }
 0x5d2   : > { %v10024_v63 = vpop.f32.mrb[68].mxu1  ;;  %v9984_v40 = vadd.f32 %v9983_v61, %v15889_v18  ;;  %v9985_v45 = vpop.f32.mrb[69].mxu0  ;;  %v11952_v18 = vpack.c.bf16 %v10321_v16, %v10320_v15 }
 0x5d3   : > { %v10026_v42 = vpop.f32.mrb[69].mxu1  ;;  %v9986_v47 = vadd.f32 %v9985_v45, %v15893_v23  ;;  %v9987_v44 = vpop.f32.mrb[70].mxu0  ;;  %v11954_v23 = vpack.c.bf16 %v10305_v21, %v10304_v19  ;;  %v10333_v45 = vld [vmem:[%s15937_s1 + $0xf8] sm:$0xff] }
 0x5d4   : > { %v10028_v49 = vpop.f32.mrb[70].mxu1  ;;  %v10025_v46 = vadd.f32 %v10024_v63, %v9984_v40  ;;  %v9988_v8 = vpop.f32.mrb[71].mxu0  ;;  %11953 = vmatprep.subr.bf16.mxu0 %v11952_v18  ;;  %v10332_v40 = vld [vmem:[%s15937_s1 + $0xf0] sm:$0xff]  ;;  %v10317_v44 = vld [vmem:[%s15937_s1 + $0x78] sm:$0xff]  ;;  %v10288_v18 = vlaneseq }
 0x5d5   : > { %v10029_v28 = vpop.f32.mrb[71].mxu1  ;;  %v15931_v9 = vadd.f32 %v10026_v42, %v9986_v47  ;;  %11955 = vmatpush3.bf16.msra.mxu0 %v11954_v23  ;;  %v11976_v42 = vpack.c.bf16 %v10333_v45, %v10332_v40  ;;  %v10316_v47 = vld [vmem:[%s15937_s1 + $0x70] sm:$0xff] }
 0x5d6   : > { %11957 = vmatprep.subr.bf16.mxu0 %v11956_v62  ;;  %v11978_v49 = vpack.c.bf16 %v10317_v44, %v10316_v47  ;;  %v10289_v19 = vshrl.u32 %v10288_v18, 7 }
 0x5d8   : > { %v10290_v21 = vsub.s32 0, %v10289_v19  ;;  %v10294_v2 = vsub.s32 1, %v10289_v19 }
 0x5d9   : > { %11959 = vmatpush3.bf16.msra.mxu0 %v11958_v29 }
 0x5da   : > { %11961 = vmatprep.subr.bf16.mxu0 %v11960_v48  ;;  %v10291_v0 = vrot.slane %v10286_v60, %v10290_v21  ;;  %v10295_v48 = vrot.slane %v10286_v60, %v10294_v2 }
 0x5dd   : > { %11963 = vmatpush3.bf16.msra.mxu0 %v11962_v33 }
 0x5de   : > { %11965 = vmatprep.subr.bf16.mxu0 %v11964_v34 }
 0x5e1   : > { %11967 = vmatpush3.bf16.msra.mxu0 %v11966_v39 }
 0x5e2   : > { %11969 = vmatprep.subr.bf16.mxu0 %v11968_v41 }
 0x5e5   : > { %11971 = vmatpush3.bf16.msra.mxu0 %v11970_v25 }
 0x5e6   : > { %11973 = vmatprep.subr.bf16.mxu0 %v11972_v51 }
 0x5e9   : > { %11975 = vmatpush3.bf16.msra.mxu0 %v11974_v57 }
 0x5ea   : > { %11977 = vmatprep.subr.bf16.mxu0 %v11976_v42 }
 0x5ed   : > { %11979 = vmatpush3.bf16.msra.mxu0 %v11978_v49 }
 0x611   : > { %v10065_v22 = vpop.f32.mrb[72].mxu0 }
 0x612   : > { %v10106_v27 = vpop.f32.mrb[72].mxu1  ;;  %v10066_v26 = vadd.f32 %v10065_v22, %v10025_v46  ;;  %v10067_v50 = vpop.f32.mrb[73].mxu0 }
 0x613   : > { %v10108_v1 = vpop.f32.mrb[73].mxu1  ;;  %v10068_v54 = vadd.f32 %v10067_v50, %v15931_v9  ;;  %v10069_v55 = vpop.f32.mrb[74].mxu0 }
 0x614   : > { %v10110_v56 = vpop.f32.mrb[74].mxu1  ;;  %v10107_v58 = vadd.f32 %v10106_v27, %v10066_v26  ;;  %v10070_v59 = vpop.f32.mrb[75].mxu0 }
 0x615   : > { %v10111_v61 = vpop.f32.mrb[75].mxu1  ;;  %v10109_v63 = vadd.f32 %v10108_v1, %v10068_v54 }
 0x651   : > { %v10147_v46 = vpop.f32.mrb[76].mxu0 }
 0x652   : > { %v10188_v8 = vpop.f32.mrb[76].mxu1  ;;  %v10148_v28 = vadd.f32 %v10147_v46, %v10107_v58  ;;  %v10149_v9 = vpop.f32.mrb[77].mxu0 }
 0x653   : > { %v10190_v52 = vpop.f32.mrb[77].mxu1  ;;  %v10150_v11 = vadd.f32 %v10149_v9, %v10109_v63  ;;  %v10151_v12 = vpop.f32.mrb[78].mxu0 }
 0x654   : > { %v10192_v13 = vpop.f32.mrb[78].mxu1  ;;  %v10189_v14 = vadd.f32 %v10188_v8, %v10148_v28  ;;  %v10152_v15 = vpop.f32.mrb[79].mxu0 }
 0x655   : > { %v10193_v16 = vpop.f32.mrb[79].mxu1  ;;  %v10191_v17 = vadd.f32 %v10190_v52, %v10150_v11 }
 0x691   : > { %v10229_v23 = vpop.f32.mrb[80].mxu0 }
 0x692   : > { %v10270_v62 = vpop.f32.mrb[80].mxu1  ;;  %v10230_v4 = vadd.f32 %v10229_v23, %v10189_v14  ;;  %v10231_v7 = vpop.f32.mrb[81].mxu0 }
 0x693   : > { %v10272_v3 = vpop.f32.mrb[81].mxu1  ;;  %v10232_v29 = vadd.f32 %v10231_v7, %v10191_v17  ;;  %v10233_v30 = vpop.f32.mrb[82].mxu0 }
 0x694   : > { %v10274_v10 = vpop.f32.mrb[82].mxu1  ;;  %v10271_v31 = vadd.f32 %v10270_v62, %v10230_v4  ;;  %v10234_v5 = vpop.f32.mrb[83].mxu0 }
 0x695   : > { %v10275_v33 = vpop.f32.mrb[83].mxu1  ;;  %v10273_v34 = vadd.f32 %v10272_v3, %v10232_v29 }
 0x696   : > { %v10298_v35 = vadd.f32 %v10291_v0, %v10271_v31 }
 0x697   : > { %v10299_v36 = vadd.f32 %v10295_v48, %v10273_v34 }
 0x698   : > { %v10300_v38 = vmax.f32 %v10298_v35, 0.0 }
 0x699   : > { %v10301_v37 = vmax.f32 %v10299_v36, 0.0 }
 0x69b   : > { %10398 = vmatprep.mubr.f32.mxu0 %v10301_v37 }
 0x69c   : > { %10399 = vmatmul.mubr.f32.vlgmr.msra.gmra.mrb[84].mxu0 %v10300_v38 }
 0x76f   : > { %v11945_v39 = vpop.f32.mrb[84].mxu0 }
 0x770   : > { %v11946_v41 = vpop.f32.mrb[85].mxu0 }
 0x771   : > { %v11947_v43 = vadd.f32 %v11946_v41, %v11945_v39 }
 0x773   : > { %10405 = vst.msk [vmem:[%s304_s25] sm:$0xff] %vm10404_vm0, %v11947_v43 }
 0x774   : > { %14180 = shalt.err (!%p14177_p6)
}
 0x775   : > { %s14181_s30 = scalar_lea.hbm %s15978_s29, 128  ;;  %s14185_s23 = scalar_lea.hbm %s16031_s4, 256 }
 0x776   : > { %p14182_p12 = scmp.ne.s32.totalorder %s15978_s29, %s14181_s30  ;;  %p14186_p5 = scmp.lt.u32.totalorder %s15978_s29, %s16031_s4 }
 0x777   : > { %p14187_p11 = scmp.lt.u32.totalorder %s14185_s23, %s14181_s30  ;;  %p14189_p13 = scmp.lt.u32.totalorder %s14181_s30, %s15978_s29 }
 0x778   : > { %p14183_p9 = pnand %p14182_p12, %p16052_p0 }
 0x779   : > { %p14188_p10 = por %p14187_p11, %p14186_p5 }
 0x77a   : > { %p14184_p8 = pneg %p14183_p9 }
 0x77b   : > { %p14190_p7 = por %p14189_p13, %p14188_p10 }
 0x77d   : > { %p14191_p4 = pnand %p14190_p7, %p14184_p8 }
 0x77f   : > { %14194 = shalt.err (!%p14191_p4)
}
 0x780   : > { %11990 = dma.vmem_to_hbm [thread:$0]  (%p16052_p0), %s15980_s6, 128, %s15978_s29, %s10407_s7  }
 0x781 PF: > { %s10432_s26 = sand.u32 1, %s14233_s15   ;;  %p16053_p1 = scmp.ne.s32.totalorder %s16043_s8, 0 }
 0x782   : > { %p16054_p3 = scmp.ge.s32.totalorder %s14253_s20, 2  ;;  %s10433_s28 = scalar_lea.sflag [#allocation5], %s10432_s26 }
 0x784   : > { %p12004_p2 = pnand %p16054_p3, %p16053_p1 }
 0x786   : > { %14228 = dma.done.wait (!%p12004_p2), %s10433_s28, 128  }
 0x787   : > { %14230 = vsyncadd (!%p12004_p2), %s10433_s28, 4294967168  ;;  %s21_s20 = sadd.s32 1, %s14253_s20   ;;  %s16055_s15 = smov %s14237_s16 }
 0x788   : > { %p18_p6 = scmp.ge.s32.totalorder %s21_s20, 4   ;;  %s16056_s16 = smov %s14241_s17 }
 0x789   : > { %s16057_s17 = smov %s14335_s27  ;;  %s16058_s18 = smov %s14249_s19 }
 0x78a   : > { %s16059_s19 = smov %s16061_s21  ;;  %20 = sbr.rel (!%p18_p6) target bundleno = 10 (0xa), region = 109 }
 0x791   :  { %10438 = vsyncpa [#allocation4], 1 }
 0x792   :  { %10440 = vsyncpa [#allocation4 + $0x1], 1 }
 0x793   :  { %10441 = vsyncpa [#allocation7], 1 }
 0x794   :  { %10443 = vsyncpa [#allocation7 + $0x1], 1 }
 0x795   :  { %10444 = vsyncpa [#allocation5], 1 }
 0x796   :  { %10446 = vsyncpa [#allocation5 + $0x1], 1 }

</bundles_post_ra>
